<compile_context>
chip_gen: v7x
topology: tpu7x:2x2x1
jax: 0.10.0
libtpu: 0.0.40
codegen_flags: <defaults>
</compile_context>

<pallas_src>
import functools
import math

import jax
import jax.numpy as jnp
from jax.experimental import pallas as pl
from jax.experimental.pallas import tpu as pltpu


def _gelu_tanh(x):
    # matches torch.nn.GELU(approximate="tanh")
    c = math.sqrt(2.0 / math.pi)
    return 0.5 * x * (1.0 + jnp.tanh(c * (x + 0.044715 * x * x * x)))


def _tile(dim, pref=256):
    # VMEM-aware tile cascade: pref -> 256 -> 128, else take the full (small /
    # unaligned) dimension.
    t = pref
    while t >= 128:
        if dim >= t and dim % t == 0:
            return t
        t //= 2
    # TODO(synk): masked partial tiles for large dims not divisible by 128.
    return dim


_VMEM_LIMIT = 64 * 1024 * 1024  # explicit scoped-VMEM ceiling (fits v7x physical)


def _mm_params():
    return pltpu.CompilerParams(
        dimension_semantics=("parallel", "parallel", "arbitrary"),
        vmem_limit_bytes=_VMEM_LIMIT)


# ----------------------------- fused projection kernels -----------------------------

def _dyt_qkv_kernel(alphas_ref, x_ref, nw_ref, nb_ref,
                    wq_ref, wk_ref, wv_ref, bq_ref, bk_ref, bv_ref,
                    qw_ref, qb_ref, kw_ref, kb_ref,
                    q_ref, k_ref, v_ref, accq, acck, accv):
    kk = pl.program_id(2)

    @pl.when(kk == 0)
    def _():
        accq[...] = jnp.zeros_like(accq)
        acck[...] = jnp.zeros_like(acck)
        accv[...] = jnp.zeros_like(accv)

    # fused DynamicTanh pre-attention norm (prologue), bf16 operands on the MXU
    xn = (jnp.tanh(alphas_ref[0] * x_ref[...]) * nw_ref[...]
          + nb_ref[...]).astype(jnp.bfloat16)
    accq[...] += jnp.dot(xn, wq_ref[...], preferred_element_type=jnp.float32)
    acck[...] += jnp.dot(xn, wk_ref[...], preferred_element_type=jnp.float32)
    accv[...] += jnp.dot(xn, wv_ref[...], preferred_element_type=jnp.float32)

    @pl.when(kk == pl.num_programs(2) - 1)
    def _():
        # fused per-head q/k DynamicTanh norms (epilogue); 1/sqrt(head_dim) is
        # folded into qw/qb so flash attention consumes fully-normalized q/k.
        aq = alphas_ref[1]
        ak = alphas_ref[2]
        q = accq[...] + bq_ref[...]
        k = acck[...] + bk_ref[...]
        q_ref[...] = (jnp.tanh(aq * q) * qw_ref[...] + qb_ref[...]).astype(q_ref.dtype)
        k_ref[...] = (jnp.tanh(ak * k) * kw_ref[...] + kb_ref[...]).astype(k_ref.dtype)
        v_ref[...] = (accv[...] + bv_ref[...]).astype(v_ref.dtype)


def qkv_projection(x2d, alphas, nw, nb, wq_t, wk_t, wv_t, bq, bk, bv, qw, qb, kw, kb):
    m, kdim = x2d.shape
    n = wq_t.shape[1]
    tm, tn, tk = _tile(m, 512), _tile(n), _tile(kdim)
    grid = (m // tm, n // tn, kdim // tk)
    x_spec = pl.BlockSpec((tm, tk), lambda i, j, k: (i, k))
    w_spec = pl.BlockSpec((tk, tn), lambda i, j, k: (k, j))
    vk_spec = pl.BlockSpec((1, tk), lambda i, j, k: (0, k))
    vn_spec = pl.BlockSpec((1, tn), lambda i, j, k: (0, j))
    o_spec = pl.BlockSpec((tm, tn), lambda i, j, k: (i, j))
    return pl.pallas_call(
        _dyt_qkv_kernel,
        out_shape=tuple(jax.ShapeDtypeStruct((m, n), jnp.bfloat16) for _ in range(3)),
        grid=grid,
        in_specs=[pl.BlockSpec(memory_space=pltpu.MemorySpace.SMEM),
                  x_spec, vk_spec, vk_spec,
                  w_spec, w_spec, w_spec,
                  vn_spec, vn_spec, vn_spec,
                  vn_spec, vn_spec, vn_spec, vn_spec],
        out_specs=(o_spec, o_spec, o_spec),
        scratch_shapes=[pltpu.VMEM((tm, tn), jnp.float32)] * 3,
        compiler_params=_mm_params(),
    )(alphas, x2d, nw, nb, wq_t, wk_t, wv_t, bq, bk, bv, qw, qb, kw, kb)


def _dyt_matmul_kernel(alpha_ref, x_ref, nw_ref, nb_ref, w_ref, b_ref,
                       o_ref, acc_ref, *, post_gelu):
    kk = pl.program_id(2)

    @pl.when(kk == 0)
    def _():
        acc_ref[...] = jnp.zeros_like(acc_ref)

    xn = (jnp.tanh(alpha_ref[0] * x_ref[...]) * nw_ref[...]
          + nb_ref[...]).astype(jnp.bfloat16)
    acc_ref[...] += jnp.dot(xn, w_ref[...], preferred_element_type=jnp.float32)

    @pl.when(kk == pl.num_programs(2) - 1)
    def _():
        y = acc_ref[...] + b_ref[...]
        if post_gelu:
            y = _gelu_tanh(y)
        o_ref[...] = y.astype(o_ref.dtype)


def dyt_matmul(x2d, alpha1, nw, nb, w_t, b, *, post_gelu=False, out_dtype=jnp.bfloat16):
    m, kdim = x2d.shape
    n = w_t.shape[1]
    tm, tn, tk = _tile(m, 512), _tile(n), _tile(kdim)
    grid = (m // tm, n // tn, kdim // tk)
    return pl.pallas_call(
        functools.partial(_dyt_matmul_kernel, post_gelu=post_gelu),
        out_shape=jax.ShapeDtypeStruct((m, n), out_dtype),
        grid=grid,
        in_specs=[pl.BlockSpec(memory_space=pltpu.MemorySpace.SMEM),
                  pl.BlockSpec((tm, tk), lambda i, j, k: (i, k)),
                  pl.BlockSpec((1, tk), lambda i, j, k: (0, k)),
                  pl.BlockSpec((1, tk), lambda i, j, k: (0, k)),
                  pl.BlockSpec((tk, tn), lambda i, j, k: (k, j)),
                  pl.BlockSpec((1, tn), lambda i, j, k: (0, j))],
        out_specs=pl.BlockSpec((tm, tn), lambda i, j, k: (i, j)),
        scratch_shapes=[pltpu.VMEM((tm, tn), jnp.float32)],
        compiler_params=_mm_params(),
    )(alpha1, x2d, nw, nb, w_t, b)


def _matmul_addcmul_kernel(x_ref, w_ref, b_ref, res_ref, scale_ref, shift_ref,
                           o_ref, acc_ref):
    kk = pl.program_id(2)

    @pl.when(kk == 0)
    def _():
        acc_ref[...] = jnp.zeros_like(acc_ref)

    acc_ref[...] += jnp.dot(x_ref[...], w_ref[...], preferred_element_type=jnp.float32)

    @pl.when(kk == pl.num_programs(2) - 1)
    def _():
        y = acc_ref[...] + b_ref[...]
        # residual + torch.addcmul(shift, y, scale), fused epilogue
        o_ref[...] = (res_ref[...] + shift_ref[...] + y * scale_ref[...]).astype(o_ref.dtype)


def matmul_addcmul_residual(x2d, w_t, b, res2d, scale, shift):
    m, kdim = x2d.shape
    n = w_t.shape[1]
    tm, tn, tk = _tile(m, 512), _tile(n), _tile(kdim)
    grid = (m // tm, n // tn, kdim // tk)
    return pl.pallas_call(
        _matmul_addcmul_kernel,
        out_shape=jax.ShapeDtypeStruct((m, n), res2d.dtype),
        grid=grid,
        in_specs=[pl.BlockSpec((tm, tk), lambda i, j, k: (i, k)),
                  pl.BlockSpec((tk, tn), lambda i, j, k: (k, j)),
                  pl.BlockSpec((1, tn), lambda i, j, k: (0, j)),
                  pl.BlockSpec((tm, tn), lambda i, j, k: (i, j)),
                  pl.BlockSpec((1, tn), lambda i, j, k: (0, j)),
                  pl.BlockSpec((1, tn), lambda i, j, k: (0, j))],
        out_specs=pl.BlockSpec((tm, tn), lambda i, j, k: (i, j)),
        scratch_shapes=[pltpu.VMEM((tm, tn), jnp.float32)],
        input_output_aliases={3: 0},   # residual buffer aliased to the output
        compiler_params=_mm_params(),
    )(x2d, w_t, b, res2d, scale, shift)


def _gelu_skip_matmul_addcmul_kernel(x_ref, skip_ref, w_ref, b_ref, res_ref,
                                     scale_ref, shift_ref, o_ref, acc_ref):
    kk = pl.program_id(2)

    @pl.when(kk == 0)
    def _():
        acc_ref[...] = jnp.zeros_like(acc_ref)

    # proj_out prologue: gelu(conv_out + router), f32 math, bf16 MXU operand
    xg = _gelu_tanh(x_ref[...].astype(jnp.float32)
                    + skip_ref[...].astype(jnp.float32)).astype(jnp.bfloat16)
    acc_ref[...] += jnp.dot(xg, w_ref[...], preferred_element_type=jnp.float32)

    @pl.when(kk == pl.num_programs(2) - 1)
    def _():
        y = acc_ref[...] + b_ref[...]
        o_ref[...] = (res_ref[...] + shift_ref[...] + y * scale_ref[...]).astype(o_ref.dtype)


def gelu_skip_matmul_addcmul_residual(x2d, skip2d, w_t, b, res2d, scale, shift):
    m, kdim = x2d.shape
    n = w_t.shape[1]
    tm, tn, tk = _tile(m, 512), _tile(n), _tile(kdim)
    grid = (m // tm, n // tn, kdim // tk)
    return pl.pallas_call(
        _gelu_skip_matmul_addcmul_kernel,
        out_shape=jax.ShapeDtypeStruct((m, n), res2d.dtype),
        grid=grid,
        in_specs=[pl.BlockSpec((tm, tk), lambda i, j, k: (i, k)),
                  pl.BlockSpec((tm, tk), lambda i, j, k: (i, k)),
                  pl.BlockSpec((tk, tn), lambda i, j, k: (k, j)),
                  pl.BlockSpec((1, tn), lambda i, j, k: (0, j)),
                  pl.BlockSpec((tm, tn), lambda i, j, k: (i, j)),
                  pl.BlockSpec((1, tn), lambda i, j, k: (0, j)),
                  pl.BlockSpec((1, tn), lambda i, j, k: (0, j))],
        out_specs=pl.BlockSpec((tm, tn), lambda i, j, k: (i, j)),
        scratch_shapes=[pltpu.VMEM((tm, tn), jnp.float32)],
        input_output_aliases={4: 0},   # residual buffer aliased to the output
        compiler_params=_mm_params(),
    )(x2d, skip2d, w_t, b, res2d, scale, shift)


# ----------------------------- flash attention kernel -----------------------------

def _flash_attn_kernel(q_ref, k_ref, v_ref, o_ref, m_ref, l_ref, acc_ref):
    # q_ref/k_ref/v_ref: (heads, tile, head_dim) bf16; q/k are already
    # DynamicTanh-normalized (and q carries the 1/sqrt(head_dim) scale).
    kv = pl.program_id(2)

    @pl.when(kv == 0)
    def _():
        m_ref[...] = jnp.full_like(m_ref, -jnp.inf)
        l_ref[...] = jnp.zeros_like(l_ref)
        acc_ref[...] = jnp.zeros_like(acc_ref)

    s = jnp.einsum('hqd,hkd->hqk', q_ref[...], k_ref[...],
                   preferred_element_type=jnp.float32)        # (heads, tq, tkv)
    m_prev = m_ref[...]
    m_new = jnp.maximum(m_prev, jnp.max(s, axis=-1, keepdims=True))
    corr = jnp.exp(m_prev - m_new)
    p = jnp.exp(s - m_new)
    l_ref[...] = corr * l_ref[...] + jnp.sum(p, axis=-1, keepdims=True)
    acc_ref[...] = corr * acc_ref[...] + jnp.einsum(
        'hqk,hkd->hqd', p.astype(v_ref.dtype), v_ref[...],
        preferred_element_type=jnp.float32)
    m_ref[...] = m_new

    @pl.when(kv == pl.num_programs(2) - 1)
    def _():
        # approximate EUP reciprocal: deliberate (tiny) deviation from exact softmax.
        o_ref[...] = (acc_ref[...] *
                      pl.reciprocal(l_ref[...], approx=True)).astype(o_ref.dtype)


def flash_attention(q, k, v):
    # q/k/v: (B, heads, S, head_dim) bf16, head-major -> batched MXU matmuls,
    # head-leading lane-dense accumulators and stores.
    B, H, S, hd = q.shape
    tq = _tile(S)
    tkv = _tile(S)
    grid = (B, S // tq, S // tkv)
    q_spec = pl.BlockSpec((None, H, tq, hd), lambda b, qi, ki: (b, 0, qi, 0))
    kv_spec = pl.BlockSpec((None, H, tkv, hd), lambda b, qi, ki: (b, 0, ki, 0))
    return pl.pallas_call(
        _flash_attn_kernel,
        out_shape=jax.ShapeDtypeStruct((B, H, S, hd), jnp.bfloat16),
        grid=grid,
        in_specs=[q_spec, kv_spec, kv_spec],
        out_specs=pl.BlockSpec((None, H, tq, hd), lambda b, qi, ki: (b, 0, qi, 0)),
        scratch_shapes=[pltpu.VMEM((H, tq, 1), jnp.float32),
                        pltpu.VMEM((H, tq, 1), jnp.float32),
                        pltpu.VMEM((H, tq, hd), jnp.float32)],
        compiler_params=pltpu.CompilerParams(
            dimension_semantics=("parallel", "parallel", "arbitrary"),
            vmem_limit_bytes=_VMEM_LIMIT),
    )(q, k, v)


# ----------------------------- fused grouped conv FF kernel -----------------------------

def _ff_conv_kernel(r_ref, w1_ref, b1_ref, w2_ref, b2_ref, o_ref,
                    xpad_ref, ypad_ref, *, height, width):
    # r_ref:  (S, gb*Cin) bf16 router block (one batch, gb conv groups)
    # w1_ref: (gb, 9, Cin, Cmid) bf16  b1_ref: (gb, 1, Cmid) f32
    # w2_ref: (gb, 9, Cmid, Cout) bf16 b2_ref: (gb, 1, Cout) f32
    # o_ref:  (S, gb*Cout) bf16
    # xpad_ref: VMEM (Spad, Cin) bf16; ypad_ref: VMEM (Spad, Cmid) bf16
    gb, _, cin, cmid = w1_ref.shape
    cout = w2_ref.shape[3]
    S = height * width
    pad = width + 1

    col1 = jax.lax.broadcasted_iota(jnp.int32, (S, cin), 0) % width
    ml1, mr1 = col1 >= 1, col1 <= width - 2
    col2 = jax.lax.broadcasted_iota(jnp.int32, (S, cmid), 0) % width
    ml2, mr2 = col2 >= 1, col2 <= width - 2

    # zero the halo rows once (center rows are rewritten per group)
    xpad_ref[0:pad, :] = jnp.zeros((pad, cin), xpad_ref.dtype)
    xpad_ref[pad + S:pad + S + pad, :] = jnp.zeros((pad, cin), xpad_ref.dtype)
    ypad_ref[0:pad, :] = jnp.zeros((pad, cmid), ypad_ref.dtype)
    ypad_ref[pad + S:pad + S + pad, :] = jnp.zeros((pad, cmid), ypad_ref.dtype)

    def conv3x3(src_ref, w_ref_, b_ref_, g, cdst, masks):
        ml, mr = masks
        acc = jnp.zeros((S, cdst), jnp.float32)
        for kh in range(3):
            for kw in range(3):
                dh, dw = kh - 1, kw - 1
                start = pad + dh * width + dw
                xs = src_ref[start:start + S, :]
                if dw == -1:
                    xs = jnp.where(ml, xs, 0)
                elif dw == 1:
                    xs = jnp.where(mr, xs, 0)
                acc = acc + jnp.dot(xs, w_ref_[g, kh * 3 + kw],
                                    preferred_element_type=jnp.float32)
        return acc + b_ref_[g]

    for g in range(gb):
        # conv1 input staged into the zero-padded VMEM scratch (no host jnp.pad)
        xpad_ref[pad:pad + S, :] = r_ref[:, g * cin:(g + 1) * cin]
        y1 = _gelu_tanh(conv3x3(xpad_ref, w1_ref, b1_ref, g, cmid, (ml1, mr1)))
        # the ff_dim intermediate never leaves VMEM
        ypad_ref[pad:pad + S, :] = y1.astype(ypad_ref.dtype)
        y2 = conv3x3(ypad_ref, w2_ref, b2_ref, g, cout, (ml2, mr2))
        o_ref[:, g * cout:(g + 1) * cout] = y2.astype(o_ref.dtype)


def fused_ff_conv(router3d, w1, b1, w2, b2, *, height, width):
    # router3d: (B, S, G*Cin) bf16 -> output (B, S, G*Cout) bf16
    B, S, _ = router3d.shape
    G, _, cin, cmid = w1.shape
    cout = w2.shape[3]
    # tile the grid over groups when the per-group channel counts are
    # 128-aligned (production shapes); otherwise keep all groups in one block.
    aligned = (cin % 128 == 0) and (cmid % 128 == 0) and (cout % 128 == 0)
    gb = 1 if aligned else G
    n_gblk = G // gb
    pad = width + 1
    spad = S + 2 * pad
    return pl.pallas_call(
        functools.partial(_ff_conv_kernel, height=height, width=width),
        out_shape=jax.ShapeDtypeStruct((B, S, G * cout), jnp.bfloat16),
        grid=(B, n_gblk),
        in_specs=[pl.BlockSpec((None, S, gb * cin), lambda b, g: (b, 0, g)),
                  pl.BlockSpec((gb, 9, cin, cmid), lambda b, g: (g, 0, 0, 0)),
                  pl.BlockSpec((gb, 1, cmid), lambda b, g: (g, 0, 0)),
                  pl.BlockSpec((gb, 9, cmid, cout), lambda b, g: (g, 0, 0, 0)),
                  pl.BlockSpec((gb, 1, cout), lambda b, g: (g, 0, 0))],
        out_specs=pl.BlockSpec((None, S, gb * cout), lambda b, g: (b, 0, g)),
        scratch_shapes=[pltpu.VMEM((spad, cin), jnp.bfloat16),
                        pltpu.VMEM((spad, cmid), jnp.bfloat16)],
        compiler_params=pltpu.CompilerParams(
            dimension_semantics=("parallel", "parallel"),
            vmem_limit_bytes=_VMEM_LIMIT),
    )(router3d, w1, b1, w2, b2)


# ----------------------------- parameters -----------------------------

def init_params(key, dim, heads, head_dim, heads_per_group, router_mult, ff_mult):
    G = heads // heads_per_group
    inner_dim = G * head_dim * heads_per_group * router_mult
    ff_dim = inner_dim * ff_mult
    attn_inner = heads * head_dim
    ks = jax.random.split(key, 24)

    def nrm(k, shape, s=0.05):
        return (s * jax.random.normal(k, shape)).astype(jnp.float32)

    p = dict(
        norm_attn_alpha=jnp.float32(0.2),
        norm_attn_w=jnp.ones((dim,), jnp.float32) + nrm(ks[0], (dim,)),
        norm_attn_b=nrm(ks[1], (dim,)),
        norm_ff_alpha=jnp.float32(0.2),
        norm_ff_w=jnp.ones((dim,), jnp.float32) + nrm(ks[2], (dim,)),
        norm_ff_b=nrm(ks[3], (dim,)),
        scale_attn=jnp.ones((dim,), jnp.float32) + nrm(ks[4], (dim,)),
        shift_attn=nrm(ks[5], (dim,)),
        scale_ff=jnp.ones((dim,), jnp.float32) + nrm(ks[6], (dim,)),
        shift_ff=nrm(ks[7], (dim,)),
        wq=nrm(ks[8], (attn_inner, dim)), bq=nrm(ks[9], (attn_inner,)),
        wk=nrm(ks[10], (attn_inner, dim)), bk=nrm(ks[11], (attn_inner,)),
        wv=nrm(ks[12], (attn_inner, dim)), bv=nrm(ks[13], (attn_inner,)),
        wo=nrm(ks[14], (dim, attn_inner)), bo=nrm(ks[15], (dim,)),
        norm_q_alpha=jnp.float32(0.2),
        norm_q_w=jnp.ones((head_dim,), jnp.float32),
        norm_q_b=jnp.zeros((head_dim,), jnp.float32),
        norm_k_alpha=jnp.float32(0.2),
        norm_k_w=jnp.ones((head_dim,), jnp.float32),
        norm_k_b=jnp.zeros((head_dim,), jnp.float32),
        w_router=nrm(ks[16], (inner_dim, dim)), b_router=nrm(ks[17], (inner_dim,)),
        w_conv1=nrm(ks[18], (ff_dim, inner_dim // G, 3, 3)), b_conv1=nrm(ks[19], (ff_dim,)),
        w_conv2=nrm(ks[20], (inner_dim, ff_dim // G, 3, 3)), b_conv2=nrm(ks[21], (inner_dim,)),
        w_proj=nrm(ks[22], (dim, inner_dim)), b_proj=nrm(ks[23], (dim,)),
    )
    return p


def prepare_params(params, heads, head_dim, num_groups):
    """One-time weight layout prep: transposes, conv tap layout, scale folding, bf16."""
    G = num_groups
    scale = 1.0 / math.sqrt(head_dim)

    def row(v):
        return jnp.asarray(v, jnp.float32).reshape(1, -1)

    def bf(v):
        return jnp.asarray(v, jnp.bfloat16)

    def conv_w(w):
        gco, cin = w.shape[0], w.shape[1]
        cout = gco // G
        # torch OIHW per group -> (G, tap=kh*3+kw, Cin, Cout), bf16
        return bf(w.reshape(G, cout, cin, 3, 3)
                   .transpose(0, 3, 4, 2, 1)
                   .reshape(G, 9, cin, cout))

    def conv_b(b):
        return jnp.asarray(b, jnp.float32).reshape(G, 1, -1)

    return dict(
        alphas_attn=jnp.stack([jnp.asarray(params['norm_attn_alpha'], jnp.float32),
                               jnp.asarray(params['norm_q_alpha'], jnp.float32),
                               jnp.asarray(params['norm_k_alpha'], jnp.float32)]),
        norm_attn_w=row(params['norm_attn_w']), norm_attn_b=row(params['norm_attn_b']),
        alpha_ff=jnp.asarray(params['norm_ff_alpha'], jnp.float32).reshape(1),
        norm_ff_w=row(params['norm_ff_w']), norm_ff_b=row(params['norm_ff_b']),
        scale_attn=row(params['scale_attn']), shift_attn=row(params['shift_attn']),
        scale_ff=row(params['scale_ff']), shift_ff=row(params['shift_ff']),
        wq_t=bf(params['wq'].T), wk_t=bf(params['wk'].T), wv_t=bf(params['wv'].T),
        bq=row(params['bq']), bk=row(params['bk']), bv=row(params['bv']),
        wo_t=bf(params['wo'].T), bo=row(params['bo']),
        # per-head qk DynamicTanh affines tiled across all heads (lane layout of
        # q/k); the 1/sqrt(head_dim) softmax scale is folded into the q params.
        qk_qw=row(jnp.tile(params['norm_q_w'] * scale, heads)),
        qk_qb=row(jnp.tile(params['norm_q_b'] * scale, heads)),
        qk_kw=row(jnp.tile(params['norm_k_w'], heads)),
        qk_kb=row(jnp.tile(params['norm_k_b'], heads)),
        w_router_t=bf(params['w_router'].T), b_router=row(params['b_router']),
        conv1_w=conv_w(params['w_conv1']), conv1_b=conv_b(params['b_conv1']),
        conv2_w=conv_w(params['w_conv2']), conv2_b=conv_b(params['b_conv2']),
        w_proj_t=bf(params['w_proj'].T), b_proj=row(params['b_proj']),
    )


# ----------------------------- forward pass -----------------------------

def raiflow_single_block(prep, hidden_states, height, width, heads, head_dim, num_groups):
    B, S, D = hidden_states.shape
    M = B * S
    AI = heads * head_dim
    x = hidden_states.reshape(M, D)

    # ---- attention branch ----
    # fused: DynamicTanh(norm_attn) prologue + q/k/v projections + per-head
    # q/k DynamicTanh (with softmax scale folded) in one kernel, bf16 outputs.
    q2d, k2d, v2d = qkv_projection(
        x, prep['alphas_attn'], prep['norm_attn_w'], prep['norm_attn_b'],
        prep['wq_t'], prep['wk_t'], prep['wv_t'], prep['bq'], prep['bk'], prep['bv'],
        prep['qk_qw'], prep['qk_qb'], prep['qk_kw'], prep['qk_kb'])

    def to_heads(t):  # (M, AI) -> (B, heads, S, head_dim); lightweight XLA copy
        return t.reshape(B, S, heads, head_dim).transpose(0, 2, 1, 3)

    attn = flash_attention(to_heads(q2d), to_heads(k2d), to_heads(v2d))
    attn2d = attn.transpose(0, 2, 1, 3).reshape(M, AI)

    # fused: out-projection + addcmul(shift, y, scale) + residual add
    x = matmul_addcmul_residual(attn2d, prep['wo_t'], prep['bo'],
                                x, prep['scale_attn'], prep['shift_attn'])

    # ---- feed-forward branch ----
    # fused: DynamicTanh(norm_ff) prologue + router linear + gelu epilogue (bf16 out)
    router = dyt_matmul(x, prep['alpha_ff'], prep['norm_ff_w'], prep['norm_ff_b'],
                        prep['w_router_t'], prep['b_router'], post_gelu=True)
    inner = router.shape[1]
    # fused: grouped conv1 + gelu + grouped conv2 (ff_dim intermediate stays in VMEM)
    y2 = fused_ff_conv(router.reshape(B, S, inner),
                       prep['conv1_w'], prep['conv1_b'],
                       prep['conv2_w'], prep['conv2_b'],
                       height=height, width=width)
    # fused: gelu(conv_out + router) prologue + proj_out + addcmul + residual
    x = gelu_skip_matmul_addcmul_residual(y2.reshape(M, inner), router,
                                          prep['w_proj_t'], prep['b_proj'],
                                          x, prep['scale_ff'], prep['shift_ff'])
    return x.reshape(B, S, D)


# ----------------------------- pure-JAX reference -----------------------------

def reference(params, hidden_states, height, width, heads, head_dim, num_groups):
    def dyt(x, a, w, b):
        return jnp.tanh(a * x) * w + b

    B, S, D = hidden_states.shape
    x = hidden_states
    nh = dyt(x, params['norm_attn_alpha'], params['norm_attn_w'], params['norm_attn_b'])
    q = nh @ params['wq'].T + params['bq']
    k = nh @ params['wk'].T + params['bk']
    v = nh @ params['wv'].T + params['bv']

    def hs(t):
        return t.reshape(B, S, heads, head_dim).transpose(0, 2, 1, 3)

    qh, kh, vh = hs(q), hs(k), hs(v)
    qh = dyt(qh, params['norm_q_alpha'], params['norm_q_w'], params['norm_q_b'])
    kh = dyt(kh, params['norm_k_alpha'], params['norm_k_w'], params['norm_k_b'])
    s = jnp.einsum('bhqd,bhkd->bhqk', qh, kh) / math.sqrt(head_dim)
    p = jax.nn.softmax(s, axis=-1)
    a = jnp.einsum('bhqk,bhkd->bhqd', p, vh).transpose(0, 2, 1, 3).reshape(B, S, heads * head_dim)
    attn_out = a @ params['wo'].T + params['bo']
    x = x + params['shift_attn'] + attn_out * params['scale_attn']

    nf = dyt(x, params['norm_ff_alpha'], params['norm_ff_w'], params['norm_ff_b'])
    router = _gelu_tanh(nf @ params['w_router'].T + params['b_router'])
    inner_dim = router.shape[-1]
    xc = router.transpose(0, 2, 1).reshape(B, inner_dim, height, width)  # NCHW
    y1 = jax.lax.conv_general_dilated(
        xc, params['w_conv1'], (1, 1), ((1, 1), (1, 1)),
        dimension_numbers=('NCHW', 'OIHW', 'NCHW'),
        feature_group_count=num_groups) + params['b_conv1'][None, :, None, None]
    y1 = _gelu_tanh(y1)
    y2 = jax.lax.conv_general_dilated(
        y1, params['w_conv2'], (1, 1), ((1, 1), (1, 1)),
        dimension_numbers=('NCHW', 'OIHW', 'NCHW'),
        feature_group_count=num_groups) + params['b_conv2'][None, :, None, None]
    conv_out = y2.reshape(B, inner_dim, S).transpose(0, 2, 1)
    ff = _gelu_tanh(conv_out + router) @ params['w_proj'].T + params['b_proj']
    x = x + params['shift_ff'] + ff * params['scale_ff']
    return x


# ----------------------------- main -----------------------------

if __name__ == "__main__":
    dim = 32
    heads = 4
    head_dim = 8
    heads_per_group = 2
    router_mult = 2
    ff_mult = 2
    B, H, W = 2, 4, 4
    S = H * W
    G = heads // heads_per_group  # conv groups

    key = jax.random.PRNGKey(0)
    pkey, xkey = jax.random.split(key)
    params = init_params(pkey, dim, heads, head_dim, heads_per_group, router_mult, ff_mult)
    hidden_states = jax.random.normal(xkey, (B, S, dim), jnp.float32)

    prep = prepare_params(params, heads, head_dim, G)  # one-time weight layout prep

    fwd = jax.jit(raiflow_single_block, static_argnums=(2, 3, 4, 5, 6))
    out = jax.block_until_ready(fwd(prep, hidden_states, H, W, heads, head_dim, G))

    ref = reference(params, hidden_states, H, W, heads, head_dim, G)
    assert out.shape == (B, S, dim)
    assert bool(jnp.all(jnp.isfinite(out)))
    max_err = float(jnp.max(jnp.abs(out - ref)))
    # bf16 MXU operands + bf16 intermediates: compare against the f32 reference
    # with a bf16-appropriate tolerance.
    assert max_err < 2e-2, f"mismatch vs reference: {max_err}"
    print("KERNEL_OK")
</pallas_src>

<mosaic_0001>
module attributes {stable_mosaic.version = 11 : i64} {
  func.func @_dyt_qkv_kernel(%arg0: i32, %arg1: i32, %arg2: i32, %arg3: memref<3xf32, #tpu.memory_space<smem>>, %arg4: memref<32x32xf32, #tpu.memory_space<vmem>>, %arg5: memref<1x32xf32, #tpu.memory_space<vmem>>, %arg6: memref<1x32xf32, #tpu.memory_space<vmem>>, %arg7: memref<32x32xbf16, #tpu.memory_space<vmem>>, %arg8: memref<32x32xbf16, #tpu.memory_space<vmem>>, %arg9: memref<32x32xbf16, #tpu.memory_space<vmem>>, %arg10: memref<1x32xf32, #tpu.memory_space<vmem>>, %arg11: memref<1x32xf32, #tpu.memory_space<vmem>>, %arg12: memref<1x32xf32, #tpu.memory_space<vmem>>, %arg13: memref<1x32xf32, #tpu.memory_space<vmem>>, %arg14: memref<1x32xf32, #tpu.memory_space<vmem>>, %arg15: memref<1x32xf32, #tpu.memory_space<vmem>>, %arg16: memref<1x32xf32, #tpu.memory_space<vmem>>, %arg17: memref<32x32xbf16, #tpu.memory_space<vmem>>, %arg18: memref<32x32xbf16, #tpu.memory_space<vmem>>, %arg19: memref<32x32xbf16, #tpu.memory_space<vmem>>, %arg20: memref<32x32xf32, #tpu.memory_space<vmem>>, %arg21: memref<32x32xf32, #tpu.memory_space<vmem>>, %arg22: memref<32x32xf32, #tpu.memory_space<vmem>>) attributes {dimension_semantics = [#tpu.dimension_semantics<parallel>, #tpu.dimension_semantics<parallel>, #tpu.dimension_semantics<arbitrary>], iteration_bounds = array<i64: 1, 1, 1>, scalar_prefetch = 0 : i64, scratch_operands = 3 : i64, tpu.core_type = #tpu.core_type<tc>, window_params = [{transform_indices = @transform_0, window_bounds = array<i64: 3>}, {transform_indices = @transform_1, window_bounds = array<i64: 32, 32>}, {transform_indices = @transform_2, window_bounds = array<i64: 1, 32>}, {transform_indices = @transform_3, window_bounds = array<i64: 1, 32>}, {transform_indices = @transform_4, window_bounds = array<i64: 32, 32>}, {transform_indices = @transform_5, window_bounds = array<i64: 32, 32>}, {transform_indices = @transform_6, window_bounds = array<i64: 32, 32>}, {transform_indices = @transform_7, window_bounds = array<i64: 1, 32>}, {transform_indices = @transform_8, window_bounds = array<i64: 1, 32>}, {transform_indices = @transform_9, window_bounds = array<i64: 1, 32>}, {transform_indices = @transform_10, window_bounds = array<i64: 1, 32>}, {transform_indices = @transform_11, window_bounds = array<i64: 1, 32>}, {transform_indices = @transform_12, window_bounds = array<i64: 1, 32>}, {transform_indices = @transform_13, window_bounds = array<i64: 1, 32>}, {transform_indices = @transform_14, window_bounds = array<i64: 32, 32>}, {transform_indices = @transform_15, window_bounds = array<i64: 32, 32>}, {transform_indices = @transform_16, window_bounds = array<i64: 32, 32>}]} {
    %c0_i32 = arith.constant 0 : i32
    %0 = arith.cmpi eq, %arg2, %c0_i32 : i32
    %1 = arith.extui %0 : i1 to i32
    %c0_i32_0 = arith.constant 0 : i32
    %2 = arith.cmpi ne, %1, %c0_i32_0 : i32
    scf.if %2 {
      %cst_29 = arith.constant 0.000000e+00 : f32
      %33 = vector.broadcast %cst_29 : f32 to vector<32x32xf32>
      %c0_30 = arith.constant 0 : index
      %c0_31 = arith.constant 0 : index
      %34 = vector.load %arg20[%c0_30, %c0_31] : memref<32x32xf32, #tpu.memory_space<vmem>>, vector<32x32xf32>
      tpu.vector_store %arg20[%c0_30, %c0_31], %33 {strides = array<i32>} : memref<32x32xf32, #tpu.memory_space<vmem>>, vector<32x32xf32>,
      %cst_32 = arith.constant 0.000000e+00 : f32
      %35 = vector.broadcast %cst_32 : f32 to vector<32x32xf32>
      %c0_33 = arith.constant 0 : index
      %c0_34 = arith.constant 0 : index
      %36 = vector.load %arg21[%c0_33, %c0_34] : memref<32x32xf32, #tpu.memory_space<vmem>>, vector<32x32xf32>
      tpu.vector_store %arg21[%c0_33, %c0_34], %35 {strides = array<i32>} : memref<32x32xf32, #tpu.memory_space<vmem>>, vector<32x32xf32>,
      %cst_35 = arith.constant 0.000000e+00 : f32
      %37 = vector.broadcast %cst_35 : f32 to vector<32x32xf32>
      %c0_36 = arith.constant 0 : index
      %c0_37 = arith.constant 0 : index
      %38 = vector.load %arg22[%c0_36, %c0_37] : memref<32x32xf32, #tpu.memory_space<vmem>>, vector<32x32xf32>
      tpu.vector_store %arg22[%c0_36, %c0_37], %37 {strides = array<i32>} : memref<32x32xf32, #tpu.memory_space<vmem>>, vector<32x32xf32>,
    } else {
    }
    %c0 = arith.constant 0 : index
    %3 = memref.load %arg3[%c0] : memref<3xf32, #tpu.memory_space<smem>>
    %c0_1 = arith.constant 0 : index
    %c0_2 = arith.constant 0 : index
    %4 = vector.load %arg4[%c0_1, %c0_2] : memref<32x32xf32, #tpu.memory_space<vmem>>, vector<32x32xf32>
    %5 = vector.broadcast %3 : f32 to vector<32x32xf32>
    %6 = arith.mulf %5, %4 : vector<32x32xf32>
    %7 = math.tanh %6 : vector<32x32xf32>
    %c0_3 = arith.constant 0 : index
    %c0_4 = arith.constant 0 : index
    %8 = vector.load %arg5[%c0_3, %c0_4] : memref<1x32xf32, #tpu.memory_space<vmem>>, vector<1x32xf32>
    %9 = vector.broadcast %8 : vector<1x32xf32> to vector<32x32xf32>
    %10 = arith.mulf %7, %9 : vector<32x32xf32>
    %c0_5 = arith.constant 0 : index
    %c0_6 = arith.constant 0 : index
    %11 = vector.load %arg6[%c0_5, %c0_6] : memref<1x32xf32, #tpu.memory_space<vmem>>, vector<1x32xf32>
    %12 = vector.broadcast %11 : vector<1x32xf32> to vector<32x32xf32>
    %13 = arith.addf %10, %12 : vector<32x32xf32>
    %14 = arith.truncf %13 : vector<32x32xf32> to vector<32x32xbf16>
    %c0_7 = arith.constant 0 : index
    %c0_8 = arith.constant 0 : index
    %15 = vector.load %arg20[%c0_7, %c0_8] : memref<32x32xf32, #tpu.memory_space<vmem>>, vector<32x32xf32>
    %c0_9 = arith.constant 0 : index
    %c0_10 = arith.constant 0 : index
    %16 = vector.load %arg7[%c0_9, %c0_10] : memref<32x32xbf16, #tpu.memory_space<vmem>>, vector<32x32xbf16>
    %cst = arith.constant dense<0.000000e+00> : vector<32x32xf32>
    %17 = tpu.matmul %14, %16, %cst {dimension_numbers = #tpu.dot_dimension_numbers<[1], [0], [0], [1], [0, 0, 1, 1], [], []>} : vector<32x32xbf16>, vector<32x32xbf16>, vector<32x32xf32> -> vector<32x32xf32>
    %18 = arith.addf %15, %17 : vector<32x32xf32>
    %c0_11 = arith.constant 0 : index
    %c0_12 = arith.constant 0 : index
    %19 = vector.load %arg20[%c0_11, %c0_12] : memref<32x32xf32, #tpu.memory_space<vmem>>, vector<32x32xf32>
    tpu.vector_store %arg20[%c0_11, %c0_12], %18 {strides = array<i32>} : memref<32x32xf32, #tpu.memory_space<vmem>>, vector<32x32xf32>,
    %c0_13 = arith.constant 0 : index
    %c0_14 = arith.constant 0 : index
    %20 = vector.load %arg21[%c0_13, %c0_14] : memref<32x32xf32, #tpu.memory_space<vmem>>, vector<32x32xf32>
    %c0_15 = arith.constant 0 : index
    %c0_16 = arith.constant 0 : index
    %21 = vector.load %arg8[%c0_15, %c0_16] : memref<32x32xbf16, #tpu.memory_space<vmem>>, vector<32x32xbf16>
    %cst_17 = arith.constant dense<0.000000e+00> : vector<32x32xf32>
    %22 = tpu.matmul %14, %21, %cst_17 {dimension_numbers = #tpu.dot_dimension_numbers<[1], [0], [0], [1], [0, 0, 1, 1], [], []>} : vector<32x32xbf16>, vector<32x32xbf16>, vector<32x32xf32> -> vector<32x32xf32>
    %23 = arith.addf %20, %22 : vector<32x32xf32>
    %c0_18 = arith.constant 0 : index
    %c0_19 = arith.constant 0 : index
    %24 = vector.load %arg21[%c0_18, %c0_19] : memref<32x32xf32, #tpu.memory_space<vmem>>, vector<32x32xf32>
    tpu.vector_store %arg21[%c0_18, %c0_19], %23 {strides = array<i32>} : memref<32x32xf32, #tpu.memory_space<vmem>>, vector<32x32xf32>,
    %c0_20 = arith.constant 0 : index
    %c0_21 = arith.constant 0 : index
    %25 = vector.load %arg22[%c0_20, %c0_21] : memref<32x32xf32, #tpu.memory_space<vmem>>, vector<32x32xf32>
    %c0_22 = arith.constant 0 : index
    %c0_23 = arith.constant 0 : index
    %26 = vector.load %arg9[%c0_22, %c0_23] : memref<32x32xbf16, #tpu.memory_space<vmem>>, vector<32x32xbf16>
    %cst_24 = arith.constant dense<0.000000e+00> : vector<32x32xf32>
    %27 = tpu.matmul %14, %26, %cst_24 {dimension_numbers = #tpu.dot_dimension_numbers<[1], [0], [0], [1], [0, 0, 1, 1], [], []>} : vector<32x32xbf16>, vector<32x32xbf16>, vector<32x32xf32> -> vector<32x32xf32>
    %28 = arith.addf %25, %27 : vector<32x32xf32>
    %c0_25 = arith.constant 0 : index
    %c0_26 = arith.constant 0 : index
    %29 = vector.load %arg22[%c0_25, %c0_26] : memref<32x32xf32, #tpu.memory_space<vmem>>, vector<32x32xf32>
    tpu.vector_store %arg22[%c0_25, %c0_26], %28 {strides = array<i32>} : memref<32x32xf32, #tpu.memory_space<vmem>>, vector<32x32xf32>,
    %c0_i32_27 = arith.constant 0 : i32
    %30 = arith.cmpi eq, %arg2, %c0_i32_27 : i32
    %31 = arith.extui %30 : i1 to i32
    %c0_i32_28 = arith.constant 0 : i32
    %32 = arith.cmpi ne, %31, %c0_i32_28 : i32
    scf.if %32 {
      %c1 = arith.constant 1 : index
      %33 = memref.load %arg3[%c1] : memref<3xf32, #tpu.memory_space<smem>>
      %c2 = arith.constant 2 : index
      %34 = memref.load %arg3[%c2] : memref<3xf32, #tpu.memory_space<smem>>
      %c0_29 = arith.constant 0 : index
      %c0_30 = arith.constant 0 : index
      %35 = vector.load %arg20[%c0_29, %c0_30] : memref<32x32xf32, #tpu.memory_space<vmem>>, vector<32x32xf32>
      %c0_31 = arith.constant 0 : index
      %c0_32 = arith.constant 0 : index
      %36 = vector.load %arg10[%c0_31, %c0_32] : memref<1x32xf32, #tpu.memory_space<vmem>>, vector<1x32xf32>
      %37 = vector.broadcast %36 : vector<1x32xf32> to vector<32x32xf32>
      %38 = arith.addf %35, %37 : vector<32x32xf32>
      %c0_33 = arith.constant 0 : index
      %c0_34 = arith.constant 0 : index
      %39 = vector.load %arg21[%c0_33, %c0_34] : memref<32x32xf32, #tpu.memory_space<vmem>>, vector<32x32xf32>
      %c0_35 = arith.constant 0 : index
      %c0_36 = arith.constant 0 : index
      %40 = vector.load %arg11[%c0_35, %c0_36] : memref<1x32xf32, #tpu.memory_space<vmem>>, vector<1x32xf32>
      %41 = vector.broadcast %40 : vector<1x32xf32> to vector<32x32xf32>
      %42 = arith.addf %39, %41 : vector<32x32xf32>
      %43 = vector.broadcast %33 : f32 to vector<32x32xf32>
      %44 = arith.mulf %43, %38 : vector<32x32xf32>
      %45 = math.tanh %44 : vector<32x32xf32>
      %c0_37 = arith.constant 0 : index
      %c0_38 = arith.constant 0 : index
      %46 = vector.load %arg13[%c0_37, %c0_38] : memref<1x32xf32, #tpu.memory_space<vmem>>, vector<1x32xf32>
      %47 = vector.broadcast %46 : vector<1x32xf32> to vector<32x32xf32>
      %48 = arith.mulf %45, %47 : vector<32x32xf32>
      %c0_39 = arith.constant 0 : index
      %c0_40 = arith.constant 0 : index
      %49 = vector.load %arg14[%c0_39, %c0_40] : memref<1x32xf32, #tpu.memory_space<vmem>>, vector<1x32xf32>
      %50 = vector.broadcast %49 : vector<1x32xf32> to vector<32x32xf32>
      %51 = arith.addf %48, %50 : vector<32x32xf32>
      %52 = arith.truncf %51 : vector<32x32xf32> to vector<32x32xbf16>
      %c0_41 = arith.constant 0 : index
      %c0_42 = arith.constant 0 : index
      %53 = vector.load %arg17[%c0_41, %c0_42] : memref<32x32xbf16, #tpu.memory_space<vmem>>, vector<32x32xbf16>
      tpu.vector_store %arg17[%c0_41, %c0_42], %52 {strides = array<i32>} : memref<32x32xbf16, #tpu.memory_space<vmem>>, vector<32x32xbf16>,
      %54 = vector.broadcast %34 : f32 to vector<32x32xf32>
      %55 = arith.mulf %54, %42 : vector<32x32xf32>
      %56 = math.tanh %55 : vector<32x32xf32>
      %c0_43 = arith.constant 0 : index
      %c0_44 = arith.constant 0 : index
      %57 = vector.load %arg15[%c0_43, %c0_44] : memref<1x32xf32, #tpu.memory_space<vmem>>, vector<1x32xf32>
      %58 = vector.broadcast %57 : vector<1x32xf32> to vector<32x32xf32>
      %59 = arith.mulf %56, %58 : vector<32x32xf32>
      %c0_45 = arith.constant 0 : index
      %c0_46 = arith.constant 0 : index
      %60 = vector.load %arg16[%c0_45, %c0_46] : memref<1x32xf32, #tpu.memory_space<vmem>>, vector<1x32xf32>
      %61 = vector.broadcast %60 : vector<1x32xf32> to vector<32x32xf32>
      %62 = arith.addf %59, %61 : vector<32x32xf32>
      %63 = arith.truncf %62 : vector<32x32xf32> to vector<32x32xbf16>
      %c0_47 = arith.constant 0 : index
      %c0_48 = arith.constant 0 : index
      %64 = vector.load %arg18[%c0_47, %c0_48] : memref<32x32xbf16, #tpu.memory_space<vmem>>, vector<32x32xbf16>
      tpu.vector_store %arg18[%c0_47, %c0_48], %63 {strides = array<i32>} : memref<32x32xbf16, #tpu.memory_space<vmem>>, vector<32x32xbf16>,
      %c0_49 = arith.constant 0 : index
      %c0_50 = arith.constant 0 : index
      %65 = vector.load %arg22[%c0_49, %c0_50] : memref<32x32xf32, #tpu.memory_space<vmem>>, vector<32x32xf32>
      %c0_51 = arith.constant 0 : index
      %c0_52 = arith.constant 0 : index
      %66 = vector.load %arg12[%c0_51, %c0_52] : memref<1x32xf32, #tpu.memory_space<vmem>>, vector<1x32xf32>
      %67 = vector.broadcast %66 : vector<1x32xf32> to vector<32x32xf32>
      %68 = arith.addf %65, %67 : vector<32x32xf32>
      %69 = arith.truncf %68 : vector<32x32xf32> to vector<32x32xbf16>
      %c0_53 = arith.constant 0 : index
      %c0_54 = arith.constant 0 : index
      %70 = vector.load %arg19[%c0_53, %c0_54] : memref<32x32xbf16, #tpu.memory_space<vmem>>, vector<32x32xbf16>
      tpu.vector_store %arg19[%c0_53, %c0_54], %69 {strides = array<i32>} : memref<32x32xbf16, #tpu.memory_space<vmem>>, vector<32x32xbf16>,
    } else {
    }
    return
  }
  func.func @transform_0(%arg0: i32, %arg1: i32, %arg2: i32) -> i32 {
    %c0_i32 = arith.constant 0 : i32
    %c0_i32_0 = arith.constant 0 : i32
    return %c0_i32 : i32
  }
  func.func @transform_1(%arg0: i32, %arg1: i32, %arg2: i32) -> (i32, i32) {
    %c0_i32 = arith.constant 0 : i32
    return %arg0, %arg2 : i32, i32
  }
  func.func @transform_2(%arg0: i32, %arg1: i32, %arg2: i32) -> (i32, i32) {
    %c0_i32 = arith.constant 0 : i32
    %c0_i32_0 = arith.constant 0 : i32
    return %c0_i32, %arg2 : i32, i32
  }
  func.func @transform_3(%arg0: i32, %arg1: i32, %arg2: i32) -> (i32, i32) {
    %c0_i32 = arith.constant 0 : i32
    %c0_i32_0 = arith.constant 0 : i32
    return %c0_i32, %arg2 : i32, i32
  }
  func.func @transform_4(%arg0: i32, %arg1: i32, %arg2: i32) -> (i32, i32) {
    %c0_i32 = arith.constant 0 : i32
    return %arg2, %arg1 : i32, i32
  }
  func.func @transform_5(%arg0: i32, %arg1: i32, %arg2: i32) -> (i32, i32) {
    %c0_i32 = arith.constant 0 : i32
    return %arg2, %arg1 : i32, i32
  }
  func.func @transform_6(%arg0: i32, %arg1: i32, %arg2: i32) -> (i32, i32) {
    %c0_i32 = arith.constant 0 : i32
    return %arg2, %arg1 : i32, i32
  }
  func.func @transform_7(%arg0: i32, %arg1: i32, %arg2: i32) -> (i32, i32) {
    %c0_i32 = arith.constant 0 : i32
    %c0_i32_0 = arith.constant 0 : i32
    return %c0_i32, %arg1 : i32, i32
  }
  func.func @transform_8(%arg0: i32, %arg1: i32, %arg2: i32) -> (i32, i32) {
    %c0_i32 = arith.constant 0 : i32
    %c0_i32_0 = arith.constant 0 : i32
    return %c0_i32, %arg1 : i32, i32
  }
  func.func @transform_9(%arg0: i32, %arg1: i32, %arg2: i32) -> (i32, i32) {
    %c0_i32 = arith.constant 0 : i32
    %c0_i32_0 = arith.constant 0 : i32
    return %c0_i32, %arg1 : i32, i32
  }
  func.func @transform_10(%arg0: i32, %arg1: i32, %arg2: i32) -> (i32, i32) {
    %c0_i32 = arith.constant 0 : i32
    %c0_i32_0 = arith.constant 0 : i32
    return %c0_i32, %arg1 : i32, i32
  }
  func.func @transform_11(%arg0: i32, %arg1: i32, %arg2: i32) -> (i32, i32) {
    %c0_i32 = arith.constant 0 : i32
    %c0_i32_0 = arith.constant 0 : i32
    return %c0_i32, %arg1 : i32, i32
  }
  func.func @transform_12(%arg0: i32, %arg1: i32, %arg2: i32) -> (i32, i32) {
    %c0_i32 = arith.constant 0 : i32
    %c0_i32_0 = arith.constant 0 : i32
    return %c0_i32, %arg1 : i32, i32
  }
  func.func @transform_13(%arg0: i32, %arg1: i32, %arg2: i32) -> (i32, i32) {
    %c0_i32 = arith.constant 0 : i32
    %c0_i32_0 = arith.constant 0 : i32
    return %c0_i32, %arg1 : i32, i32
  }
  func.func @transform_14(%arg0: i32, %arg1: i32, %arg2: i32) -> (i32, i32) {
    %c0_i32 = arith.constant 0 : i32
    return %arg0, %arg1 : i32, i32
  }
  func.func @transform_15(%arg0: i32, %arg1: i32, %arg2: i32) -> (i32, i32) {
    %c0_i32 = arith.constant 0 : i32
    return %arg0, %arg1 : i32, i32
  }
  func.func @transform_16(%arg0: i32, %arg1: i32, %arg2: i32) -> (i32, i32) {
    %c0_i32 = arith.constant 0 : i32
    return %arg0, %arg1 : i32, i32
  }
}

module attributes {stable_mosaic.version = 11 : i64} {
  func.func @_flash_attn_kernel(%arg0: i32, %arg1: i32, %arg2: i32, %arg3: memref<1x4x16x8xbf16, #tpu.memory_space<vmem>>, %arg4: memref<1x4x16x8xbf16, #tpu.memory_space<vmem>>, %arg5: memref<1x4x16x8xbf16, #tpu.memory_space<vmem>>, %arg6: memref<1x4x16x8xbf16, #tpu.memory_space<vmem>>, %arg7: memref<4x16x1xf32, #tpu.memory_space<vmem>>, %arg8: memref<4x16x1xf32, #tpu.memory_space<vmem>>, %arg9: memref<4x16x8xf32, #tpu.memory_space<vmem>>) attributes {dimension_semantics = [#tpu.dimension_semantics<parallel>, #tpu.dimension_semantics<parallel>, #tpu.dimension_semantics<arbitrary>], iteration_bounds = array<i64: 2, 1, 1>, scalar_prefetch = 0 : i64, scratch_operands = 3 : i64, tpu.core_type = #tpu.core_type<tc>, window_params = [{transform_indices = @transform_0, window_bounds = array<i64: 1, 4, 16, 8>}, {transform_indices = @transform_1, window_bounds = array<i64: 1, 4, 16, 8>}, {transform_indices = @transform_2, window_bounds = array<i64: 1, 4, 16, 8>}, {transform_indices = @transform_3, window_bounds = array<i64: 1, 4, 16, 8>}]} {
    %c0_i32 = arith.constant 0 : i32
    %0 = arith.cmpi eq, %arg2, %c0_i32 : i32
    %1 = arith.extui %0 : i1 to i32
    %c0_i32_0 = arith.constant 0 : i32
    %2 = arith.cmpi ne, %1, %c0_i32_0 : i32
    scf.if %2 {
      %cst_35 = arith.constant 0xFF800000 : f32
      %36 = vector.broadcast %cst_35 : f32 to vector<4x16x1xf32>
      %c0_36 = arith.constant 0 : index
      %c0_37 = arith.constant 0 : index
      %c0_38 = arith.constant 0 : index
      %37 = vector.load %arg7[%c0_36, %c0_37, %c0_38] : memref<4x16x1xf32, #tpu.memory_space<vmem>>, vector<4x16x1xf32>
      tpu.vector_store %arg7[%c0_36, %c0_37, %c0_38], %36 {strides = array<i32>} : memref<4x16x1xf32, #tpu.memory_space<vmem>>, vector<4x16x1xf32>,
      %cst_39 = arith.constant 0.000000e+00 : f32
      %38 = vector.broadcast %cst_39 : f32 to vector<4x16x1xf32>
      %c0_40 = arith.constant 0 : index
      %c0_41 = arith.constant 0 : index
      %c0_42 = arith.constant 0 : index
      %39 = vector.load %arg8[%c0_40, %c0_41, %c0_42] : memref<4x16x1xf32, #tpu.memory_space<vmem>>, vector<4x16x1xf32>
      tpu.vector_store %arg8[%c0_40, %c0_41, %c0_42], %38 {strides = array<i32>} : memref<4x16x1xf32, #tpu.memory_space<vmem>>, vector<4x16x1xf32>,
      %cst_43 = arith.constant 0.000000e+00 : f32
      %40 = vector.broadcast %cst_43 : f32 to vector<4x16x8xf32>
      %c0_44 = arith.constant 0 : index
      %c0_45 = arith.constant 0 : index
      %c0_46 = arith.constant 0 : index
      %41 = vector.load %arg9[%c0_44, %c0_45, %c0_46] : memref<4x16x8xf32, #tpu.memory_space<vmem>>, vector<4x16x8xf32>
      tpu.vector_store %arg9[%c0_44, %c0_45, %c0_46], %40 {strides = array<i32>} : memref<4x16x8xf32, #tpu.memory_space<vmem>>, vector<4x16x8xf32>,
    } else {
    }
    %c0 = arith.constant 0 : index
    %c0_1 = arith.constant 0 : index
    %c0_2 = arith.constant 0 : index
    %c0_3 = arith.constant 0 : index
    %3 = vector.load %arg3[%c0, %c0_1, %c0_2, %c0_3] : memref<1x4x16x8xbf16, #tpu.memory_space<vmem>>, vector<1x4x16x8xbf16>
    %4 = vector.shape_cast %3 : vector<1x4x16x8xbf16> to vector<4x16x8xbf16>
    %c0_4 = arith.constant 0 : index
    %c0_5 = arith.constant 0 : index
    %c0_6 = arith.constant 0 : index
    %c0_7 = arith.constant 0 : index
    %5 = vector.load %arg4[%c0_4, %c0_5, %c0_6, %c0_7] : memref<1x4x16x8xbf16, #tpu.memory_space<vmem>>, vector<1x4x16x8xbf16>
    %6 = vector.shape_cast %5 : vector<1x4x16x8xbf16> to vector<4x16x8xbf16>
    "tpu.trace_start"() <{level = 10 : i32, message = "hqd,hkd->hqk"}> : () -> ()
    %cst = arith.constant dense<0.000000e+00> : vector<4x16x16xf32>
    %7 = tpu.matmul %4, %6, %cst {dimension_numbers = #tpu.dot_dimension_numbers<[2], [2], [1], [1], [0, 0, 0, 1, 1, 1], [0], [0]>} : vector<4x16x8xbf16>, vector<4x16x8xbf16>, vector<4x16x16xf32> -> vector<4x16x16xf32>
    "tpu.trace_stop"() : () -> ()
    %c0_8 = arith.constant 0 : index
    %c0_9 = arith.constant 0 : index
    %c0_10 = arith.constant 0 : index
    %8 = vector.load %arg7[%c0_8, %c0_9, %c0_10] : memref<4x16x1xf32, #tpu.memory_space<vmem>>, vector<4x16x1xf32>
    %cst_11 = arith.constant dense<0xFF800000> : vector<4x16xf32>
    %9 = vector.multi_reduction <maximumf>, %7, %cst_11 [2] : vector<4x16x16xf32> to vector<4x16xf32>
    %10 = vector.shape_cast %9 : vector<4x16xf32> to vector<4x16x1xf32>
    %11 = arith.maximumf %8, %10 : vector<4x16x1xf32>
    %12 = arith.subf %8, %11 : vector<4x16x1xf32>
    %13 = math.exp %12 : vector<4x16x1xf32>
    %14 = vector.broadcast %11 : vector<4x16x1xf32> to vector<4x16x16xf32>
    %15 = arith.subf %7, %14 : vector<4x16x16xf32>
    %16 = math.exp %15 : vector<4x16x16xf32>
    %c0_12 = arith.constant 0 : index
    %c0_13 = arith.constant 0 : index
    %c0_14 = arith.constant 0 : index
    %17 = vector.load %arg8[%c0_12, %c0_13, %c0_14] : memref<4x16x1xf32, #tpu.memory_space<vmem>>, vector<4x16x1xf32>
    %18 = arith.mulf %13, %17 : vector<4x16x1xf32>
    %cst_15 = arith.constant dense<0.000000e+00> : vector<4x16xf32>
    %19 = vector.multi_reduction <add>, %16, %cst_15 [2] : vector<4x16x16xf32> to vector<4x16xf32>
    %20 = vector.shape_cast %19 : vector<4x16xf32> to vector<4x16x1xf32>
    %21 = arith.addf %18, %20 : vector<4x16x1xf32>
    %c0_16 = arith.constant 0 : index
    %c0_17 = arith.constant 0 : index
    %c0_18 = arith.constant 0 : index
    %22 = vector.load %arg8[%c0_16, %c0_17, %c0_18] : memref<4x16x1xf32, #tpu.memory_space<vmem>>, vector<4x16x1xf32>
    tpu.vector_store %arg8[%c0_16, %c0_17, %c0_18], %21 {strides = array<i32>} : memref<4x16x1xf32, #tpu.memory_space<vmem>>, vector<4x16x1xf32>,
    %c0_19 = arith.constant 0 : index
    %c0_20 = arith.constant 0 : index
    %c0_21 = arith.constant 0 : index
    %23 = vector.load %arg9[%c0_19, %c0_20, %c0_21] : memref<4x16x8xf32, #tpu.memory_space<vmem>>, vector<4x16x8xf32>
    %24 = vector.broadcast %13 : vector<4x16x1xf32> to vector<4x16x8xf32>
    %25 = arith.mulf %24, %23 : vector<4x16x8xf32>
    %26 = arith.truncf %16 : vector<4x16x16xf32> to vector<4x16x16xbf16>
    %c0_22 = arith.constant 0 : index
    %c0_23 = arith.constant 0 : index
    %c0_24 = arith.constant 0 : index
    %c0_25 = arith.constant 0 : index
    %27 = vector.load %arg5[%c0_22, %c0_23, %c0_24, %c0_25] : memref<1x4x16x8xbf16, #tpu.memory_space<vmem>>, vector<1x4x16x8xbf16>
    %28 = vector.shape_cast %27 : vector<1x4x16x8xbf16> to vector<4x16x8xbf16>
    "tpu.trace_start"() <{level = 10 : i32, message = "hqk,hkd->hqd"}> : () -> ()
    %cst_26 = arith.constant dense<0.000000e+00> : vector<4x16x8xf32>
    %29 = tpu.matmul %26, %28, %cst_26 {dimension_numbers = #tpu.dot_dimension_numbers<[2], [1], [1], [2], [0, 0, 0, 1, 1, 2], [0], [0]>} : vector<4x16x16xbf16>, vector<4x16x8xbf16>, vector<4x16x8xf32> -> vector<4x16x8xf32>
    "tpu.trace_stop"() : () -> ()
    %30 = arith.addf %25, %29 : vector<4x16x8xf32>
    %c0_27 = arith.constant 0 : index
    %c0_28 = arith.constant 0 : index
    %c0_29 = arith.constant 0 : index
    %31 = vector.load %arg9[%c0_27, %c0_28, %c0_29] : memref<4x16x8xf32, #tpu.memory_space<vmem>>, vector<4x16x8xf32>
    tpu.vector_store %arg9[%c0_27, %c0_28, %c0_29], %30 {strides = array<i32>} : memref<4x16x8xf32, #tpu.memory_space<vmem>>, vector<4x16x8xf32>,
    %c0_30 = arith.constant 0 : index
    %c0_31 = arith.constant 0 : index
    %c0_32 = arith.constant 0 : index
    %32 = vector.load %arg7[%c0_30, %c0_31, %c0_32] : memref<4x16x1xf32, #tpu.memory_space<vmem>>, vector<4x16x1xf32>
    tpu.vector_store %arg7[%c0_30, %c0_31, %c0_32], %11 {strides = array<i32>} : memref<4x16x1xf32, #tpu.memory_space<vmem>>, vector<4x16x1xf32>,
    %c0_i32_33 = arith.constant 0 : i32
    %33 = arith.cmpi eq, %arg2, %c0_i32_33 : i32
    %34 = arith.extui %33 : i1 to i32
    %c0_i32_34 = arith.constant 0 : i32
    %35 = arith.cmpi ne, %34, %c0_i32_34 : i32
    scf.if %35 {
      %c0_35 = arith.constant 0 : index
      %c0_36 = arith.constant 0 : index
      %c0_37 = arith.constant 0 : index
      %36 = vector.load %arg9[%c0_35, %c0_36, %c0_37] : memref<4x16x8xf32, #tpu.memory_space<vmem>>, vector<4x16x8xf32>
      %c0_38 = arith.constant 0 : index
      %c0_39 = arith.constant 0 : index
      %c0_40 = arith.constant 0 : index
      %37 = vector.load %arg8[%c0_38, %c0_39, %c0_40] : memref<4x16x1xf32, #tpu.memory_space<vmem>>, vector<4x16x1xf32>
      %38 = tpu.reciprocal %37 {approx = true} : vector<4x16x1xf32> -> vector<4x16x1xf32>
      %39 = vector.broadcast %38 : vector<4x16x1xf32> to vector<4x16x8xf32>
      %40 = arith.mulf %36, %39 : vector<4x16x8xf32>
      %41 = arith.truncf %40 : vector<4x16x8xf32> to vector<4x16x8xbf16>
      %c0_41 = arith.constant 0 : index
      %c0_42 = arith.constant 0 : index
      %c0_43 = arith.constant 0 : index
      %c0_44 = arith.constant 0 : index
      %42 = vector.load %arg6[%c0_41, %c0_42, %c0_43, %c0_44] : memref<1x4x16x8xbf16, #tpu.memory_space<vmem>>, vector<1x4x16x8xbf16>
      %43 = vector.shape_cast %42 : vector<1x4x16x8xbf16> to vector<4x16x8xbf16>
      %44 = vector.shape_cast %41 : vector<4x16x8xbf16> to vector<1x4x16x8xbf16>
      tpu.vector_store %arg6[%c0_41, %c0_42, %c0_43, %c0_44], %44 {strides = array<i32>} : memref<1x4x16x8xbf16, #tpu.memory_space<vmem>>, vector<1x4x16x8xbf16>,
    } else {
    }
    return
  }
  func.func @transform_0(%arg0: i32, %arg1: i32, %arg2: i32) -> (i32, i32, i32, i32) {
    %c0_i32 = arith.constant 0 : i32
    %c0_i32_0 = arith.constant 0 : i32
    %c0_i32_1 = arith.constant 0 : i32
    return %arg0, %c0_i32, %arg1, %c0_i32_0 : i32, i32, i32, i32
  }
  func.func @transform_1(%arg0: i32, %arg1: i32, %arg2: i32) -> (i32, i32, i32, i32) {
    %c0_i32 = arith.constant 0 : i32
    %c0_i32_0 = arith.constant 0 : i32
    %c0_i32_1 = arith.constant 0 : i32
    return %arg0, %c0_i32, %arg2, %c0_i32_0 : i32, i32, i32, i32
  }
  func.func @transform_2(%arg0: i32, %arg1: i32, %arg2: i32) -> (i32, i32, i32, i32) {
    %c0_i32 = arith.constant 0 : i32
    %c0_i32_0 = arith.constant 0 : i32
    %c0_i32_1 = arith.constant 0 : i32
    return %arg0, %c0_i32, %arg2, %c0_i32_0 : i32, i32, i32, i32
  }
  func.func @transform_3(%arg0: i32, %arg1: i32, %arg2: i32) -> (i32, i32, i32, i32) {
    %c0_i32 = arith.constant 0 : i32
    %c0_i32_0 = arith.constant 0 : i32
    %c0_i32_1 = arith.constant 0 : i32
    return %arg0, %c0_i32, %arg1, %c0_i32_0 : i32, i32, i32, i32
  }
}

module attributes {stable_mosaic.version = 11 : i64} {
  func.func @_matmul_addcmul_kernel(%arg0: i32, %arg1: i32, %arg2: i32, %arg3: memref<32x32xbf16, #tpu.memory_space<vmem>>, %arg4: memref<32x32xbf16, #tpu.memory_space<vmem>>, %arg5: memref<1x32xf32, #tpu.memory_space<vmem>>, %arg6: memref<32x32xf32, #tpu.memory_space<vmem>>, %arg7: memref<1x32xf32, #tpu.memory_space<vmem>>, %arg8: memref<1x32xf32, #tpu.memory_space<vmem>>, %arg9: memref<32x32xf32, #tpu.memory_space<vmem>>, %arg10: memref<32x32xf32, #tpu.memory_space<vmem>>) attributes {dimension_semantics = [#tpu.dimension_semantics<parallel>, #tpu.dimension_semantics<parallel>, #tpu.dimension_semantics<arbitrary>], iteration_bounds = array<i64: 1, 1, 1>, scalar_prefetch = 0 : i64, scratch_operands = 1 : i64, tpu.core_type = #tpu.core_type<tc>, window_params = [{transform_indices = @transform_0, window_bounds = array<i64: 32, 32>}, {transform_indices = @transform_1, window_bounds = array<i64: 32, 32>}, {transform_indices = @transform_2, window_bounds = array<i64: 1, 32>}, {transform_indices = @transform_3, window_bounds = array<i64: 32, 32>}, {transform_indices = @transform_4, window_bounds = array<i64: 1, 32>}, {transform_indices = @transform_5, window_bounds = array<i64: 1, 32>}, {transform_indices = @transform_6, window_bounds = array<i64: 32, 32>}]} {
    %c0_i32 = arith.constant 0 : i32
    %0 = arith.cmpi eq, %arg2, %c0_i32 : i32
    %1 = arith.extui %0 : i1 to i32
    %c0_i32_0 = arith.constant 0 : i32
    %2 = arith.cmpi ne, %1, %c0_i32_0 : i32
    scf.if %2 {
      %cst_10 = arith.constant 0.000000e+00 : f32
      %12 = vector.broadcast %cst_10 : f32 to vector<32x32xf32>
      %c0_11 = arith.constant 0 : index
      %c0_12 = arith.constant 0 : index
      %13 = vector.load %arg10[%c0_11, %c0_12] : memref<32x32xf32, #tpu.memory_space<vmem>>, vector<32x32xf32>
      tpu.vector_store %arg10[%c0_11, %c0_12], %12 {strides = array<i32>} : memref<32x32xf32, #tpu.memory_space<vmem>>, vector<32x32xf32>,
    } else {
    }
    %c0 = arith.constant 0 : index
    %c0_1 = arith.constant 0 : index
    %3 = vector.load %arg10[%c0, %c0_1] : memref<32x32xf32, #tpu.memory_space<vmem>>, vector<32x32xf32>
    %c0_2 = arith.constant 0 : index
    %c0_3 = arith.constant 0 : index
    %4 = vector.load %arg3[%c0_2, %c0_3] : memref<32x32xbf16, #tpu.memory_space<vmem>>, vector<32x32xbf16>
    %c0_4 = arith.constant 0 : index
    %c0_5 = arith.constant 0 : index
    %5 = vector.load %arg4[%c0_4, %c0_5] : memref<32x32xbf16, #tpu.memory_space<vmem>>, vector<32x32xbf16>
    %cst = arith.constant dense<0.000000e+00> : vector<32x32xf32>
    %6 = tpu.matmul %4, %5, %cst {dimension_numbers = #tpu.dot_dimension_numbers<[1], [0], [0], [1], [0, 0, 1, 1], [], []>} : vector<32x32xbf16>, vector<32x32xbf16>, vector<32x32xf32> -> vector<32x32xf32>
    %7 = arith.addf %3, %6 : vector<32x32xf32>
    %c0_6 = arith.constant 0 : index
    %c0_7 = arith.constant 0 : index
    %8 = vector.load %arg10[%c0_6, %c0_7] : memref<32x32xf32, #tpu.memory_space<vmem>>, vector<32x32xf32>
    tpu.vector_store %arg10[%c0_6, %c0_7], %7 {strides = array<i32>} : memref<32x32xf32, #tpu.memory_space<vmem>>, vector<32x32xf32>,
    %c0_i32_8 = arith.constant 0 : i32
    %9 = arith.cmpi eq, %arg2, %c0_i32_8 : i32
    %10 = arith.extui %9 : i1 to i32
    %c0_i32_9 = arith.constant 0 : i32
    %11 = arith.cmpi ne, %10, %c0_i32_9 : i32
    scf.if %11 {
      %c0_10 = arith.constant 0 : index
      %c0_11 = arith.constant 0 : index
      %12 = vector.load %arg10[%c0_10, %c0_11] : memref<32x32xf32, #tpu.memory_space<vmem>>, vector<32x32xf32>
      %c0_12 = arith.constant 0 : index
      %c0_13 = arith.constant 0 : index
      %13 = vector.load %arg5[%c0_12, %c0_13] : memref<1x32xf32, #tpu.memory_space<vmem>>, vector<1x32xf32>
      %14 = vector.broadcast %13 : vector<1x32xf32> to vector<32x32xf32>
      %15 = arith.addf %12, %14 : vector<32x32xf32>
      %c0_14 = arith.constant 0 : index
      %c0_15 = arith.constant 0 : index
      %16 = vector.load %arg6[%c0_14, %c0_15] : memref<32x32xf32, #tpu.memory_space<vmem>>, vector<32x32xf32>
      %c0_16 = arith.constant 0 : index
      %c0_17 = arith.constant 0 : index
      %17 = vector.load %arg8[%c0_16, %c0_17] : memref<1x32xf32, #tpu.memory_space<vmem>>, vector<1x32xf32>
      %18 = vector.broadcast %17 : vector<1x32xf32> to vector<32x32xf32>
      %19 = arith.addf %16, %18 : vector<32x32xf32>
      %c0_18 = arith.constant 0 : index
      %c0_19 = arith.constant 0 : index
      %20 = vector.load %arg7[%c0_18, %c0_19] : memref<1x32xf32, #tpu.memory_space<vmem>>, vector<1x32xf32>
      %21 = vector.broadcast %20 : vector<1x32xf32> to vector<32x32xf32>
      %22 = arith.mulf %15, %21 : vector<32x32xf32>
      %23 = arith.addf %19, %22 : vector<32x32xf32>
      %c0_20 = arith.constant 0 : index
      %c0_21 = arith.constant 0 : index
      %24 = vector.load %arg9[%c0_20, %c0_21] : memref<32x32xf32, #tpu.memory_space<vmem>>, vector<32x32xf32>
      tpu.vector_store %arg9[%c0_20, %c0_21], %23 {strides = array<i32>} : memref<32x32xf32, #tpu.memory_space<vmem>>, vector<32x32xf32>,
    } else {
    }
    return
  }
  func.func @transform_0(%arg0: i32, %arg1: i32, %arg2: i32) -> (i32, i32) {
    %c0_i32 = arith.constant 0 : i32
    return %arg0, %arg2 : i32, i32
  }
  func.func @transform_1(%arg0: i32, %arg1: i32, %arg2: i32) -> (i32, i32) {
    %c0_i32 = arith.constant 0 : i32
    return %arg2, %arg1 : i32, i32
  }
  func.func @transform_2(%arg0: i32, %arg1: i32, %arg2: i32) -> (i32, i32) {
    %c0_i32 = arith.constant 0 : i32
    %c0_i32_0 = arith.constant 0 : i32
    return %c0_i32, %arg1 : i32, i32
  }
  func.func @transform_3(%arg0: i32, %arg1: i32, %arg2: i32) -> (i32, i32) {
    %c0_i32 = arith.constant 0 : i32
    return %arg0, %arg1 : i32, i32
  }
  func.func @transform_4(%arg0: i32, %arg1: i32, %arg2: i32) -> (i32, i32) {
    %c0_i32 = arith.constant 0 : i32
    %c0_i32_0 = arith.constant 0 : i32
    return %c0_i32, %arg1 : i32, i32
  }
  func.func @transform_5(%arg0: i32, %arg1: i32, %arg2: i32) -> (i32, i32) {
    %c0_i32 = arith.constant 0 : i32
    %c0_i32_0 = arith.constant 0 : i32
    return %c0_i32, %arg1 : i32, i32
  }
  func.func @transform_6(%arg0: i32, %arg1: i32, %arg2: i32) -> (i32, i32) {
    %c0_i32 = arith.constant 0 : i32
    return %arg0, %arg1 : i32, i32
  }
}

module attributes {stable_mosaic.version = 11 : i64} {
  func.func @_dyt_matmul_kernel(%arg0: i32, %arg1: i32, %arg2: i32, %arg3: memref<1xf32, #tpu.memory_space<smem>>, %arg4: memref<32x32xf32, #tpu.memory_space<vmem>>, %arg5: memref<1x32xf32, #tpu.memory_space<vmem>>, %arg6: memref<1x32xf32, #tpu.memory_space<vmem>>, %arg7: memref<32x64xbf16, #tpu.memory_space<vmem>>, %arg8: memref<1x64xf32, #tpu.memory_space<vmem>>, %arg9: memref<32x64xbf16, #tpu.memory_space<vmem>>, %arg10: memref<32x64xf32, #tpu.memory_space<vmem>>) attributes {dimension_semantics = [#tpu.dimension_semantics<parallel>, #tpu.dimension_semantics<parallel>, #tpu.dimension_semantics<arbitrary>], iteration_bounds = array<i64: 1, 1, 1>, scalar_prefetch = 0 : i64, scratch_operands = 1 : i64, tpu.core_type = #tpu.core_type<tc>, window_params = [{transform_indices = @transform_0, window_bounds = array<i64: 1>}, {transform_indices = @transform_1, window_bounds = array<i64: 32, 32>}, {transform_indices = @transform_2, window_bounds = array<i64: 1, 32>}, {transform_indices = @transform_3, window_bounds = array<i64: 1, 32>}, {transform_indices = @transform_4, window_bounds = array<i64: 32, 64>}, {transform_indices = @transform_5, window_bounds = array<i64: 1, 64>}, {transform_indices = @transform_6, window_bounds = array<i64: 32, 64>}]} {
    %c0_i32 = arith.constant 0 : i32
    %0 = arith.cmpi eq, %arg2, %c0_i32 : i32
    %1 = arith.extui %0 : i1 to i32
    %c0_i32_0 = arith.constant 0 : i32
    %2 = arith.cmpi ne, %1, %c0_i32_0 : i32
    scf.if %2 {
      %cst_15 = arith.constant 0.000000e+00 : f32
      %23 = vector.broadcast %cst_15 : f32 to vector<32x64xf32>
      %c0_16 = arith.constant 0 : index
      %c0_17 = arith.constant 0 : index
      %24 = vector.load %arg10[%c0_16, %c0_17] : memref<32x64xf32, #tpu.memory_space<vmem>>, vector<32x64xf32>
      tpu.vector_store %arg10[%c0_16, %c0_17], %23 {strides = array<i32>} : memref<32x64xf32, #tpu.memory_space<vmem>>, vector<32x64xf32>,
    } else {
    }
    %c0 = arith.constant 0 : index
    %3 = memref.load %arg3[%c0] : memref<1xf32, #tpu.memory_space<smem>>
    %c0_1 = arith.constant 0 : index
    %c0_2 = arith.constant 0 : index
    %4 = vector.load %arg4[%c0_1, %c0_2] : memref<32x32xf32, #tpu.memory_space<vmem>>, vector<32x32xf32>
    %5 = vector.broadcast %3 : f32 to vector<32x32xf32>
    %6 = arith.mulf %5, %4 : vector<32x32xf32>
    %7 = math.tanh %6 : vector<32x32xf32>
    %c0_3 = arith.constant 0 : index
    %c0_4 = arith.constant 0 : index
    %8 = vector.load %arg5[%c0_3, %c0_4] : memref<1x32xf32, #tpu.memory_space<vmem>>, vector<1x32xf32>
    %9 = vector.broadcast %8 : vector<1x32xf32> to vector<32x32xf32>
    %10 = arith.mulf %7, %9 : vector<32x32xf32>
    %c0_5 = arith.constant 0 : index
    %c0_6 = arith.constant 0 : index
    %11 = vector.load %arg6[%c0_5, %c0_6] : memref<1x32xf32, #tpu.memory_space<vmem>>, vector<1x32xf32>
    %12 = vector.broadcast %11 : vector<1x32xf32> to vector<32x32xf32>
    %13 = arith.addf %10, %12 : vector<32x32xf32>
    %14 = arith.truncf %13 : vector<32x32xf32> to vector<32x32xbf16>
    %c0_7 = arith.constant 0 : index
    %c0_8 = arith.constant 0 : index
    %15 = vector.load %arg10[%c0_7, %c0_8] : memref<32x64xf32, #tpu.memory_space<vmem>>, vector<32x64xf32>
    %c0_9 = arith.constant 0 : index
    %c0_10 = arith.constant 0 : index
    %16 = vector.load %arg7[%c0_9, %c0_10] : memref<32x64xbf16, #tpu.memory_space<vmem>>, vector<32x64xbf16>
    %cst = arith.constant dense<0.000000e+00> : vector<32x64xf32>
    %17 = tpu.matmul %14, %16, %cst {dimension_numbers = #tpu.dot_dimension_numbers<[1], [0], [0], [1], [0, 0, 1, 1], [], []>} : vector<32x32xbf16>, vector<32x64xbf16>, vector<32x64xf32> -> vector<32x64xf32>
    %18 = arith.addf %15, %17 : vector<32x64xf32>
    %c0_11 = arith.constant 0 : index
    %c0_12 = arith.constant 0 : index
    %19 = vector.load %arg10[%c0_11, %c0_12] : memref<32x64xf32, #tpu.memory_space<vmem>>, vector<32x64xf32>
    tpu.vector_store %arg10[%c0_11, %c0_12], %18 {strides = array<i32>} : memref<32x64xf32, #tpu.memory_space<vmem>>, vector<32x64xf32>,
    %c0_i32_13 = arith.constant 0 : i32
    %20 = arith.cmpi eq, %arg2, %c0_i32_13 : i32
    %21 = arith.extui %20 : i1 to i32
    %c0_i32_14 = arith.constant 0 : i32
    %22 = arith.cmpi ne, %21, %c0_i32_14 : i32
    scf.if %22 {
      %c0_15 = arith.constant 0 : index
      %c0_16 = arith.constant 0 : index
      %23 = vector.load %arg10[%c0_15, %c0_16] : memref<32x64xf32, #tpu.memory_space<vmem>>, vector<32x64xf32>
      %c0_17 = arith.constant 0 : index
      %c0_18 = arith.constant 0 : index
      %24 = vector.load %arg8[%c0_17, %c0_18] : memref<1x64xf32, #tpu.memory_space<vmem>>, vector<1x64xf32>
      %25 = vector.broadcast %24 : vector<1x64xf32> to vector<32x64xf32>
      %26 = arith.addf %23, %25 : vector<32x64xf32>
      %cst_19 = arith.constant 5.000000e-01 : f32
      %27 = vector.broadcast %cst_19 : f32 to vector<32x64xf32>
      %28 = arith.mulf %27, %26 : vector<32x64xf32>
      %cst_20 = arith.constant 4.471500e-02 : f32
      %29 = vector.broadcast %cst_20 : f32 to vector<32x64xf32>
      %30 = arith.mulf %29, %26 : vector<32x64xf32>
      %31 = arith.mulf %30, %26 : vector<32x64xf32>
      %32 = arith.mulf %31, %26 : vector<32x64xf32>
      %33 = arith.addf %26, %32 : vector<32x64xf32>
      %cst_21 = arith.constant 0.797884583 : f32
      %34 = vector.broadcast %cst_21 : f32 to vector<32x64xf32>
      %35 = arith.mulf %34, %33 : vector<32x64xf32>
      %36 = math.tanh %35 : vector<32x64xf32>
      %cst_22 = arith.constant 1.000000e+00 : f32
      %37 = vector.broadcast %cst_22 : f32 to vector<32x64xf32>
      %38 = arith.addf %37, %36 : vector<32x64xf32>
      %39 = arith.mulf %28, %38 : vector<32x64xf32>
      %40 = arith.truncf %39 : vector<32x64xf32> to vector<32x64xbf16>
      %c0_23 = arith.constant 0 : index
      %c0_24 = arith.constant 0 : index
      %41 = vector.load %arg9[%c0_23, %c0_24] : memref<32x64xbf16, #tpu.memory_space<vmem>>, vector<32x64xbf16>
      tpu.vector_store %arg9[%c0_23, %c0_24], %40 {strides = array<i32>} : memref<32x64xbf16, #tpu.memory_space<vmem>>, vector<32x64xbf16>,
    } else {
    }
    return
  }
  func.func @transform_0(%arg0: i32, %arg1: i32, %arg2: i32) -> i32 {
    %c0_i32 = arith.constant 0 : i32
    %c0_i32_0 = arith.constant 0 : i32
    return %c0_i32 : i32
  }
  func.func @transform_1(%arg0: i32, %arg1: i32, %arg2: i32) -> (i32, i32) {
    %c0_i32 = arith.constant 0 : i32
    return %arg0, %arg2 : i32, i32
  }
  func.func @transform_2(%arg0: i32, %arg1: i32, %arg2: i32) -> (i32, i32) {
    %c0_i32 = arith.constant 0 : i32
    %c0_i32_0 = arith.constant 0 : i32
    return %c0_i32, %arg2 : i32, i32
  }
  func.func @transform_3(%arg0: i32, %arg1: i32, %arg2: i32) -> (i32, i32) {
    %c0_i32 = arith.constant 0 : i32
    %c0_i32_0 = arith.constant 0 : i32
    return %c0_i32, %arg2 : i32, i32
  }
  func.func @transform_4(%arg0: i32, %arg1: i32, %arg2: i32) -> (i32, i32) {
    %c0_i32 = arith.constant 0 : i32
    return %arg2, %arg1 : i32, i32
  }
  func.func @transform_5(%arg0: i32, %arg1: i32, %arg2: i32) -> (i32, i32) {
    %c0_i32 = arith.constant 0 : i32
    %c0_i32_0 = arith.constant 0 : i32
    return %c0_i32, %arg1 : i32, i32
  }
  func.func @transform_6(%arg0: i32, %arg1: i32, %arg2: i32) -> (i32, i32) {
    %c0_i32 = arith.constant 0 : i32
    return %arg0, %arg1 : i32, i32
  }
}

module attributes {stable_mosaic.version = 11 : i64} {
  func.func @_ff_conv_kernel(%arg0: i32, %arg1: i32, %arg2: memref<1x16x64xbf16, #tpu.memory_space<vmem>>, %arg3: memref<2x9x32x64xbf16, #tpu.memory_space<vmem>>, %arg4: memref<2x1x64xf32, #tpu.memory_space<vmem>>, %arg5: memref<2x9x64x32xbf16, #tpu.memory_space<vmem>>, %arg6: memref<2x1x32xf32, #tpu.memory_space<vmem>>, %arg7: memref<1x16x64xbf16, #tpu.memory_space<vmem>>, %arg8: memref<26x32xbf16, #tpu.memory_space<vmem>>, %arg9: memref<26x64xbf16, #tpu.memory_space<vmem>>) attributes {dimension_semantics = [#tpu.dimension_semantics<parallel>, #tpu.dimension_semantics<parallel>], iteration_bounds = array<i64: 2, 1>, scalar_prefetch = 0 : i64, scratch_operands = 2 : i64, tpu.core_type = #tpu.core_type<tc>, window_params = [{transform_indices = @transform_0, window_bounds = array<i64: 1, 16, 64>}, {transform_indices = @transform_1, window_bounds = array<i64: 2, 9, 32, 64>}, {transform_indices = @transform_2, window_bounds = array<i64: 2, 1, 64>}, {transform_indices = @transform_3, window_bounds = array<i64: 2, 9, 64, 32>}, {transform_indices = @transform_4, window_bounds = array<i64: 2, 1, 32>}, {transform_indices = @transform_5, window_bounds = array<i64: 1, 16, 64>}]} {
    %0 = tpu.iota {dimensions = array<i32: 0>} : vector<16x32xi32>
    %c4_i32 = arith.constant 4 : i32
    %c0_i32 = arith.constant 0 : i32
    %1 = arith.cmpi eq, %c4_i32, %c0_i32 : i32
    %c1_i32 = arith.constant 1 : i32
    %2 = arith.select %1, %c1_i32, %c4_i32 : i32
    %3 = vector.broadcast %2 : i32 to vector<16x32xi32>
    %4 = arith.remsi %0, %3 : vector<16x32xi32>
    %c0_i32_0 = arith.constant 0 : i32
    %5 = vector.broadcast %c0_i32_0 : i32 to vector<16x32xi32>
    %6 = arith.cmpi ne, %4, %5 : vector<16x32xi32>
    %c0_i32_1 = arith.constant 0 : i32
    %7 = vector.broadcast %c0_i32_1 : i32 to vector<16x32xi32>
    %8 = arith.cmpi slt, %4, %7 : vector<16x32xi32>
    %c0_i32_2 = arith.constant 0 : i32
    %9 = arith.cmpi slt, %2, %c0_i32_2 : i32
    %10 = vector.broadcast %9 : i1 to vector<16x32xi1>
    %11 = vector.broadcast %10 : vector<16x32xi1> to vector<16x32xi1>
    %12 = arith.xori %8, %11 : vector<16x32xi1>
    %13 = arith.andi %12, %6 : vector<16x32xi1>
    %14 = vector.broadcast %2 : i32 to vector<16x32xi32>
    %15 = arith.addi %4, %14 : vector<16x32xi32>
    %16 = arith.select %13, %15, %4 : vector<16x32xi1>, vector<16x32xi32>
    %c1_i32_3 = arith.constant 1 : i32
    %17 = vector.broadcast %c1_i32_3 : i32 to vector<16x32xi32>
    %18 = arith.cmpi sge, %16, %17 : vector<16x32xi32>
    %c2_i32 = arith.constant 2 : i32
    %19 = vector.broadcast %c2_i32 : i32 to vector<16x32xi32>
    %20 = arith.cmpi sle, %16, %19 : vector<16x32xi32>
    %21 = tpu.iota {dimensions = array<i32: 0>} : vector<16x64xi32>
    %c4_i32_4 = arith.constant 4 : i32
    %c0_i32_5 = arith.constant 0 : i32
    %22 = arith.cmpi eq, %c4_i32_4, %c0_i32_5 : i32
    %c1_i32_6 = arith.constant 1 : i32
    %23 = arith.select %22, %c1_i32_6, %c4_i32_4 : i32
    %24 = vector.broadcast %23 : i32 to vector<16x64xi32>
    %25 = arith.remsi %21, %24 : vector<16x64xi32>
    %c0_i32_7 = arith.constant 0 : i32
    %26 = vector.broadcast %c0_i32_7 : i32 to vector<16x64xi32>
    %27 = arith.cmpi ne, %25, %26 : vector<16x64xi32>
    %c0_i32_8 = arith.constant 0 : i32
    %28 = vector.broadcast %c0_i32_8 : i32 to vector<16x64xi32>
    %29 = arith.cmpi slt, %25, %28 : vector<16x64xi32>
    %c0_i32_9 = arith.constant 0 : i32
    %30 = arith.cmpi slt, %23, %c0_i32_9 : i32
    %31 = vector.broadcast %30 : i1 to vector<16x64xi1>
    %32 = vector.broadcast %31 : vector<16x64xi1> to vector<16x64xi1>
    %33 = arith.xori %29, %32 : vector<16x64xi1>
    %34 = arith.andi %33, %27 : vector<16x64xi1>
    %35 = vector.broadcast %23 : i32 to vector<16x64xi32>
    %36 = arith.addi %25, %35 : vector<16x64xi32>
    %37 = arith.select %34, %36, %25 : vector<16x64xi1>, vector<16x64xi32>
    %c1_i32_10 = arith.constant 1 : i32
    %38 = vector.broadcast %c1_i32_10 : i32 to vector<16x64xi32>
    %39 = arith.cmpi sge, %37, %38 : vector<16x64xi32>
    %c2_i32_11 = arith.constant 2 : i32
    %40 = vector.broadcast %c2_i32_11 : i32 to vector<16x64xi32>
    %41 = arith.cmpi sle, %37, %40 : vector<16x64xi32>
    %cst = arith.constant 0.000000e+00 : bf16
    %42 = vector.broadcast %cst : bf16 to vector<5x32xbf16>
    %c0 = arith.constant 0 : index
    %c0_12 = arith.constant 0 : index
    %43 = vector.load %arg8[%c0, %c0_12] : memref<26x32xbf16, #tpu.memory_space<vmem>>, vector<5x32xbf16>
    tpu.vector_store %arg8[%c0, %c0_12], %42 {strides = array<i32>} : memref<26x32xbf16, #tpu.memory_space<vmem>>, vector<5x32xbf16>,
    %cst_13 = arith.constant 0.000000e+00 : bf16
    %44 = vector.broadcast %cst_13 : bf16 to vector<5x32xbf16>
    %c21 = arith.constant 21 : index
    %c0_14 = arith.constant 0 : index
    %45 = vector.load %arg8[%c21, %c0_14] : memref<26x32xbf16, #tpu.memory_space<vmem>>, vector<5x32xbf16>
    tpu.vector_store %arg8[%c21, %c0_14], %44 {strides = array<i32>} : memref<26x32xbf16, #tpu.memory_space<vmem>>, vector<5x32xbf16>,
    %cst_15 = arith.constant 0.000000e+00 : bf16
    %46 = vector.broadcast %cst_15 : bf16 to vector<5x64xbf16>
    %c0_16 = arith.constant 0 : index
    %c0_17 = arith.constant 0 : index
    %47 = vector.load %arg9[%c0_16, %c0_17] : memref<26x64xbf16, #tpu.memory_space<vmem>>, vector<5x64xbf16>
    tpu.vector_store %arg9[%c0_16, %c0_17], %46 {strides = array<i32>} : memref<26x64xbf16, #tpu.memory_space<vmem>>, vector<5x64xbf16>,
    %cst_18 = arith.constant 0.000000e+00 : bf16
    %48 = vector.broadcast %cst_18 : bf16 to vector<5x64xbf16>
    %c21_19 = arith.constant 21 : index
    %c0_20 = arith.constant 0 : index
    %49 = vector.load %arg9[%c21_19, %c0_20] : memref<26x64xbf16, #tpu.memory_space<vmem>>, vector<5x64xbf16>
    tpu.vector_store %arg9[%c21_19, %c0_20], %48 {strides = array<i32>} : memref<26x64xbf16, #tpu.memory_space<vmem>>, vector<5x64xbf16>,
    %c0_21 = arith.constant 0 : index
    %c0_22 = arith.constant 0 : index
    %c0_23 = arith.constant 0 : index
    %50 = vector.load %arg2[%c0_21, %c0_22, %c0_23] : memref<1x16x64xbf16, #tpu.memory_space<vmem>>, vector<1x16x32xbf16>
    %51 = vector.shape_cast %50 : vector<1x16x32xbf16> to vector<16x32xbf16>
    %c5 = arith.constant 5 : index
    %c0_24 = arith.constant 0 : index
    %52 = vector.load %arg8[%c5, %c0_24] : memref<26x32xbf16, #tpu.memory_space<vmem>>, vector<16x32xbf16>
    tpu.vector_store %arg8[%c5, %c0_24], %51 {strides = array<i32>} : memref<26x32xbf16, #tpu.memory_space<vmem>>, vector<16x32xbf16>,
    %cst_25 = arith.constant 0.000000e+00 : f32
    %53 = vector.broadcast %cst_25 : f32 to vector<16x64xf32>
    %c0_26 = arith.constant 0 : index
    %c0_27 = arith.constant 0 : index
    %54 = vector.load %arg8[%c0_26, %c0_27] : memref<26x32xbf16, #tpu.memory_space<vmem>>, vector<16x32xbf16>
    %c0_i32_28 = arith.constant 0 : i32
    %55 = arith.sitofp %c0_i32_28 : i32 to bf16
    %56 = vector.broadcast %55 : bf16 to vector<16x32xbf16>
    %57 = arith.select %18, %54, %56 : vector<16x32xi1>, vector<16x32xbf16>
    %c0_29 = arith.constant 0 : index
    %c0_30 = arith.constant 0 : index
    %c0_31 = arith.constant 0 : index
    %c0_32 = arith.constant 0 : index
    %58 = vector.load %arg3[%c0_29, %c0_30, %c0_31, %c0_32] : memref<2x9x32x64xbf16, #tpu.memory_space<vmem>>, vector<1x1x32x64xbf16>
    %59 = vector.shape_cast %58 : vector<1x1x32x64xbf16> to vector<32x64xbf16>
    %cst_33 = arith.constant dense<0.000000e+00> : vector<16x64xf32>
    %60 = tpu.matmul %57, %59, %cst_33 {dimension_numbers = #tpu.dot_dimension_numbers<[1], [0], [0], [1], [0, 0, 1, 1], [], []>} : vector<16x32xbf16>, vector<32x64xbf16>, vector<16x64xf32> -> vector<16x64xf32>
    %61 = arith.addf %53, %60 : vector<16x64xf32>
    %c1 = arith.constant 1 : index
    %c0_34 = arith.constant 0 : index
    %62 = vector.load %arg8[%c1, %c0_34] : memref<26x32xbf16, #tpu.memory_space<vmem>>, vector<16x32xbf16>
    %c0_35 = arith.constant 0 : index
    %c1_36 = arith.constant 1 : index
    %c0_37 = arith.constant 0 : index
    %c0_38 = arith.constant 0 : index
    %63 = vector.load %arg3[%c0_35, %c1_36, %c0_37, %c0_38] : memref<2x9x32x64xbf16, #tpu.memory_space<vmem>>, vector<1x1x32x64xbf16>
    %64 = vector.shape_cast %63 : vector<1x1x32x64xbf16> to vector<32x64xbf16>
    %cst_39 = arith.constant dense<0.000000e+00> : vector<16x64xf32>
    %65 = tpu.matmul %62, %64, %cst_39 {dimension_numbers = #tpu.dot_dimension_numbers<[1], [0], [0], [1], [0, 0, 1, 1], [], []>} : vector<16x32xbf16>, vector<32x64xbf16>, vector<16x64xf32> -> vector<16x64xf32>
    %66 = arith.addf %61, %65 : vector<16x64xf32>
    %c2 = arith.constant 2 : index
    %c0_40 = arith.constant 0 : index
    %67 = vector.load %arg8[%c2, %c0_40] : memref<26x32xbf16, #tpu.memory_space<vmem>>, vector<16x32xbf16>
    %c0_i32_41 = arith.constant 0 : i32
    %68 = arith.sitofp %c0_i32_41 : i32 to bf16
    %69 = vector.broadcast %68 : bf16 to vector<16x32xbf16>
    %70 = arith.select %20, %67, %69 : vector<16x32xi1>, vector<16x32xbf16>
    %c0_42 = arith.constant 0 : index
    %c2_43 = arith.constant 2 : index
    %c0_44 = arith.constant 0 : index
    %c0_45 = arith.constant 0 : index
    %71 = vector.load %arg3[%c0_42, %c2_43, %c0_44, %c0_45] : memref<2x9x32x64xbf16, #tpu.memory_space<vmem>>, vector<1x1x32x64xbf16>
    %72 = vector.shape_cast %71 : vector<1x1x32x64xbf16> to vector<32x64xbf16>
    %cst_46 = arith.constant dense<0.000000e+00> : vector<16x64xf32>
    %73 = tpu.matmul %70, %72, %cst_46 {dimension_numbers = #tpu.dot_dimension_numbers<[1], [0], [0], [1], [0, 0, 1, 1], [], []>} : vector<16x32xbf16>, vector<32x64xbf16>, vector<16x64xf32> -> vector<16x64xf32>
    %74 = arith.addf %66, %73 : vector<16x64xf32>
    %c4 = arith.constant 4 : index
    %c0_47 = arith.constant 0 : index
    %75 = vector.load %arg8[%c4, %c0_47] : memref<26x32xbf16, #tpu.memory_space<vmem>>, vector<16x32xbf16>
    %c0_i32_48 = arith.constant 0 : i32
    %76 = arith.sitofp %c0_i32_48 : i32 to bf16
    %77 = vector.broadcast %76 : bf16 to vector<16x32xbf16>
    %78 = arith.select %18, %75, %77 : vector<16x32xi1>, vector<16x32xbf16>
    %c0_49 = arith.constant 0 : index
    %c3 = arith.constant 3 : index
    %c0_50 = arith.constant 0 : index
    %c0_51 = arith.constant 0 : index
    %79 = vector.load %arg3[%c0_49, %c3, %c0_50, %c0_51] : memref<2x9x32x64xbf16, #tpu.memory_space<vmem>>, vector<1x1x32x64xbf16>
    %80 = vector.shape_cast %79 : vector<1x1x32x64xbf16> to vector<32x64xbf16>
    %cst_52 = arith.constant dense<0.000000e+00> : vector<16x64xf32>
    %81 = tpu.matmul %78, %80, %cst_52 {dimension_numbers = #tpu.dot_dimension_numbers<[1], [0], [0], [1], [0, 0, 1, 1], [], []>} : vector<16x32xbf16>, vector<32x64xbf16>, vector<16x64xf32> -> vector<16x64xf32>
    %82 = arith.addf %74, %81 : vector<16x64xf32>
    %c5_53 = arith.constant 5 : index
    %c0_54 = arith.constant 0 : index
    %83 = vector.load %arg8[%c5_53, %c0_54] : memref<26x32xbf16, #tpu.memory_space<vmem>>, vector<16x32xbf16>
    %c0_55 = arith.constant 0 : index
    %c4_56 = arith.constant 4 : index
    %c0_57 = arith.constant 0 : index
    %c0_58 = arith.constant 0 : index
    %84 = vector.load %arg3[%c0_55, %c4_56, %c0_57, %c0_58] : memref<2x9x32x64xbf16, #tpu.memory_space<vmem>>, vector<1x1x32x64xbf16>
    %85 = vector.shape_cast %84 : vector<1x1x32x64xbf16> to vector<32x64xbf16>
    %cst_59 = arith.constant dense<0.000000e+00> : vector<16x64xf32>
    %86 = tpu.matmul %83, %85, %cst_59 {dimension_numbers = #tpu.dot_dimension_numbers<[1], [0], [0], [1], [0, 0, 1, 1], [], []>} : vector<16x32xbf16>, vector<32x64xbf16>, vector<16x64xf32> -> vector<16x64xf32>
    %87 = arith.addf %82, %86 : vector<16x64xf32>
    %c6 = arith.constant 6 : index
    %c0_60 = arith.constant 0 : index
    %88 = vector.load %arg8[%c6, %c0_60] : memref<26x32xbf16, #tpu.memory_space<vmem>>, vector<16x32xbf16>
    %c0_i32_61 = arith.constant 0 : i32
    %89 = arith.sitofp %c0_i32_61 : i32 to bf16
    %90 = vector.broadcast %89 : bf16 to vector<16x32xbf16>
    %91 = arith.select %20, %88, %90 : vector<16x32xi1>, vector<16x32xbf16>
    %c0_62 = arith.constant 0 : index
    %c5_63 = arith.constant 5 : index
    %c0_64 = arith.constant 0 : index
    %c0_65 = arith.constant 0 : index
    %92 = vector.load %arg3[%c0_62, %c5_63, %c0_64, %c0_65] : memref<2x9x32x64xbf16, #tpu.memory_space<vmem>>, vector<1x1x32x64xbf16>
    %93 = vector.shape_cast %92 : vector<1x1x32x64xbf16> to vector<32x64xbf16>
    %cst_66 = arith.constant dense<0.000000e+00> : vector<16x64xf32>
    %94 = tpu.matmul %91, %93, %cst_66 {dimension_numbers = #tpu.dot_dimension_numbers<[1], [0], [0], [1], [0, 0, 1, 1], [], []>} : vector<16x32xbf16>, vector<32x64xbf16>, vector<16x64xf32> -> vector<16x64xf32>
    %95 = arith.addf %87, %94 : vector<16x64xf32>
    %c8 = arith.constant 8 : index
    %c0_67 = arith.constant 0 : index
    %96 = vector.load %arg8[%c8, %c0_67] : memref<26x32xbf16, #tpu.memory_space<vmem>>, vector<16x32xbf16>
    %c0_i32_68 = arith.constant 0 : i32
    %97 = arith.sitofp %c0_i32_68 : i32 to bf16
    %98 = vector.broadcast %97 : bf16 to vector<16x32xbf16>
    %99 = arith.select %18, %96, %98 : vector<16x32xi1>, vector<16x32xbf16>
    %c0_69 = arith.constant 0 : index
    %c6_70 = arith.constant 6 : index
    %c0_71 = arith.constant 0 : index
    %c0_72 = arith.constant 0 : index
    %100 = vector.load %arg3[%c0_69, %c6_70, %c0_71, %c0_72] : memref<2x9x32x64xbf16, #tpu.memory_space<vmem>>, vector<1x1x32x64xbf16>
    %101 = vector.shape_cast %100 : vector<1x1x32x64xbf16> to vector<32x64xbf16>
    %cst_73 = arith.constant dense<0.000000e+00> : vector<16x64xf32>
    %102 = tpu.matmul %99, %101, %cst_73 {dimension_numbers = #tpu.dot_dimension_numbers<[1], [0], [0], [1], [0, 0, 1, 1], [], []>} : vector<16x32xbf16>, vector<32x64xbf16>, vector<16x64xf32> -> vector<16x64xf32>
    %103 = arith.addf %95, %102 : vector<16x64xf32>
    %c9 = arith.constant 9 : index
    %c0_74 = arith.constant 0 : index
    %104 = vector.load %arg8[%c9, %c0_74] : memref<26x32xbf16, #tpu.memory_space<vmem>>, vector<16x32xbf16>
    %c0_75 = arith.constant 0 : index
    %c7 = arith.constant 7 : index
    %c0_76 = arith.constant 0 : index
    %c0_77 = arith.constant 0 : index
    %105 = vector.load %arg3[%c0_75, %c7, %c0_76, %c0_77] : memref<2x9x32x64xbf16, #tpu.memory_space<vmem>>, vector<1x1x32x64xbf16>
    %106 = vector.shape_cast %105 : vector<1x1x32x64xbf16> to vector<32x64xbf16>
    %cst_78 = arith.constant dense<0.000000e+00> : vector<16x64xf32>
    %107 = tpu.matmul %104, %106, %cst_78 {dimension_numbers = #tpu.dot_dimension_numbers<[1], [0], [0], [1], [0, 0, 1, 1], [], []>} : vector<16x32xbf16>, vector<32x64xbf16>, vector<16x64xf32> -> vector<16x64xf32>
    %108 = arith.addf %103, %107 : vector<16x64xf32>
    %c10 = arith.constant 10 : index
    %c0_79 = arith.constant 0 : index
    %109 = vector.load %arg8[%c10, %c0_79] : memref<26x32xbf16, #tpu.memory_space<vmem>>, vector<16x32xbf16>
    %c0_i32_80 = arith.constant 0 : i32
    %110 = arith.sitofp %c0_i32_80 : i32 to bf16
    %111 = vector.broadcast %110 : bf16 to vector<16x32xbf16>
    %112 = arith.select %20, %109, %111 : vector<16x32xi1>, vector<16x32xbf16>
    %c0_81 = arith.constant 0 : index
    %c8_82 = arith.constant 8 : index
    %c0_83 = arith.constant 0 : index
    %c0_84 = arith.constant 0 : index
    %113 = vector.load %arg3[%c0_81, %c8_82, %c0_83, %c0_84] : memref<2x9x32x64xbf16, #tpu.memory_space<vmem>>, vector<1x1x32x64xbf16>
    %114 = vector.shape_cast %113 : vector<1x1x32x64xbf16> to vector<32x64xbf16>
    %cst_85 = arith.constant dense<0.000000e+00> : vector<16x64xf32>
    %115 = tpu.matmul %112, %114, %cst_85 {dimension_numbers = #tpu.dot_dimension_numbers<[1], [0], [0], [1], [0, 0, 1, 1], [], []>} : vector<16x32xbf16>, vector<32x64xbf16>, vector<16x64xf32> -> vector<16x64xf32>
    %116 = arith.addf %108, %115 : vector<16x64xf32>
    %c0_86 = arith.constant 0 : index
    %c0_87 = arith.constant 0 : index
    %c0_88 = arith.constant 0 : index
    %117 = vector.load %arg4[%c0_86, %c0_87, %c0_88] : memref<2x1x64xf32, #tpu.memory_space<vmem>>, vector<1x1x64xf32>
    %118 = vector.shape_cast %117 : vector<1x1x64xf32> to vector<1x64xf32>
    %119 = vector.broadcast %118 : vector<1x64xf32> to vector<16x64xf32>
    %120 = arith.addf %116, %119 : vector<16x64xf32>
    %cst_89 = arith.constant 5.000000e-01 : f32
    %121 = vector.broadcast %cst_89 : f32 to vector<16x64xf32>
    %122 = arith.mulf %121, %120 : vector<16x64xf32>
    %cst_90 = arith.constant 4.471500e-02 : f32
    %123 = vector.broadcast %cst_90 : f32 to vector<16x64xf32>
    %124 = arith.mulf %123, %120 : vector<16x64xf32>
    %125 = arith.mulf %124, %120 : vector<16x64xf32>
    %126 = arith.mulf %125, %120 : vector<16x64xf32>
    %127 = arith.addf %120, %126 : vector<16x64xf32>
    %cst_91 = arith.constant 0.797884583 : f32
    %128 = vector.broadcast %cst_91 : f32 to vector<16x64xf32>
    %129 = arith.mulf %128, %127 : vector<16x64xf32>
    %130 = math.tanh %129 : vector<16x64xf32>
    %cst_92 = arith.constant 1.000000e+00 : f32
    %131 = vector.broadcast %cst_92 : f32 to vector<16x64xf32>
    %132 = arith.addf %131, %130 : vector<16x64xf32>
    %133 = arith.mulf %122, %132 : vector<16x64xf32>
    %134 = arith.truncf %133 : vector<16x64xf32> to vector<16x64xbf16>
    %c5_93 = arith.constant 5 : index
    %c0_94 = arith.constant 0 : index
    %135 = vector.load %arg9[%c5_93, %c0_94] : memref<26x64xbf16, #tpu.memory_space<vmem>>, vector<16x64xbf16>
    tpu.vector_store %arg9[%c5_93, %c0_94], %134 {strides = array<i32>} : memref<26x64xbf16, #tpu.memory_space<vmem>>, vector<16x64xbf16>,
    %cst_95 = arith.constant 0.000000e+00 : f32
    %136 = vector.broadcast %cst_95 : f32 to vector<16x32xf32>
    %c0_96 = arith.constant 0 : index
    %c0_97 = arith.constant 0 : index
    %137 = vector.load %arg9[%c0_96, %c0_97] : memref<26x64xbf16, #tpu.memory_space<vmem>>, vector<16x64xbf16>
    %c0_i32_98 = arith.constant 0 : i32
    %138 = arith.sitofp %c0_i32_98 : i32 to bf16
    %139 = vector.broadcast %138 : bf16 to vector<16x64xbf16>
    %140 = arith.select %39, %137, %139 : vector<16x64xi1>, vector<16x64xbf16>
    %c0_99 = arith.constant 0 : index
    %c0_100 = arith.constant 0 : index
    %c0_101 = arith.constant 0 : index
    %c0_102 = arith.constant 0 : index
    %141 = vector.load %arg5[%c0_99, %c0_100, %c0_101, %c0_102] : memref<2x9x64x32xbf16, #tpu.memory_space<vmem>>, vector<1x1x64x32xbf16>
    %142 = vector.shape_cast %141 : vector<1x1x64x32xbf16> to vector<64x32xbf16>
    %cst_103 = arith.constant dense<0.000000e+00> : vector<16x32xf32>
    %143 = tpu.matmul %140, %142, %cst_103 {dimension_numbers = #tpu.dot_dimension_numbers<[1], [0], [0], [1], [0, 0, 1, 1], [], []>} : vector<16x64xbf16>, vector<64x32xbf16>, vector<16x32xf32> -> vector<16x32xf32>
    %144 = arith.addf %136, %143 : vector<16x32xf32>
    %c1_104 = arith.constant 1 : index
    %c0_105 = arith.constant 0 : index
    %145 = vector.load %arg9[%c1_104, %c0_105] : memref<26x64xbf16, #tpu.memory_space<vmem>>, vector<16x64xbf16>
    %c0_106 = arith.constant 0 : index
    %c1_107 = arith.constant 1 : index
    %c0_108 = arith.constant 0 : index
    %c0_109 = arith.constant 0 : index
    %146 = vector.load %arg5[%c0_106, %c1_107, %c0_108, %c0_109] : memref<2x9x64x32xbf16, #tpu.memory_space<vmem>>, vector<1x1x64x32xbf16>
    %147 = vector.shape_cast %146 : vector<1x1x64x32xbf16> to vector<64x32xbf16>
    %cst_110 = arith.constant dense<0.000000e+00> : vector<16x32xf32>
    %148 = tpu.matmul %145, %147, %cst_110 {dimension_numbers = #tpu.dot_dimension_numbers<[1], [0], [0], [1], [0, 0, 1, 1], [], []>} : vector<16x64xbf16>, vector<64x32xbf16>, vector<16x32xf32> -> vector<16x32xf32>
    %149 = arith.addf %144, %148 : vector<16x32xf32>
    %c2_111 = arith.constant 2 : index
    %c0_112 = arith.constant 0 : index
    %150 = vector.load %arg9[%c2_111, %c0_112] : memref<26x64xbf16, #tpu.memory_space<vmem>>, vector<16x64xbf16>
    %c0_i32_113 = arith.constant 0 : i32
    %151 = arith.sitofp %c0_i32_113 : i32 to bf16
    %152 = vector.broadcast %151 : bf16 to vector<16x64xbf16>
    %153 = arith.select %41, %150, %152 : vector<16x64xi1>, vector<16x64xbf16>
    %c0_114 = arith.constant 0 : index
    %c2_115 = arith.constant 2 : index
    %c0_116 = arith.constant 0 : index
    %c0_117 = arith.constant 0 : index
    %154 = vector.load %arg5[%c0_114, %c2_115, %c0_116, %c0_117] : memref<2x9x64x32xbf16, #tpu.memory_space<vmem>>, vector<1x1x64x32xbf16>
    %155 = vector.shape_cast %154 : vector<1x1x64x32xbf16> to vector<64x32xbf16>
    %cst_118 = arith.constant dense<0.000000e+00> : vector<16x32xf32>
    %156 = tpu.matmul %153, %155, %cst_118 {dimension_numbers = #tpu.dot_dimension_numbers<[1], [0], [0], [1], [0, 0, 1, 1], [], []>} : vector<16x64xbf16>, vector<64x32xbf16>, vector<16x32xf32> -> vector<16x32xf32>
    %157 = arith.addf %149, %156 : vector<16x32xf32>
    %c4_119 = arith.constant 4 : index
    %c0_120 = arith.constant 0 : index
    %158 = vector.load %arg9[%c4_119, %c0_120] : memref<26x64xbf16, #tpu.memory_space<vmem>>, vector<16x64xbf16>
    %c0_i32_121 = arith.constant 0 : i32
    %159 = arith.sitofp %c0_i32_121 : i32 to bf16
    %160 = vector.broadcast %159 : bf16 to vector<16x64xbf16>
    %161 = arith.select %39, %158, %160 : vector<16x64xi1>, vector<16x64xbf16>
    %c0_122 = arith.constant 0 : index
    %c3_123 = arith.constant 3 : index
    %c0_124 = arith.constant 0 : index
    %c0_125 = arith.constant 0 : index
    %162 = vector.load %arg5[%c0_122, %c3_123, %c0_124, %c0_125] : memref<2x9x64x32xbf16, #tpu.memory_space<vmem>>, vector<1x1x64x32xbf16>
    %163 = vector.shape_cast %162 : vector<1x1x64x32xbf16> to vector<64x32xbf16>
    %cst_126 = arith.constant dense<0.000000e+00> : vector<16x32xf32>
    %164 = tpu.matmul %161, %163, %cst_126 {dimension_numbers = #tpu.dot_dimension_numbers<[1], [0], [0], [1], [0, 0, 1, 1], [], []>} : vector<16x64xbf16>, vector<64x32xbf16>, vector<16x32xf32> -> vector<16x32xf32>
    %165 = arith.addf %157, %164 : vector<16x32xf32>
    %c5_127 = arith.constant 5 : index
    %c0_128 = arith.constant 0 : index
    %166 = vector.load %arg9[%c5_127, %c0_128] : memref<26x64xbf16, #tpu.memory_space<vmem>>, vector<16x64xbf16>
    %c0_129 = arith.constant 0 : index
    %c4_130 = arith.constant 4 : index
    %c0_131 = arith.constant 0 : index
    %c0_132 = arith.constant 0 : index
    %167 = vector.load %arg5[%c0_129, %c4_130, %c0_131, %c0_132] : memref<2x9x64x32xbf16, #tpu.memory_space<vmem>>, vector<1x1x64x32xbf16>
    %168 = vector.shape_cast %167 : vector<1x1x64x32xbf16> to vector<64x32xbf16>
    %cst_133 = arith.constant dense<0.000000e+00> : vector<16x32xf32>
    %169 = tpu.matmul %166, %168, %cst_133 {dimension_numbers = #tpu.dot_dimension_numbers<[1], [0], [0], [1], [0, 0, 1, 1], [], []>} : vector<16x64xbf16>, vector<64x32xbf16>, vector<16x32xf32> -> vector<16x32xf32>
    %170 = arith.addf %165, %169 : vector<16x32xf32>
    %c6_134 = arith.constant 6 : index
    %c0_135 = arith.constant 0 : index
    %171 = vector.load %arg9[%c6_134, %c0_135] : memref<26x64xbf16, #tpu.memory_space<vmem>>, vector<16x64xbf16>
    %c0_i32_136 = arith.constant 0 : i32
    %172 = arith.sitofp %c0_i32_136 : i32 to bf16
    %173 = vector.broadcast %172 : bf16 to vector<16x64xbf16>
    %174 = arith.select %41, %171, %173 : vector<16x64xi1>, vector<16x64xbf16>
    %c0_137 = arith.constant 0 : index
    %c5_138 = arith.constant 5 : index
    %c0_139 = arith.constant 0 : index
    %c0_140 = arith.constant 0 : index
    %175 = vector.load %arg5[%c0_137, %c5_138, %c0_139, %c0_140] : memref<2x9x64x32xbf16, #tpu.memory_space<vmem>>, vector<1x1x64x32xbf16>
    %176 = vector.shape_cast %175 : vector<1x1x64x32xbf16> to vector<64x32xbf16>
    %cst_141 = arith.constant dense<0.000000e+00> : vector<16x32xf32>
    %177 = tpu.matmul %174, %176, %cst_141 {dimension_numbers = #tpu.dot_dimension_numbers<[1], [0], [0], [1], [0, 0, 1, 1], [], []>} : vector<16x64xbf16>, vector<64x32xbf16>, vector<16x32xf32> -> vector<16x32xf32>
    %178 = arith.addf %170, %177 : vector<16x32xf32>
    %c8_142 = arith.constant 8 : index
    %c0_143 = arith.constant 0 : index
    %179 = vector.load %arg9[%c8_142, %c0_143] : memref<26x64xbf16, #tpu.memory_space<vmem>>, vector<16x64xbf16>
    %c0_i32_144 = arith.constant 0 : i32
    %180 = arith.sitofp %c0_i32_144 : i32 to bf16
    %181 = vector.broadcast %180 : bf16 to vector<16x64xbf16>
    %182 = arith.select %39, %179, %181 : vector<16x64xi1>, vector<16x64xbf16>
    %c0_145 = arith.constant 0 : index
    %c6_146 = arith.constant 6 : index
    %c0_147 = arith.constant 0 : index
    %c0_148 = arith.constant 0 : index
    %183 = vector.load %arg5[%c0_145, %c6_146, %c0_147, %c0_148] : memref<2x9x64x32xbf16, #tpu.memory_space<vmem>>, vector<1x1x64x32xbf16>
    %184 = vector.shape_cast %183 : vector<1x1x64x32xbf16> to vector<64x32xbf16>
    %cst_149 = arith.constant dense<0.000000e+00> : vector<16x32xf32>
    %185 = tpu.matmul %182, %184, %cst_149 {dimension_numbers = #tpu.dot_dimension_numbers<[1], [0], [0], [1], [0, 0, 1, 1], [], []>} : vector<16x64xbf16>, vector<64x32xbf16>, vector<16x32xf32> -> vector<16x32xf32>
    %186 = arith.addf %178, %185 : vector<16x32xf32>
    %c9_150 = arith.constant 9 : index
    %c0_151 = arith.constant 0 : index
    %187 = vector.load %arg9[%c9_150, %c0_151] : memref<26x64xbf16, #tpu.memory_space<vmem>>, vector<16x64xbf16>
    %c0_152 = arith.constant 0 : index
    %c7_153 = arith.constant 7 : index
    %c0_154 = arith.constant 0 : index
    %c0_155 = arith.constant 0 : index
    %188 = vector.load %arg5[%c0_152, %c7_153, %c0_154, %c0_155] : memref<2x9x64x32xbf16, #tpu.memory_space<vmem>>, vector<1x1x64x32xbf16>
    %189 = vector.shape_cast %188 : vector<1x1x64x32xbf16> to vector<64x32xbf16>
    %cst_156 = arith.constant dense<0.000000e+00> : vector<16x32xf32>
    %190 = tpu.matmul %187, %189, %cst_156 {dimension_numbers = #tpu.dot_dimension_numbers<[1], [0], [0], [1], [0, 0, 1, 1], [], []>} : vector<16x64xbf16>, vector<64x32xbf16>, vector<16x32xf32> -> vector<16x32xf32>
    %191 = arith.addf %186, %190 : vector<16x32xf32>
    %c10_157 = arith.constant 10 : index
    %c0_158 = arith.constant 0 : index
    %192 = vector.load %arg9[%c10_157, %c0_158] : memref<26x64xbf16, #tpu.memory_space<vmem>>, vector<16x64xbf16>
    %c0_i32_159 = arith.constant 0 : i32
    %193 = arith.sitofp %c0_i32_159 : i32 to bf16
    %194 = vector.broadcast %193 : bf16 to vector<16x64xbf16>
    %195 = arith.select %41, %192, %194 : vector<16x64xi1>, vector<16x64xbf16>
    %c0_160 = arith.constant 0 : index
    %c8_161 = arith.constant 8 : index
    %c0_162 = arith.constant 0 : index
    %c0_163 = arith.constant 0 : index
    %196 = vector.load %arg5[%c0_160, %c8_161, %c0_162, %c0_163] : memref<2x9x64x32xbf16, #tpu.memory_space<vmem>>, vector<1x1x64x32xbf16>
    %197 = vector.shape_cast %196 : vector<1x1x64x32xbf16> to vector<64x32xbf16>
    %cst_164 = arith.constant dense<0.000000e+00> : vector<16x32xf32>
    %198 = tpu.matmul %195, %197, %cst_164 {dimension_numbers = #tpu.dot_dimension_numbers<[1], [0], [0], [1], [0, 0, 1, 1], [], []>} : vector<16x64xbf16>, vector<64x32xbf16>, vector<16x32xf32> -> vector<16x32xf32>
    %199 = arith.addf %191, %198 : vector<16x32xf32>
    %c0_165 = arith.constant 0 : index
    %c0_166 = arith.constant 0 : index
    %c0_167 = arith.constant 0 : index
    %200 = vector.load %arg6[%c0_165, %c0_166, %c0_167] : memref<2x1x32xf32, #tpu.memory_space<vmem>>, vector<1x1x32xf32>
    %201 = vector.shape_cast %200 : vector<1x1x32xf32> to vector<1x32xf32>
    %202 = vector.broadcast %201 : vector<1x32xf32> to vector<16x32xf32>
    %203 = arith.addf %199, %202 : vector<16x32xf32>
    %204 = arith.truncf %203 : vector<16x32xf32> to vector<16x32xbf16>
    %c0_168 = arith.constant 0 : index
    %c0_169 = arith.constant 0 : index
    %c0_170 = arith.constant 0 : index
    %205 = vector.load %arg7[%c0_168, %c0_169, %c0_170] : memref<1x16x64xbf16, #tpu.memory_space<vmem>>, vector<1x16x32xbf16>
    %206 = vector.shape_cast %205 : vector<1x16x32xbf16> to vector<16x32xbf16>
    %207 = vector.shape_cast %204 : vector<16x32xbf16> to vector<1x16x32xbf16>
    tpu.vector_store %arg7[%c0_168, %c0_169, %c0_170], %207 {strides = array<i32>} : memref<1x16x64xbf16, #tpu.memory_space<vmem>>, vector<1x16x32xbf16>,
    %c0_171 = arith.constant 0 : index
    %c0_172 = arith.constant 0 : index
    %c32 = arith.constant 32 : index
    %208 = vector.load %arg2[%c0_171, %c0_172, %c32] : memref<1x16x64xbf16, #tpu.memory_space<vmem>>, vector<1x16x32xbf16>
    %209 = vector.shape_cast %208 : vector<1x16x32xbf16> to vector<16x32xbf16>
    %c5_173 = arith.constant 5 : index
    %c0_174 = arith.constant 0 : index
    %210 = vector.load %arg8[%c5_173, %c0_174] : memref<26x32xbf16, #tpu.memory_space<vmem>>, vector<16x32xbf16>
    tpu.vector_store %arg8[%c5_173, %c0_174], %209 {strides = array<i32>} : memref<26x32xbf16, #tpu.memory_space<vmem>>, vector<16x32xbf16>,
    %cst_175 = arith.constant 0.000000e+00 : f32
    %211 = vector.broadcast %cst_175 : f32 to vector<16x64xf32>
    %c0_176 = arith.constant 0 : index
    %c0_177 = arith.constant 0 : index
    %212 = vector.load %arg8[%c0_176, %c0_177] : memref<26x32xbf16, #tpu.memory_space<vmem>>, vector<16x32xbf16>
    %c0_i32_178 = arith.constant 0 : i32
    %213 = arith.sitofp %c0_i32_178 : i32 to bf16
    %214 = vector.broadcast %213 : bf16 to vector<16x32xbf16>
    %215 = arith.select %18, %212, %214 : vector<16x32xi1>, vector<16x32xbf16>
    %c1_179 = arith.constant 1 : index
    %c0_180 = arith.constant 0 : index
    %c0_181 = arith.constant 0 : index
    %c0_182 = arith.constant 0 : index
    %216 = vector.load %arg3[%c1_179, %c0_180, %c0_181, %c0_182] : memref<2x9x32x64xbf16, #tpu.memory_space<vmem>>, vector<1x1x32x64xbf16>
    %217 = vector.shape_cast %216 : vector<1x1x32x64xbf16> to vector<32x64xbf16>
    %cst_183 = arith.constant dense<0.000000e+00> : vector<16x64xf32>
    %218 = tpu.matmul %215, %217, %cst_183 {dimension_numbers = #tpu.dot_dimension_numbers<[1], [0], [0], [1], [0, 0, 1, 1], [], []>} : vector<16x32xbf16>, vector<32x64xbf16>, vector<16x64xf32> -> vector<16x64xf32>
    %219 = arith.addf %211, %218 : vector<16x64xf32>
    %c1_184 = arith.constant 1 : index
    %c0_185 = arith.constant 0 : index
    %220 = vector.load %arg8[%c1_184, %c0_185] : memref<26x32xbf16, #tpu.memory_space<vmem>>, vector<16x32xbf16>
    %c1_186 = arith.constant 1 : index
    %c1_187 = arith.constant 1 : index
    %c0_188 = arith.constant 0 : index
    %c0_189 = arith.constant 0 : index
    %221 = vector.load %arg3[%c1_186, %c1_187, %c0_188, %c0_189] : memref<2x9x32x64xbf16, #tpu.memory_space<vmem>>, vector<1x1x32x64xbf16>
    %222 = vector.shape_cast %221 : vector<1x1x32x64xbf16> to vector<32x64xbf16>
    %cst_190 = arith.constant dense<0.000000e+00> : vector<16x64xf32>
    %223 = tpu.matmul %220, %222, %cst_190 {dimension_numbers = #tpu.dot_dimension_numbers<[1], [0], [0], [1], [0, 0, 1, 1], [], []>} : vector<16x32xbf16>, vector<32x64xbf16>, vector<16x64xf32> -> vector<16x64xf32>
    %224 = arith.addf %219, %223 : vector<16x64xf32>
    %c2_191 = arith.constant 2 : index
    %c0_192 = arith.constant 0 : index
    %225 = vector.load %arg8[%c2_191, %c0_192] : memref<26x32xbf16, #tpu.memory_space<vmem>>, vector<16x32xbf16>
    %c0_i32_193 = arith.constant 0 : i32
    %226 = arith.sitofp %c0_i32_193 : i32 to bf16
    %227 = vector.broadcast %226 : bf16 to vector<16x32xbf16>
    %228 = arith.select %20, %225, %227 : vector<16x32xi1>, vector<16x32xbf16>
    %c1_194 = arith.constant 1 : index
    %c2_195 = arith.constant 2 : index
    %c0_196 = arith.constant 0 : index
    %c0_197 = arith.constant 0 : index
    %229 = vector.load %arg3[%c1_194, %c2_195, %c0_196, %c0_197] : memref<2x9x32x64xbf16, #tpu.memory_space<vmem>>, vector<1x1x32x64xbf16>
    %230 = vector.shape_cast %229 : vector<1x1x32x64xbf16> to vector<32x64xbf16>
    %cst_198 = arith.constant dense<0.000000e+00> : vector<16x64xf32>
    %231 = tpu.matmul %228, %230, %cst_198 {dimension_numbers = #tpu.dot_dimension_numbers<[1], [0], [0], [1], [0, 0, 1, 1], [], []>} : vector<16x32xbf16>, vector<32x64xbf16>, vector<16x64xf32> -> vector<16x64xf32>
    %232 = arith.addf %224, %231 : vector<16x64xf32>
    %c4_199 = arith.constant 4 : index
    %c0_200 = arith.constant 0 : index
    %233 = vector.load %arg8[%c4_199, %c0_200] : memref<26x32xbf16, #tpu.memory_space<vmem>>, vector<16x32xbf16>
    %c0_i32_201 = arith.constant 0 : i32
    %234 = arith.sitofp %c0_i32_201 : i32 to bf16
    %235 = vector.broadcast %234 : bf16 to vector<16x32xbf16>
    %236 = arith.select %18, %233, %235 : vector<16x32xi1>, vector<16x32xbf16>
    %c1_202 = arith.constant 1 : index
    %c3_203 = arith.constant 3 : index
    %c0_204 = arith.constant 0 : index
    %c0_205 = arith.constant 0 : index
    %237 = vector.load %arg3[%c1_202, %c3_203, %c0_204, %c0_205] : memref<2x9x32x64xbf16, #tpu.memory_space<vmem>>, vector<1x1x32x64xbf16>
    %238 = vector.shape_cast %237 : vector<1x1x32x64xbf16> to vector<32x64xbf16>
    %cst_206 = arith.constant dense<0.000000e+00> : vector<16x64xf32>
    %239 = tpu.matmul %236, %238, %cst_206 {dimension_numbers = #tpu.dot_dimension_numbers<[1], [0], [0], [1], [0, 0, 1, 1], [], []>} : vector<16x32xbf16>, vector<32x64xbf16>, vector<16x64xf32> -> vector<16x64xf32>
    %240 = arith.addf %232, %239 : vector<16x64xf32>
    %c5_207 = arith.constant 5 : index
    %c0_208 = arith.constant 0 : index
    %241 = vector.load %arg8[%c5_207, %c0_208] : memref<26x32xbf16, #tpu.memory_space<vmem>>, vector<16x32xbf16>
    %c1_209 = arith.constant 1 : index
    %c4_210 = arith.constant 4 : index
    %c0_211 = arith.constant 0 : index
    %c0_212 = arith.constant 0 : index
    %242 = vector.load %arg3[%c1_209, %c4_210, %c0_211, %c0_212] : memref<2x9x32x64xbf16, #tpu.memory_space<vmem>>, vector<1x1x32x64xbf16>
    %243 = vector.shape_cast %242 : vector<1x1x32x64xbf16> to vector<32x64xbf16>
    %cst_213 = arith.constant dense<0.000000e+00> : vector<16x64xf32>
    %244 = tpu.matmul %241, %243, %cst_213 {dimension_numbers = #tpu.dot_dimension_numbers<[1], [0], [0], [1], [0, 0, 1, 1], [], []>} : vector<16x32xbf16>, vector<32x64xbf16>, vector<16x64xf32> -> vector<16x64xf32>
    %245 = arith.addf %240, %244 : vector<16x64xf32>
    %c6_214 = arith.constant 6 : index
    %c0_215 = arith.constant 0 : index
    %246 = vector.load %arg8[%c6_214, %c0_215] : memref<26x32xbf16, #tpu.memory_space<vmem>>, vector<16x32xbf16>
    %c0_i32_216 = arith.constant 0 : i32
    %247 = arith.sitofp %c0_i32_216 : i32 to bf16
    %248 = vector.broadcast %247 : bf16 to vector<16x32xbf16>
    %249 = arith.select %20, %246, %248 : vector<16x32xi1>, vector<16x32xbf16>
    %c1_217 = arith.constant 1 : index
    %c5_218 = arith.constant 5 : index
    %c0_219 = arith.constant 0 : index
    %c0_220 = arith.constant 0 : index
    %250 = vector.load %arg3[%c1_217, %c5_218, %c0_219, %c0_220] : memref<2x9x32x64xbf16, #tpu.memory_space<vmem>>, vector<1x1x32x64xbf16>
    %251 = vector.shape_cast %250 : vector<1x1x32x64xbf16> to vector<32x64xbf16>
    %cst_221 = arith.constant dense<0.000000e+00> : vector<16x64xf32>
    %252 = tpu.matmul %249, %251, %cst_221 {dimension_numbers = #tpu.dot_dimension_numbers<[1], [0], [0], [1], [0, 0, 1, 1], [], []>} : vector<16x32xbf16>, vector<32x64xbf16>, vector<16x64xf32> -> vector<16x64xf32>
    %253 = arith.addf %245, %252 : vector<16x64xf32>
    %c8_222 = arith.constant 8 : index
    %c0_223 = arith.constant 0 : index
    %254 = vector.load %arg8[%c8_222, %c0_223] : memref<26x32xbf16, #tpu.memory_space<vmem>>, vector<16x32xbf16>
    %c0_i32_224 = arith.constant 0 : i32
    %255 = arith.sitofp %c0_i32_224 : i32 to bf16
    %256 = vector.broadcast %255 : bf16 to vector<16x32xbf16>
    %257 = arith.select %18, %254, %256 : vector<16x32xi1>, vector<16x32xbf16>
    %c1_225 = arith.constant 1 : index
    %c6_226 = arith.constant 6 : index
    %c0_227 = arith.constant 0 : index
    %c0_228 = arith.constant 0 : index
    %258 = vector.load %arg3[%c1_225, %c6_226, %c0_227, %c0_228] : memref<2x9x32x64xbf16, #tpu.memory_space<vmem>>, vector<1x1x32x64xbf16>
    %259 = vector.shape_cast %258 : vector<1x1x32x64xbf16> to vector<32x64xbf16>
    %cst_229 = arith.constant dense<0.000000e+00> : vector<16x64xf32>
    %260 = tpu.matmul %257, %259, %cst_229 {dimension_numbers = #tpu.dot_dimension_numbers<[1], [0], [0], [1], [0, 0, 1, 1], [], []>} : vector<16x32xbf16>, vector<32x64xbf16>, vector<16x64xf32> -> vector<16x64xf32>
    %261 = arith.addf %253, %260 : vector<16x64xf32>
    %c9_230 = arith.constant 9 : index
    %c0_231 = arith.constant 0 : index
    %262 = vector.load %arg8[%c9_230, %c0_231] : memref<26x32xbf16, #tpu.memory_space<vmem>>, vector<16x32xbf16>
    %c1_232 = arith.constant 1 : index
    %c7_233 = arith.constant 7 : index
    %c0_234 = arith.constant 0 : index
    %c0_235 = arith.constant 0 : index
    %263 = vector.load %arg3[%c1_232, %c7_233, %c0_234, %c0_235] : memref<2x9x32x64xbf16, #tpu.memory_space<vmem>>, vector<1x1x32x64xbf16>
    %264 = vector.shape_cast %263 : vector<1x1x32x64xbf16> to vector<32x64xbf16>
    %cst_236 = arith.constant dense<0.000000e+00> : vector<16x64xf32>
    %265 = tpu.matmul %262, %264, %cst_236 {dimension_numbers = #tpu.dot_dimension_numbers<[1], [0], [0], [1], [0, 0, 1, 1], [], []>} : vector<16x32xbf16>, vector<32x64xbf16>, vector<16x64xf32> -> vector<16x64xf32>
    %266 = arith.addf %261, %265 : vector<16x64xf32>
    %c10_237 = arith.constant 10 : index
    %c0_238 = arith.constant 0 : index
    %267 = vector.load %arg8[%c10_237, %c0_238] : memref<26x32xbf16, #tpu.memory_space<vmem>>, vector<16x32xbf16>
    %c0_i32_239 = arith.constant 0 : i32
    %268 = arith.sitofp %c0_i32_239 : i32 to bf16
    %269 = vector.broadcast %268 : bf16 to vector<16x32xbf16>
    %270 = arith.select %20, %267, %269 : vector<16x32xi1>, vector<16x32xbf16>
    %c1_240 = arith.constant 1 : index
    %c8_241 = arith.constant 8 : index
    %c0_242 = arith.constant 0 : index
    %c0_243 = arith.constant 0 : index
    %271 = vector.load %arg3[%c1_240, %c8_241, %c0_242, %c0_243] : memref<2x9x32x64xbf16, #tpu.memory_space<vmem>>, vector<1x1x32x64xbf16>
    %272 = vector.shape_cast %271 : vector<1x1x32x64xbf16> to vector<32x64xbf16>
    %cst_244 = arith.constant dense<0.000000e+00> : vector<16x64xf32>
    %273 = tpu.matmul %270, %272, %cst_244 {dimension_numbers = #tpu.dot_dimension_numbers<[1], [0], [0], [1], [0, 0, 1, 1], [], []>} : vector<16x32xbf16>, vector<32x64xbf16>, vector<16x64xf32> -> vector<16x64xf32>
    %274 = arith.addf %266, %273 : vector<16x64xf32>
    %c1_245 = arith.constant 1 : index
    %c0_246 = arith.constant 0 : index
    %c0_247 = arith.constant 0 : index
    %275 = vector.load %arg4[%c1_245, %c0_246, %c0_247] : memref<2x1x64xf32, #tpu.memory_space<vmem>>, vector<1x1x64xf32>
    %276 = vector.shape_cast %275 : vector<1x1x64xf32> to vector<1x64xf32>
    %277 = vector.broadcast %276 : vector<1x64xf32> to vector<16x64xf32>
    %278 = arith.addf %274, %277 : vector<16x64xf32>
    %cst_248 = arith.constant 5.000000e-01 : f32
    %279 = vector.broadcast %cst_248 : f32 to vector<16x64xf32>
    %280 = arith.mulf %279, %278 : vector<16x64xf32>
    %cst_249 = arith.constant 4.471500e-02 : f32
    %281 = vector.broadcast %cst_249 : f32 to vector<16x64xf32>
    %282 = arith.mulf %281, %278 : vector<16x64xf32>
    %283 = arith.mulf %282, %278 : vector<16x64xf32>
    %284 = arith.mulf %283, %278 : vector<16x64xf32>
    %285 = arith.addf %278, %284 : vector<16x64xf32>
    %cst_250 = arith.constant 0.797884583 : f32
    %286 = vector.broadcast %cst_250 : f32 to vector<16x64xf32>
    %287 = arith.mulf %286, %285 : vector<16x64xf32>
    %288 = math.tanh %287 : vector<16x64xf32>
    %cst_251 = arith.constant 1.000000e+00 : f32
    %289 = vector.broadcast %cst_251 : f32 to vector<16x64xf32>
    %290 = arith.addf %289, %288 : vector<16x64xf32>
    %291 = arith.mulf %280, %290 : vector<16x64xf32>
    %292 = arith.truncf %291 : vector<16x64xf32> to vector<16x64xbf16>
    %c5_252 = arith.constant 5 : index
    %c0_253 = arith.constant 0 : index
    %293 = vector.load %arg9[%c5_252, %c0_253] : memref<26x64xbf16, #tpu.memory_space<vmem>>, vector<16x64xbf16>
    tpu.vector_store %arg9[%c5_252, %c0_253], %292 {strides = array<i32>} : memref<26x64xbf16, #tpu.memory_space<vmem>>, vector<16x64xbf16>,
    %cst_254 = arith.constant 0.000000e+00 : f32
    %294 = vector.broadcast %cst_254 : f32 to vector<16x32xf32>
    %c0_255 = arith.constant 0 : index
    %c0_256 = arith.constant 0 : index
    %295 = vector.load %arg9[%c0_255, %c0_256] : memref<26x64xbf16, #tpu.memory_space<vmem>>, vector<16x64xbf16>
    %c0_i32_257 = arith.constant 0 : i32
    %296 = arith.sitofp %c0_i32_257 : i32 to bf16
    %297 = vector.broadcast %296 : bf16 to vector<16x64xbf16>
    %298 = arith.select %39, %295, %297 : vector<16x64xi1>, vector<16x64xbf16>
    %c1_258 = arith.constant 1 : index
    %c0_259 = arith.constant 0 : index
    %c0_260 = arith.constant 0 : index
    %c0_261 = arith.constant 0 : index
    %299 = vector.load %arg5[%c1_258, %c0_259, %c0_260, %c0_261] : memref<2x9x64x32xbf16, #tpu.memory_space<vmem>>, vector<1x1x64x32xbf16>
    %300 = vector.shape_cast %299 : vector<1x1x64x32xbf16> to vector<64x32xbf16>
    %cst_262 = arith.constant dense<0.000000e+00> : vector<16x32xf32>
    %301 = tpu.matmul %298, %300, %cst_262 {dimension_numbers = #tpu.dot_dimension_numbers<[1], [0], [0], [1], [0, 0, 1, 1], [], []>} : vector<16x64xbf16>, vector<64x32xbf16>, vector<16x32xf32> -> vector<16x32xf32>
    %302 = arith.addf %294, %301 : vector<16x32xf32>
    %c1_263 = arith.constant 1 : index
    %c0_264 = arith.constant 0 : index
    %303 = vector.load %arg9[%c1_263, %c0_264] : memref<26x64xbf16, #tpu.memory_space<vmem>>, vector<16x64xbf16>
    %c1_265 = arith.constant 1 : index
    %c1_266 = arith.constant 1 : index
    %c0_267 = arith.constant 0 : index
    %c0_268 = arith.constant 0 : index
    %304 = vector.load %arg5[%c1_265, %c1_266, %c0_267, %c0_268] : memref<2x9x64x32xbf16, #tpu.memory_space<vmem>>, vector<1x1x64x32xbf16>
    %305 = vector.shape_cast %304 : vector<1x1x64x32xbf16> to vector<64x32xbf16>
    %cst_269 = arith.constant dense<0.000000e+00> : vector<16x32xf32>
    %306 = tpu.matmul %303, %305, %cst_269 {dimension_numbers = #tpu.dot_dimension_numbers<[1], [0], [0], [1], [0, 0, 1, 1], [], []>} : vector<16x64xbf16>, vector<64x32xbf16>, vector<16x32xf32> -> vector<16x32xf32>
    %307 = arith.addf %302, %306 : vector<16x32xf32>
    %c2_270 = arith.constant 2 : index
    %c0_271 = arith.constant 0 : index
    %308 = vector.load %arg9[%c2_270, %c0_271] : memref<26x64xbf16, #tpu.memory_space<vmem>>, vector<16x64xbf16>
    %c0_i32_272 = arith.constant 0 : i32
    %309 = arith.sitofp %c0_i32_272 : i32 to bf16
    %310 = vector.broadcast %309 : bf16 to vector<16x64xbf16>
    %311 = arith.select %41, %308, %310 : vector<16x64xi1>, vector<16x64xbf16>
    %c1_273 = arith.constant 1 : index
    %c2_274 = arith.constant 2 : index
    %c0_275 = arith.constant 0 : index
    %c0_276 = arith.constant 0 : index
    %312 = vector.load %arg5[%c1_273, %c2_274, %c0_275, %c0_276] : memref<2x9x64x32xbf16, #tpu.memory_space<vmem>>, vector<1x1x64x32xbf16>
    %313 = vector.shape_cast %312 : vector<1x1x64x32xbf16> to vector<64x32xbf16>
    %cst_277 = arith.constant dense<0.000000e+00> : vector<16x32xf32>
    %314 = tpu.matmul %311, %313, %cst_277 {dimension_numbers = #tpu.dot_dimension_numbers<[1], [0], [0], [1], [0, 0, 1, 1], [], []>} : vector<16x64xbf16>, vector<64x32xbf16>, vector<16x32xf32> -> vector<16x32xf32>
    %315 = arith.addf %307, %314 : vector<16x32xf32>
    %c4_278 = arith.constant 4 : index
    %c0_279 = arith.constant 0 : index
    %316 = vector.load %arg9[%c4_278, %c0_279] : memref<26x64xbf16, #tpu.memory_space<vmem>>, vector<16x64xbf16>
    %c0_i32_280 = arith.constant 0 : i32
    %317 = arith.sitofp %c0_i32_280 : i32 to bf16
    %318 = vector.broadcast %317 : bf16 to vector<16x64xbf16>
    %319 = arith.select %39, %316, %318 : vector<16x64xi1>, vector<16x64xbf16>
    %c1_281 = arith.constant 1 : index
    %c3_282 = arith.constant 3 : index
    %c0_283 = arith.constant 0 : index
    %c0_284 = arith.constant 0 : index
    %320 = vector.load %arg5[%c1_281, %c3_282, %c0_283, %c0_284] : memref<2x9x64x32xbf16, #tpu.memory_space<vmem>>, vector<1x1x64x32xbf16>
    %321 = vector.shape_cast %320 : vector<1x1x64x32xbf16> to vector<64x32xbf16>
    %cst_285 = arith.constant dense<0.000000e+00> : vector<16x32xf32>
    %322 = tpu.matmul %319, %321, %cst_285 {dimension_numbers = #tpu.dot_dimension_numbers<[1], [0], [0], [1], [0, 0, 1, 1], [], []>} : vector<16x64xbf16>, vector<64x32xbf16>, vector<16x32xf32> -> vector<16x32xf32>
    %323 = arith.addf %315, %322 : vector<16x32xf32>
    %c5_286 = arith.constant 5 : index
    %c0_287 = arith.constant 0 : index
    %324 = vector.load %arg9[%c5_286, %c0_287] : memref<26x64xbf16, #tpu.memory_space<vmem>>, vector<16x64xbf16>
    %c1_288 = arith.constant 1 : index
    %c4_289 = arith.constant 4 : index
    %c0_290 = arith.constant 0 : index
    %c0_291 = arith.constant 0 : index
    %325 = vector.load %arg5[%c1_288, %c4_289, %c0_290, %c0_291] : memref<2x9x64x32xbf16, #tpu.memory_space<vmem>>, vector<1x1x64x32xbf16>
    %326 = vector.shape_cast %325 : vector<1x1x64x32xbf16> to vector<64x32xbf16>
    %cst_292 = arith.constant dense<0.000000e+00> : vector<16x32xf32>
    %327 = tpu.matmul %324, %326, %cst_292 {dimension_numbers = #tpu.dot_dimension_numbers<[1], [0], [0], [1], [0, 0, 1, 1], [], []>} : vector<16x64xbf16>, vector<64x32xbf16>, vector<16x32xf32> -> vector<16x32xf32>
    %328 = arith.addf %323, %327 : vector<16x32xf32>
    %c6_293 = arith.constant 6 : index
    %c0_294 = arith.constant 0 : index
    %329 = vector.load %arg9[%c6_293, %c0_294] : memref<26x64xbf16, #tpu.memory_space<vmem>>, vector<16x64xbf16>
    %c0_i32_295 = arith.constant 0 : i32
    %330 = arith.sitofp %c0_i32_295 : i32 to bf16
    %331 = vector.broadcast %330 : bf16 to vector<16x64xbf16>
    %332 = arith.select %41, %329, %331 : vector<16x64xi1>, vector<16x64xbf16>
    %c1_296 = arith.constant 1 : index
    %c5_297 = arith.constant 5 : index
    %c0_298 = arith.constant 0 : index
    %c0_299 = arith.constant 0 : index
    %333 = vector.load %arg5[%c1_296, %c5_297, %c0_298, %c0_299] : memref<2x9x64x32xbf16, #tpu.memory_space<vmem>>, vector<1x1x64x32xbf16>
    %334 = vector.shape_cast %333 : vector<1x1x64x32xbf16> to vector<64x32xbf16>
    %cst_300 = arith.constant dense<0.000000e+00> : vector<16x32xf32>
    %335 = tpu.matmul %332, %334, %cst_300 {dimension_numbers = #tpu.dot_dimension_numbers<[1], [0], [0], [1], [0, 0, 1, 1], [], []>} : vector<16x64xbf16>, vector<64x32xbf16>, vector<16x32xf32> -> vector<16x32xf32>
    %336 = arith.addf %328, %335 : vector<16x32xf32>
    %c8_301 = arith.constant 8 : index
    %c0_302 = arith.constant 0 : index
    %337 = vector.load %arg9[%c8_301, %c0_302] : memref<26x64xbf16, #tpu.memory_space<vmem>>, vector<16x64xbf16>
    %c0_i32_303 = arith.constant 0 : i32
    %338 = arith.sitofp %c0_i32_303 : i32 to bf16
    %339 = vector.broadcast %338 : bf16 to vector<16x64xbf16>
    %340 = arith.select %39, %337, %339 : vector<16x64xi1>, vector<16x64xbf16>
    %c1_304 = arith.constant 1 : index
    %c6_305 = arith.constant 6 : index
    %c0_306 = arith.constant 0 : index
    %c0_307 = arith.constant 0 : index
    %341 = vector.load %arg5[%c1_304, %c6_305, %c0_306, %c0_307] : memref<2x9x64x32xbf16, #tpu.memory_space<vmem>>, vector<1x1x64x32xbf16>
    %342 = vector.shape_cast %341 : vector<1x1x64x32xbf16> to vector<64x32xbf16>
    %cst_308 = arith.constant dense<0.000000e+00> : vector<16x32xf32>
    %343 = tpu.matmul %340, %342, %cst_308 {dimension_numbers = #tpu.dot_dimension_numbers<[1], [0], [0], [1], [0, 0, 1, 1], [], []>} : vector<16x64xbf16>, vector<64x32xbf16>, vector<16x32xf32> -> vector<16x32xf32>
    %344 = arith.addf %336, %343 : vector<16x32xf32>
    %c9_309 = arith.constant 9 : index
    %c0_310 = arith.constant 0 : index
    %345 = vector.load %arg9[%c9_309, %c0_310] : memref<26x64xbf16, #tpu.memory_space<vmem>>, vector<16x64xbf16>
    %c1_311 = arith.constant 1 : index
    %c7_312 = arith.constant 7 : index
    %c0_313 = arith.constant 0 : index
    %c0_314 = arith.constant 0 : index
    %346 = vector.load %arg5[%c1_311, %c7_312, %c0_313, %c0_314] : memref<2x9x64x32xbf16, #tpu.memory_space<vmem>>, vector<1x1x64x32xbf16>
    %347 = vector.shape_cast %346 : vector<1x1x64x32xbf16> to vector<64x32xbf16>
    %cst_315 = arith.constant dense<0.000000e+00> : vector<16x32xf32>
    %348 = tpu.matmul %345, %347, %cst_315 {dimension_numbers = #tpu.dot_dimension_numbers<[1], [0], [0], [1], [0, 0, 1, 1], [], []>} : vector<16x64xbf16>, vector<64x32xbf16>, vector<16x32xf32> -> vector<16x32xf32>
    %349 = arith.addf %344, %348 : vector<16x32xf32>
    %c10_316 = arith.constant 10 : index
    %c0_317 = arith.constant 0 : index
    %350 = vector.load %arg9[%c10_316, %c0_317] : memref<26x64xbf16, #tpu.memory_space<vmem>>, vector<16x64xbf16>
    %c0_i32_318 = arith.constant 0 : i32
    %351 = arith.sitofp %c0_i32_318 : i32 to bf16
    %352 = vector.broadcast %351 : bf16 to vector<16x64xbf16>
    %353 = arith.select %41, %350, %352 : vector<16x64xi1>, vector<16x64xbf16>
    %c1_319 = arith.constant 1 : index
    %c8_320 = arith.constant 8 : index
    %c0_321 = arith.constant 0 : index
    %c0_322 = arith.constant 0 : index
    %354 = vector.load %arg5[%c1_319, %c8_320, %c0_321, %c0_322] : memref<2x9x64x32xbf16, #tpu.memory_space<vmem>>, vector<1x1x64x32xbf16>
    %355 = vector.shape_cast %354 : vector<1x1x64x32xbf16> to vector<64x32xbf16>
    %cst_323 = arith.constant dense<0.000000e+00> : vector<16x32xf32>
    %356 = tpu.matmul %353, %355, %cst_323 {dimension_numbers = #tpu.dot_dimension_numbers<[1], [0], [0], [1], [0, 0, 1, 1], [], []>} : vector<16x64xbf16>, vector<64x32xbf16>, vector<16x32xf32> -> vector<16x32xf32>
    %357 = arith.addf %349, %356 : vector<16x32xf32>
    %c1_324 = arith.constant 1 : index
    %c0_325 = arith.constant 0 : index
    %c0_326 = arith.constant 0 : index
    %358 = vector.load %arg6[%c1_324, %c0_325, %c0_326] : memref<2x1x32xf32, #tpu.memory_space<vmem>>, vector<1x1x32xf32>
    %359 = vector.shape_cast %358 : vector<1x1x32xf32> to vector<1x32xf32>
    %360 = vector.broadcast %359 : vector<1x32xf32> to vector<16x32xf32>
    %361 = arith.addf %357, %360 : vector<16x32xf32>
    %362 = arith.truncf %361 : vector<16x32xf32> to vector<16x32xbf16>
    %c0_327 = arith.constant 0 : index
    %c0_328 = arith.constant 0 : index
    %c32_329 = arith.constant 32 : index
    %363 = vector.load %arg7[%c0_327, %c0_328, %c32_329] : memref<1x16x64xbf16, #tpu.memory_space<vmem>>, vector<1x16x32xbf16>
    %364 = vector.shape_cast %363 : vector<1x16x32xbf16> to vector<16x32xbf16>
    %365 = vector.shape_cast %362 : vector<16x32xbf16> to vector<1x16x32xbf16>
    tpu.vector_store %arg7[%c0_327, %c0_328, %c32_329], %365 {strides = array<i32>} : memref<1x16x64xbf16, #tpu.memory_space<vmem>>, vector<1x16x32xbf16>,
    return
  }
  func.func @transform_0(%arg0: i32, %arg1: i32) -> (i32, i32, i32) {
    %c0_i32 = arith.constant 0 : i32
    %c0_i32_0 = arith.constant 0 : i32
    return %arg0, %c0_i32, %arg1 : i32, i32, i32
  }
  func.func @transform_1(%arg0: i32, %arg1: i32) -> (i32, i32, i32, i32) {
    %c0_i32 = arith.constant 0 : i32
    %c0_i32_0 = arith.constant 0 : i32
    %c0_i32_1 = arith.constant 0 : i32
    %c0_i32_2 = arith.constant 0 : i32
    return %arg1, %c0_i32, %c0_i32_0, %c0_i32_1 : i32, i32, i32, i32
  }
  func.func @transform_2(%arg0: i32, %arg1: i32) -> (i32, i32, i32) {
    %c0_i32 = arith.constant 0 : i32
    %c0_i32_0 = arith.constant 0 : i32
    %c0_i32_1 = arith.constant 0 : i32
    return %arg1, %c0_i32, %c0_i32_0 : i32, i32, i32
  }
  func.func @transform_3(%arg0: i32, %arg1: i32) -> (i32, i32, i32, i32) {
    %c0_i32 = arith.constant 0 : i32
    %c0_i32_0 = arith.constant 0 : i32
    %c0_i32_1 = arith.constant 0 : i32
    %c0_i32_2 = arith.constant 0 : i32
    return %arg1, %c0_i32, %c0_i32_0, %c0_i32_1 : i32, i32, i32, i32
  }
  func.func @transform_4(%arg0: i32, %arg1: i32) -> (i32, i32, i32) {
    %c0_i32 = arith.constant 0 : i32
    %c0_i32_0 = arith.constant 0 : i32
    %c0_i32_1 = arith.constant 0 : i32
    return %arg1, %c0_i32, %c0_i32_0 : i32, i32, i32
  }
  func.func @transform_5(%arg0: i32, %arg1: i32) -> (i32, i32, i32) {
    %c0_i32 = arith.constant 0 : i32
    %c0_i32_0 = arith.constant 0 : i32
    return %arg0, %c0_i32, %arg1 : i32, i32, i32
  }
}

module attributes {stable_mosaic.version = 11 : i64} {
  func.func @_gelu_skip_matmul_addcmul_kernel(%arg0: i32, %arg1: i32, %arg2: i32, %arg3: memref<32x64xbf16, #tpu.memory_space<vmem>>, %arg4: memref<32x64xbf16, #tpu.memory_space<vmem>>, %arg5: memref<64x32xbf16, #tpu.memory_space<vmem>>, %arg6: memref<1x32xf32, #tpu.memory_space<vmem>>, %arg7: memref<32x32xf32, #tpu.memory_space<vmem>>, %arg8: memref<1x32xf32, #tpu.memory_space<vmem>>, %arg9: memref<1x32xf32, #tpu.memory_space<vmem>>, %arg10: memref<32x32xf32, #tpu.memory_space<vmem>>, %arg11: memref<32x32xf32, #tpu.memory_space<vmem>>) attributes {dimension_semantics = [#tpu.dimension_semantics<parallel>, #tpu.dimension_semantics<parallel>, #tpu.dimension_semantics<arbitrary>], iteration_bounds = array<i64: 1, 1, 1>, scalar_prefetch = 0 : i64, scratch_operands = 1 : i64, tpu.core_type = #tpu.core_type<tc>, window_params = [{transform_indices = @transform_0, window_bounds = array<i64: 32, 64>}, {transform_indices = @transform_1, window_bounds = array<i64: 32, 64>}, {transform_indices = @transform_2, window_bounds = array<i64: 64, 32>}, {transform_indices = @transform_3, window_bounds = array<i64: 1, 32>}, {transform_indices = @transform_4, window_bounds = array<i64: 32, 32>}, {transform_indices = @transform_5, window_bounds = array<i64: 1, 32>}, {transform_indices = @transform_6, window_bounds = array<i64: 1, 32>}, {transform_indices = @transform_7, window_bounds = array<i64: 32, 32>}]} {
    %c0_i32 = arith.constant 0 : i32
    %0 = arith.cmpi eq, %arg2, %c0_i32 : i32
    %1 = arith.extui %0 : i1 to i32
    %c0_i32_0 = arith.constant 0 : i32
    %2 = arith.cmpi ne, %1, %c0_i32_0 : i32
    scf.if %2 {
      %cst_16 = arith.constant 0.000000e+00 : f32
      %30 = vector.broadcast %cst_16 : f32 to vector<32x32xf32>
      %c0_17 = arith.constant 0 : index
      %c0_18 = arith.constant 0 : index
      %31 = vector.load %arg11[%c0_17, %c0_18] : memref<32x32xf32, #tpu.memory_space<vmem>>, vector<32x32xf32>
      tpu.vector_store %arg11[%c0_17, %c0_18], %30 {strides = array<i32>} : memref<32x32xf32, #tpu.memory_space<vmem>>, vector<32x32xf32>,
    } else {
    }
    %c0 = arith.constant 0 : index
    %c0_1 = arith.constant 0 : index
    %3 = vector.load %arg3[%c0, %c0_1] : memref<32x64xbf16, #tpu.memory_space<vmem>>, vector<32x64xbf16>
    %4 = arith.extf %3 : vector<32x64xbf16> to vector<32x64xf32>
    %c0_2 = arith.constant 0 : index
    %c0_3 = arith.constant 0 : index
    %5 = vector.load %arg4[%c0_2, %c0_3] : memref<32x64xbf16, #tpu.memory_space<vmem>>, vector<32x64xbf16>
    %6 = arith.extf %5 : vector<32x64xbf16> to vector<32x64xf32>
    %7 = arith.addf %4, %6 : vector<32x64xf32>
    %cst = arith.constant 5.000000e-01 : f32
    %8 = vector.broadcast %cst : f32 to vector<32x64xf32>
    %9 = arith.mulf %8, %7 : vector<32x64xf32>
    %cst_4 = arith.constant 4.471500e-02 : f32
    %10 = vector.broadcast %cst_4 : f32 to vector<32x64xf32>
    %11 = arith.mulf %10, %7 : vector<32x64xf32>
    %12 = arith.mulf %11, %7 : vector<32x64xf32>
    %13 = arith.mulf %12, %7 : vector<32x64xf32>
    %14 = arith.addf %7, %13 : vector<32x64xf32>
    %cst_5 = arith.constant 0.797884583 : f32
    %15 = vector.broadcast %cst_5 : f32 to vector<32x64xf32>
    %16 = arith.mulf %15, %14 : vector<32x64xf32>
    %17 = math.tanh %16 : vector<32x64xf32>
    %cst_6 = arith.constant 1.000000e+00 : f32
    %18 = vector.broadcast %cst_6 : f32 to vector<32x64xf32>
    %19 = arith.addf %18, %17 : vector<32x64xf32>
    %20 = arith.mulf %9, %19 : vector<32x64xf32>
    %21 = arith.truncf %20 : vector<32x64xf32> to vector<32x64xbf16>
    %c0_7 = arith.constant 0 : index
    %c0_8 = arith.constant 0 : index
    %22 = vector.load %arg11[%c0_7, %c0_8] : memref<32x32xf32, #tpu.memory_space<vmem>>, vector<32x32xf32>
    %c0_9 = arith.constant 0 : index
    %c0_10 = arith.constant 0 : index
    %23 = vector.load %arg5[%c0_9, %c0_10] : memref<64x32xbf16, #tpu.memory_space<vmem>>, vector<64x32xbf16>
    %cst_11 = arith.constant dense<0.000000e+00> : vector<32x32xf32>
    %24 = tpu.matmul %21, %23, %cst_11 {dimension_numbers = #tpu.dot_dimension_numbers<[1], [0], [0], [1], [0, 0, 1, 1], [], []>} : vector<32x64xbf16>, vector<64x32xbf16>, vector<32x32xf32> -> vector<32x32xf32>
    %25 = arith.addf %22, %24 : vector<32x32xf32>
    %c0_12 = arith.constant 0 : index
    %c0_13 = arith.constant 0 : index
    %26 = vector.load %arg11[%c0_12, %c0_13] : memref<32x32xf32, #tpu.memory_space<vmem>>, vector<32x32xf32>
    tpu.vector_store %arg11[%c0_12, %c0_13], %25 {strides = array<i32>} : memref<32x32xf32, #tpu.memory_space<vmem>>, vector<32x32xf32>,
    %c0_i32_14 = arith.constant 0 : i32
    %27 = arith.cmpi eq, %arg2, %c0_i32_14 : i32
    %28 = arith.extui %27 : i1 to i32
    %c0_i32_15 = arith.constant 0 : i32
    %29 = arith.cmpi ne, %28, %c0_i32_15 : i32
    scf.if %29 {
      %c0_16 = arith.constant 0 : index
      %c0_17 = arith.constant 0 : index
      %30 = vector.load %arg11[%c0_16, %c0_17] : memref<32x32xf32, #tpu.memory_space<vmem>>, vector<32x32xf32>
      %c0_18 = arith.constant 0 : index
      %c0_19 = arith.constant 0 : index
      %31 = vector.load %arg6[%c0_18, %c0_19] : memref<1x32xf32, #tpu.memory_space<vmem>>, vector<1x32xf32>
      %32 = vector.broadcast %31 : vector<1x32xf32> to vector<32x32xf32>
      %33 = arith.addf %30, %32 : vector<32x32xf32>
      %c0_20 = arith.constant 0 : index
      %c0_21 = arith.constant 0 : index
      %34 = vector.load %arg7[%c0_20, %c0_21] : memref<32x32xf32, #tpu.memory_space<vmem>>, vector<32x32xf32>
      %c0_22 = arith.constant 0 : index
      %c0_23 = arith.constant 0 : index
      %35 = vector.load %arg9[%c0_22, %c0_23] : memref<1x32xf32, #tpu.memory_space<vmem>>, vector<1x32xf32>
      %36 = vector.broadcast %35 : vector<1x32xf32> to vector<32x32xf32>
      %37 = arith.addf %34, %36 : vector<32x32xf32>
      %c0_24 = arith.constant 0 : index
      %c0_25 = arith.constant 0 : index
      %38 = vector.load %arg8[%c0_24, %c0_25] : memref<1x32xf32, #tpu.memory_space<vmem>>, vector<1x32xf32>
      %39 = vector.broadcast %38 : vector<1x32xf32> to vector<32x32xf32>
      %40 = arith.mulf %33, %39 : vector<32x32xf32>
      %41 = arith.addf %37, %40 : vector<32x32xf32>
      %c0_26 = arith.constant 0 : index
      %c0_27 = arith.constant 0 : index
      %42 = vector.load %arg10[%c0_26, %c0_27] : memref<32x32xf32, #tpu.memory_space<vmem>>, vector<32x32xf32>
      tpu.vector_store %arg10[%c0_26, %c0_27], %41 {strides = array<i32>} : memref<32x32xf32, #tpu.memory_space<vmem>>, vector<32x32xf32>,
    } else {
    }
    return
  }
  func.func @transform_0(%arg0: i32, %arg1: i32, %arg2: i32) -> (i32, i32) {
    %c0_i32 = arith.constant 0 : i32
    return %arg0, %arg2 : i32, i32
  }
  func.func @transform_1(%arg0: i32, %arg1: i32, %arg2: i32) -> (i32, i32) {
    %c0_i32 = arith.constant 0 : i32
    return %arg0, %arg2 : i32, i32
  }
  func.func @transform_2(%arg0: i32, %arg1: i32, %arg2: i32) -> (i32, i32) {
    %c0_i32 = arith.constant 0 : i32
    return %arg2, %arg1 : i32, i32
  }
  func.func @transform_3(%arg0: i32, %arg1: i32, %arg2: i32) -> (i32, i32) {
    %c0_i32 = arith.constant 0 : i32
    %c0_i32_0 = arith.constant 0 : i32
    return %c0_i32, %arg1 : i32, i32
  }
  func.func @transform_4(%arg0: i32, %arg1: i32, %arg2: i32) -> (i32, i32) {
    %c0_i32 = arith.constant 0 : i32
    return %arg0, %arg1 : i32, i32
  }
  func.func @transform_5(%arg0: i32, %arg1: i32, %arg2: i32) -> (i32, i32) {
    %c0_i32 = arith.constant 0 : i32
    %c0_i32_0 = arith.constant 0 : i32
    return %c0_i32, %arg1 : i32, i32
  }
  func.func @transform_6(%arg0: i32, %arg1: i32, %arg2: i32) -> (i32, i32) {
    %c0_i32 = arith.constant 0 : i32
    %c0_i32_0 = arith.constant 0 : i32
    return %c0_i32, %arg1 : i32, i32
  }
  func.func @transform_7(%arg0: i32, %arg1: i32, %arg2: i32) -> (i32, i32) {
    %c0_i32 = arith.constant 0 : i32
    return %arg0, %arg1 : i32, i32
  }
}

</mosaic_0001>

<bundles_post_ra>
// kernel: raiflow_single_block.6
= control target key start
LH: loop header
LB: loop body
LE: loop exit
PB: predicated region body
PF: predicated region fallthrough
CT: control target
= control target key end

     0   :  { %s1662_s0 = inlined_call_operand.hbm [shape: f32[3], index: 0, kind: input, shape index: {}]   ;;  %s1663_s1 = inlined_call_operand.hbm [shape: f32[32,32], index: 1, kind: input, shape index: {}]   ;;  %s1664_s2 = inlined_call_operand.hbm [shape: f32[1,32], index: 2, kind: input, shape index: {}]   ;;  %s1665_s3 = inlined_call_operand.hbm [shape: f32[1,32], index: 3, kind: input, shape index: {}]   ;;  %s1666_s4 = inlined_call_operand.hbm [shape: bf16[32,32], index: 4, kind: input, shape index: {}]   ;;  %s1667_s5 = inlined_call_operand.hbm [shape: bf16[32,32], index: 5, kind: input, shape index: {}]   ;;  %s1668_s6 = inlined_call_operand.hbm [shape: bf16[32,32], index: 6, kind: input, shape index: {}]   ;;  %s1669_s7 = inlined_call_operand.hbm [shape: f32[1,32], index: 7, kind: input, shape index: {}]   ;;  %s1670_s8 = inlined_call_operand.hbm [shape: f32[1,32], index: 8, kind: input, shape index: {}]   ;;  %s1671_s9 = inlined_call_operand.hbm [shape: f32[1,32], index: 9, kind: input, shape index: {}]   ;;  %s1672_s10 = inlined_call_operand.hbm [shape: f32[1,32], index: 10, kind: input, shape index: {}]   ;;  %s1673_s11 = inlined_call_operand.hbm [shape: f32[1,32], index: 11, kind: input, shape index: {}]   ;;  %s1674_s12 = inlined_call_operand.hbm [shape: f32[1,32], index: 12, kind: input, shape index: {}]   ;;  %s1675_s13 = inlined_call_operand.hbm [shape: f32[1,32], index: 13, kind: input, shape index: {}]   ;;  %s1676_s14 = inlined_call_operand.hbm [shape: bf16[32,32], index: 14, kind: output, shape index: {0}]   ;;  %s1677_s15 = inlined_call_operand.hbm [shape: bf16[32,32], index: 15, kind: output, shape index: {1}]   ;;  %s1678_s16 = inlined_call_operand.hbm [shape: bf16[32,32], index: 16, kind: output, shape index: {2}]  }
   0x1   :  { %1680 = sst [smem:[#allocation42_spill]] %s1662_s0 }
   0x2   :  { %22 = vsyncpa [#allocation8], 0 }
   0x3   :  { %23 = vsyncpa [#allocation6], 0 }
   0x4   :  { %24 = vsyncpa [#allocation11], 0 }
   0x5   :  { %25 = vsyncpa [#allocation14], 0 }
   0x6   :  { %26 = vsyncpa [#allocation17], 0 }
   0x7   :  { %27 = vsyncpa [#allocation20], 0 }
   0x8   :  { %28 = vsyncpa [#allocation23], 0 }
   0x9   :  { %29 = vsyncpa [#allocation26], 0 }
   0xa   :  { %30 = vsyncpa [#allocation7], 0 }
   0xb   :  { %31 = vsyncpa [#allocation30], 0  ;;  %s1260_s21 = smov [#allocation10]   ;;  %s1261_s23 = smov [#allocation13]  }
   0xc   :  { %s58_s22 = sshll.u32 %s1260_s21, 4  ;;  %s77_s24 = sshll.u32 %s1261_s23, 4  ;;  %s59_s22 = int_to_ptr.vmem [resolvable:$true] %s58_s22  ;;  %s1367_s24 = int_to_ptr.vmem [resolvable:$true] %s77_s24 }
   0xd   :  { %s878_s27 = scalar_lea.hbm %s1664_s2, 16 }
   0xe   :  { %p879_p0 = scmp.ne.s32.totalorder %s1664_s2, %s878_s27  ;;  %p882_p1 = scmp.lt.u32.totalorder %s878_s27, %s1664_s2 }
  0x10   :  { %p884_p2 = pnand %p882_p1, %p879_p0 }
  0x12   :  { %887 = shalt.err (!%p884_p2)
}
  0x13   :  { %s888_s17 = scalar_lea.vmem %s59_s22, 16  ;;  %s892_s18 = scalar_lea.vmem %s59_s22, 32 }
  0x14   :  { %p889_p3 = scmp.ne.s32.totalorder %s59_s22, %s888_s17  ;;  %p893_p4 = scmp.lt.s32.totalorder %s59_s22, %s59_s22 }
  0x15   :  { %p894_p5 = scmp.lt.s32.totalorder %s892_s18, %s888_s17 }
  0x17   :  { %p895_p6 = por %p894_p5, %p893_p4 }
  0x19   :  { %p896_p7 = pnand %p895_p6, %p889_p3 }
  0x1b   :  { %899 = shalt.err (!%p896_p7)
}
  0x1c   :  { %61 = dma.hbm_to_vmem [thread:$0]  %s1664_s2, 16, %s59_s22, [#allocation11]  }
  0x1d   :  { %s900_s25 = scalar_lea.hbm %s1666_s4, 256 }
  0x1e   :  { %p901_p8 = scmp.ne.s32.totalorder %s1666_s4, %s900_s25  ;;  %p904_p9 = scmp.lt.u32.totalorder %s900_s25, %s1666_s4 }
  0x20   :  { %p906_p10 = pnand %p904_p9, %p901_p8 }
  0x22   :  { %909 = shalt.err (!%p906_p10)
}
  0x23   :  { %s910_s30 = scalar_lea.vmem %s1367_s24, 256  ;;  %p915_p12 = scmp.lt.s32.totalorder %s1367_s24, %s1367_s24 }
  0x24   :  { %p911_p11 = scmp.ne.s32.totalorder %s1367_s24, %s910_s30  ;;  %p916_p13 = scmp.lt.s32.totalorder %s910_s30, %s910_s30 }
  0x26   :  { %p917_p0 = por %p916_p13, %p915_p12 }
  0x28   :  { %p918_p1 = pnand %p917_p0, %p911_p11 }
  0x2a   :  { %921 = shalt.err (!%p918_p1)
}
  0x2b   :  { %s1262_s2 = smov 64   ;;  %s1263_s22 = smov 4  }
  0x2c   :  { %83 = dma.hbm_to_vmem [thread:$0]  %s1666_s4, 256, %s1367_s24, [#allocation14], %s1262_s2, %s1262_s2, %s1263_s22  }
  0x2d   :  { %s1264_s18 = smov [#allocation16]   ;;  %s1265_s20 = smov [#allocation19]  }
  0x2e   :  { %s101_s19 = sshll.u32 %s1264_s18, 4  ;;  %s124_s21 = sshll.u32 %s1265_s20, 4  ;;  %s102_s19 = int_to_ptr.vmem [resolvable:$true] %s101_s19  ;;  %s125_s21 = int_to_ptr.vmem [resolvable:$true] %s124_s21 }
  0x2f   :  { %s922_s26 = scalar_lea.hbm %s1668_s6, 256 }
  0x30   :  { %p923_p2 = scmp.ne.s32.totalorder %s1668_s6, %s922_s26  ;;  %p926_p3 = scmp.lt.u32.totalorder %s922_s26, %s1668_s6 }
  0x32   :  { %p928_p4 = pnand %p926_p3, %p923_p2 }
  0x34   :  { %931 = shalt.err (!%p928_p4)
}
  0x35   :  { %s932_s4 = scalar_lea.vmem %s102_s19, 256  ;;  %p937_p6 = scmp.lt.s32.totalorder %s102_s19, %s102_s19 }
  0x36   :  { %p933_p5 = scmp.ne.s32.totalorder %s102_s19, %s932_s4  ;;  %p938_p7 = scmp.lt.s32.totalorder %s932_s4, %s932_s4 }
  0x38   :  { %p939_p8 = por %p938_p7, %p937_p6 }
  0x3a   :  { %p940_p9 = pnand %p939_p8, %p933_p5 }
  0x3c   :  { %943 = shalt.err (!%p940_p9)
}
  0x3d   :  { %107 = dma.hbm_to_vmem [thread:$0]  %s1668_s6, 256, %s102_s19, [#allocation17], %s1262_s2, %s1262_s2, %s1263_s22  }
  0x3e   :  { %s944_s20 = scalar_lea.hbm %s1670_s8, 16 }
  0x3f   :  { %p945_p10 = scmp.ne.s32.totalorder %s1670_s8, %s944_s20  ;;  %p948_p11 = scmp.lt.u32.totalorder %s944_s20, %s1670_s8 }
  0x41   :  { %p950_p12 = pnand %p948_p11, %p945_p10 }
  0x43   :  { %953 = shalt.err (!%p950_p12)
}
  0x44   :  { %s954_s28 = scalar_lea.vmem %s125_s21, 16  ;;  %s958_s29 = scalar_lea.vmem %s125_s21, 32 }
  0x45   :  { %p955_p13 = scmp.ne.s32.totalorder %s125_s21, %s954_s28  ;;  %p959_p0 = scmp.lt.s32.totalorder %s125_s21, %s125_s21 }
  0x46   :  { %p960_p1 = scmp.lt.s32.totalorder %s958_s29, %s954_s28 }
  0x48   :  { %p961_p2 = por %p960_p1, %p959_p0 }
  0x4a   :  { %p962_p3 = pnand %p961_p2, %p955_p13 }
  0x4c   :  { %965 = shalt.err (!%p962_p3)
}
  0x4d   :  { %127 = dma.hbm_to_vmem [thread:$0]  %s1670_s8, 16, %s125_s21, [#allocation20]  }
  0x4e   :  { %s1266_s30 = smov [#allocation22]   ;;  %s1267_s24 = smov [#allocation25]  }
  0x4f   :  { %s144_s4 = sshll.u32 %s1266_s30, 4  ;;  %s164_s0 = sshll.u32 %s1267_s24, 4  ;;  %s145_s4 = int_to_ptr.vmem [resolvable:$true] %s144_s4  ;;  %s165_s0 = int_to_ptr.vmem [resolvable:$true] %s164_s0 }
  0x50   :  { %s966_s20 = scalar_lea.hbm %s1672_s10, 16 }
  0x51   :  { %p967_p4 = scmp.ne.s32.totalorder %s1672_s10, %s966_s20  ;;  %p970_p5 = scmp.lt.u32.totalorder %s966_s20, %s1672_s10 }
  0x53   :  { %p972_p6 = pnand %p970_p5, %p967_p4 }
  0x55   :  { %975 = shalt.err (!%p972_p6)
}
  0x56   :  { %s976_s8 = scalar_lea.vmem %s145_s4, 16  ;;  %s980_s21 = scalar_lea.vmem %s145_s4, 32 }
  0x57   :  { %p977_p7 = scmp.ne.s32.totalorder %s145_s4, %s976_s8  ;;  %p981_p8 = scmp.lt.s32.totalorder %s145_s4, %s145_s4 }
  0x58   :  { %p982_p9 = scmp.lt.s32.totalorder %s980_s21, %s976_s8 }
  0x5a   :  { %p983_p10 = por %p982_p9, %p981_p8 }
  0x5c   :  { %p984_p11 = pnand %p983_p10, %p977_p7 }
  0x5e   :  { %987 = shalt.err (!%p984_p11)
}
  0x5f   :  { %147 = dma.hbm_to_vmem [thread:$0]  %s1672_s10, 16, %s145_s4, [#allocation23]  }
  0x60   :  { %s988_s30 = scalar_lea.hbm %s1674_s12, 16 }
  0x61   :  { %p989_p12 = scmp.ne.s32.totalorder %s1674_s12, %s988_s30  ;;  %p992_p13 = scmp.lt.u32.totalorder %s988_s30, %s1674_s12 }
  0x63   :  { %p994_p0 = pnand %p992_p13, %p989_p12 }
  0x65   :  { %997 = shalt.err (!%p994_p0)
}
  0x66   :  { %s998_s23 = scalar_lea.vmem %s165_s0, 16  ;;  %s1002_s25 = scalar_lea.vmem %s165_s0, 32 }
  0x67   :  { %p999_p1 = scmp.ne.s32.totalorder %s165_s0, %s998_s23  ;;  %p1003_p2 = scmp.lt.s32.totalorder %s165_s0, %s165_s0 }
  0x68   :  { %p1004_p3 = scmp.lt.s32.totalorder %s1002_s25, %s998_s23 }
  0x6a   :  { %p1005_p4 = por %p1004_p3, %p1003_p2 }
  0x6c   :  { %p1006_p5 = pnand %p1005_p4, %p999_p1 }
  0x6e   :  { %1009 = shalt.err (!%p1006_p5)
}
  0x6f   :  { %167 = dma.hbm_to_vmem [thread:$0]  %s1674_s12, 16, %s165_s0, [#allocation26]  }
  0x70   :  { %s1681_s8 = sld [smem:[#allocation42_spill]] }
  0x76   :  { %s1010_s21 = scalar_lea.hbm %s1681_s8, 16 }
  0x77   :  { %p1011_p6 = scmp.ne.s32.totalorder %s1681_s8, %s1010_s21  ;;  %p1014_p7 = scmp.lt.u32.totalorder %s1010_s21, %s1681_s8 }
  0x79   :  { %p1016_p8 = pnand %p1014_p7, %p1011_p6 }
  0x7b   :  { %1019 = shalt.err (!%p1016_p8)
}
  0x7c   :  { %s1268_s30 = smov [#allocation5]   ;;  %s1269_s12 = smov [#allocation9]  }
  0x7d   :  { %39 = dma.hbm_to_smem %s1681_s8, 16, %s1268_s30, [#allocation8]  }
  0x7e   :  { %s45_s0 = sshll.u32 %s1269_s12, 4  ;;  %s1020_s23 = scalar_lea.hbm %s1663_s1, 512  ;;  %s46_s0 = int_to_ptr.vmem [resolvable:$true] %s45_s0 }
  0x7f   :  { %p1021_p9 = scmp.ne.s32.totalorder %s1663_s1, %s1020_s23  ;;  %p1024_p10 = scmp.lt.u32.totalorder %s1020_s23, %s1663_s1 }
  0x81   :  { %p1026_p11 = pnand %p1024_p10, %p1021_p9 }
  0x83   :  { %1029 = shalt.err (!%p1026_p11)
}
  0x84   :  { %s1030_s27 = scalar_lea.vmem %s46_s0, 512  ;;  %p1035_p13 = scmp.lt.s32.totalorder %s46_s0, %s46_s0 }
  0x85   :  { %p1031_p12 = scmp.ne.s32.totalorder %s46_s0, %s1030_s27  ;;  %p1036_p0 = scmp.lt.s32.totalorder %s1030_s27, %s1030_s27 }
  0x87   :  { %p1037_p1 = por %p1036_p0, %p1035_p13 }
  0x89   :  { %p1038_p2 = pnand %p1037_p1, %p1031_p12 }
  0x8b   :  { %1041 = shalt.err (!%p1038_p2)
}
  0x8c   :  { %s1270_s8 = smov 128   ;;  %s1271_s21 = smov 8  }
  0x8d   :  { %51 = dma.hbm_to_vmem [thread:$0]  %s1663_s1, 512, %s46_s0, [#allocation6], %s1270_s8, %s1270_s8, %s1271_s21  }
  0x8e   :  { %s1272_s6 = smov [#allocation12]   ;;  %s1273_s30 = smov [#allocation15]  }
  0x8f   :  { %s68_s19 = sshll.u32 %s1272_s6, 4  ;;  %s89_s24 = sshll.u32 %s1273_s30, 4  ;;  %s69_s19 = int_to_ptr.vmem [resolvable:$true] %s68_s19  ;;  %s1476_s24 = int_to_ptr.vmem [resolvable:$true] %s89_s24 }
  0x90   :  { %s1042_s18 = scalar_lea.hbm %s1665_s3, 16 }
  0x91   :  { %p1043_p3 = scmp.ne.s32.totalorder %s1665_s3, %s1042_s18  ;;  %p1046_p4 = scmp.lt.u32.totalorder %s1042_s18, %s1665_s3 }
  0x93   :  { %p1048_p5 = pnand %p1046_p4, %p1043_p3 }
  0x95   :  { %1051 = shalt.err (!%p1048_p5)
}
  0x96   :  { %s1052_s1 = scalar_lea.vmem %s69_s19, 16  ;;  %s1056_s0 = scalar_lea.vmem %s69_s19, 32 }
  0x97   :  { %p1053_p6 = scmp.ne.s32.totalorder %s69_s19, %s1052_s1  ;;  %p1057_p7 = scmp.lt.s32.totalorder %s69_s19, %s69_s19 }
  0x98   :  { %p1058_p8 = scmp.lt.s32.totalorder %s1056_s0, %s1052_s1 }
  0x9a   :  { %p1059_p9 = por %p1058_p8, %p1057_p7 }
  0x9c   :  { %p1060_p10 = pnand %p1059_p9, %p1053_p6 }
  0x9e   :  { %1063 = shalt.err (!%p1060_p10)
}
  0x9f   :  { %71 = dma.hbm_to_vmem [thread:$0]  %s1665_s3, 16, %s69_s19, [#allocation11]  }
  0xa0   :  { %s1064_s21 = scalar_lea.hbm %s1667_s5, 256 }
  0xa1   :  { %p1065_p11 = scmp.ne.s32.totalorder %s1667_s5, %s1064_s21  ;;  %p1068_p12 = scmp.lt.u32.totalorder %s1064_s21, %s1667_s5 }
  0xa3   :  { %p1070_p13 = pnand %p1068_p12, %p1065_p11 }
  0xa5   :  { %1073 = shalt.err (!%p1070_p13)
}
  0xa6   :  { %s1074_s17 = scalar_lea.vmem %s1476_s24, 256  ;;  %p1079_p1 = scmp.lt.s32.totalorder %s1476_s24, %s1476_s24 }
  0xa7   :  { %p1075_p0 = scmp.ne.s32.totalorder %s1476_s24, %s1074_s17  ;;  %p1080_p2 = scmp.lt.s32.totalorder %s1074_s17, %s1074_s17 }
  0xa9   :  { %p1081_p3 = por %p1080_p2, %p1079_p1 }
  0xab   :  { %p1082_p4 = pnand %p1081_p3, %p1075_p0 }
  0xad   :  { %1085 = shalt.err (!%p1082_p4)
}
  0xae   :  { %95 = dma.hbm_to_vmem [thread:$0]  %s1667_s5, 256, %s1476_s24, [#allocation14], %s1262_s2, %s1262_s2, %s1263_s22  }
  0xaf   :  { %s1274_s12 = smov [#allocation18]   ;;  %s1275_s20 = smov [#allocation21]  }
  0xb0   :  { %s114_s18 = sshll.u32 %s1274_s12, 4  ;;  %s134_s23 = sshll.u32 %s1275_s20, 4  ;;  %s115_s18 = int_to_ptr.vmem [resolvable:$true] %s114_s18  ;;  %s135_s23 = int_to_ptr.vmem [resolvable:$true] %s134_s23 }
  0xb1   :  { %s1086_s1 = scalar_lea.hbm %s1669_s7, 16 }
  0xb2   :  { %p1087_p5 = scmp.ne.s32.totalorder %s1669_s7, %s1086_s1  ;;  %p1090_p6 = scmp.lt.u32.totalorder %s1086_s1, %s1669_s7 }
  0xb4   :  { %p1092_p7 = pnand %p1090_p6, %p1087_p5 }
  0xb6   :  { %1095 = shalt.err (!%p1092_p7)
}
  0xb7   :  { %s1096_s5 = scalar_lea.vmem %s115_s18, 16  ;;  %s1100_s24 = scalar_lea.vmem %s115_s18, 32 }
  0xb8   :  { %p1097_p8 = scmp.ne.s32.totalorder %s115_s18, %s1096_s5  ;;  %p1101_p9 = scmp.lt.s32.totalorder %s115_s18, %s115_s18 }
  0xb9   :  { %p1102_p10 = scmp.lt.s32.totalorder %s1100_s24, %s1096_s5 }
  0xbb   :  { %p1103_p11 = por %p1102_p10, %p1101_p9 }
  0xbd   :  { %p1104_p12 = pnand %p1103_p11, %p1097_p8 }
  0xbf   :  { %1107 = shalt.err (!%p1104_p12)
}
  0xc0   :  { %117 = dma.hbm_to_vmem [thread:$0]  %s1669_s7, 16, %s115_s18, [#allocation17]  }
  0xc1   :  { %s1108_s6 = scalar_lea.hbm %s1671_s9, 16 }
  0xc2   :  { %p1109_p13 = scmp.ne.s32.totalorder %s1671_s9, %s1108_s6  ;;  %p1112_p0 = scmp.lt.u32.totalorder %s1108_s6, %s1671_s9 }
  0xc4   :  { %p1114_p1 = pnand %p1112_p0, %p1109_p13 }
  0xc6   :  { %1117 = shalt.err (!%p1114_p1)
}
  0xc7   :  { %s1118_s12 = scalar_lea.vmem %s135_s23, 16  ;;  %s1122_s20 = scalar_lea.vmem %s135_s23, 32 }
  0xc8   :  { %p1119_p2 = scmp.ne.s32.totalorder %s135_s23, %s1118_s12  ;;  %p1123_p3 = scmp.lt.s32.totalorder %s135_s23, %s135_s23 }
  0xc9   :  { %p1124_p4 = scmp.lt.s32.totalorder %s1122_s20, %s1118_s12 }
  0xcb   :  { %p1125_p5 = por %p1124_p4, %p1123_p3 }
  0xcd   :  { %p1126_p6 = pnand %p1125_p5, %p1119_p2 }
  0xcf   :  { %1129 = shalt.err (!%p1126_p6)
}
  0xd0   :  { %137 = dma.hbm_to_vmem [thread:$0]  %s1671_s9, 16, %s135_s23, [#allocation20]  }
  0xd1   :  { %s1276_s25 = smov [#allocation24]   ;;  %s1277_s1 = smov [#allocation27]  }
  0xd2   :  { %s154_s10 = sshll.u32 %s1276_s25, 4  ;;  %s174_s0 = sshll.u32 %s1277_s1, 4  ;;  %s155_s10 = int_to_ptr.vmem [resolvable:$true] %s154_s10  ;;  %s175_s0 = int_to_ptr.vmem [resolvable:$true] %s174_s0 }
  0xd3   :  { %s1130_s27 = scalar_lea.hbm %s1673_s11, 16 }
  0xd4   :  { %p1131_p7 = scmp.ne.s32.totalorder %s1673_s11, %s1130_s27  ;;  %p1134_p8 = scmp.lt.u32.totalorder %s1130_s27, %s1673_s11 }
  0xd6   :  { %p1136_p9 = pnand %p1134_p8, %p1131_p7 }
  0xd8   :  { %1139 = shalt.err (!%p1136_p9)
}
  0xd9   :  { %s1140_s9 = scalar_lea.vmem %s155_s10, 16  ;;  %s1144_s23 = scalar_lea.vmem %s155_s10, 32 }
  0xda   :  { %p1141_p10 = scmp.ne.s32.totalorder %s155_s10, %s1140_s9  ;;  %p1145_p11 = scmp.lt.s32.totalorder %s155_s10, %s155_s10 }
  0xdb   :  { %p1146_p12 = scmp.lt.s32.totalorder %s1144_s23, %s1140_s9 }
  0xdd   :  { %p1147_p13 = por %p1146_p12, %p1145_p11 }
  0xdf   :  { %p1148_p0 = pnand %p1147_p13, %p1141_p10 }
  0xe1   :  { %1151 = shalt.err (!%p1148_p0)
}
  0xe2   :  { %157 = dma.hbm_to_vmem [thread:$0]  %s1673_s11, 16, %s155_s10, [#allocation23]  }
  0xe3   :  { %s1152_s17 = scalar_lea.hbm %s1675_s13, 16 }
  0xe4   :  { %p1153_p1 = scmp.ne.s32.totalorder %s1675_s13, %s1152_s17  ;;  %p1156_p2 = scmp.lt.u32.totalorder %s1152_s17, %s1675_s13 }
  0xe6   :  { %p1158_p3 = pnand %p1156_p2, %p1153_p1 }
  0xe8   :  { %1161 = shalt.err (!%p1158_p3)
}
  0xe9   :  { %s1162_s7 = scalar_lea.vmem %s175_s0, 16  ;;  %s1166_s18 = scalar_lea.vmem %s175_s0, 32 }
  0xea   :  { %p1163_p4 = scmp.ne.s32.totalorder %s175_s0, %s1162_s7  ;;  %p1167_p5 = scmp.lt.s32.totalorder %s175_s0, %s175_s0 }
  0xeb   :  { %p1168_p6 = scmp.lt.s32.totalorder %s1166_s18, %s1162_s7 }
  0xed   :  { %p1169_p7 = por %p1168_p6, %p1167_p5 }
  0xef   :  { %p1170_p8 = pnand %p1169_p7, %p1163_p4 }
  0xf1   :  { %1173 = shalt.err (!%p1170_p8)
}
  0xf2   :  { %177 = dma.hbm_to_vmem [thread:$0]  %s1675_s13, 16, %s175_s0, [#allocation26]  }
  0xf3   :  { %1240 = dma.done.wait [#allocation8], 16  }
  0xf4   :  { %1241 = vsyncadd [#allocation8], 4294967280 }
  0xf5   :  { %1242 = dma.done.wait [#allocation6], 512  }
  0xf6   :  { %1243 = vsyncadd [#allocation6], 4294966784 }
  0xf7   :  { %1244 = dma.done.wait [#allocation11], 32  }
  0xf8   :  { %1245 = vsyncadd [#allocation11], 4294967264 }
  0xf9   :  { %1246 = dma.done.wait [#allocation14], 512  }
  0xfa   :  { %1247 = vsyncadd [#allocation14], 4294966784 }
  0xfb   :  { %1248 = dma.done.wait [#allocation17], 272  }
  0xfc   :  { %1249 = vsyncadd [#allocation17], 4294967024 }
  0xfd   :  { %1250 = dma.done.wait [#allocation20], 32  }
  0xfe   :  { %1251 = vsyncadd [#allocation20], 4294967264 }
  0xff   :  { %1252 = dma.done.wait [#allocation23], 32  }
 0x100   :  { %1253 = vsyncadd [#allocation23], 4294967264 }
 0x101   :  { %1254 = dma.done.wait [#allocation26], 32  }
 0x102   :  { %1255 = vsyncadd [#allocation26], 4294967264 }
 0x103   :  { %220 = sfence }
 0x104   :  { %v848_v0 = vld [vmem:[#allocation13] sm:$0xff]   ;;  %vm226_vm0 = vcmask 261120   ;;  %v849_v1 = vld [vmem:[#allocation15] sm:$0xff]   ;;  %v850_v2 = vld [vmem:[#allocation13 + $0x8] sm:$0xff]   ;;  %v1278_v3 = vmov 0.0   ;;  %s239_s13 = sld [smem:[#allocation5]] }
 0x105   :  { %802 = vmatprep.subr.bf16.mxu0 %v848_v0  ;;  %229 = vst.msk [vmem:[#allocation2 + $0x10] sm:$0xff] %vm226_vm0, %v1278_v3  ;;  %227 = vst.msk [vmem:[#allocation2] sm:$0xff] %vm226_vm0, %v1278_v3  ;;  %810 = vmatprep.subr.bf16.mxu1 %v849_v1  ;;  %v851_v4 = vld [vmem:[#allocation15 + $0x8] sm:$0xff]   ;;  %v852_v5 = vld [vmem:[#allocation16] sm:$0xff]   ;;  %s758_s10 = sld [smem:[#allocation5 + $0x2]]  ;;  %s1580_s1 = sld [smem:[#allocation5 + $0x1]] }
 0x106   :  { %228 = vst.msk [vmem:[#allocation2 + $0x8] sm:$0xff] %vm226_vm0, %v1278_v3  ;;  %230 = vst.msk [vmem:[#allocation2 + $0x18] sm:$0xff] %vm226_vm0, %v1278_v3  ;;  %803 = vmatpush3.bf16.msra.mxu0 %v848_v0  ;;  %811 = vmatpush3.bf16.msra.mxu1 %v849_v1  ;;  %v240_v6 = vld [vmem:[#allocation9] sm:$0xff]  ;;  %v241_v7 = vld [vmem:[#allocation9 + $0x8] sm:$0xff]  ;;  %vm597_vm1 = vcmask 257024   ;;  %s1279_s0 = smov [#allocation29]  }
 0x107   :  { %231 = vst.msk [vmem:[#allocation3] sm:$0xff] %vm226_vm0, %v1278_v3  ;;  %232 = vst.msk [vmem:[#allocation3 + $0x8] sm:$0xff] %vm226_vm0, %v1278_v3  ;;  %804 = vmatprep.subr.bf16.mxu0 %v850_v2  ;;  %812 = vmatprep.subr.bf16.mxu1 %v851_v4  ;;  %v242_v8 = vld [vmem:[#allocation9 + $0x10] sm:$0xff]  ;;  %v243_v9 = vld [vmem:[#allocation9 + $0x18] sm:$0xff]  ;;  %s705_s4 = sshll.u32 %s1279_s0, 4  ;;  %s1280_s26 = smov [#allocation31]   ;;  %s706_s4 = int_to_ptr.vmem [resolvable:$true] %s705_s4 }
 0x108   :  { %233 = vst.msk [vmem:[#allocation3 + $0x10] sm:$0xff] %vm226_vm0, %v1278_v3  ;;  %234 = vst.msk [vmem:[#allocation3 + $0x18] sm:$0xff] %vm226_vm0, %v1278_v3  ;;  %v743_v15 = vld [vmem:[#allocation10] ss:$0 sm:$0xff]  ;;  %v744_v17 = vld [vmem:[#allocation12] ss:$0 sm:$0xff]  ;;  %p1179_p10 = scmp.lt.s32.totalorder %s706_s4, %s706_s4 }
 0x109   :  { %235 = vst.msk [vmem:[#allocation4] sm:$0xff] %vm226_vm0, %v1278_v3  ;;  %236 = vst.msk [vmem:[#allocation4 + $0x8] sm:$0xff] %vm226_vm0, %v1278_v3  ;;  %v853_v31 = vld [vmem:[#allocation16 + $0x8] sm:$0xff]   ;;  %v760_v60 = vld [vmem:[#allocation19] ss:$0 sm:$0xff]  ;;  %s717_s27 = sshll.u32 %s1280_s26, 4  ;;  %s1598_s27 = int_to_ptr.vmem [resolvable:$true] %s717_s27 }
 0x10a   :  { %237 = vst.msk [vmem:[#allocation4 + $0x10] sm:$0xff] %vm226_vm0, %v1278_v3  ;;  %238 = vst.msk [vmem:[#allocation4 + $0x18] sm:$0xff] %vm226_vm0, %v1278_v3  ;;  %805 = vmatpush3.bf16.msra.mxu0 %v850_v2  ;;  %813 = vmatpush3.bf16.msra.mxu1 %v851_v4  ;;  %v244_v10 = vstv %s239_s13  ;;  %v759_v0 = vld [vmem:[#allocation18] ss:$0 sm:$0xff]  ;;  %s1281_s5 = smov [#allocation28]   ;;  %s1174_s8 = scalar_lea.vmem %s706_s4, 256 }
 0x10b   :  { %818 = vmatprep.subr.bf16.mxu0 %v852_v5  ;;  %v245_v11 = vmul.f32 %v244_v10, %v240_v6  ;;  %v246_v12 = vmul.f32 %v244_v10, %v241_v7  ;;  %v247_v13 = vmul.f32 %v244_v10, %v242_v8  ;;  %v248_v14 = vmul.f32 %v244_v10, %v243_v9  ;;  %s693_s24 = sshll.u32 %s1281_s5, 4  ;;  %p1175_p9 = scmp.ne.s32.totalorder %s706_s4, %s1174_s8  ;;  %s1601_s24 = int_to_ptr.vmem [resolvable:$true] %s693_s24 }
 0x10c   :  { %v279_v32 = vld [vmem:[#allocation2 + $0x10] sm:$0xff]  ;;  %v277_v34 = vld [vmem:[#allocation2] sm:$0xff]  ;;  %v602_v4 = vstv %s758_s10  ;;  %p1180_p11 = scmp.lt.s32.totalorder %s1174_s8, %s1174_s8 }
 0x10d   :  { %854 = vtanh.f32 %v245_v11  ;;  %v280_v38 = vld [vmem:[#allocation2 + $0x18] sm:$0xff]  ;;  %v278_v44 = vld [vmem:[#allocation2 + $0x8] sm:$0xff] }
 0x10e   :  { %856 = vtanh.f32 %v246_v12  ;;  %v361_v35 = vld [vmem:[#allocation3] sm:$0xff]  ;;  %v362_v45 = vld [vmem:[#allocation3 + $0x8] sm:$0xff]  ;;  %p1181_p12 = por %p1180_p11, %p1179_p10 }
 0x10f   :  { %858 = vtanh.f32 %v247_v13  ;;  %v363_v33 = vld [vmem:[#allocation3 + $0x10] sm:$0xff]  ;;  %v364_v39 = vld [vmem:[#allocation3 + $0x18] sm:$0xff] }
 0x110   :  { %860 = vtanh.f32 %v248_v14  ;;  %v438_v57 = vld [vmem:[#allocation4] sm:$0xff]  ;;  %v439_v63 = vld [vmem:[#allocation4 + $0x8] sm:$0xff]  ;;  %p1182_p13 = pnand %p1181_p12, %p1175_p9 }
 0x111   :  { %v440_v56 = vld [vmem:[#allocation4 + $0x10] sm:$0xff]  ;;  %v441_v59 = vld [vmem:[#allocation4 + $0x18] sm:$0xff] }
 0x117   :  { %v855_v16 = vpop.eup %854 }
 0x118   :  { %v857_v18 = vpop.eup %856  ;;  %v260_v19 = vmul.f32 %v855_v16, %v743_v15  ;;  %v550_v16 = vstv %s1580_s1 }
 0x119   :  { %v859_v20 = vpop.eup %858  ;;  %v261_v21 = vmul.f32 %v857_v18, %v743_v15 }
 0x11a   :  { %v861_v22 = vpop.eup %860  ;;  %v271_v23 = vadd.f32 %v744_v17, %v260_v19  ;;  %v262_v24 = vmul.f32 %v859_v20, %v743_v15 }
 0x11b   :  { %v272_v25 = vadd.f32 %v744_v17, %v261_v21  ;;  %v263_v26 = vmul.f32 %v861_v22, %v743_v15 }
 0x11c   :  { %v273_v27 = vadd.f32 %v744_v17, %v262_v24 }
 0x11d   :  { %v275_v28 = vpack.c.bf16 %v272_v25, %v271_v23  ;;  %v274_v29 = vadd.f32 %v744_v17, %v263_v26 }
 0x11f   :  { %806 = vmatprep.mubr.msk.bf16.mxu0 %vm226_vm0, %v275_v28  ;;  %814 = vmatprep.mubr.msk.bf16.mxu1 %vm226_vm0, %v275_v28  ;;  %v276_v30 = vpack.c.bf16 %v274_v29, %v273_v27 }
 0x121   :  { %807 = vmatmul.mubr.msk.bf16.vlgmr.msra.gmra.mrb[0].mxu0 %vm226_vm0, %v276_v30  ;;  %815 = vmatmul.mubr.msk.bf16.vlgmr.msra.gmra.mrb[0].mxu1 %vm226_vm0, %v276_v30 }
 0x122   :  { %819 = vmatpush3.bf16.msra.mxu0 %v852_v5  ;;  %822 = vmatprep.mubr.msk.bf16.mxu0 %vm226_vm0, %v275_v28 }
 0x123   :  { %820 = vmatprep.subr.bf16.mxu0 %v853_v31 }
 0x126   :  { %821 = vmatpush3.bf16.msra.mxu0 %v853_v31 }
 0x129   :  { %823 = vmatmul.mubr.msk.bf16.vlgmr.msra.gmra.mrb[4].mxu0 %vm226_vm0, %v276_v30  ;;  %v773_v30 = vld [vmem:[#allocation21] ss:$0 sm:$0xff] }
 0x1f4   :  { %v808_v36 = vpop.f32.mrb[0].mxu0  ;;  %v816_v37 = vpop.f32.mrb[0].mxu1 }
 0x1f5   :  { %v355_v40 = vadd.f32 %v808_v36, %v279_v32  ;;  %v432_v41 = vadd.f32 %v816_v37, %v363_v33  ;;  %v338_v42 = vpop.f32.mrb[1].mxu0  ;;  %v415_v43 = vpop.f32.mrb[1].mxu1 }
 0x1f6   :  { %v353_v46 = vadd.f32 %v338_v42, %v277_v34  ;;  %v430_v47 = vadd.f32 %v415_v43, %v361_v35  ;;  %v809_v48 = vpop.f32.mrb[2].mxu0  ;;  %v817_v49 = vpop.f32.mrb[2].mxu1  ;;  %v767_v43 = vld [vmem:[#allocation25] ss:$0 sm:$0xff] }
 0x1f7   :  { %359 = vst.msk [vmem:[#allocation2 + $0x10] sm:$0xff] %vm226_vm0, %v355_v40  ;;  %436 = vst.msk [vmem:[#allocation3 + $0x10] sm:$0xff] %vm226_vm0, %v432_v41  ;;  %v356_v50 = vadd.f32 %v809_v48, %v280_v38  ;;  %v433_v51 = vadd.f32 %v817_v49, %v364_v39  ;;  %v341_v52 = vpop.f32.mrb[3].mxu0  ;;  %v418_v53 = vpop.f32.mrb[3].mxu1 }
 0x1f8   :  { %357 = vst.msk [vmem:[#allocation2] sm:$0xff] %vm226_vm0, %v353_v46  ;;  %434 = vst.msk [vmem:[#allocation3] sm:$0xff] %vm226_vm0, %v430_v47  ;;  %v354_v54 = vadd.f32 %v341_v52, %v278_v44  ;;  %v431_v55 = vadd.f32 %v418_v53, %v362_v45  ;;  %v768_v47 = vld [vmem:[#allocation27] ss:$0 sm:$0xff]  ;;  %v761_v52 = vld [vmem:[#allocation22] ss:$0 sm:$0xff] }
 0x1f9   :  { %360 = vst.msk [vmem:[#allocation2 + $0x18] sm:$0xff] %vm226_vm0, %v356_v50  ;;  %437 = vst.msk [vmem:[#allocation3 + $0x18] sm:$0xff] %vm226_vm0, %v433_v51 }
 0x1fa   :  { %358 = vst.msk [vmem:[#allocation2 + $0x8] sm:$0xff] %vm226_vm0, %v354_v54  ;;  %435 = vst.msk [vmem:[#allocation3 + $0x8] sm:$0xff] %vm226_vm0, %v431_v55 }
 0x1fc   :  { %v824_v58 = vpop.f32.mrb[4].mxu0 }
 0x1fd   :  { %v509_v61 = vadd.f32 %v824_v58, %v440_v56  ;;  %v492_v62 = vpop.f32.mrb[5].mxu0 }
 0x1fe   :  { %v507_v1 = vadd.f32 %v492_v62, %v438_v57  ;;  %v825_v2 = vpop.f32.mrb[6].mxu0  ;;  %v537_v3 = vld [vmem:[#allocation3 + $0x10] sm:$0xff] }
 0x1ff   :  { %v522_v5 = vld [vmem:[#allocation2 + $0x10] sm:$0xff]  ;;  %513 = vst.msk [vmem:[#allocation4 + $0x10] sm:$0xff] %vm226_vm0, %v509_v61  ;;  %v510_v6 = vadd.f32 %v825_v2, %v441_v59  ;;  %v495_v7 = vpop.f32.mrb[7].mxu0  ;;  %v535_v8 = vld [vmem:[#allocation3] sm:$0xff]  ;;  %v548_v9 = vadd.f32 %v760_v60, %v537_v3  ;;  %v762_v59 = vld [vmem:[#allocation24] ss:$0 sm:$0xff] }
 0x200   :  { %v520_v10 = vld [vmem:[#allocation2] sm:$0xff]  ;;  %511 = vst.msk [vmem:[#allocation4] sm:$0xff] %vm226_vm0, %v507_v1  ;;  %v508_v11 = vadd.f32 %v495_v7, %v439_v63  ;;  %v538_v12 = vld [vmem:[#allocation3 + $0x18] sm:$0xff]  ;;  %v546_v13 = vadd.f32 %v760_v60, %v535_v8  ;;  %v533_v21 = vadd.f32 %v759_v0, %v522_v5 }
 0x201   :  { %v523_v14 = vld [vmem:[#allocation2 + $0x18] sm:$0xff]  ;;  %v531_v15 = vadd.f32 %v759_v0, %v520_v10  ;;  %514 = vst.msk [vmem:[#allocation4 + $0x18] sm:$0xff] %vm226_vm0, %v510_v6  ;;  %v536_v17 = vld [vmem:[#allocation3 + $0x8] sm:$0xff]  ;;  %v549_v18 = vadd.f32 %v760_v60, %v538_v12  ;;  %v605_v19 = vmul.f32 %v602_v4, %v548_v9 }
 0x202   :  { %v521_v20 = vld [vmem:[#allocation2 + $0x8] sm:$0xff]  ;;  %512 = vst.msk [vmem:[#allocation4 + $0x8] sm:$0xff] %vm226_vm0, %v508_v11  ;;  %v547_v22 = vadd.f32 %v760_v60, %v536_v17  ;;  %v603_v23 = vmul.f32 %v602_v4, %v546_v13  ;;  %v534_v25 = vadd.f32 %v759_v0, %v523_v14  ;;  %v553_v31 = vmul.f32 %v550_v16, %v533_v21 }
 0x203   :  { %v532_v24 = vadd.f32 %v759_v0, %v521_v20  ;;  %v606_v26 = vmul.f32 %v602_v4, %v549_v18  ;;  %862 = vtanh.f32 %v605_v19  ;;  %v551_v27 = vmul.f32 %v550_v16, %v531_v15 }
 0x204   :  { %v604_v28 = vmul.f32 %v602_v4, %v547_v22  ;;  %864 = vtanh.f32 %v603_v23  ;;  %v554_v32 = vmul.f32 %v550_v16, %v534_v25 }
 0x205   :  { %v552_v29 = vmul.f32 %v550_v16, %v532_v24  ;;  %866 = vtanh.f32 %v606_v26 }
 0x206   :  { %868 = vtanh.f32 %v604_v28  ;;  %v655_v33 = vld [vmem:[#allocation4 + $0x10] sm:$0xff] }
 0x207   :  { %870 = vtanh.f32 %v551_v27  ;;  %v653_v34 = vld [vmem:[#allocation4] sm:$0xff]  ;;  %v666_v35 = vadd.f32 %v773_v30, %v655_v33 }
 0x208   :  { %872 = vtanh.f32 %v552_v29  ;;  %v656_v36 = vld [vmem:[#allocation4 + $0x18] sm:$0xff]  ;;  %v664_v37 = vadd.f32 %v773_v30, %v653_v34 }
 0x209   :  { %874 = vtanh.f32 %v553_v31  ;;  %v654_v38 = vld [vmem:[#allocation4 + $0x8] sm:$0xff]  ;;  %v667_v39 = vadd.f32 %v773_v30, %v656_v36  ;;  %v788_v40 = vpack.c.bf16 %v666_v35, %v666_v35 }
 0x20a   :  { %876 = vtanh.f32 %v554_v32  ;;  %v665_v41 = vadd.f32 %v773_v30, %v654_v38  ;;  %v786_v42 = vpack.c.bf16 %v664_v37, %v664_v37 }
 0x20b   :  { %v789_v44 = vpack.c.bf16 %v667_v39, %v667_v39  ;;  %686 = vst.msk [vmem:[#allocation31 + $0x8] sm:$0xf] %vm597_vm1, %v788_v40 }
 0x20c   :  { %v787_v45 = vpack.c.bf16 %v665_v41, %v665_v41  ;;  %684 = vst.msk [vmem:[#allocation31] sm:$0xf] %vm597_vm1, %v786_v42 }
 0x20d   :  { %v863_v46 = vpop.eup %862  ;;  %687 = vst.msk [vmem:[#allocation31 + $0xc] sm:$0xf] %vm597_vm1, %v789_v44 }
 0x20e   :  { %v865_v48 = vpop.eup %864  ;;  %v620_v49 = vmul.f32 %v863_v46, %v767_v43  ;;  %685 = vst.msk [vmem:[#allocation31 + $0x4] sm:$0xf] %vm597_vm1, %v787_v45 }
 0x20f   :  { %v867_v50 = vpop.eup %866  ;;  %v618_v51 = vmul.f32 %v865_v48, %v767_v43 }
 0x210   :  { %v869_v53 = vpop.eup %868  ;;  %v621_v54 = vmul.f32 %v867_v50, %v767_v43  ;;  %v631_v55 = vadd.f32 %v768_v47, %v620_v49 }
 0x211   :  { %v871_v56 = vpop.eup %870  ;;  %v619_v57 = vmul.f32 %v869_v53, %v767_v43  ;;  %v629_v58 = vadd.f32 %v768_v47, %v618_v51 }
 0x212   :  { %v873_v60 = vpop.eup %872  ;;  %v632_v61 = vadd.f32 %v768_v47, %v621_v54  ;;  %v784_v62 = vpack.c.bf16 %v631_v55, %v631_v55  ;;  %v566_v63 = vmul.f32 %v871_v56, %v761_v52 }
 0x213   :  { %v875_v0 = vpop.eup %874  ;;  %v630_v1 = vadd.f32 %v768_v47, %v619_v57  ;;  %v782_v2 = vpack.c.bf16 %v629_v58, %v629_v58  ;;  %v567_v3 = vmul.f32 %v873_v60, %v761_v52 }
 0x214   :  { %v877_v4 = vpop.eup %876  ;;  %v785_v5 = vpack.c.bf16 %v632_v61, %v632_v61  ;;  %651 = vst.msk [vmem:[#allocation29 + $0x8] sm:$0xf] %vm597_vm1, %v784_v62  ;;  %v568_v6 = vmul.f32 %v875_v0, %v761_v52  ;;  %v577_v7 = vadd.f32 %v762_v59, %v566_v63 }
 0x215   :  { %v783_v8 = vpack.c.bf16 %v630_v1, %v630_v1  ;;  %649 = vst.msk [vmem:[#allocation29] sm:$0xf] %vm597_vm1, %v782_v2  ;;  %v569_v9 = vmul.f32 %v877_v4, %v761_v52  ;;  %v578_v10 = vadd.f32 %v762_v59, %v567_v3 }
 0x216   :  { %652 = vst.msk [vmem:[#allocation29 + $0xc] sm:$0xf] %vm597_vm1, %v785_v5  ;;  %v579_v11 = vadd.f32 %v762_v59, %v568_v6  ;;  %v778_v12 = vpack.c.bf16 %v577_v7, %v577_v7 }
 0x217   :  { %650 = vst.msk [vmem:[#allocation29 + $0x4] sm:$0xf] %vm597_vm1, %v783_v8  ;;  %v580_v13 = vadd.f32 %v762_v59, %v569_v9  ;;  %v779_v14 = vpack.c.bf16 %v578_v10, %v578_v10 }
 0x218   :  { %1185 = shalt.err (!%p1182_p13)
}
 0x219   :  { %s1186_s23 = scalar_lea.hbm %s1677_s15, 256 }
 0x21a   :  { %p1187_p0 = scmp.ne.s32.totalorder %s1677_s15, %s1186_s23  ;;  %p1190_p1 = scmp.lt.u32.totalorder %s1186_s23, %s1677_s15 }
 0x21c   :  { %p1192_p2 = pnand %p1190_p1, %p1187_p0 }
 0x21e   :  { %1195 = shalt.err (!%p1192_p2)
}
 0x21f   :  { %711 = dma.vmem_to_hbm [thread:$0]  %s706_s4, 256, %s1677_s15, [#allocation30], %s1262_s2, %s1262_s2, %s1263_s22   ;;  %v780_v15 = vpack.c.bf16 %v579_v11, %v579_v11  ;;  %598 = vst.msk [vmem:[#allocation28] sm:$0xf] %vm597_vm1, %v778_v12  ;;  %v781_v16 = vpack.c.bf16 %v580_v13, %v580_v13  ;;  %599 = vst.msk [vmem:[#allocation28 + $0x4] sm:$0xf] %vm597_vm1, %v779_v14 }
 0x220   :  { %s1196_s19 = scalar_lea.vmem %s1598_s27, 256  ;;  %p1201_p4 = scmp.lt.s32.totalorder %s1598_s27, %s1598_s27 }
 0x221   :  { %p1197_p3 = scmp.ne.s32.totalorder %s1598_s27, %s1196_s19  ;;  %p1202_p5 = scmp.lt.s32.totalorder %s1196_s19, %s1196_s19 }
 0x223   :  { %p1203_p6 = por %p1202_p5, %p1201_p4 }
 0x225   :  { %p1204_p7 = pnand %p1203_p6, %p1197_p3 }
 0x227   :  { %1207 = shalt.err (!%p1204_p7)
}
 0x228   :  { %s1208_s7 = scalar_lea.hbm %s1678_s16, 256 }
 0x229   :  { %p1209_p8 = scmp.ne.s32.totalorder %s1678_s16, %s1208_s7  ;;  %p1212_p9 = scmp.lt.u32.totalorder %s1208_s7, %s1678_s16 }
 0x22b   :  { %p1214_p10 = pnand %p1212_p9, %p1209_p8 }
 0x22d   :  { %1217 = shalt.err (!%p1214_p10)
}
 0x22e   :  { %723 = dma.vmem_to_hbm [thread:$0]  %s1598_s27, 256, %s1678_s16, [#allocation30], %s1262_s2, %s1262_s2, %s1263_s22   ;;  %600 = vst.msk [vmem:[#allocation28 + $0x8] sm:$0xf] %vm597_vm1, %v780_v15  ;;  %601 = vst.msk [vmem:[#allocation28 + $0xc] sm:$0xf] %vm597_vm1, %v781_v16 }
 0x22f   :  { %s1218_s1 = scalar_lea.vmem %s1601_s24, 256  ;;  %p1223_p12 = scmp.lt.s32.totalorder %s1601_s24, %s1601_s24 }
 0x230   :  { %p1219_p11 = scmp.ne.s32.totalorder %s1601_s24, %s1218_s1  ;;  %p1224_p13 = scmp.lt.s32.totalorder %s1218_s1, %s1218_s1 }
 0x232   :  { %p1225_p0 = por %p1224_p13, %p1223_p12 }
 0x234   :  { %p1226_p1 = pnand %p1225_p0, %p1219_p11 }
 0x236   :  { %1229 = shalt.err (!%p1226_p1)
}
 0x237   :  { %s1230_s26 = scalar_lea.hbm %s1676_s14, 256 }
 0x238   :  { %p1231_p2 = scmp.ne.s32.totalorder %s1676_s14, %s1230_s26  ;;  %p1234_p3 = scmp.lt.u32.totalorder %s1230_s26, %s1676_s14 }
 0x23a   :  { %p1236_p4 = pnand %p1234_p3, %p1231_p2 }
 0x23c   :  { %1239 = shalt.err (!%p1236_p4)
}
 0x23d   :  { %699 = dma.vmem_to_hbm [thread:$0]  %s1601_s24, 256, %s1676_s14, [#allocation7], %s1262_s2, %s1262_s2, %s1263_s22  }
 0x23e   :  { %1256 = dma.done.wait [#allocation7], 256  }
 0x23f   :  { %1257 = vsyncadd [#allocation7], 4294967040 }
 0x240   :  { %1258 = dma.done.wait [#allocation30], 512  }
 0x241   :  { %1259 = vsyncadd [#allocation30], 4294966784 }
 0x242   :  { %733 = vsyncpa [#allocation6], 1 }
 0x243   :  { %734 = vsyncpa [#allocation11], 1 }
 0x244   :  { %735 = vsyncpa [#allocation14], 1 }
 0x245   :  { %736 = vsyncpa [#allocation17], 1 }
 0x246   :  { %737 = vsyncpa [#allocation20], 1 }
 0x247   :  { %738 = vsyncpa [#allocation23], 1 }
 0x248   :  { %739 = vsyncpa [#allocation26], 1 }
 0x249   :  { %740 = vsyncpa [#allocation7], 1 }
 0x24a   :  { %741 = vsyncpa [#allocation30], 1 }
 0x24b   :  { %742 = vsyncpa [#allocation8], 1 }

// kernel: raiflow_single_block.8
= control target key start
LH: loop header
LB: loop body
LE: loop exit
PB: predicated region body
PF: predicated region fallthrough
CT: control target
= control target key end

     0   :  { %11 = vsyncpa [#allocation4], 0  ;;  %s645_s0 = inlined_call_operand.hbm [shape: bf16[32,32], index: 0, kind: input, shape index: {}]   ;;  %s646_s1 = inlined_call_operand.hbm [shape: bf16[32,32], index: 1, kind: input, shape index: {}]   ;;  %s647_s2 = inlined_call_operand.hbm [shape: f32[1,32], index: 2, kind: input, shape index: {}]   ;;  %s648_s3 = inlined_call_operand.hbm [shape: f32[32,32], index: 3, kind: input, shape index: {}, may-alias: {3,6}]   ;;  %s649_s4 = inlined_call_operand.hbm [shape: f32[1,32], index: 4, kind: input, shape index: {}]   ;;  %s650_s5 = inlined_call_operand.hbm [shape: f32[1,32], index: 5, kind: input, shape index: {}]   ;;  %s651_s6 = inlined_call_operand.hbm [shape: f32[32,32], index: 6, kind: output, shape index: {}, may-alias: {3,6}]  }
   0x1   :  { %12 = vsyncpa [#allocation7], 0 }
   0x2   :  { %13 = vsyncpa [#allocation10], 0 }
   0x3   :  { %14 = vsyncpa [#allocation13], 0 }
   0x4   :  { %15 = vsyncpa [#allocation5], 0  ;;  %s481_s21 = smov [#allocation6]   ;;  %s482_s23 = smov [#allocation9]  }
   0x5   :  { %s33_s22 = sshll.u32 %s481_s21, 4  ;;  %s55_s24 = sshll.u32 %s482_s23, 4  ;;  %s34_s22 = int_to_ptr.vmem [resolvable:$true] %s33_s22  ;;  %s528_s24 = int_to_ptr.vmem [resolvable:$true] %s55_s24 }
   0x6   :  { %s317_s27 = scalar_lea.hbm %s646_s1, 256 }
   0x7   :  { %p318_p0 = scmp.ne.s32.totalorder %s646_s1, %s317_s27  ;;  %p321_p1 = scmp.lt.u32.totalorder %s317_s27, %s646_s1 }
   0x9   :  { %p323_p2 = pnand %p321_p1, %p318_p0 }
   0xb   :  { %326 = shalt.err (!%p323_p2)
}
   0xc   :  { %s327_s8 = scalar_lea.vmem %s34_s22, 256  ;;  %p332_p4 = scmp.lt.s32.totalorder %s34_s22, %s34_s22 }
   0xd   :  { %p328_p3 = scmp.ne.s32.totalorder %s34_s22, %s327_s8  ;;  %p333_p5 = scmp.lt.s32.totalorder %s327_s8, %s327_s8 }
   0xf   :  { %p334_p6 = por %p333_p5, %p332_p4 }
  0x11   :  { %p335_p7 = pnand %p334_p6, %p328_p3 }
  0x13   :  { %338 = shalt.err (!%p335_p7)
}
  0x14   :  { %s483_s9 = smov 64   ;;  %s484_s10 = smov 4  }
  0x15   :  { %39 = dma.hbm_to_vmem [thread:$0]  %s646_s1, 256, %s34_s22, [#allocation7], %s483_s9, %s483_s9, %s484_s10  }
  0x16   :  { %s339_s15 = scalar_lea.hbm %s648_s3, 512 }
  0x17   :  { %p340_p8 = scmp.ne.s32.totalorder %s648_s3, %s339_s15  ;;  %p343_p9 = scmp.lt.u32.totalorder %s339_s15, %s648_s3 }
  0x19   :  { %p345_p10 = pnand %p343_p9, %p340_p8 }
  0x1b   :  { %348 = shalt.err (!%p345_p10)
}
  0x1c   :  { %s349_s20 = scalar_lea.vmem %s528_s24, 512  ;;  %p354_p12 = scmp.lt.s32.totalorder %s528_s24, %s528_s24 }
  0x1d   :  { %p350_p11 = scmp.ne.s32.totalorder %s528_s24, %s349_s20  ;;  %p355_p13 = scmp.lt.s32.totalorder %s349_s20, %s349_s20 }
  0x1f   :  { %p356_p0 = por %p355_p13, %p354_p12 }
  0x21   :  { %p357_p1 = pnand %p356_p0, %p350_p11 }
  0x23   :  { %360 = shalt.err (!%p357_p1)
}
  0x24   :  { %s485_s1 = smov 128   ;;  %s486_s21 = smov 8  }
  0x25   :  { %61 = dma.hbm_to_vmem [thread:$0]  %s648_s3, 512, %s528_s24, [#allocation10], %s485_s1, %s485_s1, %s486_s21  }
  0x26   :  { %s487_s25 = smov [#allocation3]   ;;  %s488_s27 = smov [#allocation8]  }
  0x27   :  { %s21_s26 = sshll.u32 %s487_s25, 4  ;;  %s46_s28 = sshll.u32 %s488_s27, 4  ;;  %s22_s26 = int_to_ptr.vmem [resolvable:$true] %s21_s26  ;;  %s47_s28 = int_to_ptr.vmem [resolvable:$true] %s46_s28 }
  0x28   :  { %s361_s7 = scalar_lea.hbm %s645_s0, 256 }
  0x29   :  { %p362_p2 = scmp.ne.s32.totalorder %s645_s0, %s361_s7  ;;  %p365_p3 = scmp.lt.u32.totalorder %s361_s7, %s645_s0 }
  0x2b   :  { %p367_p4 = pnand %p365_p3, %p362_p2 }
  0x2d   :  { %370 = shalt.err (!%p367_p4)
}
  0x2e   :  { %s371_s3 = scalar_lea.vmem %s22_s26, 256  ;;  %p376_p6 = scmp.lt.s32.totalorder %s22_s26, %s22_s26 }
  0x2f   :  { %p372_p5 = scmp.ne.s32.totalorder %s22_s26, %s371_s3  ;;  %p377_p7 = scmp.lt.s32.totalorder %s371_s3, %s371_s3 }
  0x31   :  { %p378_p8 = por %p377_p7, %p376_p6 }
  0x33   :  { %p379_p9 = pnand %p378_p8, %p372_p5 }
  0x35   :  { %382 = shalt.err (!%p379_p9)
}
  0x36   :  { %27 = dma.hbm_to_vmem [thread:$0]  %s645_s0, 256, %s22_s26, [#allocation4], %s483_s9, %s483_s9, %s484_s10  }
  0x37   :  { %s383_s17 = scalar_lea.hbm %s647_s2, 16 }
  0x38   :  { %p384_p10 = scmp.ne.s32.totalorder %s647_s2, %s383_s17  ;;  %p387_p11 = scmp.lt.u32.totalorder %s383_s17, %s647_s2 }
  0x3a   :  { %p389_p12 = pnand %p387_p11, %p384_p10 }
  0x3c   :  { %392 = shalt.err (!%p389_p12)
}
  0x3d   :  { %s393_s23 = scalar_lea.vmem %s47_s28, 16  ;;  %s397_s25 = scalar_lea.vmem %s47_s28, 32 }
  0x3e   :  { %p394_p13 = scmp.ne.s32.totalorder %s47_s28, %s393_s23  ;;  %p398_p0 = scmp.lt.s32.totalorder %s47_s28, %s47_s28 }
  0x3f   :  { %p399_p1 = scmp.lt.s32.totalorder %s397_s25, %s393_s23 }
  0x41   :  { %p400_p2 = por %p399_p1, %p398_p0 }
  0x43   :  { %p401_p3 = pnand %p400_p2, %p394_p13 }
  0x45   :  { %404 = shalt.err (!%p401_p3)
}
  0x46   :  { %49 = dma.hbm_to_vmem [thread:$0]  %s647_s2, 16, %s47_s28, [#allocation7]  }
  0x47   :  { %s489_s10 = smov [#allocation11]   ;;  %s490_s27 = smov [#allocation12]  }
  0x48   :  { %s68_s26 = sshll.u32 %s489_s10, 4  ;;  %s78_s29 = sshll.u32 %s490_s27, 4  ;;  %s69_s26 = int_to_ptr.vmem [resolvable:$true] %s68_s26  ;;  %s79_s29 = int_to_ptr.vmem [resolvable:$true] %s78_s29 }
  0x49   :  { %s405_s8 = scalar_lea.hbm %s649_s4, 16 }
  0x4a   :  { %p406_p4 = scmp.ne.s32.totalorder %s649_s4, %s405_s8  ;;  %p409_p5 = scmp.lt.u32.totalorder %s405_s8, %s649_s4 }
  0x4c   :  { %p411_p6 = pnand %p409_p5, %p406_p4 }
  0x4e   :  { %414 = shalt.err (!%p411_p6)
}
  0x4f   :  { %s415_s2 = scalar_lea.vmem %s69_s26, 16  ;;  %s419_s28 = scalar_lea.vmem %s69_s26, 32 }
  0x50   :  { %p416_p7 = scmp.ne.s32.totalorder %s69_s26, %s415_s2  ;;  %p420_p8 = scmp.lt.s32.totalorder %s69_s26, %s69_s26 }
  0x51   :  { %p421_p9 = scmp.lt.s32.totalorder %s419_s28, %s415_s2 }
  0x53   :  { %p422_p10 = por %p421_p9, %p420_p8 }
  0x55   :  { %p423_p11 = pnand %p422_p10, %p416_p7 }
  0x57   :  { %426 = shalt.err (!%p423_p11)
}
  0x58   :  { %71 = dma.hbm_to_vmem [thread:$0]  %s649_s4, 16, %s69_s26, [#allocation10]  }
  0x59   :  { %s427_s17 = scalar_lea.hbm %s650_s5, 16 }
  0x5a   :  { %p428_p12 = scmp.ne.s32.totalorder %s650_s5, %s427_s17  ;;  %p431_p13 = scmp.lt.u32.totalorder %s427_s17, %s650_s5 }
  0x5c   :  { %p433_p0 = pnand %p431_p13, %p428_p12 }
  0x5e   :  { %436 = shalt.err (!%p433_p0)
}
  0x5f   :  { %s437_s23 = scalar_lea.vmem %s79_s29, 16  ;;  %s441_s25 = scalar_lea.vmem %s79_s29, 32 }
  0x60   :  { %p438_p1 = scmp.ne.s32.totalorder %s79_s29, %s437_s23  ;;  %p442_p2 = scmp.lt.s32.totalorder %s79_s29, %s79_s29 }
  0x61   :  { %p443_p3 = scmp.lt.s32.totalorder %s441_s25, %s437_s23 }
  0x63   :  { %p444_p4 = por %p443_p3, %p442_p2 }
  0x65   :  { %p445_p5 = pnand %p444_p4, %p438_p1 }
  0x67   :  { %448 = shalt.err (!%p445_p5)
}
  0x68   :  { %81 = dma.hbm_to_vmem [thread:$0]  %s650_s5, 16, %s79_s29, [#allocation13]  }
  0x69   :  { %471 = dma.done.wait [#allocation4], 256  }
  0x6a   :  { %472 = vsyncadd [#allocation4], 4294967040 }
  0x6b   :  { %473 = dma.done.wait [#allocation7], 272  }
  0x6c   :  { %474 = vsyncadd [#allocation7], 4294967024 }
  0x6d   :  { %475 = dma.done.wait [#allocation10], 528  }
  0x6e   :  { %476 = vsyncadd [#allocation10], 4294966768 }
  0x6f   :  { %477 = dma.done.wait [#allocation13], 16  }
  0x70   :  { %478 = vsyncadd [#allocation13], 4294967280  ;;  %vm105_vm0 = vcmask 261120   ;;  %v491_v0 = vmov 0.0   ;;  %v313_v1 = vld [vmem:[#allocation6] sm:$0xff]   ;;  %v314_v2 = vld [vmem:[#allocation6 + $0x8] sm:$0xff]  }
  0x71   :  { %108 = vst.msk [vmem:[#allocation2 + $0x10] sm:$0xff] %vm105_vm0, %v491_v0  ;;  %106 = vst.msk [vmem:[#allocation2] sm:$0xff] %vm105_vm0, %v491_v0  ;;  %293 = vmatprep.subr.bf16.mxu0 %v313_v1  ;;  %v315_v3 = vld [vmem:[#allocation3] sm:$0xff]   ;;  %v316_v4 = vld [vmem:[#allocation3 + $0x8] sm:$0xff]   ;;  %s492_s5 = smov [#allocation14]  }
  0x72   :  { %107 = vst.msk [vmem:[#allocation2 + $0x8] sm:$0xff] %vm105_vm0, %v491_v0  ;;  %109 = vst.msk [vmem:[#allocation2 + $0x18] sm:$0xff] %vm105_vm0, %v491_v0  ;;  %294 = vmatpush3.bf16.msra.mxu0 %v313_v1  ;;  %297 = vmatprep.mubr.msk.bf16.mxu0 %vm105_vm0, %v315_v3  ;;  %v286_v17 = vld [vmem:[#allocation8] ss:$0 sm:$0xff]  ;;  %v228_v18 = vld [vmem:[#allocation9 + $0x10] sm:$0xff]  ;;  %s265_s9 = sshll.u32 %s492_s5, 4  ;;  %s266_s9 = int_to_ptr.vmem [resolvable:$true] %s265_s9 }
  0x73   :  { %295 = vmatprep.subr.bf16.mxu0 %v314_v2  ;;  %v287_v19 = vld [vmem:[#allocation12] ss:$0 sm:$0xff]  ;;  %v229_v22 = vld [vmem:[#allocation9 + $0x18] sm:$0xff]  ;;  %v288_v23 = vld [vmem:[#allocation11] ss:$0 sm:$0xff]  ;;  %s449_s10 = scalar_lea.vmem %s266_s9, 512  ;;  %p454_p7 = scmp.lt.s32.totalorder %s266_s9, %s266_s9 }
  0x74   :  { %v226_v20 = vld [vmem:[#allocation9] sm:$0xff]  ;;  %v227_v26 = vld [vmem:[#allocation9 + $0x8] sm:$0xff]  ;;  %v239_v27 = vadd.f32 %v287_v19, %v228_v18  ;;  %v240_v33 = vadd.f32 %v287_v19, %v229_v22  ;;  %p450_p6 = scmp.ne.s32.totalorder %s266_s9, %s449_s10  ;;  %p455_p8 = scmp.lt.s32.totalorder %s449_s10, %s449_s10 }
  0x75   :  { %v237_v30 = vadd.f32 %v287_v19, %v226_v20  ;;  %v238_v36 = vadd.f32 %v287_v19, %v227_v26 }
  0x76   :  { %296 = vmatpush3.bf16.msra.mxu0 %v314_v2  ;;  %p456_p9 = por %p455_p8, %p454_p7 }
  0x78   :  { %v112_v5 = vld [vmem:[#allocation2 + $0x10] sm:$0xff]  ;;  %v110_v6 = vld [vmem:[#allocation2] sm:$0xff]  ;;  %p457_p10 = pnand %p456_p9, %p450_p6 }
  0x79   :  { %298 = vmatmul.mubr.msk.bf16.vlgmr.msra.gmra.mrb[0].mxu0 %vm105_vm0, %v316_v4  ;;  %v113_v8 = vld [vmem:[#allocation2 + $0x18] sm:$0xff]  ;;  %v111_v11 = vld [vmem:[#allocation2 + $0x8] sm:$0xff] }
 0x14c   :  { %v299_v7 = vpop.f32.mrb[0].mxu0 }
 0x14d   :  { %v202_v9 = vadd.f32 %v299_v7, %v112_v5  ;;  %v185_v10 = vpop.f32.mrb[1].mxu0 }
 0x14e   :  { %v200_v12 = vadd.f32 %v185_v10, %v110_v6  ;;  %v300_v13 = vpop.f32.mrb[2].mxu0 }
 0x14f   :  { %206 = vst.msk [vmem:[#allocation2 + $0x10] sm:$0xff] %vm105_vm0, %v202_v9  ;;  %v203_v14 = vadd.f32 %v300_v13, %v113_v8  ;;  %v188_v15 = vpop.f32.mrb[3].mxu0 }
 0x150   :  { %204 = vst.msk [vmem:[#allocation2] sm:$0xff] %vm105_vm0, %v200_v12  ;;  %v201_v16 = vadd.f32 %v188_v15, %v111_v11 }
 0x151   :  { %207 = vst.msk [vmem:[#allocation2 + $0x18] sm:$0xff] %vm105_vm0, %v203_v14 }
 0x152   :  { %205 = vst.msk [vmem:[#allocation2 + $0x8] sm:$0xff] %vm105_vm0, %v201_v16 }
 0x156   :  { %v213_v21 = vld [vmem:[#allocation2 + $0x10] sm:$0xff] }
 0x157   :  { %v211_v24 = vld [vmem:[#allocation2] sm:$0xff]  ;;  %v224_v25 = vadd.f32 %v286_v17, %v213_v21 }
 0x158   :  { %v214_v28 = vld [vmem:[#allocation2 + $0x18] sm:$0xff]  ;;  %v222_v29 = vadd.f32 %v286_v17, %v211_v24 }
 0x159   :  { %v212_v31 = vld [vmem:[#allocation2 + $0x8] sm:$0xff]  ;;  %v225_v32 = vadd.f32 %v286_v17, %v214_v28  ;;  %v250_v34 = vmul.f32 %v288_v23, %v224_v25 }
 0x15a   :  { %v223_v35 = vadd.f32 %v286_v17, %v212_v31  ;;  %v248_v37 = vmul.f32 %v288_v23, %v222_v29 }
 0x15b   :  { %v251_v38 = vmul.f32 %v288_v23, %v225_v32  ;;  %v254_v39 = vadd.f32 %v250_v34, %v239_v27 }
 0x15c   :  { %v249_v40 = vmul.f32 %v288_v23, %v223_v35  ;;  %v252_v41 = vadd.f32 %v248_v37, %v237_v30 }
 0x15d   :  { %v255_v42 = vadd.f32 %v251_v38, %v240_v33  ;;  %258 = vst.msk [vmem:[#allocation14 + $0x10] sm:$0xff] %vm105_vm0, %v254_v39 }
 0x15e   :  { %v253_v43 = vadd.f32 %v249_v40, %v238_v36  ;;  %256 = vst.msk [vmem:[#allocation14] sm:$0xff] %vm105_vm0, %v252_v41 }
 0x15f   :  { %259 = vst.msk [vmem:[#allocation14 + $0x18] sm:$0xff] %vm105_vm0, %v255_v42 }
 0x160   :  { %257 = vst.msk [vmem:[#allocation14 + $0x8] sm:$0xff] %vm105_vm0, %v253_v43 }
 0x161   :  { %460 = shalt.err (!%p457_p10)
}
 0x162   :  { %s461_s29 = scalar_lea.hbm %s651_s6, 512 }
 0x163   :  { %p462_p11 = scmp.ne.s32.totalorder %s651_s6, %s461_s29  ;;  %p465_p12 = scmp.lt.u32.totalorder %s461_s29, %s651_s6 }
 0x165   :  { %p467_p13 = pnand %p465_p12, %p462_p11 }
 0x167   :  { %470 = shalt.err (!%p467_p13)
}
 0x168   :  { %271 = dma.vmem_to_hbm [thread:$0]  %s266_s9, 512, %s651_s6, [#allocation5], %s485_s1, %s485_s1, %s486_s21  }
 0x169   :  { %479 = dma.done.wait [#allocation5], 512  }
 0x16a   :  { %480 = vsyncadd [#allocation5], 4294966784 }
 0x16b   :  { %275 = vsyncpa [#allocation4], 1 }
 0x16c   :  { %276 = vsyncpa [#allocation7], 1 }
 0x16d   :  { %277 = vsyncpa [#allocation10], 1 }
 0x16e   :  { %278 = vsyncpa [#allocation13], 1 }
 0x16f   :  { %279 = vsyncpa [#allocation5], 1 }

// kernel: raiflow_single_block.9
= control target key start
LH: loop header
LB: loop body
LE: loop exit
PB: predicated region body
PF: predicated region fallthrough
CT: control target
= control target key end

     0   :  { %12 = vsyncpa [#allocation5], 0  ;;  %s652_s0 = inlined_call_operand.<no memory space> [shape: f32[1], index: 0, kind: input, shape index: {}]   ;;  %s653_s1 = inlined_call_operand.hbm [shape: f32[32,32], index: 1, kind: input, shape index: {}]   ;;  %s654_s2 = inlined_call_operand.hbm [shape: f32[1,32], index: 2, kind: input, shape index: {}]   ;;  %s655_s3 = inlined_call_operand.hbm [shape: f32[1,32], index: 3, kind: input, shape index: {}]   ;;  %s656_s4 = inlined_call_operand.hbm [shape: bf16[32,64], index: 4, kind: input, shape index: {}]   ;;  %s657_s5 = inlined_call_operand.hbm [shape: f32[1,64], index: 5, kind: input, shape index: {}]   ;;  %s658_s6 = inlined_call_operand.hbm [shape: bf16[32,64], index: 6, kind: output, shape index: {}]  }
   0x1   :  { %13 = vsyncpa [#allocation8], 0 }
   0x2   :  { %14 = vsyncpa [#allocation11], 0 }
   0x3   :  { %15 = vsyncpa [#allocation6], 0  ;;  %s510_s21 = smov [#allocation7]   ;;  %s511_s23 = smov [#allocation10]  }
   0x4   :  { %s36_s22 = sshll.u32 %s510_s21, 4  ;;  %s55_s24 = sshll.u32 %s511_s23, 4  ;;  %s37_s22 = int_to_ptr.vmem [resolvable:$true] %s36_s22  ;;  %s556_s24 = int_to_ptr.vmem [resolvable:$true] %s55_s24 }
   0x5   :  { %s370_s27 = scalar_lea.hbm %s654_s2, 16 }
   0x6   :  { %p371_p0 = scmp.ne.s32.totalorder %s654_s2, %s370_s27  ;;  %p374_p1 = scmp.lt.u32.totalorder %s370_s27, %s654_s2 }
   0x8   :  { %p376_p2 = pnand %p374_p1, %p371_p0 }
   0xa   :  { %379 = shalt.err (!%p376_p2)
}
   0xb   :  { %s380_s8 = scalar_lea.vmem %s37_s22, 16  ;;  %s384_s9 = scalar_lea.vmem %s37_s22, 32 }
   0xc   :  { %p381_p3 = scmp.ne.s32.totalorder %s37_s22, %s380_s8  ;;  %p385_p4 = scmp.lt.s32.totalorder %s37_s22, %s37_s22 }
   0xd   :  { %p386_p5 = scmp.lt.s32.totalorder %s384_s9, %s380_s8 }
   0xf   :  { %p387_p6 = por %p386_p5, %p385_p4 }
  0x11   :  { %p388_p7 = pnand %p387_p6, %p381_p3 }
  0x13   :  { %391 = shalt.err (!%p388_p7)
}
  0x14   :  { %39 = dma.hbm_to_vmem [thread:$0]  %s654_s2, 16, %s37_s22, [#allocation8]  }
  0x15   :  { %s392_s14 = scalar_lea.hbm %s656_s4, 256 }
  0x16   :  { %p393_p8 = scmp.ne.s32.totalorder %s656_s4, %s392_s14  ;;  %p396_p9 = scmp.lt.u32.totalorder %s392_s14, %s656_s4 }
  0x18   :  { %p398_p10 = pnand %p396_p9, %p393_p8 }
  0x1a   :  { %401 = shalt.err (!%p398_p10)
}
  0x1b   :  { %s402_s19 = scalar_lea.vmem %s556_s24, 256  ;;  %p407_p12 = scmp.lt.s32.totalorder %s556_s24, %s556_s24 }
  0x1c   :  { %p403_p11 = scmp.ne.s32.totalorder %s556_s24, %s402_s19  ;;  %p408_p13 = scmp.lt.s32.totalorder %s402_s19, %s402_s19 }
  0x1e   :  { %p409_p0 = por %p408_p13, %p407_p12 }
  0x20   :  { %p410_p1 = pnand %p409_p0, %p403_p11 }
  0x22   :  { %413 = shalt.err (!%p410_p1)
}
  0x23   :  { %s512_s2 = smov 64   ;;  %s513_s20 = smov 4  }
  0x24   :  { %61 = dma.hbm_to_vmem [thread:$0]  %s656_s4, 256, %s556_s24, [#allocation11], %s512_s2, %s512_s2, %s513_s20  }
  0x25   :  { %s514_s23 = smov [#allocation4]   ;;  %s414_s28 = scalar_lea.hbm %s653_s1, 512 }
  0x26   :  { %s23_s25 = sshll.u32 %s514_s23, 4  ;;  %p415_p2 = scmp.ne.s32.totalorder %s653_s1, %s414_s28  ;;  %s24_s25 = int_to_ptr.vmem [resolvable:$true] %s23_s25 }
  0x27   :  { %p418_p3 = scmp.lt.u32.totalorder %s414_s28, %s653_s1 }
  0x29   :  { %p420_p4 = pnand %p418_p3, %p415_p2 }
  0x2b   :  { %423 = shalt.err (!%p420_p4)
}
  0x2c   :  { %s424_s9 = scalar_lea.vmem %s24_s25, 512  ;;  %p429_p6 = scmp.lt.s32.totalorder %s24_s25, %s24_s25 }
  0x2d   :  { %p425_p5 = scmp.ne.s32.totalorder %s24_s25, %s424_s9  ;;  %p430_p7 = scmp.lt.s32.totalorder %s424_s9, %s424_s9 }
  0x2f   :  { %p431_p8 = por %p430_p7, %p429_p6 }
  0x31   :  { %p432_p9 = pnand %p431_p8, %p425_p5 }
  0x33   :  { %435 = shalt.err (!%p432_p9)
}
  0x34   :  { %s515_s4 = smov 128   ;;  %s516_s24 = smov 8  }
  0x35   :  { %29 = dma.hbm_to_vmem [thread:$0]  %s653_s1, 512, %s24_s25, [#allocation5], %s515_s4, %s515_s4, %s516_s24  }
  0x36   :  { %s517_s12 = smov [#allocation9]   ;;  %s518_s14 = smov [#allocation12]  }
  0x37   :  { %s46_s13 = sshll.u32 %s517_s12, 4  ;;  %s68_s15 = sshll.u32 %s518_s14, 4  ;;  %s47_s13 = int_to_ptr.vmem [resolvable:$true] %s46_s13  ;;  %s69_s15 = int_to_ptr.vmem [resolvable:$true] %s68_s15 }
  0x38   :  { %s436_s18 = scalar_lea.hbm %s655_s3, 16 }
  0x39   :  { %p437_p10 = scmp.ne.s32.totalorder %s655_s3, %s436_s18  ;;  %p440_p11 = scmp.lt.u32.totalorder %s436_s18, %s655_s3 }
  0x3b   :  { %p442_p12 = pnand %p440_p11, %p437_p10 }
  0x3d   :  { %445 = shalt.err (!%p442_p12)
}
  0x3e   :  { %s446_s1 = scalar_lea.vmem %s47_s13, 16  ;;  %s450_s25 = scalar_lea.vmem %s47_s13, 32 }
  0x3f   :  { %p447_p13 = scmp.ne.s32.totalorder %s47_s13, %s446_s1  ;;  %p451_p0 = scmp.lt.s32.totalorder %s47_s13, %s47_s13 }
  0x40   :  { %p452_p1 = scmp.lt.s32.totalorder %s450_s25, %s446_s1 }
  0x42   :  { %p453_p2 = por %p452_p1, %p451_p0 }
  0x44   :  { %p454_p3 = pnand %p453_p2, %p447_p13 }
  0x46   :  { %457 = shalt.err (!%p454_p3)
}
  0x47   :  { %49 = dma.hbm_to_vmem [thread:$0]  %s655_s3, 16, %s47_s13, [#allocation8]  }
  0x48   :  { %s458_s30 = scalar_lea.hbm %s657_s5, 16 }
  0x49   :  { %p459_p4 = scmp.ne.s32.totalorder %s657_s5, %s458_s30  ;;  %p462_p5 = scmp.lt.u32.totalorder %s458_s30, %s657_s5 }
  0x4b   :  { %p464_p6 = pnand %p462_p5, %p459_p4 }
  0x4d   :  { %467 = shalt.err (!%p464_p6)
}
  0x4e   :  { %s468_s24 = scalar_lea.vmem %s69_s15, 16  ;;  %s472_s10 = scalar_lea.vmem %s69_s15, 32 }
  0x4f   :  { %p469_p7 = scmp.ne.s32.totalorder %s69_s15, %s468_s24  ;;  %p473_p8 = scmp.lt.s32.totalorder %s69_s15, %s69_s15 }
  0x50   :  { %p474_p9 = scmp.lt.s32.totalorder %s472_s10, %s468_s24 }
  0x52   :  { %p475_p10 = por %p474_p9, %p473_p8 }
  0x54   :  { %p476_p11 = pnand %p475_p10, %p469_p7 }
  0x56   :  { %479 = shalt.err (!%p476_p11)
}
  0x57   :  { %71 = dma.hbm_to_vmem [thread:$0]  %s657_s5, 16, %s69_s15, [#allocation11]  }
  0x58   :  { %502 = dma.done.wait [#allocation5], 512  }
  0x59   :  { %503 = vsyncadd [#allocation5], 4294966784 }
  0x5a   :  { %504 = dma.done.wait [#allocation8], 32  }
  0x5b   :  { %505 = vsyncadd [#allocation8], 4294967264 }
  0x5c   :  { %506 = dma.done.wait [#allocation11], 272  }
  0x5d   :  { %507 = vsyncadd [#allocation11], 4294967024  ;;  %vm92_vm0 = vcmask 523264   ;;  %v519_v0 = vmov 0.0   ;;  %v352_v1 = vld [vmem:[#allocation10] sm:$0xff]   ;;  %v102_v2 = vstv %s652_s0  ;;  %v353_v3 = vld [vmem:[#allocation10 + $0x8] sm:$0xff]  }
  0x5e   :  { %95 = vst.msk [vmem:[#allocation2 + $0x10] sm:$0xff] %vm92_vm0, %v519_v0  ;;  %93 = vst.msk [vmem:[#allocation2] sm:$0xff] %vm92_vm0, %v519_v0  ;;  %333 = vmatprep.subr.bf16.mxu0 %v352_v1  ;;  %v98_v4 = vld [vmem:[#allocation4] sm:$0xff]  ;;  %v99_v5 = vld [vmem:[#allocation4 + $0x8] sm:$0xff]  ;;  %vm155_vm1 = vcmask 261120   ;;  %vm290_vm2 = vcmask 519168  }
  0x5f   :  { %94 = vst.msk [vmem:[#allocation2 + $0x8] sm:$0xff] %vm92_vm0, %v519_v0  ;;  %96 = vst.msk [vmem:[#allocation2 + $0x18] sm:$0xff] %vm92_vm0, %v519_v0  ;;  %334 = vmatpush3.bf16.msra.mxu0 %v352_v1  ;;  %v103_v6 = vmul.f32 %v102_v2, %v98_v4  ;;  %v104_v7 = vmul.f32 %v102_v2, %v99_v5  ;;  %v100_v8 = vld [vmem:[#allocation4 + $0x10] sm:$0xff]  ;;  %v101_v9 = vld [vmem:[#allocation4 + $0x18] sm:$0xff]  ;;  %s520_s0 = smov [#allocation13]  }
  0x60   :  { %335 = vmatprep.subr.bf16.mxu0 %v353_v3  ;;  %v105_v10 = vmul.f32 %v102_v2, %v100_v8  ;;  %v106_v11 = vmul.f32 %v102_v2, %v101_v9  ;;  %v314_v12 = vld [vmem:[#allocation7] ss:$0 sm:$0xff]  ;;  %v315_v14 = vld [vmem:[#allocation9] ss:$0 sm:$0xff]  ;;  %v320_v40 = vld [vmem:[#allocation12] ss:$0 sm:$0xff] }
  0x61   :  { %354 = vtanh.f32 %v103_v6  ;;  %s300_s5 = sshll.u32 %s520_s0, 4  ;;  %s301_s5 = int_to_ptr.vmem [resolvable:$true] %s300_s5 }
  0x62   :  { %356 = vtanh.f32 %v104_v7  ;;  %s480_s14 = scalar_lea.vmem %s301_s5, 256  ;;  %p485_p13 = scmp.lt.s32.totalorder %s301_s5, %s301_s5 }
  0x63   :  { %336 = vmatpush3.bf16.msra.mxu0 %v353_v3  ;;  %358 = vtanh.f32 %v105_v10  ;;  %p481_p12 = scmp.ne.s32.totalorder %s301_s5, %s480_s14  ;;  %p486_p0 = scmp.lt.s32.totalorder %s480_s14, %s480_s14 }
  0x64   :  { %360 = vtanh.f32 %v106_v11 }
  0x65   :  { %v137_v28 = vld [vmem:[#allocation2 + $0x10] sm:$0xff]  ;;  %v135_v29 = vld [vmem:[#allocation2] sm:$0xff]  ;;  %p487_p1 = por %p486_p0, %p485_p13 }
  0x66   :  { %v138_v31 = vld [vmem:[#allocation2 + $0x18] sm:$0xff]  ;;  %v136_v34 = vld [vmem:[#allocation2 + $0x8] sm:$0xff] }
  0x67   :  { %p488_p2 = pnand %p487_p1, %p481_p12 }
  0x6b   :  { %v355_v13 = vpop.eup %354 }
  0x6c   :  { %v357_v15 = vpop.eup %356  ;;  %v118_v16 = vmul.f32 %v355_v13, %v314_v12 }
  0x6d   :  { %v359_v17 = vpop.eup %358  ;;  %v119_v18 = vmul.f32 %v357_v15, %v314_v12 }
  0x6e   :  { %v361_v19 = vpop.eup %360  ;;  %v129_v20 = vadd.f32 %v315_v14, %v118_v16  ;;  %v120_v21 = vmul.f32 %v359_v17, %v314_v12 }
  0x6f   :  { %v130_v22 = vadd.f32 %v315_v14, %v119_v18  ;;  %v121_v23 = vmul.f32 %v361_v19, %v314_v12 }
  0x70   :  { %v131_v24 = vadd.f32 %v315_v14, %v120_v21 }
  0x71   :  { %v133_v25 = vpack.c.bf16 %v130_v22, %v129_v20  ;;  %v132_v26 = vadd.f32 %v315_v14, %v121_v23 }
  0x73   :  { %337 = vmatprep.mubr.msk.bf16.mxu0 %vm155_vm1, %v133_v25  ;;  %v134_v27 = vpack.c.bf16 %v132_v26, %v131_v24 }
  0x75   :  { %338 = vmatmul.mubr.msk.bf16.vlgmr.msra.gmra.mrb[0].mxu0 %vm155_vm1, %v134_v27 }
 0x148   :  { %v339_v30 = vpop.f32.mrb[0].mxu0 }
 0x149   :  { %v213_v32 = vadd.f32 %v339_v30, %v137_v28  ;;  %v196_v33 = vpop.f32.mrb[1].mxu0 }
 0x14a   :  { %v211_v35 = vadd.f32 %v196_v33, %v135_v29  ;;  %v340_v36 = vpop.f32.mrb[2].mxu0 }
 0x14b   :  { %218 = vst.msk [vmem:[#allocation2 + $0x10] sm:$0xff] %vm92_vm0, %v213_v32  ;;  %v214_v37 = vadd.f32 %v340_v36, %v138_v31  ;;  %v199_v38 = vpop.f32.mrb[3].mxu0 }
 0x14c   :  { %216 = vst.msk [vmem:[#allocation2] sm:$0xff] %vm92_vm0, %v211_v35  ;;  %v212_v39 = vadd.f32 %v199_v38, %v136_v34 }
 0x14d   :  { %219 = vst.msk [vmem:[#allocation2 + $0x18] sm:$0xff] %vm92_vm0, %v214_v37 }
 0x14e   :  { %217 = vst.msk [vmem:[#allocation2 + $0x8] sm:$0xff] %vm92_vm0, %v212_v39 }
 0x152   :  { %v225_v41 = vld [vmem:[#allocation2 + $0x10] sm:$0xff] }
 0x153   :  { %v223_v42 = vld [vmem:[#allocation2] sm:$0xff]  ;;  %v236_v43 = vadd.f32 %v320_v40, %v225_v41 }
 0x154   :  { %v226_v44 = vld [vmem:[#allocation2 + $0x18] sm:$0xff]  ;;  %v234_v45 = vadd.f32 %v320_v40, %v223_v42 }
 0x155   :  { %v224_v46 = vld [vmem:[#allocation2 + $0x8] sm:$0xff]  ;;  %v237_v47 = vadd.f32 %v320_v40, %v226_v44  ;;  %v244_v48 = vmul.f32 0.044715, %v236_v43  ;;  %v240_v7 = vmul.f32 0.5, %v236_v43 }
 0x156   :  { %v235_v49 = vadd.f32 %v320_v40, %v224_v46  ;;  %v242_v50 = vmul.f32 0.044715, %v234_v45  ;;  %v238_v10 = vmul.f32 0.5, %v234_v45 }
 0x157   :  { %v245_v51 = vmul.f32 0.044715, %v237_v47  ;;  %v248_v52 = vmul.f32 %v244_v48, %v236_v43  ;;  %v241_v13 = vmul.f32 0.5, %v237_v47 }
 0x158   :  { %v243_v53 = vmul.f32 0.044715, %v235_v49  ;;  %v246_v54 = vmul.f32 %v242_v50, %v234_v45  ;;  %v239_v16 = vmul.f32 0.5, %v235_v49 }
 0x159   :  { %v249_v55 = vmul.f32 %v245_v51, %v237_v47  ;;  %v252_v56 = vmul.f32 %v248_v52, %v236_v43 }
 0x15a   :  { %v247_v57 = vmul.f32 %v243_v53, %v235_v49  ;;  %v250_v58 = vmul.f32 %v246_v54, %v234_v45 }
 0x15b   :  { %v253_v59 = vmul.f32 %v249_v55, %v237_v47  ;;  %v256_v60 = vadd.f32 %v252_v56, %v236_v43 }
 0x15c   :  { %v251_v61 = vmul.f32 %v247_v57, %v235_v49  ;;  %v254_v62 = vadd.f32 %v250_v58, %v234_v45 }
 0x15d   :  { %v257_v63 = vadd.f32 %v253_v59, %v237_v47  ;;  %v260_v0 = vmul.f32 0.7978846, %v256_v60 }
 0x15e   :  { %v255_v1 = vadd.f32 %v251_v61, %v235_v49  ;;  %v258_v2 = vmul.f32 0.7978846, %v254_v62 }
 0x15f   :  { %v261_v3 = vmul.f32 0.7978846, %v257_v63  ;;  %362 = vtanh.f32 %v260_v0 }
 0x160   :  { %v259_v4 = vmul.f32 0.7978846, %v255_v1  ;;  %364 = vtanh.f32 %v258_v2 }
 0x161   :  { %366 = vtanh.f32 %v261_v3 }
 0x162   :  { %368 = vtanh.f32 %v259_v4 }
 0x169   :  { %v363_v5 = vpop.eup %362 }
 0x16a   :  { %v365_v6 = vpop.eup %364  ;;  %v268_v8 = vadd.f32 1.0, %v363_v5 }
 0x16b   :  { %v367_v9 = vpop.eup %366  ;;  %v266_v11 = vadd.f32 1.0, %v365_v6 }
 0x16c   :  { %v369_v12 = vpop.eup %368  ;;  %v269_v14 = vadd.f32 1.0, %v367_v9  ;;  %v272_v15 = vmul.f32 %v268_v8, %v240_v7 }
 0x16d   :  { %v267_v17 = vadd.f32 1.0, %v369_v12  ;;  %v270_v18 = vmul.f32 %v266_v11, %v238_v10 }
 0x16e   :  { %v273_v19 = vmul.f32 %v269_v14, %v241_v13  ;;  %v327_v20 = vpack.c.bf16 %v272_v15, %v272_v15 }
 0x16f   :  { %v271_v21 = vmul.f32 %v267_v17, %v239_v16  ;;  %v325_v22 = vpack.c.bf16 %v270_v18, %v270_v18 }
 0x170   :  { %v328_v23 = vpack.c.bf16 %v273_v19, %v273_v19  ;;  %293 = vst.msk [vmem:[#allocation13 + $0x8] sm:$0xf] %vm290_vm2, %v327_v20 }
 0x171   :  { %v326_v24 = vpack.c.bf16 %v271_v21, %v271_v21  ;;  %291 = vst.msk [vmem:[#allocation13] sm:$0xf] %vm290_vm2, %v325_v22 }
 0x172   :  { %294 = vst.msk [vmem:[#allocation13 + $0xc] sm:$0xf] %vm290_vm2, %v328_v23 }
 0x173   :  { %292 = vst.msk [vmem:[#allocation13 + $0x4] sm:$0xf] %vm290_vm2, %v326_v24 }
 0x174   :  { %491 = shalt.err (!%p488_p2)
}
 0x175   :  { %s492_s17 = scalar_lea.hbm %s658_s6, 256 }
 0x176   :  { %p493_p3 = scmp.ne.s32.totalorder %s658_s6, %s492_s17  ;;  %p496_p4 = scmp.lt.u32.totalorder %s492_s17, %s658_s6 }
 0x178   :  { %p498_p5 = pnand %p496_p4, %p493_p3 }
 0x17a   :  { %501 = shalt.err (!%p498_p5)
}
 0x17b   :  { %306 = dma.vmem_to_hbm [thread:$0]  %s301_s5, 256, %s658_s6, [#allocation6], %s512_s2, %s512_s2, %s513_s20  }
 0x17c   :  { %508 = dma.done.wait [#allocation6], 256  }
 0x17d   :  { %509 = vsyncadd [#allocation6], 4294967040 }
 0x17e   :  { %310 = vsyncpa [#allocation5], 1 }
 0x17f   :  { %311 = vsyncpa [#allocation8], 1 }
 0x180   :  { %312 = vsyncpa [#allocation11], 1 }
 0x181   :  { %313 = vsyncpa [#allocation6], 1 }

// kernel: raiflow_single_block.7
= control target key start
LH: loop header
LB: loop body
LE: loop exit
PB: predicated region body
PF: predicated region fallthrough
CT: control target
= control target key end

     0   :  { %s2366_s0 = inlined_call_operand.hbm [shape: bf16[2,4,16,8], index: 0, kind: input, shape index: {}]   ;;  %s2367_s1 = inlined_call_operand.hbm [shape: bf16[2,4,16,8], index: 1, kind: input, shape index: {}]   ;;  %s2368_s2 = inlined_call_operand.hbm [shape: bf16[2,4,16,8], index: 2, kind: input, shape index: {}]   ;;  %s2369_s3 = inlined_call_operand.hbm [shape: bf16[2,4,16,8], index: 3, kind: output, shape index: {}]  }
   0x1   :  { %2379 = sst [smem:[#allocation18_spill]] %s2367_s1 }
   0x2   :  { %8 = vsyncpa [#allocation6], 0 }
   0x3   :  { %10 = vsyncpa [#allocation6 + $0x1], 0 }
   0x4   :  { %11 = vsyncpa [#allocation9], 0 }
   0x5   :  { %13 = vsyncpa [#allocation9 + $0x1], 0 }
   0x6   :  { %14 = vsyncpa [#allocation7], 0 }
   0x7   :  { %16 = vsyncpa [#allocation7 + $0x1], 0  ;;  %s1807_s12 = smov 0   ;;  %s1809_s13 = smov 0  }
   0x8   :  { %s1811_s14 = smov 0   ;;  %s1813_s15 = smov 0  }
   0x9   :  { %s1815_s16 = smov 0   ;;  %s1817_s17 = smov 0  }
   0xa LB: > { %2380 = sst [smem:[#allocation15_spill]] %s1769_s16  ;;  %s1838_s18 = sadd.s32 4294967295, %s1773_s17   ;;  %s1773_s17 = sphi %s1817_s17, %s22_s17   ;;  %s1769_s16 = sphi %s1815_s16, %s2403_s16   ;;  %s1765_s15 = sphi %s1813_s15, %s2402_s15   ;;  %s1761_s14 = sphi %s1811_s14, %s2406_s14   ;;  %s1757_s13 = sphi %s1809_s13, %s2405_s13   ;;  %s1753_s12 = sphi %s1807_s12, %s2404_s12  }
   0xb   : > { %s1329_s19 = sadd.s32 4294967294, %s1773_s17   ;;  %s41_s20 = sadd.s32 1, %s1769_s16 }
   0xc   : > { %s50_s21 = sadd.s32 1, %s1761_s14  ;;  %p43_p0 = scmp.ge.s32.totalorder %s41_s20, 2 }
   0xd   : > { %p57_p1 = scmp.ne.s32.totalorder %s1761_s14, %s1757_s13  ;;  %p58_p2 = scmp.eq.s32.totalorder %s1773_s17, 0 }
   0xe   : > { %p63_p3 = scmp.ne.s32.totalorder %s1757_s13, %s1753_s12  ;;  %s2408_s20 = smov (%p43_p0, %s41_s20), 0 }
   0xf   : > { %2381 = sst [smem:[#allocation16_spill]] %s2408_s20  ;;  %p1850_p4 = por %p58_p2, %p57_p1 }
  0x10   : > { %p64_p5 = scmp.eq.s32.totalorder %s1838_s18, 0  ;;  %s45_s23 = ssub.s32 %s1769_s16, %s2408_s20 }
  0x11   : > { %p145_p6 = scmp.eq.s32.totalorder %s1838_s18, 1  ;;  %p48_p7 = scmp.eq.s32.totalorder %s45_s23, 0 }
  0x12   : > { %p1858_p8 = por %p64_p5, %p63_p3  ;;  %p151_p10 = scmp.eq.s32.totalorder %s1329_s19, 1 }
  0x13   : > { %p1862_p9 = por %p145_p6, %p57_p1  ;;  %p1477_p13 = scmp.lt.s32.totalorder %s1773_s17, 2 }
  0x14   : > { %s2383_s24 = scalar_select %p1858_p8, 1, 0 }
  0x15   : > { %s2384_s25 = scalar_select %p1862_p9, 1, 0 }
  0x16   : > { %s1867_s26 = scalar_select %p48_p7, %s1761_s14, %s50_s21  }
  0x17   : > { %p1869_p11 = por %p151_p10, %p63_p3  ;;  %s2372_s28 = sand.u32 1, %s1761_s14  }
  0x18   : > { %2385 = sst [smem:[#allocation17_spill]] %s1867_s26  ;;  %s1878_s29 = sshll.u32 %s2372_s28, 5 }
  0x19   : > { %s2386_s27 = scalar_select %p1869_p11, 1, 0 }
  0x1a   : > { %s1881_s30 = sshll.u32 %s1769_s16, 9  ;;  %p1885_p0 = pnand %p1477_p13, %p1850_p4 }
  0x1b   : > { %s194_s5 = sand.u32 1, %s1773_s17   ;;  %s2388_s1 = sld [smem:[#allocation18_spill]] }
  0x1c   : > { %s198_s9 = scalar_lea.vmem [#allocation8], %s1878_s29  ;;  %s1901_s11 = scalar_lea.sflag [#allocation9], %s194_s5 }
  0x1d   : > { %s207_s10 = sshll.u32 %s198_s9, 4  ;;  %p1907_p4 = pneg %p1885_p0  ;;  %s1898_s10 = int_to_ptr.vmem [resolvable:$true] %s207_s10 }
  0x21   : > { %s1894_s8 = scalar_lea.hbm %s2388_s1, %s1881_s30  ;;  %s1602_s6 = scalar_lea.hbm %s2388_s1, 1024 }
  0x22   : > { %s1597_s19 = scalar_lea.hbm %s1894_s8, 512  ;;  %p1603_p7 = scmp.lt.u32.totalorder %s1894_s8, %s2388_s1 }
  0x23   : > { %p1598_p3 = scmp.ne.s32.totalorder %s1894_s8, %s1597_s19  ;;  %p1604_p10 = scmp.lt.u32.totalorder %s1602_s6, %s1597_s19 }
  0x24   : > { %p1606_p12 = scmp.lt.u32.totalorder %s1597_s19, %s1894_s8 }
  0x25   : > { %p1600_p5 = pnand %p1907_p4, %p1598_p3  ;;  %p1605_p13 = por %p1604_p10, %p1603_p7 }
  0x27   : > { %p1601_p6 = pneg %p1600_p5  ;;  %p1607_p1 = por %p1606_p12, %p1605_p13 }
  0x29   : > { %p1608_p2 = pnand %p1607_p1, %p1601_p6 }
  0x2b   : > { %1611 = shalt.err (!%p1608_p2)
}
  0x2c   : > { %s1612_s5 = scalar_lea.vmem %s1898_s10, 512  ;;  %s1775_s22 = smov [#allocation8]  }
  0x2d   : > { %p1613_p3 = scmp.ne.s32.totalorder %s1898_s10, %s1612_s5  ;;  %s1617_s23 = sshll.u32 %s1775_s22, 4  ;;  %s1618_s23 = int_to_ptr.vmem [resolvable:$false] %s1617_s23 }
  0x2e   : > { %s1619_s7 = scalar_lea.vmem %s1618_s23, 1024  ;;  %p1620_p9 = scmp.lt.s32.totalorder %s1898_s10, %s1618_s23 }
  0x2f   : > { %p1615_p5 = pnand %p1613_p3, %p1907_p4  ;;  %p1621_p8 = scmp.lt.s32.totalorder %s1619_s7, %s1612_s5 }
  0x31   : > { %p1616_p11 = pneg %p1615_p5  ;;  %p1622_p7 = por %p1621_p8, %p1620_p9 }
  0x33   : > { %p1623_p10 = pnand %p1622_p7, %p1616_p11 }
  0x35   : > { %1626 = shalt.err (!%p1623_p10)
}
  0x36   : > { %s2373_s19 = smov 64   ;;  %s2375_s6 = smov 4  }
  0x37   : > { %1469 = dma.hbm_to_vmem [thread:$0]  (!%p1885_p0), %s1894_s8, 512, %s1898_s10, %s1901_s11, %s2373_s19, %s2373_s19, %s2375_s6  }
  0x38   : > { %p2390_p8 = scmp.lt.s32.totalorder %s1773_s17, 3  ;;  %p2391_p9 = scmp.ge.s32.totalorder %s1773_s17, 1 }
  0x39   : > { %s1946_s23 = scalar_lea.hbm %s2366_s0, %s1881_s30  ;;  %s175_s7 = scalar_lea.vmem [#allocation5], %s1878_s29 }
  0x3a   : > { %p1938_p11 = pnand %p2391_p9, %p2390_p8  ;;  %s184_s28 = sshll.u32 %s175_s7, 4  ;;  %s1949_s28 = int_to_ptr.vmem [resolvable:$true] %s184_s28 }
  0x3b   : > { %s1955_s19 = scalar_lea.hbm %s2368_s2, %s1881_s30  ;;  %s2393_s6 = sand.u32 1, %s1761_s14  }
  0x3c   : > { %s2392_s9 = scalar_select %p1938_p11, 1, 0 }
  0x3d   : > { %s1959_s1 = scalar_lea.sflag [#allocation6], %s2393_s6  ;;  %s1627_s20 = scalar_lea.hbm %s1946_s23, 512 }
  0x3e   : > { %p1628_p12 = scmp.ne.s32.totalorder %s1946_s23, %s1627_s20  ;;  %s1632_s16 = scalar_lea.hbm %s2366_s0, 1024 }
  0x3f   : > { %p1633_p6 = scmp.lt.u32.totalorder %s1946_s23, %s2366_s0  ;;  %p1634_p13 = scmp.lt.u32.totalorder %s1632_s16, %s1627_s20 }
  0x40   : > { %p1630_p1 = pnand %p1628_p12, %p1907_p4  ;;  %p1636_p5 = scmp.lt.u32.totalorder %s1627_s20, %s1946_s23 }
  0x41   : > { %p1635_p3 = por %p1634_p13, %p1633_p6 }
  0x42   : > { %p1631_p2 = pneg %p1630_p1 }
  0x43   : > { %p1637_p7 = por %p1636_p5, %p1635_p3 }
  0x45   : > { %p1638_p10 = pnand %p1637_p7, %p1631_p2 }
  0x47   : > { %1641 = shalt.err (!%p1638_p10)
}
  0x48   : > { %s1642_s30 = scalar_lea.vmem %s1949_s28, 512  ;;  %s1778_s6 = smov [#allocation5]  }
  0x49   : > { %p1643_p8 = scmp.ne.s32.totalorder %s1949_s28, %s1642_s30  ;;  %s1647_s8 = sshll.u32 %s1778_s6, 4  ;;  %s1648_s8 = int_to_ptr.vmem [resolvable:$false] %s1647_s8 }
  0x4a   : > { %s1649_s26 = scalar_lea.vmem %s1648_s8, 1024  ;;  %p1650_p1 = scmp.lt.s32.totalorder %s1949_s28, %s1648_s8 }
  0x4b   : > { %p1645_p9 = pnand %p1643_p8, %p1907_p4  ;;  %p1651_p11 = scmp.lt.s32.totalorder %s1649_s26, %s1642_s30 }
  0x4d   : > { %p1646_p12 = pneg %p1645_p9  ;;  %p1652_p6 = por %p1651_p11, %p1650_p1 }
  0x4f   : > { %p1653_p13 = pnand %p1652_p6, %p1646_p12 }
  0x51   : > { %1656 = shalt.err (!%p1653_p13)
}
  0x52   : > { %s2394_s16 = smov 4   ;;  %s2395_s20 = smov 64  }
  0x53   : > { %1466 = dma.hbm_to_vmem [thread:$0]  (!%p1885_p0), %s1946_s23, 512, %s1949_s28, %s1959_s1, %s2395_s20, %s2395_s20, %s2394_s16  }
  0x54   : > { %s221_s10 = scalar_lea.vmem [#allocation10], %s1878_s29  ;;  %s1657_s22 = scalar_lea.hbm %s1955_s19, 512 }
  0x55   : > { %s230_s5 = sshll.u32 %s221_s10, 4  ;;  %p1658_p11 = scmp.ne.s32.totalorder %s1955_s19, %s1657_s22  ;;  %s1987_s5 = int_to_ptr.vmem [resolvable:$true] %s230_s5 }
  0x56   : > { %s1662_s6 = scalar_lea.hbm %s2368_s2, 1024  ;;  %p1663_p5 = scmp.lt.u32.totalorder %s1955_s19, %s2368_s2 }
  0x57   : > { %p1660_p2 = pnand %p1658_p11, %p1907_p4  ;;  %p1664_p7 = scmp.lt.u32.totalorder %s1662_s6, %s1657_s22 }
  0x58   : > { %p1666_p8 = scmp.lt.u32.totalorder %s1657_s22, %s1955_s19 }
  0x59   : > { %p1661_p3 = pneg %p1660_p2  ;;  %p1665_p10 = por %p1664_p7, %p1663_p5 }
  0x5b   : > { %p1667_p9 = por %p1666_p8, %p1665_p10 }
  0x5d   : > { %p1668_p12 = pnand %p1667_p9, %p1661_p3 }
  0x5f   : > { %1671 = shalt.err (!%p1668_p12)
}
  0x60   : > { %s1672_s1 = scalar_lea.vmem %s1987_s5, 512  ;;  %s1779_s28 = smov [#allocation10]  }
  0x61   : > { %p1673_p1 = scmp.ne.s32.totalorder %s1987_s5, %s1672_s1  ;;  %s1677_s29 = sshll.u32 %s1779_s28, 4  ;;  %s1678_s29 = int_to_ptr.vmem [resolvable:$false] %s1677_s29 }
  0x62   : > { %s1679_s23 = scalar_lea.vmem %s1678_s29, 1024  ;;  %p1680_p11 = scmp.lt.s32.totalorder %s1987_s5, %s1678_s29 }
  0x63   : > { %p1675_p6 = pnand %p1673_p1, %p1907_p4  ;;  %p1681_p2 = scmp.lt.s32.totalorder %s1679_s23, %s1672_s1 }
  0x65   : > { %p1676_p13 = pneg %p1675_p6  ;;  %p1682_p5 = por %p1681_p2, %p1680_p11 }
  0x67   : > { %p1683_p7 = pnand %p1682_p5, %p1676_p13 }
  0x69   : > { %1686 = shalt.err (!%p1683_p7)
}
  0x6a   : > { %1472 = dma.hbm_to_vmem [thread:$0]  (!%p1885_p0), %s1955_s19, 512, %s1987_s5, %s1901_s11, %s2395_s20, %s2395_s20, %s2394_s16  }
  0x6b   : > { %p2396_p4 = scmp.ne.s32.totalorder %s2392_s9, 0 }
  0x6c   : > { %s2017_s21 = sand.u32 (!%p2396_p4), 1, %s1757_s13   ;;  %p2397_p3 = scmp.ne.s32.totalorder (!%p2396_p4), %s2383_s24, 0 }
  0x6d   : > { %242 = sbr.rel (%p2396_p4) target bundleno = 965 (0x3c5), region = 32  ;;  %s2020_s10 = sshll.u32 (!%p2396_p4), %s2017_s21, 5 }
  0x6e   : > { %s245_s4 = scalar_lea.sflag (!%p2396_p4), [#allocation6], %s2017_s21  ;;  %s2024_s22 = scalar_lea.vmem (!%p2396_p4), [#allocation5], %s2020_s10 }
  0x74   : > { %1740 = dma.done.wait (%p2397_p3), %s245_s4, 512  }
  0x75   : > { %1742 = vsyncadd (%p2397_p3), %s245_s4, 4294966784  ;;  %s253_s11 = sand.u32 1, %s1838_s18   ;;  %s257_s9 = scalar_lea.vmem [#allocation8], %s2020_s10 }
  0x76   : > { %s254_s19 = scalar_lea.sflag [#allocation9], %s253_s11 }
  0x77   : > { %1744 = dma.done.wait (%p2397_p3), %s254_s19, 1024  }
  0x78   : > { %1746 = vsyncadd (%p2397_p3), %s254_s19, 4294966272  ;;  %vm325_vm0 = vcmask 64512   ;;  %v1780_v0 = vmov 0.0   ;;  %vm1781_vm1 = vmmov 0   ;;  %v1537_v1 = vld [vmem:[%s257_s9] sm:$0xff]   ;;  %v1538_v2 = vld [vmem:[%s257_s9 + $0x8] sm:$0xff]  }
  0x79   : > { %1407 = vmatprep.subr.bf16.mxu0 %v1780_v0  ;;  %1413 = vmatprep.subr.bf16.mxu1 %v1780_v0  ;;  %326 = vst.msk [vmem:[#allocation4] sm:$0xff] %vm325_vm0, %v1780_v0  ;;  %327 = vst.msk [vmem:[#allocation4 + $0x8] sm:$0xff] %vm325_vm0, %v1780_v0  ;;  %v365_v3 = vsel %vm325_vm0, %v1537_v1, 0  ;;  %v422_v4 = vsel %vm325_vm0, %v1538_v2, 0  ;;  %v1541_v5 = vld [vmem:[%s257_s9 + $0x10] sm:$0xff]   ;;  %v1542_v6 = vld [vmem:[%s257_s9 + $0x18] sm:$0xff]  }
  0x7a   : > { %328 = vst.msk [vmem:[#allocation4 + $0x10] sm:$0xff] %vm325_vm0, %v1780_v0  ;;  %329 = vst.msk [vmem:[#allocation4 + $0x18] sm:$0xff] %vm325_vm0, %v1780_v0  ;;  %1409 = vmatprep.mubr.msk.bf16.mxu0 %vm1781_vm1, %v1780_v0  ;;  %1415 = vmatprep.mubr.msk.bf16.mxu1 %vm1781_vm1, %v1780_v0  ;;  %v1539_v7 = vld [vmem:[%s2024_s22] sm:$0xff]   ;;  %v1540_v8 = vld [vmem:[%s2024_s22 + $0x8] sm:$0xff]   ;;  %v479_v9 = vsel %vm325_vm0, %v1541_v5, 0  ;;  %v536_v10 = vsel %vm325_vm0, %v1542_v6, 0 }
  0x7b   : > { %330 = vst.msk [vmem:[#allocation4 + $0x20] sm:$0xff] %vm325_vm0, %v1780_v0  ;;  %331 = vst.msk [vmem:[#allocation4 + $0x28] sm:$0xff] %vm325_vm0, %v1780_v0  ;;  %1408 = vmatpush3.bf16.xpose.msra.mxu0 %v365_v3  ;;  %1414 = vmatpush3.bf16.xpose.msra.mxu1 %v422_v4  ;;  %v1543_v11 = vld [vmem:[%s2024_s22 + $0x10] sm:$0xff]   ;;  %v1544_v12 = vld [vmem:[%s2024_s22 + $0x18] sm:$0xff]   ;;  %vm308_vm2 = vcmask 7168   ;;  %v1782_v13 = vmov -inf  }
  0x7c   : > { %332 = vst.msk [vmem:[#allocation4 + $0x30] sm:$0xff] %vm325_vm0, %v1780_v0  ;;  %333 = vst.msk [vmem:[#allocation4 + $0x38] sm:$0xff] %vm325_vm0, %v1780_v0  ;;  %1419 = vmatprep.subr.bf16.mxu0 %v1780_v0  ;;  %1425 = vmatprep.subr.bf16.mxu1 %v1780_v0  ;;  %vm587_vm3 = vcmask 130048   ;;  %v1783_v38 = vmov 0   ;;  %s2217_s18 = scalar_lea.vmem [#allocation10], %s2020_s10  ;;  %vm1164_vm4 = vcmask 60416  }
  0x7d   : > { %311 = vst.msk [vmem:[#allocation2 + $0x10] sm:$0xff] %vm308_vm2, %v1782_v13  ;;  %309 = vst.msk [vmem:[#allocation2] sm:$0xff] %vm308_vm2, %v1782_v13  ;;  %1536 = vset.pattern.permute.xlu1 %v1783_v38  ;;  %1535 = vset.pattern.permute.xlu0 %v1783_v38  ;;  %s2292_s24 = scalar_lea.vmem [#allocation11], %s2020_s10  ;;  %s1390_s16 = sshll.u32 %s1765_s15, 9 }
  0x7e   : > { %310 = vst.msk [vmem:[#allocation2 + $0x8] sm:$0xff] %vm308_vm2, %v1782_v13  ;;  %312 = vst.msk [vmem:[#allocation2 + $0x18] sm:$0xff] %vm308_vm2, %v1782_v13  ;;  %s1189_s20 = sshll.u32 %s2292_s24, 4  ;;  %s2313_s30 = scalar_lea.hbm %s2369_s3, %s1390_s16  ;;  %s2315_s20 = int_to_ptr.vmem [resolvable:$true] %s1189_s20 }
  0x7f   : > { %313 = vst.msk [vmem:[#allocation2 + $0x20] sm:$0xff] %vm308_vm2, %v1782_v13  ;;  %314 = vst.msk [vmem:[#allocation2 + $0x28] sm:$0xff] %vm308_vm2, %v1782_v13  ;;  %s1174_s15 = scalar_lea.sflag [#allocation7], %s2017_s21  ;;  %s1687_s6 = scalar_lea.vmem %s2315_s20, 512 }
  0x80   : > { %315 = vst.msk [vmem:[#allocation2 + $0x30] sm:$0xff] %vm308_vm2, %v1782_v13  ;;  %316 = vst.msk [vmem:[#allocation2 + $0x38] sm:$0xff] %vm308_vm2, %v1782_v13  ;;  %p1688_p0 = scmp.ne.s32.totalorder %s2315_s20, %s1687_s6  ;;  %p2398_p10 = scmp.ne.s32.totalorder %s2384_s25, 0 }
  0x81   : > { %317 = vst.msk [vmem:[#allocation3] sm:$0xff] %vm308_vm2, %v1780_v0  ;;  %318 = vst.msk [vmem:[#allocation3 + $0x8] sm:$0xff] %vm308_vm2, %v1780_v0  ;;  %s1784_s8 = smov [#allocation11]  }
  0x82   : > { %1410 = vmatmul.mubr.msk.bf16.vlgmr.msra.gmra.mrb[0].mxu0 %vm325_vm0, %v1539_v7  ;;  %1416 = vmatmul.mubr.msk.bf16.vlgmr.msra.gmra.mrb[0].mxu1 %vm325_vm0, %v1540_v8  ;;  %319 = vst.msk [vmem:[#allocation3 + $0x10] sm:$0xff] %vm308_vm2, %v1780_v0  ;;  %320 = vst.msk [vmem:[#allocation3 + $0x18] sm:$0xff] %vm308_vm2, %v1780_v0  ;;  %v1545_v8 = vld [vmem:[%s2217_s18] sm:$0xff]   ;;  %p1689_p8 = pnand %p1688_p0, %p2398_p10  ;;  %s1691_s26 = sshll.u32 %s1784_s8, 4  ;;  %s1692_s26 = int_to_ptr.vmem [resolvable:$false] %s1691_s26 }
  0x83   : > { %1420 = vmatpush3.bf16.xpose.msra.mxu0 %v479_v9  ;;  %1426 = vmatpush3.bf16.xpose.msra.mxu1 %v536_v10  ;;  %321 = vst.msk [vmem:[#allocation3 + $0x20] sm:$0xff] %vm308_vm2, %v1780_v0  ;;  %322 = vst.msk [vmem:[#allocation3 + $0x28] sm:$0xff] %vm308_vm2, %v1780_v0  ;;  %v1546_v9 = vld [vmem:[%s2217_s18 + $0x8] sm:$0xff]   ;;  %s1693_s1 = scalar_lea.vmem %s1692_s26, 1024  ;;  %p1694_p12 = scmp.lt.s32.totalorder %s2315_s20, %s1692_s26 }
  0x84   : > { %1421 = vmatprep.mubr.msk.bf16.mxu0 %vm1781_vm1, %v1780_v0  ;;  %1427 = vmatprep.mubr.msk.bf16.mxu1 %vm1781_vm1, %v1780_v0  ;;  %323 = vst.msk [vmem:[#allocation3 + $0x30] sm:$0xff] %vm308_vm2, %v1780_v0  ;;  %324 = vst.msk [vmem:[#allocation3 + $0x38] sm:$0xff] %vm308_vm2, %v1780_v0  ;;  %v2138_v39 = vld [vmem:[#allocation2] sm:$0xff]  ;;  %v2140_v40 = vld [vmem:[#allocation2 + $0x10] sm:$0xff]  ;;  %p1690_p9 = pneg %p1689_p8  ;;  %p1695_p1 = scmp.lt.s32.totalorder %s1693_s1, %s1687_s6 }
  0x85   : > { %1431 = vmatprep.subr.bf16.mxu0 %v1780_v0  ;;  %1437 = vmatprep.subr.bf16.mxu1 %v1780_v0  ;;  %v2148_v45 = vld [vmem:[#allocation2 + $0x8] sm:$0xff]  ;;  %v2155_v47 = vld [vmem:[#allocation2 + $0x18] sm:$0xff] }
  0x86   : > { %v2168_v53 = vld [vmem:[#allocation2 + $0x20] sm:$0xff]  ;;  %v2179_v57 = vld [vmem:[#allocation2 + $0x28] sm:$0xff]  ;;  %p1696_p6 = por %p1695_p1, %p1694_p12 }
  0x87   : > { %v2184_v60 = vld [vmem:[#allocation2 + $0x30] sm:$0xff]  ;;  %v2194_v1 = vld [vmem:[#allocation2 + $0x38] sm:$0xff] }
  0x88   : > { %p1697_p13 = pnand %p1696_p6, %p1690_p9 }
  0x8a   : > { %1422 = vmatmul.mubr.msk.bf16.vlgmr.msra.gmra.mrb[4].mxu0 %vm325_vm0, %v1543_v11  ;;  %1428 = vmatmul.mubr.msk.bf16.vlgmr.msra.gmra.mrb[4].mxu1 %vm325_vm0, %v1544_v12 }
  0x8b   : > { %1433 = vmatprep.mubr.msk.bf16.mxu0 %vm1781_vm1, %v1780_v0  ;;  %1439 = vmatprep.mubr.msk.bf16.mxu1 %vm1781_vm1, %v1780_v0 }
  0x8c   : > { %1432 = vmatpush3.bf16.msra.mxu0 %v1545_v8  ;;  %1438 = vmatpush3.bf16.msra.mxu1 %v1546_v9 }
  0x8d   : > { %1443 = vmatprep.subr.bf16.mxu0 %v1780_v0  ;;  %1449 = vmatprep.subr.bf16.mxu1 %v1780_v0 }
 0x155   : > { %v2106_v14 = vpop.f32.mrb[0].mxu0  ;;  %v2108_v15 = vpop.f32.mrb[0].mxu1 }
 0x156   : > { %v1411_v16 = vpop.f32.mrb[1].mxu0  ;;  %v588_v17 = vsel %vm587_vm3, %v2106_v14, -inf  ;;  %v1417_v18 = vpop.f32.mrb[1].mxu1  ;;  %v594_v19 = vsel %vm587_vm3, %v2108_v15, -inf }
 0x157   : > { %589 = vmax.xlane.f32.xlu0 %v588_v17  ;;  %v2114_v20 = vpop.f32.mrb[2].mxu0  ;;  %595 = vmax.xlane.f32.xlu1 %v594_v19  ;;  %v2116_v21 = vpop.f32.mrb[2].mxu1 }
 0x158   : > { %v1412_v22 = vpop.f32.mrb[3].mxu0  ;;  %v1418_v23 = vpop.f32.mrb[3].mxu1  ;;  %v591_v24 = vsel %vm587_vm3, %v2114_v20, -inf  ;;  %v597_v25 = vsel %vm587_vm3, %v2116_v21, -inf }
 0x15b   : > { %592 = vmax.xlane.f32.xlu0 %v591_v24  ;;  %598 = vmax.xlane.f32.xlu1 %v597_v25 }
 0x15d   : > { %v2122_v26 = vpop.f32.mrb[4].mxu0  ;;  %v2124_v28 = vpop.f32.mrb[4].mxu1 }
 0x15e   : > { %v1423_v27 = vpop.f32.mrb[5].mxu0  ;;  %v600_v29 = vsel %vm587_vm3, %v2122_v26, -inf  ;;  %v1429_v31 = vpop.f32.mrb[5].mxu1  ;;  %v606_v35 = vsel %vm587_vm3, %v2124_v28, -inf }
 0x15f   : > { %v2128_v30 = vpop.f32.mrb[6].mxu0  ;;  %601 = vmax.xlane.f32.xlu0 %v600_v29  ;;  %v2132_v34 = vpop.f32.mrb[6].mxu1 }
 0x160   : > { %v1424_v32 = vpop.f32.mrb[7].mxu0  ;;  %v603_v33 = vsel %vm587_vm3, %v2128_v30, -inf  ;;  %v1430_v36 = vpop.f32.mrb[7].mxu1  ;;  %v609_v37 = vsel %vm587_vm3, %v2132_v34, -inf }
 0x161   : > { %604 = vmax.xlane.f32.xlu1 %v603_v33 }
 0x163   : > { %607 = vmax.xlane.f32.xlu0 %v606_v35 }
 0x165   : > { %610 = vmax.xlane.f32.xlu1 %v609_v37  ;;  %v1547_v37 = vld [vmem:[%s2217_s18 + $0x10] sm:$0xff]  }
 0x1e4   : > { %v590_v41 = vpop.xlane.xlu0 %589  ;;  %v596_v42 = vpop.xlane.xlu1 %595 }
 0x1e5   : > { %v2143_v43 = vmax.f32 %v2138_v39, %v590_v41  ;;  %v2146_v44 = vmax.f32 %v2140_v40, %v596_v42 }
 0x1e7   : > { %v620_v46 = vsub.f32 %v2138_v39, %v2143_v43  ;;  %1049 = vst.msk [vmem:[#allocation2] sm:$0xff] %vm308_vm2, %v2143_v43  ;;  %646 = vperm.xlu0 %1535, %v2143_v43   ;;  %v622_v48 = vsub.f32 %v2140_v40, %v2146_v44  ;;  %1051 = vst.msk [vmem:[#allocation2 + $0x10] sm:$0xff] %vm308_vm2, %v2146_v44  ;;  %656 = vperm.xlu1 %1536, %v2146_v44  }
 0x1e8   : > { %v593_v49 = vpop.xlane.xlu0 %592  ;;  %v599_v50 = vpop.xlane.xlu1 %598 }
 0x1e9   : > { %v2163_v51 = vmax.f32 %v2148_v45, %v593_v49  ;;  %v2166_v52 = vmax.f32 %v2155_v47, %v599_v50  ;;  %v632_v39 = vmul.f32 1.442695, %v622_v48 }
 0x1eb   : > { %v621_v54 = vsub.f32 %v2148_v45, %v2163_v51  ;;  %1050 = vst.msk [vmem:[#allocation2 + $0x8] sm:$0xff] %vm308_vm2, %v2163_v51  ;;  %v623_v55 = vsub.f32 %v2155_v47, %v2166_v52  ;;  %1052 = vst.msk [vmem:[#allocation2 + $0x18] sm:$0xff] %vm308_vm2, %v2166_v52  ;;  %651 = vperm.xlu1 %1536, %v2163_v51  }
 0x1ec   : > { %v602_v56 = vpop.xlane.xlu0 %601 }
 0x1ed   : > { %v2182_v58 = vmax.f32 %v2168_v53, %v602_v56 }
 0x1ee   : > { %v605_v59 = vpop.xlane.xlu1 %604 }
 0x1ef   : > { %v624_v61 = vsub.f32 %v2168_v53, %v2182_v58  ;;  %1053 = vst.msk [vmem:[#allocation2 + $0x20] sm:$0xff] %vm308_vm2, %v2182_v58  ;;  %v2191_v62 = vmax.f32 %v2179_v57, %v605_v59  ;;  %661 = vperm.xlu1 %1536, %v2166_v52  }
 0x1f0   : > { %v608_v63 = vpop.xlane.xlu0 %607 }
 0x1f1   : > { %v625_v2 = vsub.f32 %v2179_v57, %v2191_v62  ;;  %1054 = vst.msk [vmem:[#allocation2 + $0x28] sm:$0xff] %vm308_vm2, %v2191_v62  ;;  %v2201_v3 = vmax.f32 %v2184_v60, %v608_v63  ;;  %v636_v45 = vmul.f32 1.442695, %v624_v61  ;;  %v708_v57 = vld [vmem:[#allocation3] sm:$0xff] }
 0x1f2   : > { %v611_v4 = vpop.xlane.xlu1 %610 }
 0x1f3   : > { %v626_v5 = vsub.f32 %v2184_v60, %v2201_v3  ;;  %1055 = vst.msk [vmem:[#allocation2 + $0x30] sm:$0xff] %vm308_vm2, %v2201_v3  ;;  %v2208_v6 = vmax.f32 %v2194_v1, %v611_v4  ;;  %666 = vperm.xlu1 %1536, %v2182_v58   ;;  %v638_v43 = vmul.f32 1.442695, %v625_v2  ;;  %v710_v58 = vld [vmem:[#allocation3 + $0x10] sm:$0xff] }
 0x1f5   : > { %v627_v7 = vsub.f32 %v2194_v1, %v2208_v6  ;;  %1056 = vst.msk [vmem:[#allocation2 + $0x38] sm:$0xff] %vm308_vm2, %v2208_v6  ;;  %v640_v40 = vmul.f32 1.442695, %v626_v5 }
 0x1f7   : > { %676 = vperm.xlu1 %1536, %v2201_v3   ;;  %v709_v3 = vld [vmem:[#allocation3 + $0x8] sm:$0xff] }
 0x1fb   : > { %671 = vperm.xlu1 %1536, %v2191_v62  }
 0x1ff   : > { %681 = vperm.xlu1 %1536, %v2208_v6  }
 0x266   : > { %v647_v10 = vpop.permute.xlu0 %646  ;;  %v657_v11 = vpop.permute.xlu1 %656 }
 0x267   : > { %v684_v12 = vsub.f32 %v2106_v14, %v647_v10  ;;  %v686_v13 = vsub.f32 %v2108_v15, %v657_v11 }
 0x269   : > { %v692_v16 = vmul.f32 1.442695, %v684_v12  ;;  %v696_v17 = vmul.f32 1.442695, %v686_v13 }
 0x26a   : > { %v652_v18 = vpop.permute.xlu1 %651 }
 0x26b   : > { %1549 = vpow2.f32 %v692_v16  ;;  %v685_v19 = vsub.f32 %v2114_v20, %v652_v18 }
 0x26c   : > { %1551 = vpow2.f32 %v696_v17 }
 0x26d   : > { %v694_v22 = vmul.f32 1.442695, %v685_v19  ;;  %v630_v19 = vmul.f32 1.442695, %v621_v54 }
 0x26e   : > { %v662_v23 = vpop.permute.xlu1 %661 }
 0x26f   : > { %1553 = vpow2.f32 %v694_v22  ;;  %v687_v24 = vsub.f32 %v2116_v21, %v662_v23  ;;  %v634_v22 = vmul.f32 1.442695, %v623_v55  ;;  %v711_v23 = vld [vmem:[#allocation3 + $0x18] sm:$0xff] }
 0x271   : > { %v698_v25 = vmul.f32 1.442695, %v687_v24 }
 0x272   : > { %v667_v27 = vpop.permute.xlu1 %666 }
 0x273   : > { %1555 = vpow2.f32 %v698_v25  ;;  %v688_v14 = vsub.f32 %v2122_v26, %v667_v27 }
 0x275   : > { %v1550_v29 = vpop.eup %1549  ;;  %v700_v31 = vmul.f32 1.442695, %v688_v14  ;;  %v712_v14 = vld [vmem:[#allocation3 + $0x20] sm:$0xff] }
 0x276   : > { %v1552_v15 = vpop.eup %1551  ;;  %v724_v32 = vsel %vm587_vm3, %v1550_v29, 0.0  ;;  %v677_v33 = vpop.permute.xlu1 %676 }
 0x277   : > { %v730_v35 = vsel %vm587_vm3, %v1552_v15, 0.0  ;;  %725 = vadd.xlane.f32.xlu1 %v724_v32  ;;  %1557 = vpow2.f32 %v700_v31  ;;  %v690_v20 = vsub.f32 %v2124_v28, %v677_v33  ;;  %v1548_v28 = vld [vmem:[%s2217_s18 + $0x18] sm:$0xff]  }
 0x278   : > { %731 = vadd.xlane.f32.xlu0 %v730_v35  ;;  %v714_v35 = vld [vmem:[#allocation3 + $0x30] sm:$0xff] }
 0x279   : > { %v1554_v21 = vpop.eup %1553  ;;  %v704_v36 = vmul.f32 1.442695, %v690_v20 }
 0x27a   : > { %v672_v38 = vpop.permute.xlu1 %671  ;;  %v727_v26 = vsel %vm587_vm3, %v1554_v21, 0.0  ;;  %v821_v41 = vpack.c.bf16 %v1554_v21, %v1550_v29 }
 0x27b   : > { %1559 = vpow2.f32 %v704_v36  ;;  %v689_v42 = vsub.f32 %v2128_v30, %v672_v38  ;;  %v713_v38 = vld [vmem:[#allocation3 + $0x28] sm:$0xff] }
 0x27c   : > { %728 = vadd.xlane.f32.xlu0 %v727_v26  ;;  %1434 = vmatmul.mubr.msk.bf16.vlgmr.msra.gmra.mrb[8].mxu0 %vm587_vm3, %v821_v41 }
 0x27d   : > { %v1556_v49 = vpop.eup %1555  ;;  %v702_v50 = vmul.f32 1.442695, %v689_v42  ;;  %1444 = vmatpush3.bf16.msra.mxu0 %v1547_v37  ;;  %1445 = vmatprep.mubr.msk.bf16.mxu0 %vm1781_vm1, %v1780_v0 }
 0x27e   : > { %v682_v56 = vpop.permute.xlu1 %681  ;;  %v733_v59 = vsel %vm587_vm3, %v1556_v49, 0.0  ;;  %v822_v63 = vpack.c.bf16 %v1556_v49, %v1552_v15 }
 0x27f   : > { %1561 = vpow2.f32 %v702_v50  ;;  %v691_v4 = vsub.f32 %v2132_v34, %v682_v56  ;;  %734 = vadd.xlane.f32.xlu1 %v733_v59 }
 0x280   : > { %1440 = vmatmul.mubr.msk.bf16.vlgmr.msra.gmra.mrb[8].mxu1 %vm587_vm3, %v822_v63 }
 0x281   : > { %v1558_v30 = vpop.eup %1557  ;;  %v706_v8 = vmul.f32 1.442695, %v691_v4  ;;  %1450 = vmatpush3.bf16.msra.mxu1 %v1548_v28  ;;  %1451 = vmatprep.mubr.msk.bf16.mxu1 %vm1781_vm1, %v1780_v0  ;;  %v628_v0 = vmul.f32 1.442695, %v620_v46  ;;  %v642_v46 = vmul.f32 1.442695, %v627_v7 }
 0x282   : > { %v736_v9 = vsel %vm587_vm3, %v1558_v30, 0.0  ;;  %v715_v28 = vld [vmem:[#allocation3 + $0x38] sm:$0xff] }
 0x283   : > { %1563 = vpow2.f32 %v706_v8  ;;  %737 = vadd.xlane.f32.xlu0 %v736_v9 }
 0x284   : > { %1565 = vpow2.f32 %v628_v0 }
 0x285   : > { %v1560_v10 = vpop.eup %1559  ;;  %1567 = vpow2.f32 %v630_v19  ;;  %v765_v19 = vld [vmem:[#allocation4] sm:$0xff] }
 0x286   : > { %v742_v11 = vsel %vm587_vm3, %v1560_v10, 0.0  ;;  %1569 = vpow2.f32 %v634_v22 }
 0x287   : > { %743 = vadd.xlane.f32.xlu0 %v742_v11  ;;  %1571 = vpow2.f32 %v632_v39  ;;  %v766_v39 = vld [vmem:[#allocation4 + $0x8] sm:$0xff] }
 0x288   : > { %1573 = vpow2.f32 %v638_v43 }
 0x289   : > { %v1562_v12 = vpop.eup %1561  ;;  %1575 = vpow2.f32 %v636_v45  ;;  %v767_v45 = vld [vmem:[#allocation4 + $0x10] sm:$0xff] }
 0x28a   : > { %v739_v34 = vsel %vm587_vm3, %v1562_v12, 0.0  ;;  %v823_v13 = vpack.c.bf16 %v1562_v12, %v1558_v30  ;;  %1577 = vpow2.f32 %v642_v46 }
 0x28b   : > { %740 = vadd.xlane.f32.xlu1 %v739_v34  ;;  %1579 = vpow2.f32 %v640_v40 }
 0x28c   : > { %1446 = vmatmul.mubr.msk.bf16.vlgmr.msra.gmra.mrb[12].mxu0 %vm587_vm3, %v823_v13 }
 0x28d   : > { %v1564_v16 = vpop.eup %1563 }
 0x28e   : > { %v745_v17 = vsel %vm587_vm3, %v1564_v16, 0.0  ;;  %v824_v18 = vpack.c.bf16 %v1564_v16, %v1560_v10  ;;  %v1566_v47 = vpop.eup %1565 }
 0x28f   : > { %746 = vadd.xlane.f32.xlu1 %v745_v17  ;;  %v1568_v44 = vpop.eup %1567  ;;  %v716_v60 = vmul.f32 %v1566_v47, %v708_v57 }
 0x290   : > { %1452 = vmatmul.mubr.msk.bf16.vlgmr.msra.gmra.mrb[12].mxu1 %vm587_vm3, %v824_v18  ;;  %v1570_v48 = vpop.eup %1569  ;;  %v717_v6 = vmul.f32 %v1568_v44, %v709_v3 }
 0x291   : > { %v1572_v51 = vpop.eup %1571  ;;  %v719_v25 = vmul.f32 %v1570_v48, %v711_v23  ;;  %v770_v23 = vld [vmem:[#allocation4 + $0x28] sm:$0xff] }
 0x292   : > { %v1574_v52 = vpop.eup %1573  ;;  %v718_v62 = vmul.f32 %v1572_v51, %v710_v58 }
 0x293   : > { %v1576_v53 = vpop.eup %1575  ;;  %v721_v42 = vmul.f32 %v1574_v52, %v713_v38 }
 0x294   : > { %v1578_v54 = vpop.eup %1577  ;;  %v720_v31 = vmul.f32 %v1576_v53, %v712_v14 }
 0x295   : > { %v1580_v55 = vpop.eup %1579  ;;  %v723_v63 = vmul.f32 %v1578_v54, %v715_v28 }
 0x296   : > { %v722_v36 = vmul.f32 %v1580_v55, %v714_v35 }
 0x29d   : > { %775 = vperm.xlu0 %1535, %v1566_v47  }
 0x2a0   : > { %780 = vperm.xlu1 %1536, %v1568_v44  }
 0x2a1   : > { %790 = vperm.xlu0 %1535, %v1570_v48  }
 0x2a4   : > { %785 = vperm.xlu1 %1536, %v1572_v51   ;;  %v768_v51 = vld [vmem:[#allocation4 + $0x18] sm:$0xff] }
 0x2a5   : > { %800 = vperm.xlu0 %1535, %v1574_v52  }
 0x2a8   : > { %795 = vperm.xlu1 %1536, %v1576_v53  }
 0x2a9   : > { %810 = vperm.xlu0 %1535, %v1578_v54  }
 0x2ac   : > { %805 = vperm.xlu1 %1536, %v1580_v55  }
 0x304   : > { %v726_v61 = vpop.xlane.xlu1 %725 }
 0x305   : > { %v748_v1 = vadd.f32 %v726_v61, %v716_v60  ;;  %v732_v2 = vpop.xlane.xlu0 %731 }
 0x306   : > { %v750_v5 = vadd.f32 %v732_v2, %v718_v62 }
 0x307   : > { %757 = vst.msk [vmem:[#allocation3] sm:$0xff] %vm308_vm2, %v748_v1 }
 0x308   : > { %759 = vst.msk [vmem:[#allocation3 + $0x10] sm:$0xff] %vm308_vm2, %v750_v5 }
 0x309   : > { %v729_v7 = vpop.xlane.xlu0 %728 }
 0x30a   : > { %v749_v24 = vadd.f32 %v729_v7, %v717_v6  ;;  %v769_v7 = vld [vmem:[#allocation4 + $0x20] sm:$0xff] }
 0x30c   : > { %758 = vst.msk [vmem:[#allocation3 + $0x8] sm:$0xff] %vm308_vm2, %v749_v24  ;;  %v735_v27 = vpop.xlane.xlu1 %734 }
 0x30d   : > { %v751_v29 = vadd.f32 %v735_v27, %v719_v25  ;;  %v771_v25 = vld [vmem:[#allocation4 + $0x30] sm:$0xff] }
 0x30e   : > { %v1068_v15 = vld [vmem:[#allocation3] sm:$0xff] }
 0x30f   : > { %1581 = vrcp.f32 %v1068_v15  ;;  %760 = vst.msk [vmem:[#allocation3 + $0x18] sm:$0xff] %vm308_vm2, %v751_v29  ;;  %v1070_v32 = vld [vmem:[#allocation3 + $0x10] sm:$0xff] }
 0x310   : > { %v738_v33 = vpop.xlane.xlu0 %737  ;;  %1583 = vrcp.f32 %v1070_v32  ;;  %v772_v32 = vld [vmem:[#allocation4 + $0x38] sm:$0xff] }
 0x311   : > { %v752_v20 = vadd.f32 %v738_v33, %v720_v31 }
 0x313   : > { %v1069_v21 = vld [vmem:[#allocation3 + $0x8] sm:$0xff]  ;;  %761 = vst.msk [vmem:[#allocation3 + $0x20] sm:$0xff] %vm308_vm2, %v752_v20 }
 0x314   : > { %1585 = vrcp.f32 %v1069_v21  ;;  %v744_v37 = vpop.xlane.xlu0 %743 }
 0x315   : > { %v754_v26 = vadd.f32 %v744_v37, %v722_v36 }
 0x316   : > { %v1071_v41 = vld [vmem:[#allocation3 + $0x18] sm:$0xff] }
 0x317   : > { %763 = vst.msk [vmem:[#allocation3 + $0x30] sm:$0xff] %vm308_vm2, %v754_v26  ;;  %1587 = vrcp.f32 %v1071_v41 }
 0x318   : > { %v741_v50 = vpop.xlane.xlu1 %740 }
 0x319   : > { %v1582_v49 = vpop.eup %1581  ;;  %v753_v56 = vadd.f32 %v741_v50, %v721_v42 }
 0x31a   : > { %1086 = vperm.xlu1 %1536, %v1582_v49   ;;  %v1072_v59 = vld [vmem:[#allocation3 + $0x20] sm:$0xff]  ;;  %v1584_v4 = vpop.eup %1583 }
 0x31b   : > { %762 = vst.msk [vmem:[#allocation3 + $0x28] sm:$0xff] %vm308_vm2, %v753_v56  ;;  %1589 = vrcp.f32 %v1072_v59 }
 0x31c   : > { %v747_v30 = vpop.xlane.xlu1 %746  ;;  %v776_v22 = vpop.permute.xlu0 %775 }
 0x31d   : > { %v755_v9 = vadd.f32 %v747_v30, %v723_v63  ;;  %v813_v43 = vmul.f32 %v776_v22, %v765_v19 }
 0x31e   : > { %v1586_v8 = vpop.eup %1585  ;;  %1096 = vperm.xlu1 %1536, %v1584_v4   ;;  %v1074_v10 = vld [vmem:[#allocation3 + $0x30] sm:$0xff] }
 0x31f   : > { %1091 = vperm.xlu0 %1535, %v1586_v8   ;;  %764 = vst.msk [vmem:[#allocation3 + $0x38] sm:$0xff] %vm308_vm2, %v755_v9  ;;  %1591 = vrcp.f32 %v1074_v10 }
 0x320   : > { %v781_v18 = vpop.permute.xlu1 %780  ;;  %v791_v52 = vpop.permute.xlu0 %790 }
 0x321   : > { %v1588_v11 = vpop.eup %1587  ;;  %v814_v40 = vmul.f32 %v781_v18, %v766_v39  ;;  %v816_v60 = vmul.f32 %v791_v52, %v768_v51 }
 0x322   : > { %v1073_v12 = vld [vmem:[#allocation3 + $0x28] sm:$0xff] }
 0x323   : > { %1101 = vperm.xlu0 %1535, %v1588_v11   ;;  %1593 = vrcp.f32 %v1073_v12 }
 0x324   : > { %v786_v46 = vpop.permute.xlu1 %785  ;;  %v801_v6 = vpop.permute.xlu0 %800 }
 0x325   : > { %v1590_v34 = vpop.eup %1589  ;;  %v815_v54 = vmul.f32 %v786_v46, %v767_v45  ;;  %v818_v29 = vmul.f32 %v801_v6, %v770_v23 }
 0x326   : > { %1106 = vperm.xlu1 %1536, %v1590_v34   ;;  %v1075_v13 = vld [vmem:[#allocation3 + $0x38] sm:$0xff] }
 0x327   : > { %1595 = vrcp.f32 %v1075_v13 }
 0x328   : > { %v796_v5 = vpop.permute.xlu1 %795  ;;  %v811_v33 = vpop.permute.xlu0 %810 }
 0x329   : > { %v1592_v16 = vpop.eup %1591  ;;  %v817_v24 = vmul.f32 %v796_v5, %v769_v7  ;;  %v820_v38 = vmul.f32 %v811_v33, %v772_v32 }
 0x32a   : > { %1116 = vperm.xlu1 %1536, %v1592_v16  }
 0x32c   : > { %v806_v27 = vpop.permute.xlu1 %805 }
 0x32d   : > { %v1594_v0 = vpop.eup %1593  ;;  %v819_v20 = vmul.f32 %v806_v27, %v771_v25 }
 0x32e   : > { %1111 = vperm.xlu0 %1535, %v1594_v0  }
 0x331   : > { %v1596_v17 = vpop.eup %1595 }
 0x332   : > { %1121 = vperm.xlu0 %1535, %v1596_v17  }
 0x34f   : > { %v876_v47 = vpop.f32.mrb[8].mxu0 }
 0x350   : > { %v1033_v44 = vadd.f32 %v876_v47, %v813_v43  ;;  %v1435_v48 = vpop.f32.mrb[9].mxu0 }
 0x351   : > { %v879_v53 = vpop.f32.mrb[10].mxu0 }
 0x352   : > { %1041 = vst.msk [vmem:[#allocation4] sm:$0xff] %vm325_vm0, %v1033_v44  ;;  %v1034_v55 = vadd.f32 %v879_v53, %v814_v40  ;;  %v1436_v57 = vpop.f32.mrb[11].mxu0 }
 0x353   : > { %v926_v58 = vpop.f32.mrb[8].mxu1 }
 0x354   : > { %1042 = vst.msk [vmem:[#allocation4 + $0x8] sm:$0xff] %vm325_vm0, %v1034_v55  ;;  %v1035_v61 = vadd.f32 %v926_v58, %v815_v54  ;;  %v1441_v62 = vpop.f32.mrb[9].mxu1 }
 0x355   : > { %v929_v1 = vpop.f32.mrb[10].mxu1 }
 0x356   : > { %1043 = vst.msk [vmem:[#allocation4 + $0x10] sm:$0xff] %vm325_vm0, %v1035_v61  ;;  %v1036_v2 = vadd.f32 %v929_v1, %v816_v60  ;;  %v1442_v3 = vpop.f32.mrb[11].mxu1 }
 0x358   : > { %1044 = vst.msk [vmem:[#allocation4 + $0x18] sm:$0xff] %vm325_vm0, %v1036_v2 }
 0x359   : > { %v1060_v28 = vld [vmem:[#allocation4] sm:$0xff] }
 0x35b   : > { %v1061_v8 = vld [vmem:[#allocation4 + $0x8] sm:$0xff] }
 0x35d   : > { %v1062_v4 = vld [vmem:[#allocation4 + $0x10] sm:$0xff] }
 0x35f   : > { %v976_v14 = vpop.f32.mrb[12].mxu0  ;;  %v1063_v13 = vld [vmem:[#allocation4 + $0x18] sm:$0xff] }
 0x360   : > { %v1037_v15 = vadd.f32 %v976_v14, %v817_v24  ;;  %v1447_v31 = vpop.f32.mrb[13].mxu0 }
 0x361   : > { %v979_v35 = vpop.f32.mrb[14].mxu0 }
 0x362   : > { %1045 = vst.msk [vmem:[#allocation4 + $0x20] sm:$0xff] %vm325_vm0, %v1037_v15  ;;  %v1038_v21 = vadd.f32 %v979_v35, %v818_v29  ;;  %v1448_v36 = vpop.f32.mrb[15].mxu0 }
 0x363   : > { %v1026_v37 = vpop.f32.mrb[12].mxu1 }
 0x364   : > { %1046 = vst.msk [vmem:[#allocation4 + $0x28] sm:$0xff] %vm325_vm0, %v1038_v21  ;;  %v1039_v26 = vadd.f32 %v1026_v37, %v819_v20  ;;  %v1453_v41 = vpop.f32.mrb[13].mxu1 }
 0x365   : > { %v1029_v42 = vpop.f32.mrb[14].mxu1 }
 0x366   : > { %1047 = vst.msk [vmem:[#allocation4 + $0x30] sm:$0xff] %vm325_vm0, %v1039_v26  ;;  %v1040_v49 = vadd.f32 %v1029_v42, %v820_v38  ;;  %v1454_v50 = vpop.f32.mrb[15].mxu1 }
 0x368   : > { %1048 = vst.msk [vmem:[#allocation4 + $0x38] sm:$0xff] %vm325_vm0, %v1040_v49 }
 0x369   : > { %v1064_v18 = vld [vmem:[#allocation4 + $0x20] sm:$0xff] }
 0x36b   : > { %v1065_v40 = vld [vmem:[#allocation4 + $0x28] sm:$0xff] }
 0x36d   : > { %v1066_v43 = vld [vmem:[#allocation4 + $0x30] sm:$0xff] }
 0x36f   : > { %v1067_v52 = vld [vmem:[#allocation4 + $0x38] sm:$0xff] }
 0x399   : > { %v1087_v56 = vpop.permute.xlu1 %1086 }
 0x39a   : > { %v1124_v59 = vmul.f32 %v1087_v56, %v1060_v28 }
 0x39c   : > { %v1382_v63 = vpack.c.bf16 %v1124_v59, %v1124_v59 }
 0x39d   : > { %v1097_v30 = vpop.permute.xlu1 %1096 }
 0x39e   : > { %1165 = vst.msk [vmem:[%s2292_s24] sm:$0xf] %vm1164_vm4, %v1382_v63  ;;  %v1092_v9 = vpop.permute.xlu0 %1091  ;;  %v1126_v10 = vmul.f32 %v1097_v30, %v1062_v4 }
 0x39f   : > { %v1125_v11 = vmul.f32 %v1092_v9, %v1061_v8 }
 0x3a0   : > { %v1384_v12 = vpack.c.bf16 %v1126_v10, %v1126_v10 }
 0x3a1   : > { %v1383_v34 = vpack.c.bf16 %v1125_v11, %v1125_v11 }
 0x3a2   : > { %1167 = vst.msk [vmem:[%s2292_s24 + $0x8] sm:$0xf] %vm1164_vm4, %v1384_v12  ;;  %v1102_v16 = vpop.permute.xlu0 %1101 }
 0x3a3   : > { %1166 = vst.msk [vmem:[%s2292_s24 + $0x4] sm:$0xf] %vm1164_vm4, %v1383_v34  ;;  %v1127_v0 = vmul.f32 %v1102_v16, %v1063_v13 }
 0x3a5   : > { %v1385_v17 = vpack.c.bf16 %v1127_v0, %v1127_v0  ;;  %v1107_v19 = vpop.permute.xlu1 %1106 }
 0x3a6   : > { %v1128_v22 = vmul.f32 %v1107_v19, %v1064_v18 }
 0x3a7   : > { %1168 = vst.msk [vmem:[%s2292_s24 + $0xc] sm:$0xf] %vm1164_vm4, %v1385_v17 }
 0x3a8   : > { %v1386_v39 = vpack.c.bf16 %v1128_v22, %v1128_v22 }
 0x3a9   : > { %v1117_v45 = vpop.permute.xlu1 %1116 }
 0x3aa   : > { %1169 = vst.msk [vmem:[%s2292_s24 + $0x10] sm:$0xf] %vm1164_vm4, %v1386_v39  ;;  %v1130_v46 = vmul.f32 %v1117_v45, %v1066_v43 }
 0x3ac   : > { %v1388_v47 = vpack.c.bf16 %v1130_v46, %v1130_v46 }
 0x3ad   : > { %v1112_v44 = vpop.permute.xlu0 %1111 }
 0x3ae   : > { %1171 = vst.msk [vmem:[%s2292_s24 + $0x18] sm:$0xf] %vm1164_vm4, %v1388_v47  ;;  %v1129_v48 = vmul.f32 %v1112_v44, %v1065_v40 }
 0x3b0   : > { %v1387_v51 = vpack.c.bf16 %v1129_v48, %v1129_v48 }
 0x3b1   : > { %v1122_v53 = vpop.permute.xlu0 %1121 }
 0x3b2   : > { %1170 = vst.msk [vmem:[%s2292_s24 + $0x14] sm:$0xf] %vm1164_vm4, %v1387_v51  ;;  %v1131_v54 = vmul.f32 %v1122_v53, %v1067_v52 }
 0x3b4   : > { %v1389_v55 = vpack.c.bf16 %v1131_v54, %v1131_v54 }
 0x3b6   : > { %1172 = vst.msk [vmem:[%s2292_s24 + $0x1c] sm:$0xf] %vm1164_vm4, %v1389_v55 }
 0x3b7   : > { %1700 = shalt.err (!%p1697_p13)
}
 0x3b8   : > { %s1701_s28 = scalar_lea.hbm %s2313_s30, 512  ;;  %s1705_s10 = scalar_lea.hbm %s2369_s3, 1024 }
 0x3b9   : > { %p1702_p11 = scmp.ne.s32.totalorder %s2313_s30, %s1701_s28  ;;  %p1706_p7 = scmp.lt.u32.totalorder %s2313_s30, %s2369_s3 }
 0x3ba   : > { %p1707_p4 = scmp.lt.u32.totalorder %s1705_s10, %s1701_s28  ;;  %p1709_p0 = scmp.lt.u32.totalorder %s1701_s28, %s2313_s30 }
 0x3bb   : > { %p1703_p2 = pnand %p1702_p11, %p2398_p10 }
 0x3bc   : > { %p1708_p3 = por %p1707_p4, %p1706_p7 }
 0x3bd   : > { %p1704_p5 = pneg %p1703_p2 }
 0x3be   : > { %p1710_p8 = por %p1709_p0, %p1708_p3 }
 0x3c0   : > { %p1711_p9 = pnand %p1710_p8, %p1704_p5 }
 0x3c2   : > { %1714 = shalt.err (!%p1711_p9)
}
 0x3c3   : > { %s1785_s11 = smov 64   ;;  %s1786_s19 = smov 4  }
 0x3c4   : > { %1461 = dma.vmem_to_hbm [thread:$0]  (%p2398_p10), %s2315_s20, 512, %s2313_s30, %s1174_s15, %s1785_s11, %s1785_s11, %s1786_s19  }
 0x3c5 PF: > { %s1204_s9 = sand.u32 1, %s1753_s12   ;;  %p2399_p12 = scmp.ne.s32.totalorder %s2386_s27, 0 }
 0x3c6   : > { %p2400_p1 = scmp.ge.s32.totalorder %s1773_s17, 2  ;;  %s1205_s18 = scalar_lea.sflag [#allocation7], %s1204_s9 }
 0x3c8   : > { %p1474_p6 = pnand %p2400_p1, %p2399_p12 }
 0x3ca   : > { %1748 = dma.done.wait (!%p1474_p6), %s1205_s18, 512  }
 0x3cb   : > { %1750 = vsyncadd (!%p1474_p6), %s1205_s18, 4294966784  ;;  %s22_s17 = sadd.s32 1, %s1773_s17   ;;  %s2401_s24 = sld [smem:[#allocation17_spill]] }
 0x3cc   : > { %p19_p13 = scmp.ge.s32.totalorder %s22_s17, 4   ;;  %s2402_s15 = sld [smem:[#allocation15_spill]] }
 0x3cd   : > { %s2403_s16 = sld [smem:[#allocation16_spill]]  ;;  %s2404_s12 = smov %s1757_s13 }
 0x3ce   : > { %s2405_s13 = smov %s1761_s14  ;;  %21 = sbr.rel (!%p19_p13) target bundleno = 10 (0xa), region = 109 }
 0x3d1   : > { %s2406_s14 = smov %s2401_s24 }
 0x3d5   :  { %1210 = vsyncpa [#allocation6], 1 }
 0x3d6   :  { %1212 = vsyncpa [#allocation6 + $0x1], 1 }
 0x3d7   :  { %1213 = vsyncpa [#allocation9], 1 }
 0x3d8   :  { %1215 = vsyncpa [#allocation9 + $0x1], 1 }
 0x3d9   :  { %1216 = vsyncpa [#allocation7], 1 }
 0x3da   :  { %1218 = vsyncpa [#allocation7 + $0x1], 1 }

// kernel: raiflow_single_block.11
= control target key start
LH: loop header
LB: loop body
LE: loop exit
PB: predicated region body
PF: predicated region fallthrough
CT: control target
= control target key end

     0   :  { %12 = vsyncpa [#allocation4], 0  ;;  %s811_s0 = inlined_call_operand.hbm [shape: bf16[32,64], index: 0, kind: input, shape index: {}]   ;;  %s812_s1 = inlined_call_operand.hbm [shape: bf16[32,64], index: 1, kind: input, shape index: {}]   ;;  %s813_s2 = inlined_call_operand.hbm [shape: bf16[64,32], index: 2, kind: input, shape index: {}]   ;;  %s814_s3 = inlined_call_operand.hbm [shape: f32[1,32], index: 3, kind: input, shape index: {}]   ;;  %s815_s4 = inlined_call_operand.hbm [shape: f32[32,32], index: 4, kind: input, shape index: {}, may-alias: {4,7}]   ;;  %s816_s5 = inlined_call_operand.hbm [shape: f32[1,32], index: 5, kind: input, shape index: {}]   ;;  %s817_s6 = inlined_call_operand.hbm [shape: f32[1,32], index: 6, kind: input, shape index: {}]   ;;  %s818_s7 = inlined_call_operand.hbm [shape: f32[32,32], index: 7, kind: output, shape index: {}, may-alias: {4,7}]  }
   0x1   :  { %13 = vsyncpa [#allocation7], 0 }
   0x2   :  { %14 = vsyncpa [#allocation10], 0 }
   0x3   :  { %15 = vsyncpa [#allocation13], 0 }
   0x4   :  { %16 = vsyncpa [#allocation5], 0  ;;  %s613_s24 = smov [#allocation6]   ;;  %s614_s26 = smov [#allocation9]  }
   0x5   :  { %s34_s25 = sshll.u32 %s613_s24, 4  ;;  %s59_s27 = sshll.u32 %s614_s26, 4  ;;  %s35_s25 = int_to_ptr.vmem [resolvable:$true] %s34_s25  ;;  %s666_s27 = int_to_ptr.vmem [resolvable:$true] %s59_s27 }
   0x6   :  { %s427_s30 = scalar_lea.hbm %s812_s1, 256 }
   0x7   :  { %p428_p0 = scmp.ne.s32.totalorder %s812_s1, %s427_s30  ;;  %p431_p1 = scmp.lt.u32.totalorder %s427_s30, %s812_s1 }
   0x9   :  { %p433_p2 = pnand %p431_p1, %p428_p0 }
   0xb   :  { %436 = shalt.err (!%p433_p2)
}
   0xc   :  { %s437_s12 = scalar_lea.vmem %s35_s25, 256  ;;  %p442_p4 = scmp.lt.s32.totalorder %s35_s25, %s35_s25 }
   0xd   :  { %p438_p3 = scmp.ne.s32.totalorder %s35_s25, %s437_s12  ;;  %p443_p5 = scmp.lt.s32.totalorder %s437_s12, %s437_s12 }
   0xf   :  { %p444_p6 = por %p443_p5, %p442_p4 }
  0x11   :  { %p445_p7 = pnand %p444_p6, %p438_p3 }
  0x13   :  { %448 = shalt.err (!%p445_p7)
}
  0x14   :  { %s615_s13 = smov 64   ;;  %s616_s14 = smov 4  }
  0x15   :  { %40 = dma.hbm_to_vmem [thread:$0]  %s812_s1, 256, %s35_s25, [#allocation7], %s615_s13, %s615_s13, %s616_s14  }
  0x16   :  { %s449_s19 = scalar_lea.hbm %s814_s3, 16 }
  0x17   :  { %p450_p8 = scmp.ne.s32.totalorder %s814_s3, %s449_s19  ;;  %p453_p9 = scmp.lt.u32.totalorder %s449_s19, %s814_s3 }
  0x19   :  { %p455_p10 = pnand %p453_p9, %p450_p8 }
  0x1b   :  { %458 = shalt.err (!%p455_p10)
}
  0x1c   :  { %s459_s24 = scalar_lea.vmem %s666_s27, 16  ;;  %s463_s1 = scalar_lea.vmem %s666_s27, 32 }
  0x1d   :  { %p460_p11 = scmp.ne.s32.totalorder %s666_s27, %s459_s24  ;;  %p464_p12 = scmp.lt.s32.totalorder %s666_s27, %s666_s27 }
  0x1e   :  { %p465_p13 = scmp.lt.s32.totalorder %s463_s1, %s459_s24 }
  0x20   :  { %p466_p0 = por %p465_p13, %p464_p12 }
  0x22   :  { %p467_p1 = pnand %p466_p0, %p460_p11 }
  0x24   :  { %470 = shalt.err (!%p467_p1)
}
  0x25   :  { %62 = dma.hbm_to_vmem [thread:$0]  %s814_s3, 16, %s666_s27, [#allocation10]  }
  0x26   :  { %s617_s28 = smov [#allocation12]   ;;  %s618_s30 = smov [#allocation3]  }
  0x27   :  { %s81_s29 = sshll.u32 %s617_s28, 4  ;;  %s22_s8 = sshll.u32 %s618_s30, 4  ;;  %s82_s29 = int_to_ptr.vmem [resolvable:$true] %s81_s29  ;;  %s701_s8 = int_to_ptr.vmem [resolvable:$true] %s22_s8 }
  0x28   :  { %s471_s11 = scalar_lea.hbm %s816_s5, 16 }
  0x29   :  { %p472_p2 = scmp.ne.s32.totalorder %s816_s5, %s471_s11  ;;  %p475_p3 = scmp.lt.u32.totalorder %s471_s11, %s816_s5 }
  0x2b   :  { %p477_p4 = pnand %p475_p3, %p472_p2 }
  0x2d   :  { %480 = shalt.err (!%p477_p4)
}
  0x2e   :  { %s481_s3 = scalar_lea.vmem %s82_s29, 16  ;;  %s485_s27 = scalar_lea.vmem %s82_s29, 32 }
  0x2f   :  { %p482_p5 = scmp.ne.s32.totalorder %s82_s29, %s481_s3  ;;  %p486_p6 = scmp.lt.s32.totalorder %s82_s29, %s82_s29 }
  0x30   :  { %p487_p7 = scmp.lt.s32.totalorder %s485_s27, %s481_s3 }
  0x32   :  { %p488_p8 = por %p487_p7, %p486_p6 }
  0x34   :  { %p489_p9 = pnand %p488_p8, %p482_p5 }
  0x36   :  { %492 = shalt.err (!%p489_p9)
}
  0x37   :  { %84 = dma.hbm_to_vmem [thread:$0]  %s816_s5, 16, %s82_s29, [#allocation13]  }
  0x38   :  { %s493_s22 = scalar_lea.hbm %s811_s0, 256 }
  0x39   :  { %p494_p10 = scmp.ne.s32.totalorder %s811_s0, %s493_s22  ;;  %p497_p11 = scmp.lt.u32.totalorder %s493_s22, %s811_s0 }
  0x3b   :  { %p499_p12 = pnand %p497_p11, %p494_p10 }
  0x3d   :  { %502 = shalt.err (!%p499_p12)
}
  0x3e   :  { %s503_s26 = scalar_lea.vmem %s701_s8, 256  ;;  %p508_p0 = scmp.lt.s32.totalorder %s701_s8, %s701_s8 }
  0x3f   :  { %p504_p13 = scmp.ne.s32.totalorder %s701_s8, %s503_s26  ;;  %p509_p1 = scmp.lt.s32.totalorder %s503_s26, %s503_s26 }
  0x41   :  { %p510_p2 = por %p509_p1, %p508_p0 }
  0x43   :  { %p511_p3 = pnand %p510_p2, %p504_p13 }
  0x45   :  { %514 = shalt.err (!%p511_p3)
}
  0x46   :  { %28 = dma.hbm_to_vmem [thread:$0]  %s811_s0, 256, %s701_s8, [#allocation4], %s615_s13, %s615_s13, %s616_s14  }
  0x47   :  { %s619_s29 = smov [#allocation8]   ;;  %s620_s9 = smov [#allocation11]  }
  0x48   :  { %s46_s30 = sshll.u32 %s619_s29, 4  ;;  %s68_s10 = sshll.u32 %s620_s9, 4  ;;  %s47_s30 = int_to_ptr.vmem [resolvable:$true] %s46_s30  ;;  %s735_s10 = int_to_ptr.vmem [resolvable:$true] %s68_s10 }
  0x49   :  { %s515_s15 = scalar_lea.hbm %s813_s2, 512 }
  0x4a   :  { %p516_p4 = scmp.ne.s32.totalorder %s813_s2, %s515_s15  ;;  %p519_p5 = scmp.lt.u32.totalorder %s515_s15, %s813_s2 }
  0x4c   :  { %p521_p6 = pnand %p519_p5, %p516_p4 }
  0x4e   :  { %524 = shalt.err (!%p521_p6)
}
  0x4f   :  { %s525_s0 = scalar_lea.vmem %s47_s30, 512  ;;  %p530_p8 = scmp.lt.s32.totalorder %s47_s30, %s47_s30 }
  0x50   :  { %p526_p7 = scmp.ne.s32.totalorder %s47_s30, %s525_s0  ;;  %p531_p9 = scmp.lt.s32.totalorder %s525_s0, %s525_s0 }
  0x52   :  { %p532_p10 = por %p531_p9, %p530_p8 }
  0x54   :  { %p533_p11 = pnand %p532_p10, %p526_p7 }
  0x56   :  { %536 = shalt.err (!%p533_p11)
}
  0x57   :  { %52 = dma.hbm_to_vmem [thread:$0]  %s813_s2, 512, %s47_s30, [#allocation7], %s615_s13, %s615_s13, %s616_s14  }
  0x58   :  { %s537_s21 = scalar_lea.hbm %s815_s4, 512 }
  0x59   :  { %p538_p12 = scmp.ne.s32.totalorder %s815_s4, %s537_s21  ;;  %p541_p13 = scmp.lt.u32.totalorder %s537_s21, %s815_s4 }
  0x5b   :  { %p543_p0 = pnand %p541_p13, %p538_p12 }
  0x5d   :  { %546 = shalt.err (!%p543_p0)
}
  0x5e   :  { %s547_s25 = scalar_lea.vmem %s735_s10, 512  ;;  %p552_p2 = scmp.lt.s32.totalorder %s735_s10, %s735_s10 }
  0x5f   :  { %p548_p1 = scmp.ne.s32.totalorder %s735_s10, %s547_s25  ;;  %p553_p3 = scmp.lt.s32.totalorder %s547_s25, %s547_s25 }
  0x61   :  { %p554_p4 = por %p553_p3, %p552_p2 }
  0x63   :  { %p555_p5 = pnand %p554_p4, %p548_p1 }
  0x65   :  { %558 = shalt.err (!%p555_p5)
}
  0x66   :  { %s621_s2 = smov 128   ;;  %s622_s13 = smov 8  }
  0x67   :  { %74 = dma.hbm_to_vmem [thread:$0]  %s815_s4, 512, %s735_s10, [#allocation10], %s621_s2, %s621_s2, %s622_s13  }
  0x68   :  { %s623_s5 = smov [#allocation14]   ;;  %s559_s9 = scalar_lea.hbm %s817_s6, 16 }
  0x69   :  { %s91_s28 = sshll.u32 %s623_s5, 4  ;;  %p560_p6 = scmp.ne.s32.totalorder %s817_s6, %s559_s9  ;;  %s92_s28 = int_to_ptr.vmem [resolvable:$true] %s91_s28 }
  0x6a   :  { %p563_p7 = scmp.lt.u32.totalorder %s559_s9, %s817_s6 }
  0x6c   :  { %p565_p8 = pnand %p563_p7, %p560_p6 }
  0x6e   :  { %568 = shalt.err (!%p565_p8)
}
  0x6f   :  { %s569_s17 = scalar_lea.vmem %s92_s28, 16  ;;  %s573_s4 = scalar_lea.vmem %s92_s28, 32 }
  0x70   :  { %p570_p9 = scmp.ne.s32.totalorder %s92_s28, %s569_s17  ;;  %p574_p10 = scmp.lt.s32.totalorder %s92_s28, %s92_s28 }
  0x71   :  { %p575_p11 = scmp.lt.s32.totalorder %s573_s4, %s569_s17 }
  0x73   :  { %p576_p12 = por %p575_p11, %p574_p10 }
  0x75   :  { %p577_p13 = pnand %p576_p12, %p570_p9 }
  0x77   :  { %580 = shalt.err (!%p577_p13)
}
  0x78   :  { %94 = dma.hbm_to_vmem [thread:$0]  %s817_s6, 16, %s92_s28, [#allocation13]  }
  0x79   :  { %603 = dma.done.wait [#allocation4], 256  }
  0x7a   :  { %604 = vsyncadd [#allocation4], 4294967040 }
  0x7b   :  { %605 = dma.done.wait [#allocation7], 768  }
  0x7c   :  { %606 = vsyncadd [#allocation7], 4294966528 }
  0x7d   :  { %607 = dma.done.wait [#allocation10], 528  }
  0x7e   :  { %608 = vsyncadd [#allocation10], 4294966768 }
  0x7f   :  { %609 = dma.done.wait [#allocation13], 32  }
  0x80   :  { %610 = vsyncadd [#allocation13], 4294967264  ;;  %vm121_vm0 = vcmask 261120   ;;  %v624_v0 = vmov 0.0   ;;  %v415_v1 = vld [vmem:[#allocation8] sm:$0xff]   ;;  %v416_v2 = vld [vmem:[#allocation8 + $0x8] sm:$0xff]  }
  0x81   :  { %124 = vst.msk [vmem:[#allocation2 + $0x10] sm:$0xff] %vm121_vm0, %v624_v0  ;;  %122 = vst.msk [vmem:[#allocation2] sm:$0xff] %vm121_vm0, %v624_v0  ;;  %390 = vmatprep.subr.bf16.mxu0 %v415_v1  ;;  %v417_v3 = vld [vmem:[#allocation8 + $0x10] sm:$0xff]   ;;  %v367_v4 = vld [vmem:[#allocation3] sm:$0xff]   ;;  %vm220_vm1 = vcmask 523264   ;;  %s625_s6 = smov [#allocation15]  }
  0x82   :  { %123 = vst.msk [vmem:[#allocation2 + $0x8] sm:$0xff] %vm121_vm0, %v624_v0  ;;  %125 = vst.msk [vmem:[#allocation2 + $0x18] sm:$0xff] %vm121_vm0, %v624_v0  ;;  %391 = vmatpush3.bf16.msra.mxu0 %v415_v1  ;;  %v375_v5 = vld [vmem:[#allocation6] sm:$0xff]   ;;  %v382_v6 = vld [vmem:[#allocation3 + $0x8] sm:$0xff]   ;;  %v368_v7 = vunpack.c.l.bf16 %v367_v4  ;;  %v369_v8 = vunpack.c.h.bf16 %v367_v4  ;;  %s342_s27 = sshll.u32 %s625_s6, 4  ;;  %s343_s27 = int_to_ptr.vmem [resolvable:$true] %s342_s27 }
  0x83   :  { %392 = vmatprep.subr.bf16.mxu0 %v416_v2  ;;  %v376_v9 = vunpack.c.l.bf16 %v375_v5  ;;  %v377_v10 = vunpack.c.h.bf16 %v375_v5  ;;  %v383_v11 = vld [vmem:[#allocation6 + $0x8] sm:$0xff]   ;;  %v372_v12 = vunpack.c.l.bf16 %v382_v6  ;;  %v373_v13 = vunpack.c.h.bf16 %v382_v6  ;;  %s581_s0 = scalar_lea.vmem %s343_s27, 512  ;;  %p586_p1 = scmp.lt.s32.totalorder %s343_s27, %s343_s27 }
  0x84   :  { %v380_v14 = vunpack.c.l.bf16 %v383_v11  ;;  %v381_v15 = vunpack.c.h.bf16 %v383_v11  ;;  %v418_v18 = vld [vmem:[#allocation8 + $0x18] sm:$0xff]   ;;  %p582_p0 = scmp.ne.s32.totalorder %s343_s27, %s581_s0  ;;  %p587_p2 = scmp.lt.s32.totalorder %s581_s0, %s581_s0 }
  0x85   :  { %v142_v16 = vadd.f32 %v376_v9, %v368_v7  ;;  %v143_v17 = vadd.f32 %v377_v10, %v369_v8  ;;  %v363_v7 = vld [vmem:[#allocation9] ss:$0 sm:$0xff]  ;;  %v305_v8 = vld [vmem:[#allocation11 + $0x10] sm:$0xff]  ;;  %v364_v9 = vld [vmem:[#allocation14] ss:$0 sm:$0xff] }
  0x86   :  { %393 = vmatpush3.bf16.msra.mxu0 %v416_v2  ;;  %v144_v19 = vadd.f32 %v380_v14, %v372_v12  ;;  %v145_v20 = vadd.f32 %v381_v15, %v373_v13  ;;  %v303_v10 = vld [vmem:[#allocation11] sm:$0xff]  ;;  %v306_v12 = vld [vmem:[#allocation11 + $0x18] sm:$0xff]  ;;  %p588_p3 = por %p587_p2, %p586_p1 }
  0x87   :  { %394 = vmatprep.subr.bf16.mxu0 %v417_v3  ;;  %v150_v21 = vmul.f32 0.044715, %v142_v16  ;;  %v151_v22 = vmul.f32 0.044715, %v143_v17  ;;  %v146_v41 = vmul.f32 0.5, %v142_v16  ;;  %v147_v43 = vmul.f32 0.5, %v143_v17 }
  0x88   :  { %v152_v23 = vmul.f32 0.044715, %v144_v19  ;;  %v153_v24 = vmul.f32 0.044715, %v145_v20  ;;  %v148_v46 = vmul.f32 0.5, %v144_v19  ;;  %v149_v49 = vmul.f32 0.5, %v145_v20  ;;  %p589_p4 = pnand %p588_p3, %p582_p0 }
  0x89   :  { %v154_v25 = vmul.f32 %v150_v21, %v142_v16  ;;  %v155_v26 = vmul.f32 %v151_v22, %v143_v17  ;;  %v186_v59 = vld [vmem:[#allocation2 + $0x10] sm:$0xff]  ;;  %v184_v60 = vld [vmem:[#allocation2] sm:$0xff]  ;;  %v187_v62 = vld [vmem:[#allocation2 + $0x18] sm:$0xff] }
  0x8a   :  { %395 = vmatpush3.bf16.msra.mxu0 %v417_v3  ;;  %v156_v27 = vmul.f32 %v152_v23, %v144_v19  ;;  %v157_v28 = vmul.f32 %v153_v24, %v145_v20  ;;  %v185_v1 = vld [vmem:[#allocation2 + $0x8] sm:$0xff]  ;;  %v365_v13 = vld [vmem:[#allocation12] ss:$0 sm:$0xff]  ;;  %v317_v23 = vadd.f32 %v364_v9, %v306_v12 }
  0x8b   :  { %396 = vmatprep.subr.bf16.mxu0 %v418_v18  ;;  %v158_v29 = vmul.f32 %v154_v25, %v142_v16  ;;  %v159_v30 = vmul.f32 %v155_v26, %v143_v17 }
  0x8c   :  { %v160_v31 = vmul.f32 %v156_v27, %v144_v19  ;;  %v161_v32 = vmul.f32 %v157_v28, %v145_v20 }
  0x8d   :  { %v162_v33 = vadd.f32 %v158_v29, %v142_v16  ;;  %v163_v34 = vadd.f32 %v159_v30, %v143_v17  ;;  %v304_v16 = vld [vmem:[#allocation11 + $0x8] sm:$0xff]  ;;  %v316_v17 = vadd.f32 %v364_v9, %v305_v8 }
  0x8e   :  { %397 = vmatpush3.bf16.msra.mxu0 %v418_v18  ;;  %v164_v35 = vadd.f32 %v160_v31, %v144_v19  ;;  %v165_v36 = vadd.f32 %v161_v32, %v145_v20  ;;  %v314_v20 = vadd.f32 %v364_v9, %v303_v10  ;;  %v315_v26 = vadd.f32 %v364_v9, %v304_v16 }
  0x8f   :  { %v166_v37 = vmul.f32 0.7978846, %v162_v33  ;;  %v167_v38 = vmul.f32 0.7978846, %v163_v34 }
  0x90   :  { %v168_v39 = vmul.f32 0.7978846, %v164_v35  ;;  %v169_v40 = vmul.f32 0.7978846, %v165_v36 }
  0x91   :  { %419 = vtanh.f32 %v166_v37 }
  0x92   :  { %421 = vtanh.f32 %v167_v38 }
  0x93   :  { %423 = vtanh.f32 %v168_v39 }
  0x94   :  { %425 = vtanh.f32 %v169_v40 }
  0x9b   :  { %v420_v42 = vpop.eup %419 }
  0x9c   :  { %v422_v44 = vpop.eup %421  ;;  %v174_v45 = vadd.f32 1.0, %v420_v42 }
  0x9d   :  { %v424_v47 = vpop.eup %423  ;;  %v175_v48 = vadd.f32 1.0, %v422_v44 }
  0x9e   :  { %v426_v50 = vpop.eup %425  ;;  %v178_v51 = vmul.f32 %v174_v45, %v146_v41  ;;  %v176_v52 = vadd.f32 1.0, %v424_v47 }
  0x9f   :  { %v179_v53 = vmul.f32 %v175_v48, %v147_v43  ;;  %v177_v54 = vadd.f32 1.0, %v426_v50 }
  0xa0   :  { %v180_v55 = vmul.f32 %v176_v52, %v148_v46 }
  0xa1   :  { %v182_v56 = vpack.c.bf16 %v179_v53, %v178_v51  ;;  %v181_v57 = vmul.f32 %v177_v54, %v149_v49 }
  0xa3   :  { %398 = vmatprep.mubr.msk.bf16.mxu0 %vm220_vm1, %v182_v56  ;;  %v183_v58 = vpack.c.bf16 %v181_v57, %v180_v55 }
  0xa5   :  { %399 = vmatmul.mubr.msk.bf16.vlgmr.msra.gmra.mrb[0].mxu0 %vm220_vm1, %v183_v58 }
 0x178   :  { %v400_v61 = vpop.f32.mrb[0].mxu0 }
 0x179   :  { %v278_v63 = vadd.f32 %v400_v61, %v186_v59  ;;  %v261_v0 = vpop.f32.mrb[1].mxu0 }
 0x17a   :  { %v276_v2 = vadd.f32 %v261_v0, %v184_v60  ;;  %v401_v3 = vpop.f32.mrb[2].mxu0 }
 0x17b   :  { %283 = vst.msk [vmem:[#allocation2 + $0x10] sm:$0xff] %vm121_vm0, %v278_v63  ;;  %v279_v4 = vadd.f32 %v401_v3, %v187_v62  ;;  %v264_v5 = vpop.f32.mrb[3].mxu0 }
 0x17c   :  { %281 = vst.msk [vmem:[#allocation2] sm:$0xff] %vm121_vm0, %v276_v2  ;;  %v277_v6 = vadd.f32 %v264_v5, %v185_v1 }
 0x17d   :  { %284 = vst.msk [vmem:[#allocation2 + $0x18] sm:$0xff] %vm121_vm0, %v279_v4 }
 0x17e   :  { %282 = vst.msk [vmem:[#allocation2 + $0x8] sm:$0xff] %vm121_vm0, %v277_v6 }
 0x182   :  { %v290_v11 = vld [vmem:[#allocation2 + $0x10] sm:$0xff] }
 0x183   :  { %v288_v14 = vld [vmem:[#allocation2] sm:$0xff]  ;;  %v301_v15 = vadd.f32 %v363_v7, %v290_v11 }
 0x184   :  { %v291_v18 = vld [vmem:[#allocation2 + $0x18] sm:$0xff]  ;;  %v299_v19 = vadd.f32 %v363_v7, %v288_v14 }
 0x185   :  { %v289_v21 = vld [vmem:[#allocation2 + $0x8] sm:$0xff]  ;;  %v302_v22 = vadd.f32 %v363_v7, %v291_v18  ;;  %v327_v24 = vmul.f32 %v365_v13, %v301_v15 }
 0x186   :  { %v300_v25 = vadd.f32 %v363_v7, %v289_v21  ;;  %v325_v27 = vmul.f32 %v365_v13, %v299_v19 }
 0x187   :  { %v328_v28 = vmul.f32 %v365_v13, %v302_v22  ;;  %v331_v29 = vadd.f32 %v327_v24, %v316_v17 }
 0x188   :  { %v326_v30 = vmul.f32 %v365_v13, %v300_v25  ;;  %v329_v31 = vadd.f32 %v325_v27, %v314_v20 }
 0x189   :  { %v332_v32 = vadd.f32 %v328_v28, %v317_v23  ;;  %335 = vst.msk [vmem:[#allocation15 + $0x10] sm:$0xff] %vm121_vm0, %v331_v29 }
 0x18a   :  { %v330_v33 = vadd.f32 %v326_v30, %v315_v26  ;;  %333 = vst.msk [vmem:[#allocation15] sm:$0xff] %vm121_vm0, %v329_v31 }
 0x18b   :  { %336 = vst.msk [vmem:[#allocation15 + $0x18] sm:$0xff] %vm121_vm0, %v332_v32 }
 0x18c   :  { %334 = vst.msk [vmem:[#allocation15 + $0x8] sm:$0xff] %vm121_vm0, %v330_v33 }
 0x18d   :  { %592 = shalt.err (!%p589_p4)
}
 0x18e   :  { %s593_s19 = scalar_lea.hbm %s818_s7, 512 }
 0x18f   :  { %p594_p5 = scmp.ne.s32.totalorder %s818_s7, %s593_s19  ;;  %p597_p6 = scmp.lt.u32.totalorder %s593_s19, %s818_s7 }
 0x191   :  { %p599_p7 = pnand %p597_p6, %p594_p5 }
 0x193   :  { %602 = shalt.err (!%p599_p7)
}
 0x194   :  { %348 = dma.vmem_to_hbm [thread:$0]  %s343_s27, 512, %s818_s7, [#allocation5], %s621_s2, %s621_s2, %s622_s13  }
 0x195   :  { %611 = dma.done.wait [#allocation5], 512  }
 0x196   :  { %612 = vsyncadd [#allocation5], 4294966784 }
 0x197   :  { %352 = vsyncpa [#allocation4], 1 }
 0x198   :  { %353 = vsyncpa [#allocation7], 1 }
 0x199   :  { %354 = vsyncpa [#allocation10], 1 }
 0x19a   :  { %355 = vsyncpa [#allocation13], 1 }
 0x19b   :  { %356 = vsyncpa [#allocation5], 1 }

// kernel: raiflow_single_block.10
= control target key start
LH: loop header
LB: loop body
LE: loop exit
PB: predicated region body
PF: predicated region fallthrough
CT: control target
= control target key end

     0   :  { %10 = vsyncpa [#allocation5], 0  ;;  %s6179_s0 = inlined_call_operand.hbm [shape: bf16[2,16,64], index: 0, kind: input, shape index: {}]   ;;  %s6180_s1 = inlined_call_operand.hbm [shape: bf16[2,9,32,64], index: 1, kind: input, shape index: {}]   ;;  %s6181_s2 = inlined_call_operand.hbm [shape: f32[2,1,64], index: 2, kind: input, shape index: {}]   ;;  %s6182_s3 = inlined_call_operand.hbm [shape: bf16[2,9,64,32], index: 3, kind: input, shape index: {}]   ;;  %s6183_s4 = inlined_call_operand.hbm [shape: f32[2,1,32], index: 4, kind: input, shape index: {}]   ;;  %s6184_s5 = inlined_call_operand.hbm [shape: bf16[2,16,64], index: 5, kind: output, shape index: {}]  }
   0x1   :  { %12 = vsyncpa [#allocation5 + $0x1], 0 }
   0x2   :  { %13 = vsyncpa [#allocation8], 0 }
   0x3   :  { %14 = vsyncpa [#allocation11], 0 }
   0x4   :  { %15 = vsyncpa [#allocation6], 0 }
   0x5   :  { %17 = vsyncpa [#allocation6 + $0x1], 0  ;;  %s5263_s18 = smov 0   ;;  %s5265_s19 = smov 0  }
   0x6   :  { %s5267_s20 = smov 0   ;;  %s5269_s21 = smov 0  }
   0x7   :  { %s5271_s22 = smov 0   ;;  %s5273_s23 = smov 0  }
   0x8 LB: > { %6210 = sst [smem:[#allocation18_spill]] %s5194_s18  ;;  %s3973_s24 = sadd.s32 4294967295, %s5214_s23   ;;  %s5214_s23 = sphi %s5273_s23, %s23_s23   ;;  %s5210_s22 = sphi %s5271_s22, %s6313_s22   ;;  %s5206_s21 = sphi %s5269_s21, %s6312_s21   ;;  %s5202_s20 = sphi %s5267_s20, %s6311_s20   ;;  %s5198_s19 = sphi %s5265_s19, %s6310_s19   ;;  %s5194_s18 = sphi %s5263_s18, %s6309_s18  }
   0x9   : > { %s3974_s25 = sadd.s32 4294967294, %s5214_s23   ;;  %p57_p0 = scmp.ne.s32.totalorder %s5198_s19, %s5194_s18 }
   0xa   : > { %p5297_p1 = scmp.eq.s32.totalorder %s3973_s24, 0  ;;  %p5301_p2 = scmp.eq.s32.totalorder %s3973_s24, 1 }
   0xb   : > { %p193_p3 = scmp.eq.s32.totalorder %s3974_s25, 1  ;;  %p3975_p5 = scmp.ge.s32.totalorder %s5214_s23, 1 }
   0xc   : > { %s6211_s26 = scalar_select %p5297_p1, 1, 0 }
   0xd   : > { %s6212_s27 = scalar_select %p5301_p2, 1, 0 }
   0xe   : > { %p5307_p4 = por %p5297_p1, %p57_p0  ;;  %p5312_p6 = por %p193_p3, %p57_p0 }
   0xf   : > { %p200_p7 = scmp.lt.s32.totalorder %s5214_s23, 3  ;;  %s5216_s6 = smov [#allocation7]  }
  0x10   : > { %s6213_s28 = scalar_select %p5307_p4, 1, 0 }
  0x11   : > { %s6214_s29 = scalar_select %p5312_p6, 1, 0 }
  0x12   : > { %p5317_p8 = pnand %p3975_p5, %p200_p7  ;;  %s216_s7 = sshll.u32 %s5216_s6, 4  ;;  %s5321_s7 = int_to_ptr.vmem [resolvable:$true] %s216_s7 }
  0x13   : > { %6215 = sst [smem:[#allocation19_spill]] %s6214_s29  ;;  %s5217_s9 = smov [#allocation10]  }
  0x14   : > { %s6216_s30 = scalar_select %p5317_p8, 1, 0 }
  0x15   : > { %p4750_p9 = pneg %p5317_p8  ;;  %s249_s10 = sshll.u32 %s5217_s9, 4  ;;  %s5332_s10 = int_to_ptr.vmem [resolvable:$true] %s249_s10 }
  0x16   : > { %s5218_s11 = smov [#allocation9]   ;;  %s4982_s15 = scalar_lea.hbm %s6180_s1, 4608 }
  0x17   : > { %p5328_p11 = pnand %p4750_p9, %p5297_p1  ;;  %s5334_s12 = sshll.u32 %s5218_s11, 4  ;;  %s233_s12 = int_to_ptr.vmem [resolvable:$true] %s5334_s12 }
  0x18   : > { %p4983_p12 = scmp.ne.s32.totalorder %s6180_s1, %s4982_s15  ;;  %p4989_p5 = scmp.lt.u32.totalorder %s4982_s15, %s6180_s1 }
  0x19   : > { %p5344_p13 = pneg %p5328_p11 }
  0x1b   : > { %p4985_p0 = pnand %p5344_p13, %p4983_p12 }
  0x1d   : > { %p4986_p3 = pneg %p4985_p0 }
  0x1f   : > { %p4991_p7 = pnand %p4989_p5, %p4986_p3 }
  0x21   : > { %4994 = shalt.err (!%p4991_p7)
}
  0x22   : > { %s4995_s9 = scalar_lea.vmem %s5321_s7, 4608  ;;  %p5003_p1 = scmp.lt.s32.totalorder %s5321_s7, %s5321_s7 }
  0x23   : > { %p4996_p9 = scmp.ne.s32.totalorder %s5321_s7, %s4995_s9  ;;  %p5004_p4 = scmp.lt.s32.totalorder %s4995_s9, %s4995_s9 }
  0x25   : > { %p4998_p10 = pnand %p4996_p9, %p5344_p13  ;;  %p5005_p12 = por %p5004_p4, %p5003_p1 }
  0x27   : > { %p4999_p6 = pneg %p4998_p10 }
  0x29   : > { %p5006_p0 = pnand %p5005_p12, %p4999_p6 }
  0x2b   : > { %5009 = shalt.err (!%p5006_p0)
}
  0x2c   : > { %s6191_s11 = smov 64   ;;  %s6192_s13 = smov 4  }
  0x2d   : > { %4753 = dma.hbm_to_vmem [thread:$0]  (!%p5328_p11), %s6180_s1, 4608, %s5321_s7, [#allocation8], %s6191_s11, %s6191_s11, %s6192_s13  }
  0x2e   : > { %s5010_s25 = scalar_lea.hbm %s6182_s3, 9216 }
  0x2f   : > { %p5011_p1 = scmp.ne.s32.totalorder %s6182_s3, %s5010_s25  ;;  %p5017_p10 = scmp.lt.u32.totalorder %s5010_s25, %s6182_s3 }
  0x31   : > { %p5013_p4 = pnand %p5011_p1, %p5344_p13 }
  0x33   : > { %p5014_p6 = pneg %p5013_p4 }
  0x35   : > { %p5019_p3 = pnand %p5017_p10, %p5014_p6 }
  0x37   : > { %5022 = shalt.err (!%p5019_p3)
}
  0x38   : > { %s5023_s7 = scalar_lea.vmem %s5332_s10, 9216  ;;  %p5031_p12 = scmp.lt.s32.totalorder %s5332_s10, %s5332_s10 }
  0x39   : > { %p5024_p5 = scmp.ne.s32.totalorder %s5332_s10, %s5023_s7  ;;  %p5032_p0 = scmp.lt.s32.totalorder %s5023_s7, %s5023_s7 }
  0x3b   : > { %p5026_p7 = pnand %p5024_p5, %p5344_p13  ;;  %p5033_p1 = por %p5032_p0, %p5031_p12 }
  0x3d   : > { %p5027_p9 = pneg %p5026_p7 }
  0x3f   : > { %p5034_p4 = pnand %p5033_p1, %p5027_p9 }
  0x41   : > { %5037 = shalt.err (!%p5034_p4)
}
  0x42   : > { %4759 = dma.hbm_to_vmem [thread:$0]  (!%p5328_p11), %s6182_s3, 9216, %s5332_s10, [#allocation11], %s6191_s11, %s6191_s11, %s6192_s13  }
  0x43   : > { %s5038_s16 = scalar_lea.hbm %s6181_s2, 32 }
  0x44   : > { %p5039_p6 = scmp.ne.s32.totalorder %s6181_s2, %s5038_s16  ;;  %p5045_p5 = scmp.lt.u32.totalorder %s5038_s16, %s6181_s2 }
  0x46   : > { %p5041_p10 = pnand %p5039_p6, %p5344_p13 }
  0x48   : > { %p5042_p3 = pneg %p5041_p10 }
  0x4a   : > { %p5047_p7 = pnand %p5045_p5, %p5042_p3 }
  0x4c   : > { %5050 = shalt.err (!%p5047_p7)
}
  0x4d   : > { %s5051_s7 = scalar_lea.vmem %s233_s12, 32  ;;  %p5059_p1 = scmp.lt.s32.totalorder %s233_s12, %s233_s12 }
  0x4e   : > { %p5052_p9 = scmp.ne.s32.totalorder %s233_s12, %s5051_s7  ;;  %p5060_p4 = scmp.lt.s32.totalorder %s5051_s7, %s5051_s7 }
  0x50   : > { %p5054_p12 = pnand %p5052_p9, %p5344_p13  ;;  %p5061_p8 = por %p5060_p4, %p5059_p1 }
  0x52   : > { %p5055_p0 = pneg %p5054_p12 }
  0x54   : > { %p5062_p2 = pnand %p5061_p8, %p5055_p0 }
  0x56   : > { %5065 = shalt.err (!%p5062_p2)
}
  0x57   : > { %s5221_s10 = smov 16   ;;  %s5222_s18 = smov 1  }
  0x58   : > { %4756 = dma.hbm_to_vmem [thread:$0]  (!%p5328_p11), %s6181_s2, 32, %s233_s12, [#allocation8], %s5221_s10, %s5221_s10, %s5222_s18  }
  0x59   : > { %s5223_s15 = smov [#allocation12]   ;;  %s5066_s6 = scalar_lea.hbm %s6183_s4, 32 }
  0x5a   : > { %s265_s16 = sshll.u32 %s5223_s15, 4  ;;  %p5067_p2 = scmp.ne.s32.totalorder %s6183_s4, %s5066_s6  ;;  %s266_s16 = int_to_ptr.vmem [resolvable:$true] %s265_s16 }
  0x5b   : > { %p5073_p10 = scmp.lt.u32.totalorder %s5066_s6, %s6183_s4 }
  0x5c   : > { %p5069_p8 = pnand %p5067_p2, %p5344_p13 }
  0x5e   : > { %p5070_p6 = pneg %p5069_p8 }
  0x60   : > { %p5075_p3 = pnand %p5073_p10, %p5070_p6 }
  0x62   : > { %5078 = shalt.err (!%p5075_p3)
}
  0x63   : > { %s5079_s12 = scalar_lea.vmem %s266_s16, 32  ;;  %p5087_p12 = scmp.lt.s32.totalorder %s266_s16, %s266_s16 }
  0x64   : > { %p5080_p5 = scmp.ne.s32.totalorder %s266_s16, %s5079_s12  ;;  %p5088_p0 = scmp.lt.s32.totalorder %s5079_s12, %s5079_s12 }
  0x66   : > { %p5082_p7 = pnand %p5080_p5, %p5344_p13  ;;  %p5089_p1 = por %p5088_p0, %p5087_p12 }
  0x68   : > { %p5083_p9 = pneg %p5082_p7 }
  0x6a   : > { %p5090_p4 = pnand %p5089_p1, %p5083_p9 }
  0x6c   : > { %5093 = shalt.err (!%p5090_p4)
}
  0x6d   : > { %4762 = dma.hbm_to_vmem [thread:$0]  (!%p5328_p11), %s6183_s4, 32, %s266_s16, [#allocation11], %s5221_s10, %s5221_s10, %s5222_s18  }
  0x6e   : > { %s35_s24 = sadd.s32 1, %s5210_s22  ;;  %s44_s11 = sadd.s32 1, %s5202_s20 }
  0x6f   : > { %p37_p13 = scmp.ge.s32.totalorder %s35_s24, 2  ;;  %p51_p2 = scmp.ne.s32.totalorder %s5202_s20, %s5198_s19 }
  0x70   : > { %p52_p8 = scmp.eq.s32.totalorder %s5214_s23, 0  ;;  %p4775_p6 = scmp.lt.s32.totalorder %s5214_s23, 2 }
  0x71   : > { %s6315_s24 = smov (%p37_p13, %s35_s24), 0  ;;  %p6219_p3 = scmp.ne.s32.totalorder %s6212_s27, 0 }
  0x72   : > { %p53_p10 = por %p52_p8, %p51_p2  ;;  %s39_s13 = ssub.s32 %s5210_s22, %s6315_s24 }
  0x73   : > { %p5441_p5 = por %p6219_p3, %p51_p2  ;;  %s279_s15 = sand.u32 1, %s5202_s20  }
  0x74   : > { %p42_p7 = scmp.eq.s32.totalorder %s39_s13, 0  ;;  %s3981_s10 = sshll.u32 %s279_s15, 3 }
  0x75   : > { %s4216_s18 = sshll.u32 %s5210_s22, 7  ;;  %s283_s27 = scalar_lea.vmem [#allocation4], %s3981_s10 }
  0x76   : > { %s5450_s16 = scalar_select %p42_p7, %s5202_s20, %s44_s11  }
  0x77   : > { %s5455_s6 = scalar_lea.hbm %s6179_s0, %s4216_s18  ;;  %s291_s9 = sshll.u32 %s283_s27, 4  ;;  %s5463_s9 = int_to_ptr.vmem [resolvable:$true] %s291_s9 }
  0x78   : > { %p5459_p11 = pnand %p4775_p6, %p53_p10  ;;  %s5465_s12 = scalar_lea.sflag [#allocation5], %s279_s15 }
  0x79   : > { %s5094_s29 = scalar_lea.hbm %s5455_s6, 128  ;;  %s5099_s13 = scalar_lea.hbm %s6179_s0, 256 }
  0x7a   : > { %p5095_p9 = scmp.ne.s32.totalorder %s5455_s6, %s5094_s29  ;;  %p5096_p12 = pneg %p5459_p11 }
  0x7b   : > { %p5100_p4 = scmp.lt.u32.totalorder %s5455_s6, %s6179_s0  ;;  %p5101_p13 = scmp.lt.u32.totalorder %s5099_s13, %s5094_s29 }
  0x7c   : > { %p5097_p0 = pnand %p5096_p12, %p5095_p9  ;;  %p5103_p8 = scmp.lt.u32.totalorder %s5094_s29, %s5455_s6 }
  0x7d   : > { %p5102_p2 = por %p5101_p13, %p5100_p4 }
  0x7e   : > { %p5098_p1 = pneg %p5097_p0 }
  0x7f   : > { %p5104_p6 = por %p5103_p8, %p5102_p2 }
  0x81   : > { %p5105_p10 = pnand %p5104_p6, %p5098_p1 }
  0x83   : > { %5108 = shalt.err (!%p5105_p10)
}
  0x84   : > { %s5109_s15 = scalar_lea.vmem %s5463_s9, 128  ;;  %s5224_s17 = smov [#allocation4]  }
  0x85   : > { %p5110_p3 = scmp.ne.s32.totalorder %s5463_s9, %s5109_s15  ;;  %s5114_s25 = sshll.u32 %s5224_s17, 4  ;;  %s5115_s25 = int_to_ptr.vmem [resolvable:$false] %s5114_s25 }
  0x86   : > { %s5116_s27 = scalar_lea.vmem %s5115_s25, 256  ;;  %p5117_p0 = scmp.lt.s32.totalorder %s5463_s9, %s5115_s25 }
  0x87   : > { %p5112_p7 = pnand %p5110_p3, %p5096_p12  ;;  %p5118_p4 = scmp.lt.s32.totalorder %s5116_s27, %s5109_s15 }
  0x89   : > { %p5113_p9 = pneg %p5112_p7  ;;  %p5119_p13 = por %p5118_p4, %p5117_p0 }
  0x8b   : > { %p5120_p2 = pnand %p5119_p13, %p5113_p9 }
  0x8d   : > { %5123 = shalt.err (!%p5120_p2)
}
  0x8e   : > { %s6222_s29 = smov 4   ;;  %s6223_s14 = smov 64  }
  0x8f   : > { %4766 = dma.hbm_to_vmem [thread:$0]  (!%p5459_p11), %s5455_s6, 128, %s5463_s9, %s5465_s12, %s6223_s14, %s6223_s14, %s6222_s29  }
  0x90   : > { %p6224_p12 = scmp.ne.s32.totalorder %s6216_s30, 0 }
  0x91   : > { %s5499_s11 = sand.u32 (!%p6224_p12), 1, %s5198_s19   ;;  %p6225_p1 = scmp.ne.s32.totalorder (!%p6224_p12), %s6213_s28, 0 }
  0x92   : > { %303 = sbr.rel (%p6224_p12) target bundleno = 1273 (0x4f9), region = 40  ;;  %s3985_s13 = sshll.u32 (!%p6224_p12), %s5499_s11, 3 }
  0x93   : > { %s306_s10 = scalar_lea.sflag (!%p6224_p12), [#allocation5], %s5499_s11  ;;  %s5505_s7 = scalar_lea.vmem (!%p6224_p12), [#allocation4], %s3985_s13 }
  0x99   : > { %5177 = dma.done.wait (%p6225_p1), %s306_s10, 128  }
  0x9a   : > { %5179 = vsyncadd (%p6225_p1), %s306_s10, 4294967168  ;;  %p6226_p11 = scmp.ne.s32.totalorder %s6211_s26, 0 }
  0x9c   : > { %5181 = dma.done.wait (%p6226_p11), [#allocation8], 4640  }
  0x9d   : > { %5183 = vsyncadd (%p6226_p11), [#allocation8], 4294962656 }
  0x9e   : > { %5185 = dma.done.wait (%p6226_p11), [#allocation11], 9248  }
  0x9f   : > { %5187 = vsyncadd (%p6226_p11), [#allocation11], 4294958048  ;;  %v5225_v0 = vmov 0.0   ;;  %vm6196_vm0 = vmmov 0   ;;  %v359_v1 = vlaneseq  ;;  %vm390_vm1 = vcmask 256000   ;;  %v4844_v7 = vld [vmem:[#allocation7 + $0x10] sm:$0xff]  }
  0xa0   : > { %4370 = vmatprep.subr.bf16.mxu1 %v5225_v0  ;;  %4374 = vmatprep.mubr.msk.bf16.mxu1 %vm6196_vm0, %v5225_v0  ;;  %vm6195_vm2 = vsmask.f32 2304  ;;  %vm396_vm3 = vcmask 257026   ;;  %vm6194_vm4 = vsmask.f32 7946  ;;  %v6227_v3 = vmov 0 }
  0xa1   : > { %4386 = vmatprep.subr.bf16.mxu0 %v5225_v0  ;;  %4390 = vmatprep.mubr.msk.bf16.mxu0 %vm6196_vm0, %v5225_v0  ;;  %v360_v2 = vshrl.u32 %v359_v1, 7  ;;  %vm5526_vm5 = vmand %vm390_vm1, %vm6195_vm2  ;;  %vm418_vm7 = vsmask.f32 6416  ;;  %vm610_vm8 = vcmask 1040384   ;;  %vm402_vm9 = vcmask 253952   ;;  %v4845_v10 = vld [vmem:[#allocation7 + $0x18] sm:$0xff]  }
  0xa2   : > { %v6228_v3 = vsel %vm5526_vm5, 4294967295, %v6227_v3  ;;  %vm5531_vm6 = vmand %vm396_vm3, %vm6194_vm4  ;;  %v5227_v9 = vmov 0   ;;  %4371 = vmatpush3.bf16.msra.mxu1 %v4844_v7  ;;  %v393_v12 = vld [vmem:[#allocation2] sm:$0x7]  ;;  %v399_v13 = vld [vmem:[#allocation2 + $0x8] sm:$0xc] }
  0xa3   : > { %v361_v4 = vadd.s32 8, %v360_v2  ;;  %v366_v5 = vand.u32 3, %v360_v2  ;;  %403 = vst.msk [vmem:[#allocation2 + $0xc] sm:$0x1] %vm402_vm9, %v5227_v9  ;;  %v416_v14 = vld [vmem:[%s5505_s7] sm:$0xf]  ;;  %4372 = vmatprep.subr.bf16.mxu1 %v5225_v0  ;;  %vm5552_vm13 = vmor %vm6195_vm2, %vm418_vm7 }
  0xa4   : > { %v394_v15 = vsel %vm5526_vm5, 0, %v393_v12  ;;  %v400_v16 = vsel %vm5531_vm6, 0, %v399_v13  ;;  %v417_v17 = vld [vmem:[%s5505_s7 + $0x4] sm:$0xf]  ;;  %v421_v18 = vshrl.u32 %v416_v14, 16  ;;  %v424_v19 = vshll.u32 %v416_v14, 16 }
  0xa5   : > { %v373_v8 = vand.u32 3, %v361_v4  ;;  %vm5536_vm10 = vcmp.le.s32.totalorder %v366_v5, 2  ;;  %395 = vst [vmem:[#allocation2] sm:$0x7] %v394_v15  ;;  %401 = vst [vmem:[#allocation2 + $0x8] sm:$0xc] %v400_v16 }
  0xa6   : > { %v430_v20 = vshrl.u32 %v417_v17, 16  ;;  %v433_v21 = vshll.u32 %v417_v17, 16  ;;  %v423_v22 = vrot.slane %v421_v18, 5  ;;  %v426_v23 = vrot.slane %v424_v19, 6  ;;  %v4848_v24 = vld [vmem:[#allocation7 + $0x20] sm:$0xff]   ;;  %vm606_vm11 = vmpackc.low %vm5536_vm10, %vm5536_vm10  ;;  %4373 = vmatpush3.bf16.msra.mxu1 %v4845_v10  ;;  %v4850_v29 = vld [vmem:[#allocation7 + $0x28] sm:$0xff]  }
  0xa7   : > { %vm611_vm12 = vcmask 1044484   ;;  %4378 = vmatprep.subr.bf16.mxu1 %v5225_v0  ;;  %4387 = vmatpush3.bf16.msra.mxu0 %v4848_v24  ;;  %vm389_vm14 = vcmp.le.s32.totalorder %v373_v8, 2  ;;  %v5559_v31 = vsel %vm606_vm11, 65537, %v5227_v9  ;;  %vm386_vm1 = vcmp.ge.s32.totalorder %v366_v5, 1  ;;  %v4852_v15 = vld [vmem:[#allocation7 + $0x40] sm:$0xff]   ;;  %v4854_v34 = vld [vmem:[#allocation7 + $0x48] sm:$0xff]  }
  0xa8   : > { %v432_v26 = vrot.slane %v430_v20, 5  ;;  %v435_v27 = vrot.slane %v433_v21, 6  ;;  %v427_v28 = vor.u32 %v426_v23, %v423_v22  ;;  %4388 = vmatprep.subr.bf16.mxu0 %v5225_v0  ;;  %vm607_vm15 = vmpackc.low %vm389_vm14, %vm389_vm14  ;;  %vm387_vm3 = vcmp.ge.s32.totalorder %v373_v8, 1  ;;  %v4849_v23 = vld [vmem:[#allocation7] sm:$0xff]   ;;  %s5228_s26 = smov 96   ;;  %s6007_s28 = scalar_lea.vmem [#allocation13], %s3985_s13 }
  0xa9   : > { %vm6193_vm7 = vcmask 257024   ;;  %v5562_v33 = vsel %vm607_vm15, 65537, %v5227_v9  ;;  %vm5566_vm9 = vmor %vm610_vm8, %vm611_vm12  ;;  %v613_v35 = vrot.slane %v5559_v31, 7  ;;  %vm703_vm11 = vcmask 1041408   ;;  %v4939_v25 = vld [vmem:[#allocation10 + $0x180] sm:$0xff]   ;;  %s5229_s30 = smov 32  }
  0xaa   : > { %v436_v30 = vor.u32 %v435_v27, %v432_v26  ;;  %v428_v32 = vrot.slane %v427_v28, 4  ;;  %v615_v37 = vrot.slane %v5562_v33, 7  ;;  %vm5572_vm10 = vmpackc.low %vm386_vm1, %vm386_vm1  ;;  %vm704_vm12 = vcmask 1045508   ;;  %s4225_s6 = sshll.u32 %s5206_s21, 7  ;;  %s3842_s9 = sshll.u32 %s6007_s28, 4  ;;  %s6128_s9 = int_to_ptr.vmem [resolvable:$true] %s3842_s9 }
  0xab   : > { %4389 = vmatpush3.bf16.msra.mxu0 %v4850_v29  ;;  %v614_v42 = vrot.slane %v613_v35, 4  ;;  %vm5578_vm8 = vmpackc.low %vm387_vm3, %vm387_vm3  ;;  %v701_v46 = vsel %vm5572_vm10, 65537, %v5227_v9  ;;  %vm5600_vm14 = vcmp.ne.s16.totalorder %v613_v35, 0  ;;  %vm6199_vm1 = vcmask 1046528   ;;  %s6126_s15 = scalar_lea.hbm %s6184_s5, %s4225_s6  ;;  %s3828_s17 = scalar_lea.sflag [#allocation6], %s5499_s11 }
  0xac   : > { %v438_v36 = vrot.slane %v436_v30, 4  ;;  %v437_v39 = vsel %vm5552_vm13, %v428_v32, %v436_v30  ;;  %v442_v40 = vld [vmem:[#allocation2] sm:$0xc]  ;;  %v447_v41 = vld [vmem:[#allocation2 + $0x8] sm:$0x7]  ;;  %4402 = vmatprep.subr.bf16.mxu0 %v5225_v0  ;;  %v5595_v48 = vrot.slane %v615_v37, 4  ;;  %vm705_vm3 = vmor %vm703_vm11, %vm704_vm12 }
  0xad   : > { %v443_v44 = vsel %vm5531_vm6, %v427_v28, %v442_v40  ;;  %446 = vst.msk [vmem:[#allocation2 + $0x4] sm:$0xf] %vm6193_vm7, %v437_v39  ;;  %v5593_v47 = vsel %vm5566_vm9, %v614_v42, %v615_v37  ;;  %v702_v49 = vsel %vm5578_vm8, 65537, %v5227_v9  ;;  %v706_v50 = vrot.slane %v701_v46, 6  ;;  %s5124_s25 = scalar_lea.vmem %s6128_s9, 128  ;;  %s5230_s21 = smov [#allocation13]  }
  0xae   : > { %v448_v45 = vsel %vm5526_vm5, %v438_v36, %v447_v41  ;;  %444 = vst [vmem:[#allocation2] sm:$0xc] %v443_v44  ;;  %v708_v51 = vrot.slane %v702_v49, 6  ;;  %vm6207_vm15 = vcmp.ne.s16.totalorder %v5593_v47, 0  ;;  %vm474_vm9 = vsmask.f32 7424  ;;  %p5125_p8 = scmp.ne.s32.totalorder %s6128_s9, %s5124_s25 }
  0xaf   : > { %449 = vst [vmem:[#allocation2 + $0x8] sm:$0x7] %v448_v45  ;;  %v707_v53 = vrot.slane %v706_v50, 4  ;;  %vm6208_vm7 = vcmp.ne.s16.totalorder %v5595_v48, 0  ;;  %vm6204_vm4 = vcmask 261120   ;;  %vm5610_vm2 = vcmp.ne.s16.totalorder %v706_v50, 0 }
  0xb0   : > { %v5606_v54 = vrot.slane %v708_v51, 4  ;;  %vm881_vm0 = vcmask 1042432   ;;  %vm882_vm5 = vcmask 1046532   ;;  %v884_v57 = vrot.slane %v5559_v31, 5  ;;  %v4853_v31 = vld [vmem:[#allocation7 + $0x30] sm:$0xff]   ;;  %p5126_p6 = pnand %p5125_p8, %p5441_p5  ;;  %s5128_s27 = sshll.u32 %s5230_s21, 4  ;;  %s5129_s27 = int_to_ptr.vmem [resolvable:$false] %s5128_s27 }
  0xb1   : > { %v5615_v61 = vsel %vm705_vm3, %v707_v53, %v708_v51  ;;  %vm6201_vm11 = vsmask.f32 5376  ;;  %s5130_s29 = scalar_lea.vmem %s5129_s27, 256  ;;  %p5131_p3 = scmp.lt.s32.totalorder %s6128_s9, %s5129_s27 }
  0xb2   : > { %vm6209_vm12 = vcmp.ne.s16.totalorder %v5606_v54, 0  ;;  %vm6200_vm3 = vcmp.ne.s16.totalorder %v5615_v61, 0  ;;  %v885_v46 = vrot.slane %v884_v57, 4  ;;  %p5127_p10 = pneg %p5126_p6  ;;  %p5132_p7 = scmp.lt.s32.totalorder %s5130_s29, %s5124_s25 }
  0xb4   : > { %v5608_v55 = vld [vmem:[#allocation2 + $0x4] sm:$0xf]  ;;  %p5133_p9 = por %p5132_p7, %p5131_p3 }
  0xb5   : > { %v450_v58 = vld [vmem:[#allocation2] sm:$0xf]  ;;  %v622_v2 = vsel %vm6207_vm15, %v5608_v55, 0  ;;  %v455_v17 = vsel %vm5578_vm8, %v5608_v55, 0  ;;  %v715_v36 = vsel %vm6200_vm3, %v5608_v55, 0  ;;  %vm5657_vm3 = vmor %vm881_vm0, %vm882_vm5  ;;  %vm5671_vm0 = vcmp.ne.s16.totalorder %v884_v57, 0 }
  0xb6   : > { %v460_v59 = vld [vmem:[#allocation2 + $0x8] sm:$0x1]  ;;  %v605_v60 = vld [vmem:[#allocation2] sm:$0xe]  ;;  %v3991_v62 = vcombine.low %v450_v58, %v5608_v55  ;;  %v454_v10 = vsel %vm5572_vm10, %v450_v58, 0  ;;  %vm6206_vm5 = vcmask 1045504   ;;  %p5134_p0 = pnand %p5133_p9, %p5127_p10 }
  0xb7   : > { %v3992_v63 = vcombine.low %v460_v59, %v460_v59  ;;  %v621_v1 = vsel %vm5600_vm14, %v605_v60, 0  ;;  %v699_v4 = vld [vmem:[#allocation2] sm:$0xc]  ;;  %v5623_v5 = vld [vmem:[#allocation2 + $0x8] sm:$0x7]  ;;  %v623_v7 = vsel %vm6208_vm7, %v460_v59, 0  ;;  %v3996_v49 = vcombine.low %v454_v10, %v455_v17 }
  0xb8   : > { %v4000_v8 = vcombine.low %v621_v1, %v622_v2  ;;  %v476_v11 = vshrl.u32 %v3991_v62, 16  ;;  %v478_v12 = vshll.u32 %v3991_v62, 16  ;;  %v4001_v14 = vcombine.low %v623_v7, %v623_v7  ;;  %v700_v20 = vld [vmem:[#allocation2 + $0x8] sm:$0x3]  ;;  %v880_v37 = vld [vmem:[#allocation2] sm:$0x8] }
  0xb9   : > { %v483_v13 = vshll.u32 %v3992_v63, 16  ;;  %v4010_v18 = vcombine.low %v699_v4, %v5608_v55  ;;  %v4011_v19 = vcombine.low %v5623_v5, %v5623_v5  ;;  %v714_v35 = vsel %vm5610_vm2, %v699_v4, 0  ;;  %v5653_v53 = vld [vmem:[#allocation2 + $0x8] sm:$0xf]  ;;  %v1043_v59 = vld [vmem:[#allocation2 + $0xc] sm:$0x1] }
  0xba   : > { %v638_v16 = vrot.slane %v4000_v8, 1  ;;  %v480_v21 = vrot.slane %v478_v12, 1  ;;  %v639_v24 = vrot.slane %v4001_v14, 1  ;;  %v716_v45 = vsel %vm6209_vm12, %v700_v20, 0  ;;  %v4851_v60 = vld [vmem:[#allocation7 + $0x8] sm:$0xff]   ;;  %v4858_v57 = vld [vmem:[#allocation7 + $0x60] sm:$0xff]  }
  0xbb   : > { %v485_v22 = vrot.slane %v483_v13, 1  ;;  %v806_v26 = vshrl.u32 %v4010_v18, 16  ;;  %v809_v27 = vshll.u32 %v4010_v18, 16  ;;  %v814_v28 = vshrl.u32 %v4011_v19, 16  ;;  %v1127_v4 = vld [vmem:[#allocation2 + $0x4] sm:$0xe] }
  0xbc   : > { %v817_v29 = vshll.u32 %v4011_v19, 16  ;;  %v481_v30 = vor.u32 %v480_v21, %v476_v11  ;;  %v640_v32 = vsel %vm6199_vm1, %v638_v16, %v639_v24  ;;  %vm6245_vm1 = vmmov 0   ;;  %v1042_v11 = vld [vmem:[#allocation2 + $0x8] sm:$0xf]  ;;  %v1041_v12 = vld [vmem:[#allocation2 + $0x4] sm:$0xf] }
  0xbd   : > { %4391 = vmatmul.mubr.msk.bf16.vlgmr.msra.gmra.mrb[0].mxu0 %vm6204_vm4, %v640_v32  ;;  %v808_v39 = vrot.slane %v806_v26, 2  ;;  %v811_v40 = vrot.slane %v809_v27, 3  ;;  %v816_v41 = vrot.slane %v814_v28, 2  ;;  %v5663_v62 = vcombine.low %v714_v35, %v715_v36  ;;  %v4855_v28 = vld [vmem:[#allocation7 + $0x38] sm:$0xff]   ;;  %v4959_v2 = vld [vmem:[#allocation10 + $0x200] sm:$0xff]  }
  0xbe   : > { %v819_v42 = vrot.slane %v817_v29, 3  ;;  %v486_v44 = vsel %vm474_vm9, %v481_v30, %v485_v22  ;;  %4403 = vmatpush3.bf16.msra.mxu0 %v4852_v15  ;;  %4406 = vmatprep.mubr.msk.bf16.mxu0 %vm6245_vm1, %v5225_v0  ;;  %v971_v63 = vsel %vm5572_vm10, %v5608_v55, 0  ;;  %v886_v1 = vrot.slane %v5562_v33, 5  ;;  %v4860_v29 = vld [vmem:[#allocation7 + $0x68] sm:$0xff]   ;;  %v4865_v58 = vld [vmem:[#allocation7 + $0x78] sm:$0xff]  }
  0xbf   : > { %4375 = vmatmul.mubr.msk.bf16.vlgmr.msra.gmra.mrb[0].mxu1 %vm6204_vm4, %v486_v44  ;;  %4404 = vmatprep.subr.bf16.mxu0 %v5225_v0  ;;  %v812_v50 = vor.u32 %v811_v40, %v808_v39  ;;  %v4006_v8 = vcombine.low %v716_v45, %v716_v45  ;;  %v892_v10 = vsel %vm5671_vm0, %v880_v37, 0  ;;  %v1128_v33 = vsel %vm5600_vm14, %v1127_v4, 0  ;;  %v4862_v39 = vld [vmem:[#allocation7 + $0x80] sm:$0xff]   ;;  %v4859_v44 = vld [vmem:[#allocation7 + $0x50] sm:$0xff]  }
  0xc0   : > { %v820_v51 = vor.u32 %v819_v42, %v816_v41  ;;  %4379 = vmatpush3.bf16.msra.mxu1 %v4849_v23  ;;  %4382 = vmatprep.mubr.msk.bf16.mxu1 %vm6245_vm1, %v5225_v0  ;;  %v5683_v13 = vsel %vm5657_vm3, %v885_v46, %v886_v1  ;;  %v5685_v14 = vrot.slane %v886_v1, 4  ;;  %v1129_v15 = vsel %vm6207_vm15, %v1042_v11, 0  ;;  %v4864_v46 = vld [vmem:[#allocation7 + $0x88] sm:$0xff]  }
  0xc1   : > { %4380 = vmatprep.subr.bf16.mxu1 %v5225_v0  ;;  %v1130_v16 = vsel %vm6208_vm7, %v1043_v59, 0  ;;  %v972_v17 = vsel %vm5578_vm8, %v5653_v53, 0  ;;  %v4029_v18 = vcombine.low %v1128_v33, %v1129_v15  ;;  %v4024_v21 = vcombine.low %v1041_v12, %v1042_v11 }
  0xc2   : > { %v821_v7 = vsel %vm6201_vm11, %v812_v50, %v820_v51  ;;  %4405 = vmatpush3.bf16.msra.mxu0 %v4854_v34  ;;  %vm6202_vm11 = vcmp.ne.s16.totalorder %v5683_v13, 0  ;;  %v4030_v19 = vcombine.low %v1130_v16, %v1130_v16  ;;  %vm6203_vm3 = vcmp.ne.s16.totalorder %v5685_v14, 0  ;;  %v4863_v50 = vld [vmem:[#allocation7 + $0x70] sm:$0xff]  }
  0xc3   : > { %4418 = vmatprep.subr.bf16.mxu0 %v5225_v0  ;;  %v893_v20 = vsel %vm6202_vm11, %v5608_v55, 0  ;;  %v4025_v22 = vcombine.low %v1043_v59, %v1043_v59  ;;  %v731_v23 = vrot.slane %v5663_v62, 2  ;;  %v732_v24 = vrot.slane %v4006_v8, 2  ;;  %v2140_v62 = vld [vmem:[%s5505_s7] sm:$0xf] }
  0xc4   : > { %4381 = vmatpush3.bf16.msra.mxu1 %v4851_v60  ;;  %v894_v26 = vsel %vm6203_vm3, %v5623_v5, 0  ;;  %v4015_v27 = vcombine.low %v892_v10, %v893_v20  ;;  %v1144_v30 = vrot.slane %v4029_v18, 1  ;;  %v1060_v32 = vshll.u32 %v4024_v21, 16  ;;  %v2141_v8 = vld [vmem:[%s5505_s7 + $0x4] sm:$0xf]  ;;  %v4941_v20 = vld [vmem:[#allocation10 + $0x188] sm:$0xff]  }
  0xc5   : > { %4394 = vmatprep.subr.bf16.mxu1 %v5225_v0  ;;  %4407 = vmatmul.mubr.msk.bf16.vlgmr.msra.gmra.mrb[4].mxu0 %vm6204_vm4, %v821_v7  ;;  %v4016_v55 = vcombine.low %v894_v26, %v894_v26  ;;  %v1065_v34 = vshll.u32 %v4025_v22, 16  ;;  %v1145_v35 = vrot.slane %v4030_v19, 1  ;;  %v1058_v36 = vshrl.u32 %v4024_v21, 16  ;;  %v406_v18 = vld [vmem:[#allocation3] sm:$0x7]  ;;  %v4869_v26 = vld [vmem:[#allocation10 + $0x8] sm:$0xff]  }
  0xc6   : > { %4419 = vmatpush3.bf16.msra.mxu0 %v4858_v57  ;;  %4422 = vmatprep.mubr.msk.bf16.mxu0 %vm6245_vm1, %v5225_v0  ;;  %v909_v5 = vrot.slane %v4015_v27, 3  ;;  %v1062_v40 = vrot.slane %v1060_v32, 1  ;;  %v4020_v42 = vcombine.low %v971_v63, %v972_v17  ;;  %vm6205_vm11 = vcmask 1044480   ;;  %v411_v19 = vld [vmem:[#allocation3 + $0x8] sm:$0xc]  ;;  %v4870_v27 = vld [vmem:[#allocation10 + $0x20] sm:$0xff]  }
  0xc7   : > { %4383 = vmatmul.mubr.msk.bf16.vlgmr.msra.gmra.mrb[4].mxu1 %vm6204_vm4, %v3996_v49  ;;  %4420 = vmatprep.subr.bf16.mxu0 %v5225_v0  ;;  %v910_v37 = vrot.slane %v4016_v55, 3  ;;  %v1067_v41 = vrot.slane %v1065_v34, 1  ;;  %v733_v45 = vsel %vm6206_vm5, %v731_v23, %v732_v24  ;;  %v4861_v49 = vld [vmem:[#allocation7 + $0x58] sm:$0xff]   ;;  %vm6250_vm3 = vcmask 1046528   ;;  %v4868_v24 = vld [vmem:[#allocation10] sm:$0xff]  }
  0xc8   : > { %4395 = vmatpush3.bf16.msra.mxu1 %v4853_v31  ;;  %4398 = vmatprep.mubr.msk.bf16.mxu1 %vm6245_vm1, %v5225_v0  ;;  %v1146_v51 = vsel %vm6250_vm3, %v1144_v30, %v1145_v35  ;;  %v1063_v59 = vor.u32 %v1062_v40, %v1058_v36  ;;  %v2143_v63 = vshrl.u32 %v2140_v62, 16  ;;  %v2146_v1 = vshll.u32 %v2140_v62, 16  ;;  %v4873_v55 = vld [vmem:[#allocation10 + $0x18] sm:$0xff]   ;;  %v4874_v30 = vld [vmem:[#allocation10 + $0x30] sm:$0xff]  }
  0xc9   : > { %4396 = vmatprep.subr.bf16.mxu1 %v5225_v0  ;;  %v911_v53 = vsel %vm6205_vm11, %v909_v5, %v910_v37  ;;  %v2152_v10 = vshrl.u32 %v2141_v8, 16  ;;  %v2155_v11 = vshll.u32 %v2141_v8, 16  ;;  %vm404_vm3 = vcmask 518144   ;;  %v4876_v32 = vld [vmem:[#allocation10 + $0x38] sm:$0xff]   ;;  %v2170_v35 = vld [vmem:[#allocation2] sm:$0xc] }
  0xca   : > { %4421 = vmatpush3.bf16.msra.mxu0 %v4860_v29  ;;  %v1068_v60 = vsel %vm474_vm9, %v1063_v59, %v1067_v41  ;;  %v2145_v4 = vrot.slane %v2143_v63, 5  ;;  %v2148_v7 = vrot.slane %v2146_v1, 6  ;;  %vm6251_vm11 = vsmask.f32 2304  ;;  %v4872_v29 = vld [vmem:[#allocation10 + $0x28] sm:$0xff]  }
  0xcb   : > { %4434 = vmatprep.subr.bf16.mxu0 %v5225_v0  ;;  %v2154_v12 = vrot.slane %v2152_v10, 5  ;;  %v2157_v31 = vrot.slane %v2155_v11, 6  ;;  %vm5745_vm5 = vmand %vm404_vm3, %vm6251_vm11  ;;  %vm6254_vm15 = vsmask.f32 7946  ;;  %vm6258_vm11 = vnez %v6228_v3 }
  0xcc   : > { %4397 = vmatpush3.bf16.msra.mxu1 %v4855_v28  ;;  %v2149_v33 = vor.u32 %v2148_v7, %v2145_v4  ;;  %v407_v21 = vsel %vm5745_vm5, 0, %v406_v18  ;;  %v4871_v28 = vld [vmem:[#allocation10 + $0x10] sm:$0xff]   ;;  %vm1334_vm3 = vcmask 523264  }
  0xcd   : > { %4410 = vmatprep.subr.bf16.mxu1 %v5225_v0  ;;  %4423 = vmatmul.mubr.msk.bf16.vlgmr.msra.gmra.mrb[8].mxu0 %vm6204_vm4, %v4020_v42  ;;  %v2158_v15 = vor.u32 %v2157_v31, %v2154_v12  ;;  %408 = vst [vmem:[#allocation3] sm:$0x7] %v407_v21 }
  0xce   : > { %4435 = vmatpush3.bf16.msra.mxu0 %v4862_v39  ;;  %4438 = vmatprep.mubr.msk.bf16.mxu0 %vm6245_vm1, %v5225_v0  ;;  %v2150_v57 = vrot.slane %v2149_v33, 4 }
  0xcf   : > { %4399 = vmatmul.mubr.msk.bf16.vlgmr.msra.gmra.mrb[8].mxu1 %vm6204_vm4, %v733_v45  ;;  %4436 = vmatprep.subr.bf16.mxu0 %v5225_v0  ;;  %v2160_v17 = vrot.slane %v2158_v15, 4 }
  0xd0   : > { %4411 = vmatpush3.bf16.msra.mxu1 %v4859_v44  ;;  %4414 = vmatprep.mubr.msk.bf16.mxu1 %vm6245_vm1, %v5225_v0  ;;  %v2159_v16 = vsel %vm5552_vm13, %v2150_v57, %v2158_v15 }
  0xd1   : > { %4412 = vmatprep.subr.bf16.mxu1 %v5225_v0  ;;  %2161 = vrot.lane.b32.xlu0 %v2149_v33, %s5228_s26 }
  0xd2   : > { %4437 = vmatpush3.bf16.msra.mxu0 %v4864_v46  ;;  %2165 = vrot.lane.b32.xlu1 %v2160_v17, %s5228_s26 }
  0xd3   : > { %4454 = vmatprep.subr.bf16.mxu0 %v5225_v0 }
  0xd4   : > { %4413 = vmatpush3.bf16.msra.mxu1 %v4861_v49 }
  0xd5   : > { %4426 = vmatprep.subr.bf16.mxu1 %v5225_v0  ;;  %4439 = vmatmul.mubr.msk.bf16.vlgmr.msra.gmra.mrb[12].mxu0 %vm6204_vm4, %v1146_v51 }
  0xd6   : > { %4462 = vmatprep.mubr.msk.bf16.mxu0 %vm6245_vm1, %v5225_v0  ;;  %2163 = vrot.lane.b32.xlu0 %v2159_v16, %s5228_s26 }
  0xd7   : > { %4415 = vmatmul.mubr.msk.bf16.vlgmr.msra.gmra.mrb[12].mxu1 %vm6204_vm4, %v911_v53  ;;  %4455 = vmatpush3.bf16.msra.mxu0 %v4868_v24 }
  0xd8   : > { %4427 = vmatpush3.bf16.msra.mxu1 %v4863_v50  ;;  %4430 = vmatprep.mubr.msk.bf16.mxu1 %vm6245_vm1, %v5225_v0 }
  0xd9   : > { %4428 = vmatprep.subr.bf16.mxu1 %v5225_v0  ;;  %4456 = vmatprep.subr.bf16.mxu0 %v5225_v0 }
  0xdb   : > { %4457 = vmatpush3.bf16.msra.mxu0 %v4869_v26 }
  0xdc   : > { %4429 = vmatpush3.bf16.msra.mxu1 %v4865_v58  ;;  %4458 = vmatprep.subr.bf16.mxu0 %v5225_v0 }
  0xdd   : > { %4442 = vmatprep.subr.bf16.mxu1 %v5225_v0 }
  0xdf   : > { %4431 = vmatmul.mubr.msk.bf16.vlgmr.msra.gmra.mrb[16].mxu1 %vm6204_vm4, %v1068_v60  ;;  %vm409_vm4 = vcmask 519170   ;;  %4459 = vmatpush3.bf16.msra.mxu0 %v4871_v28 }
  0xe0   : > { %4450 = vmatprep.mubr.msk.bf16.mxu1 %vm6245_vm1, %v5225_v0  ;;  %vm5752_vm7 = vmand %vm409_vm4, %vm6254_vm15  ;;  %4443 = vmatpush3.bf16.msra.mxu1 %v4870_v27  ;;  %vm414_vm4 = vcmask 516096   ;;  %vm6257_vm15 = vcmask 257024  }
  0xe1   : > { %v412_v23 = vsel %vm5752_vm7, 0, %v411_v19  ;;  %4444 = vmatprep.subr.bf16.mxu1 %v5225_v0  ;;  %4460 = vmatprep.subr.bf16.mxu0 %v5225_v0  ;;  %415 = vst.msk [vmem:[#allocation3 + $0xc] sm:$0x1] %vm414_vm4, %v5227_v9  ;;  %v2174_v9 = vld [vmem:[#allocation2 + $0x8] sm:$0x7]  ;;  %vm6259_vm4 = vcmp.ne.s16.totalorder %v5615_v61, 0 }
  0xe2   : > { %413 = vst [vmem:[#allocation3 + $0x8] sm:$0xc] %v412_v23 }
  0xe3   : > { %4461 = vmatpush3.bf16.msra.mxu0 %v4873_v55 }
  0xe4   : > { %4445 = vmatpush3.bf16.msra.mxu1 %v4872_v29  ;;  %4478 = vmatprep.subr.bf16.mxu0 %v5225_v0 }
  0xe5   : > { %4446 = vmatprep.subr.bf16.mxu1 %v5225_v0 }
  0xe8   : > { %4447 = vmatpush3.bf16.msra.mxu1 %v4874_v30 }
  0xe9   : > { %4448 = vmatprep.subr.bf16.mxu1 %v5225_v0 }
  0xec   : > { %4449 = vmatpush3.bf16.msra.mxu1 %v4876_v32 }
  0xed   : > { %4466 = vmatprep.subr.bf16.mxu1 %v5225_v0 }
 0x143   : > { %v2162_v34 = vpop.permute.xlu0 %2161 }
 0x144   : > { %v2171_v36 = vsel %vm5531_vm6, %v2162_v34, %v2170_v35  ;;  %v2166_v37 = vpop.permute.xlu1 %2165  ;;  %vm1263_vm6 = vcmask 519168  }
 0x145   : > { %2172 = vst [vmem:[#allocation2] sm:$0xc] %v2171_v36  ;;  %v2175_v39 = vsel %vm6258_vm11, %v2166_v37, %v2174_v9  ;;  %v4034_v9 = vld [vmem:[#allocation9] ss:$0 sm:$0xff]  ;;  %vm6261_vm11 = vcmp.ne.s16.totalorder %v5593_v47, 0 }
 0x146   : > { %2176 = vst [vmem:[#allocation2 + $0x8] sm:$0x7] %v2175_v39 }
 0x148   : > { %v2164_v5 = vpop.permute.xlu0 %2163 }
 0x149   : > { %2173 = vst.msk [vmem:[#allocation2 + $0x4] sm:$0xf] %vm6257_vm15, %v2164_v5  ;;  %vm6260_vm15 = vcmp.ne.s16.totalorder %v5595_v48, 0 }
 0x190   : > { %v690_v40 = vpop.f32.mrb[0].mxu0 }
 0x191   : > { %v4392_v41 = vpop.f32.mrb[1].mxu0 }
 0x192   : > { %v537_v42 = vpop.f32.mrb[0].mxu1  ;;  %v693_v44 = vpop.f32.mrb[2].mxu0 }
 0x193   : > { %v4376_v45 = vpop.f32.mrb[1].mxu1  ;;  %v4393_v46 = vpop.f32.mrb[3].mxu0 }
 0x194   : > { %v540_v49 = vpop.f32.mrb[2].mxu1 }
 0x195   : > { %v4377_v50 = vpop.f32.mrb[3].mxu1 }
 0x198   : > { %v871_v6 = vpop.f32.mrb[4].mxu0 }
 0x199   : > { %v4408_v51 = vpop.f32.mrb[5].mxu0 }
 0x19a   : > { %v598_v53 = vpop.f32.mrb[4].mxu1  ;;  %v874_v58 = vpop.f32.mrb[6].mxu0 }
 0x19b   : > { %v599_v59 = vadd.f32 %v598_v53, %v537_v42  ;;  %v4384_v60 = vpop.f32.mrb[5].mxu1  ;;  %v4409_v62 = vpop.f32.mrb[7].mxu0 }
 0x19c   : > { %v601_v63 = vpop.f32.mrb[6].mxu1 }
 0x19d   : > { %v602_v1 = vadd.f32 %v601_v63, %v540_v49  ;;  %v4385_v3 = vpop.f32.mrb[7].mxu1  ;;  %v697_v4 = vadd.f32 %v690_v40, %v599_v59 }
 0x19f   : > { %v698_v7 = vadd.f32 %v693_v44, %v602_v1 }
 0x1a0   : > { %v1032_v8 = vpop.f32.mrb[8].mxu0 }
 0x1a1   : > { %v4424_v10 = vpop.f32.mrb[9].mxu0 }
 0x1a2   : > { %v783_v11 = vpop.f32.mrb[8].mxu1  ;;  %v1035_v33 = vpop.f32.mrb[10].mxu0 }
 0x1a3   : > { %v790_v12 = vadd.f32 %v783_v11, %v697_v4  ;;  %v4400_v31 = vpop.f32.mrb[9].mxu1  ;;  %v4425_v57 = vpop.f32.mrb[11].mxu0 }
 0x1a4   : > { %v786_v15 = vpop.f32.mrb[10].mxu1 }
 0x1a5   : > { %v791_v16 = vadd.f32 %v786_v15, %v698_v7  ;;  %v4401_v17 = vpop.f32.mrb[11].mxu1  ;;  %v878_v18 = vadd.f32 %v871_v6, %v790_v12 }
 0x1a7   : > { %v879_v19 = vadd.f32 %v874_v58, %v791_v16 }
 0x1a8   : > { %v1196_v21 = vpop.f32.mrb[12].mxu0 }
 0x1a9   : > { %v4440_v23 = vpop.f32.mrb[13].mxu0 }
 0x1aa   : > { %v961_v24 = vpop.f32.mrb[12].mxu1  ;;  %v1199_v26 = vpop.f32.mrb[14].mxu0 }
 0x1ab   : > { %v968_v27 = vadd.f32 %v961_v24, %v878_v18  ;;  %v4416_v28 = vpop.f32.mrb[13].mxu1  ;;  %v4441_v29 = vpop.f32.mrb[15].mxu0 }
 0x1ac   : > { %v964_v55 = vpop.f32.mrb[14].mxu1 }
 0x1ad   : > { %v969_v30 = vadd.f32 %v964_v55, %v879_v19  ;;  %v4417_v32 = vpop.f32.mrb[15].mxu1  ;;  %v1039_v34 = vadd.f32 %v1032_v8, %v968_v27  ;;  %v1265_v55 = vld [vmem:[#allocation3 + $0x8] sm:$0x7] }
 0x1af   : > { %v1040_v35 = vadd.f32 %v1035_v33, %v969_v30 }
 0x1b2   : > { %v1118_v36 = vpop.f32.mrb[16].mxu1 }
 0x1b3   : > { %v1125_v5 = vadd.f32 %v1118_v36, %v1039_v34  ;;  %v4432_v37 = vpop.f32.mrb[17].mxu1 }
 0x1b4   : > { %v1121_v39 = vpop.f32.mrb[18].mxu1 }
 0x1b5   : > { %v1203_v40 = vadd.f32 %v1196_v21, %v1125_v5  ;;  %v1126_v41 = vadd.f32 %v1121_v39, %v1040_v35  ;;  %v4433_v42 = vpop.f32.mrb[19].mxu1  ;;  %v1260_v21 = vld [vmem:[#allocation3] sm:$0xc] }
 0x1b7   : > { %v1212_v44 = vadd.f32 %v4034_v9, %v1203_v40  ;;  %v1204_v45 = vadd.f32 %v1199_v26, %v1126_v41 }
 0x1b9   : > { %v1216_v46 = vmul.f32 0.044715, %v1212_v44  ;;  %v1213_v49 = vadd.f32 %v4034_v9, %v1204_v45  ;;  %v1214_v3 = vmul.f32 0.5, %v1212_v44  ;;  %v4875_v9 = vld [vmem:[#allocation10 + $0x60] sm:$0xff]   ;;  %v4877_v45 = vld [vmem:[#allocation10 + $0x68] sm:$0xff]  }
 0x1bb   : > { %v1218_v50 = vmul.f32 %v1216_v46, %v1212_v44  ;;  %v1217_v6 = vmul.f32 0.044715, %v1213_v49  ;;  %v1215_v10 = vmul.f32 0.5, %v1213_v49 }
 0x1bd   : > { %v1220_v51 = vmul.f32 %v1218_v50, %v1212_v44  ;;  %v1219_v53 = vmul.f32 %v1217_v6, %v1213_v49 }
 0x1bf   : > { %v1222_v58 = vadd.f32 %v1220_v51, %v1212_v44  ;;  %v1221_v59 = vmul.f32 %v1219_v53, %v1213_v49 }
 0x1c1   : > { %v1224_v60 = vmul.f32 0.7978846, %v1222_v58  ;;  %v1223_v62 = vadd.f32 %v1221_v59, %v1213_v49  ;;  %v4880_v58 = vld [vmem:[#allocation10 + $0x40] sm:$0xff]  }
 0x1c3   : > { %4974 = vtanh.f32 %v1224_v60  ;;  %v1225_v63 = vmul.f32 0.7978846, %v1223_v62  ;;  %v4881_v62 = vld [vmem:[#allocation10 + $0x70] sm:$0xff]  }
 0x1c5   : > { %4976 = vtanh.f32 %v1225_v63 }
 0x1cd   : > { %v4975_v1 = vpop.eup %4974 }
 0x1ce   : > { %v1228_v4 = vadd.f32 1.0, %v4975_v1 }
 0x1cf   : > { %v4977_v7 = vpop.eup %4976 }
 0x1d0   : > { %v1230_v8 = vmul.f32 %v1228_v4, %v1214_v3  ;;  %v1229_v11 = vadd.f32 1.0, %v4977_v7  ;;  %v4882_v3 = vld [vmem:[#allocation10 + $0x48] sm:$0xff]  }
 0x1d2   : > { %v4217_v33 = vpack.c.bf16 %v1230_v8, %v1230_v8  ;;  %v1231_v12 = vmul.f32 %v1229_v11, %v1215_v10  ;;  %v4883_v8 = vld [vmem:[#allocation10 + $0x78] sm:$0xff]  }
 0x1d4   : > { %v1239_v31 = vshrl.u32 %v4217_v33, 16  ;;  %v1242_v57 = vshll.u32 %v4217_v33, 16  ;;  %v4218_v15 = vpack.c.bf16 %v1231_v12, %v1231_v12  ;;  %v4884_v33 = vld [vmem:[#allocation10 + $0x50] sm:$0xff]  }
 0x1d6   : > { %v1241_v16 = vrot.slane %v1239_v31, 5  ;;  %v1244_v17 = vrot.slane %v1242_v57, 6  ;;  %v1248_v18 = vshrl.u32 %v4218_v15, 16  ;;  %v1251_v19 = vshll.u32 %v4218_v15, 16 }
 0x1d8   : > { %v1245_v23 = vor.u32 %v1244_v17, %v1241_v16  ;;  %v1250_v24 = vrot.slane %v1248_v18, 5  ;;  %v1253_v26 = vrot.slane %v1251_v19, 6  ;;  %v4885_v16 = vld [vmem:[#allocation10 + $0xa0] sm:$0xff]  }
 0x1da   : > { %v1246_v27 = vrot.slane %v1245_v23, 4  ;;  %v1261_v28 = vsel %vm5752_vm7, %v1245_v23, %v1260_v21  ;;  %v1254_v29 = vor.u32 %v1253_v26, %v1250_v24  ;;  %v4886_v21 = vld [vmem:[#allocation10 + $0x58] sm:$0xff]   ;;  %v4887_v24 = vld [vmem:[#allocation10 + $0xa8] sm:$0xff]  }
 0x1db   : > { %1262 = vst [vmem:[#allocation3] sm:$0xc] %v1261_v28 }
 0x1dc   : > { %v1255_v30 = vsel %vm5552_vm13, %v1246_v27, %v1254_v29  ;;  %v1256_v32 = vrot.slane %v1254_v29, 4  ;;  %v4888_v29 = vld [vmem:[#allocation10 + $0x80] sm:$0xff]  }
 0x1dd   : > { %1264 = vst.msk [vmem:[#allocation3 + $0x4] sm:$0xf] %vm1263_vm6, %v1255_v30 }
 0x1de   : > { %v1266_v34 = vsel %vm5745_vm5, %v1256_v32, %v1265_v55  ;;  %v4889_v32 = vld [vmem:[#allocation10 + $0xb0] sm:$0xff]  }
 0x1df   : > { %1267 = vst [vmem:[#allocation3 + $0x8] sm:$0x7] %v1266_v34 }
 0x1e2   : > { %v1268_v35 = vld [vmem:[#allocation3] sm:$0xf] }
 0x1e3   : > { %v1270_v5 = vsel %vm5572_vm10, %v1268_v35, 0  ;;  %v1546_v63 = vld [vmem:[#allocation3] sm:$0xc] }
 0x1e4   : > { %v5779_v36 = vld [vmem:[#allocation3 + $0x4] sm:$0xf]  ;;  %v1548_v7 = vsel %vm5610_vm2, %v1546_v63, 0  ;;  %v1452_v31 = vld [vmem:[#allocation3] sm:$0xe] }
 0x1e5   : > { %v1271_v37 = vsel %vm5578_vm8, %v5779_v36, 0  ;;  %v4037_v39 = vcombine.low %v1268_v35, %v5779_v36  ;;  %v1549_v1 = vsel %vm6259_vm4, %v5779_v36, 0  ;;  %v1454_v57 = vsel %vm6261_vm11, %v5779_v36, 0  ;;  %v1744_v34 = vld [vmem:[#allocation3] sm:$0x8] }
 0x1e6   : > { %v4044_v40 = vcombine.low %v1270_v5, %v1271_v37  ;;  %v1280_v41 = vld [vmem:[#allocation3 + $0x8] sm:$0x1]  ;;  %v4057_v10 = vcombine.low %v1548_v7, %v1549_v1  ;;  %v1453_v18 = vsel %vm5600_vm14, %v1452_v31, 0  ;;  %vm6262_vm4 = vcmask 1045504   ;;  %v4890_v37 = vld [vmem:[#allocation10 + $0x88] sm:$0xff]   ;;  %v4894_v1 = vld [vmem:[#allocation10 + $0x98] sm:$0xff]  }
 0x1e7   : > { %v4038_v42 = vcombine.low %v1280_v41, %v1280_v41  ;;  %v1301_v44 = vshll.u32 %v4037_v39, 16  ;;  %v1299_v46 = vshrl.u32 %v4037_v39, 16  ;;  %v1547_v6 = vld [vmem:[#allocation3 + $0x8] sm:$0x3]  ;;  %v1455_v11 = vsel %vm6260_vm15, %v1280_v41, 0  ;;  %v4891_v41 = vld [vmem:[#allocation10 + $0xb8] sm:$0xff]  }
 0x1e8   : > { %4463 = vmatmul.mubr.msk.bf16.vlgmr.msra.gmra.mrb[16].mxu0 %vm1334_vm3, %v4044_v40  ;;  %v1550_v59 = vsel %vm6209_vm12, %v1547_v6, 0  ;;  %v1568_v15 = vrot.slane %v4057_v10, 2  ;;  %v4051_v17 = vcombine.low %v1455_v11, %v1455_v11  ;;  %v4050_v23 = vcombine.low %v1453_v18, %v1454_v57  ;;  %v1641_v27 = vld [vmem:[#allocation3 + $0x8] sm:$0x7]  ;;  %v5847_v11 = vld [vmem:[#allocation3 + $0xc] sm:$0x1] }
 0x1e9   : > { %4479 = vmatpush3.bf16.msra.mxu0 %v4875_v9  ;;  %v1303_v49 = vrot.slane %v1301_v44, 1  ;;  %v1306_v50 = vshll.u32 %v4038_v42, 16  ;;  %4486 = vmatprep.mubr.msk.bf16.mxu0 %vm6245_vm1, %v5225_v0  ;;  %v4058_v4 = vcombine.low %v1550_v59, %v1550_v59  ;;  %vm6263_vm15 = vcmp.ne.s16.totalorder %v5685_v14, 0  ;;  %v4896_v57 = vld [vmem:[#allocation10 + $0xc0] sm:$0xff]   ;;  %v4897_v18 = vld [vmem:[#allocation10 + $0xf0] sm:$0xff]  }
 0x1ea   : > { %4480 = vmatprep.subr.bf16.mxu0 %v5225_v0  ;;  %v1474_v26 = vrot.slane %v4051_v17, 1  ;;  %v1473_v28 = vrot.slane %v4050_v23, 1  ;;  %v1747_v55 = vsel %vm6263_vm15, %v1641_v27, 0  ;;  %vm6264_vm11 = vcmask 1046528   ;;  %v4898_v23 = vld [vmem:[#allocation10 + $0xc8] sm:$0xff]  }
 0x1eb   : > { %v1304_v51 = vor.u32 %v1303_v49, %v1299_v46  ;;  %v1308_v53 = vrot.slane %v1306_v50, 1  ;;  %v1569_v12 = vrot.slane %v4058_v4, 2  ;;  %v4065_v35 = vcombine.low %v1641_v27, %v1641_v27  ;;  %v4892_v46 = vld [vmem:[#allocation10 + $0x90] sm:$0xff]   ;;  %v4899_v27 = vld [vmem:[#allocation10 + $0xf8] sm:$0xff]  }
 0x1ec   : > { %v1475_v30 = vsel %vm6264_vm11, %v1473_v28, %v1474_v26  ;;  %v4072_v9 = vcombine.low %v1747_v55, %v1747_v55  ;;  %v4064_v39 = vcombine.low %v1546_v63, %v5779_v36  ;;  %v1745_v40 = vsel %vm5671_vm0, %v1744_v34, 0 }
 0x1ed   : > { %4481 = vmatpush3.bf16.msra.mxu0 %v4877_v45  ;;  %v1309_v60 = vsel %vm474_vm9, %v1304_v51, %v1308_v53  ;;  %v1570_v19 = vsel %vm6262_vm4, %v1568_v15, %v1569_v12  ;;  %vm6265_vm4 = vcmp.ne.s16.totalorder %v5683_v13, 0  ;;  %v1666_v44 = vshrl.u32 %v4065_v35, 16  ;;  %v5837_v51 = vld [vmem:[#allocation3 + $0x8] sm:$0xf]  ;;  %v5851_v12 = vld [vmem:[#allocation2 + $0x4] sm:$0xf] }
 0x1ee   : > { %4451 = vmatmul.mubr.msk.bf16.vlgmr.msra.gmra.mrb[20].mxu1 %vm1334_vm3, %v1309_v60  ;;  %4482 = vmatprep.subr.bf16.mxu0 %v5225_v0  ;;  %v1746_v5 = vsel %vm6265_vm4, %v5779_v36, 0  ;;  %v1669_v45 = vshll.u32 %v4065_v35, 16  ;;  %v1766_v49 = vrot.slane %v4072_v9, 3  ;;  %v1658_v50 = vshrl.u32 %v4064_v39, 16  ;;  %v4903_v35 = vld [vmem:[#allocation7 + $0xa0] sm:$0xff]  }
 0x1ef   : > { %4467 = vmatpush3.bf16.msra.mxu1 %v4880_v58  ;;  %4474 = vmatprep.mubr.msk.bf16.mxu1 %vm6245_vm1, %v5225_v0  ;;  %v4071_v42 = vcombine.low %v1745_v40, %v1746_v5  ;;  %v1661_v6 = vshll.u32 %v4064_v39, 16  ;;  %v4893_v58 = vld [vmem:[#allocation10 + $0xe0] sm:$0xff]   ;;  %v1668_v59 = vrot.slane %v1666_v44, 2  ;;  %vm6266_vm15 = vcmask 1044480  }
 0x1f0   : > { %4468 = vmatprep.subr.bf16.mxu1 %v5225_v0  ;;  %v1671_v60 = vrot.slane %v1669_v45, 3  ;;  %v4085_v15 = vcombine.low %v5847_v11, %v5847_v11  ;;  %vm6267_vm11 = vsmask.f32 5376  ;;  %v1838_v39 = vld [vmem:[#allocation3 + $0x8] sm:$0xf]  ;;  %vm6268_vm4 = vcmask 261120  }
 0x1f1   : > { %4483 = vmatpush3.bf16.msra.mxu0 %v4881_v62  ;;  %v1765_v53 = vrot.slane %v4071_v42, 3  ;;  %v1925_v62 = vld [vmem:[#allocation3 + $0x4] sm:$0xf]  ;;  %v1663_v4 = vrot.slane %v1661_v6, 3  ;;  %v4905_v42 = vld [vmem:[#allocation7 + $0xa8] sm:$0xff]   ;;  %v1840_v44 = vsel %vm5578_vm8, %v1838_v39, 0 }
 0x1f2   : > { %4484 = vmatprep.subr.bf16.mxu0 %v5225_v0  ;;  %v4084_v7 = vcombine.low %v1925_v62, %v5837_v51  ;;  %v1672_v10 = vor.u32 %v1671_v60, %v1668_v59  ;;  %v1953_v26 = vshll.u32 %v4085_v15, 16  ;;  %v4910_v59 = vld [vmem:[#allocation10 + $0x108] sm:$0xff]   ;;  %v2408_v60 = vld [vmem:[#allocation2 + $0x8] sm:$0x3] }
 0x1f3   : > { %4469 = vmatpush3.bf16.msra.mxu1 %v4882_v3  ;;  %v1767_v63 = vsel %vm6266_vm15, %v1765_v53, %v1766_v49  ;;  %v1660_v3 = vrot.slane %v1658_v50, 2  ;;  %v1839_v49 = vsel %vm5572_vm10, %v5779_v36, 0  ;;  %v4906_v50 = vld [vmem:[#allocation10 + $0x100] sm:$0xff]   ;;  %v2407_v36 = vld [vmem:[#allocation2] sm:$0xc]  ;;  %v4911_v62 = vld [vmem:[#allocation7 + $0x98] sm:$0xff]  }
 0x1f4   : > { %4470 = vmatprep.subr.bf16.mxu1 %v5225_v0  ;;  %v1946_v28 = vshrl.u32 %v4084_v7, 16  ;;  %v1955_v34 = vrot.slane %v1953_v26, 1  ;;  %v4078_v6 = vcombine.low %v1839_v49, %v1840_v44  ;;  %vm6269_vm15 = vcmp.ne.s16.totalorder %v5595_v48, 0 }
 0x1f5   : > { %4485 = vmatpush3.bf16.msra.mxu0 %v4883_v8  ;;  %v4895_v8 = vld [vmem:[#allocation10 + $0xe8] sm:$0xff]   ;;  %v1664_v31 = vor.u32 %v1663_v4, %v1660_v3 }
 0x1f6   : > { %4502 = vmatprep.subr.bf16.mxu0 %v5225_v0 }
 0x1f7   : > { %4471 = vmatpush3.bf16.msra.mxu1 %v4884_v33  ;;  %v5849_v33 = vld [vmem:[#allocation2] sm:$0xf]  ;;  %v1673_v17 = vsel %vm6267_vm11, %v1664_v31, %v1672_v10  ;;  %vm6270_vm11 = vcmp.ne.s16.totalorder %v5593_v47, 0  ;;  %v2409_v10 = vsel %vm5610_vm2, %v2407_v36, 0 }
 0x1f8   : > { %4487 = vmatmul.mubr.msk.bf16.vlgmr.msra.gmra.mrb[20].mxu0 %vm1334_vm3, %v1570_v19  ;;  %4472 = vmatprep.subr.bf16.mxu1 %v5225_v0  ;;  %v4101_v19 = vcombine.low %v5849_v33, %v5851_v12  ;;  %v2179_v3 = vsel %vm5572_vm10, %v5849_v33, 0  ;;  %v2029_v4 = vsel %vm6270_vm11, %v5837_v51, 0  ;;  %v2411_v33 = vsel %vm6209_vm12, %v2408_v60, 0 }
 0x1f9   : > { %4503 = vmatpush3.bf16.msra.mxu0 %v4885_v16  ;;  %4510 = vmatprep.mubr.msk.bf16.mxu0 %vm6245_vm1, %v5225_v0  ;;  %v1948_v16 = vshll.u32 %v4084_v7, 16  ;;  %v4912_v7 = vld [vmem:[#allocation10 + $0x110] sm:$0xff]   ;;  %vm6277_vm12 = vcmask 1045504  }
 0x1fa   : > { %4504 = vmatprep.subr.bf16.mxu0 %v5225_v0  ;;  %v2203_v55 = vshll.u32 %v4101_v19, 16  ;;  %v2201_v5 = vshrl.u32 %v4101_v19, 16  ;;  %v4116_v19 = vcombine.low %v2411_v33, %v2411_v33 }
 0x1fb   : > { %4473 = vmatpush3.bf16.msra.mxu1 %v4886_v21  ;;  %v5861_v21 = vld [vmem:[#allocation2 + $0x8] sm:$0x1] }
 0x1fc   : > { %4490 = vmatprep.subr.bf16.mxu1 %v5225_v0 }
 0x1fd   : > { %4505 = vmatpush3.bf16.msra.mxu0 %v4887_v24  ;;  %v1950_v24 = vrot.slane %v1948_v16, 1  ;;  %v2329_v16 = vld [vmem:[#allocation2] sm:$0xe] }
 0x1fe   : > { %4475 = vmatmul.mubr.msk.bf16.vlgmr.msra.gmra.mrb[24].mxu1 %vm1334_vm3, %v1475_v30  ;;  %4506 = vmatprep.subr.bf16.mxu0 %v5225_v0  ;;  %v4900_v30 = vld [vmem:[#allocation10 + $0xd0] sm:$0xff]  }
 0x1ff   : > { %4491 = vmatpush3.bf16.msra.mxu1 %v4888_v29  ;;  %4498 = vmatprep.mubr.msk.bf16.mxu1 %vm6245_vm1, %v5225_v0  ;;  %v4102_v29 = vcombine.low %v5861_v21, %v5861_v21 }
 0x200   : > { %4492 = vmatprep.subr.bf16.mxu1 %v5225_v0 }
 0x201   : > { %4507 = vmatpush3.bf16.msra.mxu0 %v4889_v32  ;;  %v1951_v32 = vor.u32 %v1950_v24, %v1946_v28  ;;  %v2208_v9 = vshll.u32 %v4102_v29, 16  ;;  %v4915_v24 = vld [vmem:[#allocation7 + $0xc8] sm:$0xff]   ;;  %v2331_v28 = vsel %vm6270_vm11, %v5851_v12, 0  ;;  %vm6275_vm11 = vcmp.ne.s16.totalorder %v5685_v14, 0 }
 0x202   : > { %4508 = vmatprep.subr.bf16.mxu0 %v5225_v0 }
 0x203   : > { %4493 = vmatpush3.bf16.msra.mxu1 %v4890_v37  ;;  %v2205_v37 = vrot.slane %v2203_v55, 1  ;;  %v1956_v40 = vsel %vm474_vm9, %v1951_v32, %v1955_v34  ;;  %v2573_v32 = vld [vmem:[#allocation2] sm:$0x8] }
 0x204   : > { %4494 = vmatprep.subr.bf16.mxu1 %v5225_v0 }
 0x205   : > { %4509 = vmatpush3.bf16.msra.mxu0 %v4891_v41  ;;  %v4904_v41 = vld [vmem:[#allocation10 + $0xd8] sm:$0xff]   ;;  %v2206_v45 = vor.u32 %v2205_v37, %v2201_v5  ;;  %v4916_v5 = vld [vmem:[#allocation7 + $0xb0] sm:$0xff]  }
 0x206   : > { %4526 = vmatprep.subr.bf16.mxu0 %v5225_v0 }
 0x207   : > { %4495 = vmatpush3.bf16.msra.mxu1 %v4892_v46  ;;  %v2210_v46 = vrot.slane %v2208_v9, 1  ;;  %v2722_v9 = vld [vmem:[#allocation2 + $0x4] sm:$0xf] }
 0x208   : > { %4511 = vmatmul.mubr.msk.bf16.vlgmr.msra.gmra.mrb[24].mxu0 %vm1334_vm3, %v1767_v63  ;;  %4496 = vmatprep.subr.bf16.mxu1 %v5225_v0  ;;  %v2027_v63 = vld [vmem:[#allocation3 + $0x4] sm:$0xe] }
 0x209   : > { %4527 = vmatpush3.bf16.msra.mxu0 %v4893_v58  ;;  %4534 = vmatprep.mubr.msk.bf16.mxu0 %vm6245_vm1, %v5225_v0  ;;  %v2211_v53 = vsel %vm474_vm9, %v2206_v45, %v2210_v46  ;;  %v4909_v58 = vld [vmem:[#allocation7 + $0x90] sm:$0xff]   ;;  %v2028_v51 = vsel %vm5600_vm14, %v2027_v63, 0  ;;  %v4120_v45 = vcombine.low %v2407_v36, %v5851_v12  ;;  %v4918_v46 = vld [vmem:[#allocation7 + $0xe0] sm:$0xff]   ;;  %v4920_v63 = vld [vmem:[#allocation7 + $0xe8] sm:$0xff]  }
 0x20a   : > { %4528 = vmatprep.subr.bf16.mxu0 %v5225_v0  ;;  %v4091_v15 = vcombine.low %v2028_v51, %v2029_v4 }
 0x20b   : > { %4497 = vmatpush3.bf16.msra.mxu1 %v4894_v1  ;;  %v2030_v1 = vsel %vm6269_vm15, %v5847_v11, 0  ;;  %vm6272_vm15 = vcmask 261120  }
 0x20c   : > { %4514 = vmatprep.subr.bf16.mxu1 %v5225_v0  ;;  %v4092_v31 = vcombine.low %v2030_v1, %v2030_v1  ;;  %v2048_v29 = vrot.slane %v4091_v15, 1  ;;  %v2499_v1 = vshrl.u32 %v4120_v45, 16 }
 0x20d   : > { %4529 = vmatpush3.bf16.msra.mxu0 %v4895_v8  ;;  %v2180_v8 = vsel %vm5578_vm8, %v5851_v12, 0 }
 0x20e   : > { %4499 = vmatmul.mubr.msk.bf16.vlgmr.msra.gmra.mrb[28].mxu1 %vm1334_vm3, %v1673_v17  ;;  %4530 = vmatprep.subr.bf16.mxu0 %v5225_v0  ;;  %v4106_v17 = vcombine.low %v2179_v3, %v2180_v8  ;;  %v2049_v26 = vrot.slane %v4092_v31, 1  ;;  %v2502_v3 = vshll.u32 %v4120_v45, 16  ;;  %v4921_v8 = vld [vmem:[#allocation7 + $0xd0] sm:$0xff]   ;;  %v2501_v15 = vrot.slane %v2499_v1, 2 }
 0x20f   : > { %4515 = vmatpush3.bf16.msra.mxu1 %v4896_v57  ;;  %4522 = vmatprep.mubr.msk.bf16.mxu1 %vm6245_vm1, %v5225_v0  ;;  %v4913_v57 = vld [vmem:[#allocation7 + $0xc0] sm:$0xff]  }
 0x210   : > { %4516 = vmatprep.subr.bf16.mxu1 %v5225_v0 }
 0x211   : > { %4531 = vmatpush3.bf16.msra.mxu0 %v4897_v18 }
 0x212   : > { %4532 = vmatprep.subr.bf16.mxu0 %v5225_v0 }
 0x213   : > { %4517 = vmatpush3.bf16.msra.mxu1 %v4898_v23  ;;  %v4914_v23 = vld [vmem:[#allocation10 + $0x118] sm:$0xff]  }
 0x214   : > { %4518 = vmatprep.subr.bf16.mxu1 %v5225_v0 }
 0x215   : > { %4533 = vmatpush3.bf16.msra.mxu0 %v4899_v27  ;;  %v2330_v27 = vsel %vm5600_vm14, %v2329_v16, 0  ;;  %v2504_v16 = vrot.slane %v2502_v3, 3 }
 0x216   : > { %4550 = vmatprep.subr.bf16.mxu0 %v5225_v0  ;;  %v4110_v37 = vcombine.low %v2330_v27, %v2331_v28  ;;  %v4925_v28 = vld [vmem:[#allocation7 + $0x108] sm:$0xff]  }
 0x217   : > { %4519 = vmatpush3.bf16.msra.mxu1 %v4900_v30  ;;  %v2486_v30 = vld [vmem:[#allocation2 + $0x8] sm:$0x7] }
 0x218   : > { %4535 = vmatmul.mubr.msk.bf16.vlgmr.msra.gmra.mrb[28].mxu0 %vm1334_vm3, %v1956_v40  ;;  %4520 = vmatprep.subr.bf16.mxu1 %v5225_v0  ;;  %v2574_v40 = vsel %vm5671_vm0, %v2573_v32, 0  ;;  %v4121_v49 = vcombine.low %v2486_v30, %v2486_v30  ;;  %v2346_v36 = vrot.slane %v4110_v37, 1 }
 0x219   : > { %4551 = vmatpush3.bf16.msra.mxu0 %v4903_v35  ;;  %4554 = vmatprep.mubr.msk.bf16.mxu0 %vm6245_vm1, %v5225_v0  ;;  %v2426_v35 = vrot.slane %v4116_v19, 2 }
 0x21a   : > { %4552 = vmatprep.subr.bf16.mxu0 %v5225_v0  ;;  %v2507_v4 = vshrl.u32 %v4121_v49, 16 }
 0x21b   : > { %4521 = vmatpush3.bf16.msra.mxu1 %v4904_v41  ;;  %v2576_v41 = vsel %vm6275_vm11, %v2486_v30, 0  ;;  %v4926_v30 = vld [vmem:[#allocation7 + $0xf0] sm:$0xff]  }
 0x21c   : > { %4538 = vmatprep.subr.bf16.mxu1 %v5225_v0 }
 0x21d   : > { %4553 = vmatpush3.bf16.msra.mxu0 %v4905_v42  ;;  %v5937_v42 = vld [vmem:[#allocation2 + $0x8] sm:$0xf] }
 0x21e   : > { %4523 = vmatmul.mubr.msk.bf16.vlgmr.msra.gmra.mrb[32].mxu1 %vm1334_vm3, %v4078_v6  ;;  %4558 = vmatprep.subr.bf16.mxu0 %v5225_v0  ;;  %v4919_v6 = vld [vmem:[#allocation7 + $0xb8] sm:$0xff]  }
 0x21f   : > { %4539 = vmatpush3.bf16.msra.mxu1 %v4906_v50  ;;  %4546 = vmatprep.mubr.msk.bf16.mxu1 %vm6245_vm1, %v5225_v0 }
 0x220   : > { %4555 = vmatmul.mubr.msk.bf16.vlgmr.msra.gmra.mrb[32].mxu0 %vm6268_vm4, %v2211_v53  ;;  %4540 = vmatprep.subr.bf16.mxu1 %v5225_v0  ;;  %vm6271_vm4 = vcmp.ne.s16.totalorder %v5615_v61, 0 }
 0x221   : > { %4559 = vmatpush3.bf16.msra.mxu0 %v4909_v58  ;;  %4562 = vmatprep.mubr.msk.bf16.mxu0 %vm6245_vm1, %v5225_v0  ;;  %v2410_v11 = vsel %vm6271_vm4, %v5851_v12, 0  ;;  %vm6273_vm4 = vcmp.ne.s16.totalorder %v5595_v48, 0  ;;  %v4126_v58 = vcombine.low %v2576_v41, %v2576_v41 }
 0x222   : > { %4560 = vmatprep.subr.bf16.mxu0 %v5225_v0  ;;  %v4115_v18 = vcombine.low %v2409_v10, %v2410_v11  ;;  %v2332_v55 = vsel %vm6273_vm4, %v5861_v21, 0  ;;  %vm6276_vm4 = vcmask 1046528  }
 0x223   : > { %4541 = vmatpush3.bf16.msra.mxu1 %v4910_v59  ;;  %v4111_v39 = vcombine.low %v2332_v55, %v2332_v55  ;;  %v2050_v44 = vsel %vm6276_vm4, %v2048_v29, %v2049_v26  ;;  %v4134_v59 = vcombine.low %v2722_v9, %v5937_v42  ;;  %v2591_v11 = vrot.slane %v4126_v58, 3  ;;  %v4929_v9 = vld [vmem:[#allocation7 + $0xf8] sm:$0xff]  }
 0x224   : > { %4542 = vmatprep.subr.bf16.mxu1 %v5225_v0  ;;  %v2425_v34 = vrot.slane %v4115_v18, 2  ;;  %v2505_v29 = vor.u32 %v2504_v16, %v2501_v15  ;;  %v4933_v15 = vld [vmem:[#allocation10 + $0x128] sm:$0xff]  }
 0x225   : > { %4561 = vmatpush3.bf16.msra.mxu0 %v4911_v62  ;;  %v2347_v60 = vrot.slane %v4111_v39, 1  ;;  %v2724_v62 = vld [vmem:[#allocation2 + $0xc] sm:$0x1]  ;;  %v2741_v51 = vshll.u32 %v4134_v59, 16  ;;  %v2808_v39 = vld [vmem:[#allocation2 + $0x4] sm:$0xe] }
 0x226   : > { %4574 = vmatprep.subr.bf16.mxu0 %v5225_v0  ;;  %v2427_v50 = vsel %vm6277_vm12, %v2425_v34, %v2426_v35  ;;  %v4135_v33 = vcombine.low %v2724_v62, %v2724_v62  ;;  %vm6279_vm12 = vmmov %vm6276_vm4  ;;  %vm6281_vm4 = vcmask 1044480   ;;  %v2809_v41 = vsel %vm5600_vm14, %v2808_v39, 0  ;;  %v4936_v16 = vld [vmem:[#allocation10 + $0x148] sm:$0xff]  }
 0x227   : > { %4543 = vmatpush3.bf16.msra.mxu1 %v4912_v7  ;;  %v2510_v7 = vshll.u32 %v4121_v49, 16  ;;  %v2348_v31 = vsel %vm6279_vm12, %v2346_v36, %v2347_v60  ;;  %v2743_v26 = vrot.slane %v2741_v51, 1  ;;  %vm6283_vm12 = vsmask.f32 5376  ;;  %v4934_v51 = vld [vmem:[#allocation10 + $0x140] sm:$0xff]  }
 0x228   : > { %4563 = vmatmul.mubr.msk.bf16.vlgmr.msra.gmra.mrb[36].mxu0 %vm6272_vm15, %v4106_v17  ;;  %4544 = vmatprep.subr.bf16.mxu1 %v5225_v0  ;;  %vm6274_vm15 = vcmp.ne.s16.totalorder %v5683_v13, 0  ;;  %v2509_v17 = vrot.slane %v2507_v4, 2  ;;  %v2746_v27 = vshll.u32 %v4135_v33, 16  ;;  %v4932_v33 = vld [vmem:[#allocation10 + $0x120] sm:$0xff]  }
 0x229   : > { %4575 = vmatpush3.bf16.msra.mxu0 %v4913_v57  ;;  %4578 = vmatprep.mubr.msk.bf16.mxu0 %vm6245_vm1, %v5225_v0  ;;  %v2575_v21 = vsel %vm6274_vm15, %v5851_v12, 0  ;;  %vm6278_vm15 = vcmask 261120   ;;  %v4923_v57 = vld [vmem:[#allocation7 + $0x100] sm:$0xff]   ;;  %v2512_v18 = vrot.slane %v2510_v7, 3 }
 0x22a   : > { %4576 = vmatprep.subr.bf16.mxu0 %v5225_v0  ;;  %v4125_v53 = vcombine.low %v2574_v40, %v2575_v21  ;;  %vm6280_vm11 = vmmov %vm6278_vm15  ;;  %v2748_v34 = vrot.slane %v2746_v27, 1  ;;  %v2652_v40 = vsel %vm5572_vm10, %v5851_v12, 0 }
 0x22b   : > { %4545 = vmatpush3.bf16.msra.mxu1 %v4914_v23  ;;  %v4924_v23 = vld [vmem:[#allocation7 + $0xd8] sm:$0xff]   ;;  %v2513_v55 = vor.u32 %v2512_v18, %v2509_v17 }
 0x22c   : > { %4566 = vmatprep.subr.bf16.mxu1 %v5225_v0  ;;  %v2590_v10 = vrot.slane %v4125_v53, 3 }
 0x22d   : > { %4577 = vmatpush3.bf16.msra.mxu0 %v4915_v24  ;;  %v2739_v24 = vshrl.u32 %v4134_v59, 16  ;;  %v2514_v35 = vsel %vm6283_vm12, %v2505_v29, %v2513_v55  ;;  %vm6286_vm12 = vcmp.ne.s16.totalorder %v5595_v48, 0 }
 0x22e   : > { %4547 = vmatmul.mubr.msk.bf16.vlgmr.msra.gmra.mrb[36].mxu1 %vm1334_vm3, %v2050_v44  ;;  %4590 = vmatprep.subr.bf16.mxu0 %v5225_v0  ;;  %v2592_v19 = vsel %vm6281_vm4, %v2590_v10, %v2591_v11  ;;  %vm6284_vm4 = vmmov %vm6280_vm11  ;;  %v2811_v45 = vsel %vm6286_vm12, %v2724_v62, 0  ;;  %vm6290_vm12 = vcmask 257024  }
 0x22f   : > { %4567 = vmatpush3.bf16.msra.mxu1 %v4916_v5  ;;  %4570 = vmatprep.mubr.msk.bf16.mxu1 %vm6245_vm1, %v5225_v0  ;;  %v2744_v32 = vor.u32 %v2743_v26, %v2739_v24  ;;  %v2651_v5 = vld [vmem:[#allocation2 + $0x8] sm:$0xf] }
 0x230   : > { %4579 = vmatmul.mubr.msk.bf16.vlgmr.msra.gmra.mrb[40].mxu0 %vm6278_vm15, %v2427_v50  ;;  %4568 = vmatprep.subr.bf16.mxu1 %v5225_v0  ;;  %vm6282_vm15 = vmmov %vm6280_vm11  ;;  %v2653_v21 = vsel %vm5578_vm8, %v2651_v5, 0  ;;  %v4140_v50 = vcombine.low %v2811_v45, %v2811_v45  ;;  %v4938_v24 = vld [vmem:[#allocation10 + $0x150] sm:$0xff]  }
 0x231   : > { %4591 = vmatpush3.bf16.msra.mxu0 %v4918_v46  ;;  %4594 = vmatprep.mubr.msk.bf16.mxu0 %vm6245_vm1, %v5225_v0  ;;  %v2749_v37 = vsel %vm474_vm9, %v2744_v32, %v2748_v34  ;;  %v4930_v46 = vld [vmem:[#allocation7 + $0x110] sm:$0xff]   ;;  %v4130_v49 = vcombine.low %v2652_v40, %v2653_v21  ;;  %v4940_v32 = vld [vmem:[#allocation10 + $0x158] sm:$0xff]  }
 0x232   : > { %4592 = vmatprep.subr.bf16.mxu0 %v5225_v0  ;;  %v2826_v53 = vrot.slane %v4140_v50, 1 }
 0x233   : > { %4569 = vmatpush3.bf16.msra.mxu1 %v4919_v6  ;;  %v4931_v6 = vld [vmem:[#allocation7 + $0x118] sm:$0xff]  }
 0x234   : > { %4582 = vmatprep.subr.bf16.mxu1 %v5225_v0 }
 0x235   : > { %4593 = vmatpush3.bf16.msra.mxu0 %v4920_v63 }
 0x236   : > { %4571 = vmatmul.mubr.msk.bf16.vlgmr.msra.gmra.mrb[40].mxu1 %vm6280_vm11, %v2348_v31  ;;  %4606 = vmatprep.subr.bf16.mxu0 %v5225_v0 }
 0x237   : > { %4583 = vmatpush3.bf16.msra.mxu1 %v4921_v8  ;;  %4586 = vmatprep.mubr.msk.bf16.mxu1 %vm6245_vm1, %v5225_v0 }
 0x238   : > { %4595 = vmatmul.mubr.msk.bf16.vlgmr.msra.gmra.mrb[44].mxu0 %vm6282_vm15, %v2592_v19  ;;  %4584 = vmatprep.subr.bf16.mxu1 %v5225_v0  ;;  %vm6285_vm15 = vcmp.ne.s16.totalorder %v5593_v47, 0 }
 0x239   : > { %4607 = vmatpush3.bf16.msra.mxu0 %v4923_v57  ;;  %4610 = vmatprep.mubr.msk.bf16.mxu0 %vm6245_vm1, %v5225_v0  ;;  %v2810_v44 = vsel %vm6285_vm15, %v5937_v42, 0 }
 0x23a   : > { %4608 = vmatprep.subr.bf16.mxu0 %v5225_v0  ;;  %v4139_v12 = vcombine.low %v2809_v41, %v2810_v44 }
 0x23b   : > { %4585 = vmatpush3.bf16.msra.mxu1 %v4924_v23  ;;  %v4935_v23 = vld [vmem:[#allocation10 + $0x130] sm:$0xff]  }
 0x23c   : > { %4598 = vmatprep.subr.bf16.mxu1 %v5225_v0  ;;  %v2825_v42 = vrot.slane %v4139_v12, 1 }
 0x23d   : > { %4609 = vmatpush3.bf16.msra.mxu0 %v4925_v28 }
 0x23e   : > { %4587 = vmatmul.mubr.msk.bf16.vlgmr.msra.gmra.mrb[44].mxu1 %vm6280_vm11, %v2514_v35  ;;  %4622 = vmatprep.subr.bf16.mxu0 %v5225_v0  ;;  %vm6287_vm11 = vmmov %vm6284_vm4 }
 0x23f   : > { %4599 = vmatpush3.bf16.msra.mxu1 %v4926_v30  ;;  %4602 = vmatprep.mubr.msk.bf16.mxu1 %vm6245_vm1, %v5225_v0  ;;  %vm6289_vm15 = vmmov %vm6287_vm11  ;;  %v4937_v30 = vld [vmem:[#allocation10 + $0x138] sm:$0xff]  }
 0x240   : > { %4611 = vmatmul.mubr.msk.bf16.vlgmr.msra.gmra.mrb[48].mxu0 %vm6284_vm4, %v2749_v37  ;;  %4600 = vmatprep.subr.bf16.mxu1 %v5225_v0  ;;  %vm6288_vm4 = vcmask 1046528  }
 0x241   : > { %4630 = vmatprep.mubr.msk.bf16.mxu0 %vm6245_vm1, %v5225_v0  ;;  %v2827_v58 = vsel %vm6288_vm4, %v2825_v42, %v2826_v53  ;;  %4623 = vmatpush3.bf16.msra.mxu0 %v4934_v51  ;;  %vm6297_vm4 = vcmp.ne.s16.totalorder %v5685_v14, 0 }
 0x242   : > { %4624 = vmatprep.subr.bf16.mxu0 %v5225_v0 }
 0x243   : > { %4601 = vmatpush3.bf16.msra.mxu1 %v4929_v9 }
 0x244   : > { %4614 = vmatprep.subr.bf16.mxu1 %v5225_v0 }
 0x245   : > { %4625 = vmatpush3.bf16.msra.mxu0 %v4936_v16 }
 0x246   : > { %4603 = vmatmul.mubr.msk.bf16.vlgmr.msra.gmra.mrb[48].mxu1 %vm6287_vm11, %v4130_v49  ;;  %4626 = vmatprep.subr.bf16.mxu0 %v5225_v0  ;;  %vm6291_vm11 = vmmov %vm6290_vm12 }
 0x247   : > { %4615 = vmatpush3.bf16.msra.mxu1 %v4930_v46  ;;  %4618 = vmatprep.mubr.msk.bf16.mxu1 %vm6245_vm1, %v5225_v0 }
 0x248   : > { %4616 = vmatprep.subr.bf16.mxu1 %v5225_v0 }
 0x249   : > { %4627 = vmatpush3.bf16.msra.mxu0 %v4938_v24 }
 0x24a   : > { %4628 = vmatprep.subr.bf16.mxu0 %v5225_v0 }
 0x24b   : > { %4617 = vmatpush3.bf16.msra.mxu1 %v4931_v6 }
 0x24c   : > { %4634 = vmatprep.subr.bf16.mxu1 %v5225_v0 }
 0x24d   : > { %4629 = vmatpush3.bf16.msra.mxu0 %v4940_v32 }
 0x24e   : > { %4619 = vmatmul.mubr.msk.bf16.vlgmr.msra.gmra.mrb[52].mxu1 %vm6289_vm15, %v2827_v58  ;;  %4646 = vmatprep.subr.bf16.mxu0 %v5225_v0  ;;  %vm6298_vm15 = vcmask 1046528  }
 0x24f   : > { %4642 = vmatprep.mubr.msk.bf16.mxu1 %vm6245_vm1, %v5225_v0  ;;  %4635 = vmatpush3.bf16.msra.mxu1 %v4932_v33 }
 0x250   : > { %4636 = vmatprep.subr.bf16.mxu1 %v5225_v0 }
 0x253   : > { %4637 = vmatpush3.bf16.msra.mxu1 %v4933_v15  ;;  %v4098_v15 = vld [vmem:[#allocation12] ss:$0 sm:$0xff] }
 0x254   : > { %4638 = vmatprep.subr.bf16.mxu1 %v5225_v0 }
 0x257   : > { %4639 = vmatpush3.bf16.msra.mxu1 %v4935_v23 }
 0x258   : > { %4640 = vmatprep.subr.bf16.mxu1 %v5225_v0 }
 0x25b   : > { %4641 = vmatpush3.bf16.msra.mxu1 %v4937_v30 }
 0x25c   : > { %4658 = vmatprep.subr.bf16.mxu1 %v5225_v0 }
 0x2bb   : > { %v1445_v59 = vpop.f32.mrb[16].mxu0 }
 0x2bc   : > { %v4464_v36 = vpop.f32.mrb[17].mxu0 }
 0x2bd   : > { %v1448_v60 = vpop.f32.mrb[18].mxu0 }
 0x2be   : > { %v4465_v62 = vpop.f32.mrb[19].mxu0 }
 0x2c1   : > { %v1372_v63 = vpop.f32.mrb[20].mxu1 }
 0x2c2   : > { %v1446_v1 = vadd.f32 %v1445_v59, %v1372_v63  ;;  %v4452_v3 = vpop.f32.mrb[21].mxu1 }
 0x2c3   : > { %v1375_v4 = vpop.f32.mrb[22].mxu1 }
 0x2c4   : > { %v1449_v7 = vadd.f32 %v1448_v60, %v1375_v4  ;;  %v4453_v8 = vpop.f32.mrb[23].mxu1 }
 0x2cb   : > { %v1632_v10 = vpop.f32.mrb[20].mxu0 }
 0x2cc   : > { %v4488_v11 = vpop.f32.mrb[21].mxu0 }
 0x2cd   : > { %v1635_v31 = vpop.f32.mrb[22].mxu0 }
 0x2ce   : > { %v4489_v57 = vpop.f32.mrb[23].mxu0 }
 0x2d1   : > { %v1537_v17 = vpop.f32.mrb[24].mxu1 }
 0x2d2   : > { %v1544_v18 = vadd.f32 %v1537_v17, %v1446_v1  ;;  %v4476_v19 = vpop.f32.mrb[25].mxu1 }
 0x2d3   : > { %v1540_v26 = vpop.f32.mrb[26].mxu1 }
 0x2d4   : > { %v1545_v27 = vadd.f32 %v1540_v26, %v1449_v7  ;;  %v4477_v28 = vpop.f32.mrb[27].mxu1  ;;  %v1639_v29 = vadd.f32 %v1632_v10, %v1544_v18 }
 0x2d6   : > { %v1640_v55 = vadd.f32 %v1635_v31, %v1545_v27 }
 0x2db   : > { %v1829_v34 = vpop.f32.mrb[24].mxu0 }
 0x2dc   : > { %v4512_v35 = vpop.f32.mrb[25].mxu0 }
 0x2dd   : > { %v1832_v5 = vpop.f32.mrb[26].mxu0 }
 0x2de   : > { %v4513_v37 = vpop.f32.mrb[27].mxu0 }
 0x2e1   : > { %v1735_v9 = vpop.f32.mrb[28].mxu1 }
 0x2e2   : > { %v1742_v39 = vadd.f32 %v1735_v9, %v1639_v29  ;;  %v4500_v40 = vpop.f32.mrb[29].mxu1 }
 0x2e3   : > { %v1738_v21 = vpop.f32.mrb[30].mxu1 }
 0x2e4   : > { %v1743_v41 = vadd.f32 %v1738_v21, %v1640_v55  ;;  %v4501_v44 = vpop.f32.mrb[31].mxu1  ;;  %v1836_v45 = vadd.f32 %v1829_v34, %v1742_v39 }
 0x2e6   : > { %v1837_v46 = vadd.f32 %v1832_v5, %v1743_v41 }
 0x2eb   : > { %v2018_v49 = vpop.f32.mrb[28].mxu0 }
 0x2ec   : > { %v4536_v12 = vpop.f32.mrb[29].mxu0 }
 0x2ed   : > { %v2021_v50 = vpop.f32.mrb[30].mxu0 }
 0x2ee   : > { %v4537_v6 = vpop.f32.mrb[31].mxu0 }
 0x2f1   : > { %v1916_v42 = vpop.f32.mrb[32].mxu1 }
 0x2f2   : > { %v1923_v53 = vadd.f32 %v1916_v42, %v1836_v45  ;;  %v4524_v58 = vpop.f32.mrb[33].mxu1 }
 0x2f3   : > { %v1919_v59 = vpop.f32.mrb[34].mxu1  ;;  %v2261_v36 = vpop.f32.mrb[32].mxu0 }
 0x2f4   : > { %v1924_v60 = vadd.f32 %v1919_v59, %v1837_v46  ;;  %v4525_v62 = vpop.f32.mrb[35].mxu1  ;;  %v4556_v63 = vpop.f32.mrb[33].mxu0  ;;  %v2025_v1 = vadd.f32 %v2018_v49, %v1923_v53 }
 0x2f5   : > { %v2264_v3 = vpop.f32.mrb[34].mxu0 }
 0x2f6   : > { %v4557_v4 = vpop.f32.mrb[35].mxu0  ;;  %v2026_v7 = vadd.f32 %v2021_v50, %v1924_v60 }
 0x2fb   : > { %v2322_v8 = vpop.f32.mrb[36].mxu0 }
 0x2fc   : > { %v2323_v10 = vadd.f32 %v2322_v8, %v2261_v36  ;;  %v4564_v11 = vpop.f32.mrb[37].mxu0 }
 0x2fd   : > { %v2325_v33 = vpop.f32.mrb[38].mxu0 }
 0x2fe   : > { %v2326_v51 = vadd.f32 %v2325_v33, %v2264_v3  ;;  %v4565_v31 = vpop.f32.mrb[39].mxu0 }
 0x2ff   : > { %v4144_v31 = vld [vmem:[#allocation9 + $0x1] ss:$0 sm:$0xff] }
 0x301   : > { %v2112_v57 = vpop.f32.mrb[36].mxu1 }
 0x302   : > { %v2119_v16 = vadd.f32 %v2112_v57, %v2025_v1  ;;  %v4548_v17 = vpop.f32.mrb[37].mxu1 }
 0x303   : > { %v2115_v18 = vpop.f32.mrb[38].mxu1  ;;  %v2477_v19 = vpop.f32.mrb[40].mxu0 }
 0x304   : > { %v2128_v23 = vadd.f32 %v4098_v15, %v2119_v16  ;;  %v2120_v24 = vadd.f32 %v2115_v18, %v2026_v7  ;;  %v4549_v26 = vpop.f32.mrb[39].mxu1  ;;  %v4580_v27 = vpop.f32.mrb[41].mxu0 }
 0x305   : > { %v2480_v28 = vpop.f32.mrb[42].mxu0 }
 0x306   : > { %v4219_v29 = vpack.c.bf16 %v2128_v23, %v2128_v23  ;;  %v2129_v55 = vadd.f32 %v4098_v15, %v2120_v24  ;;  %v4581_v30 = vpop.f32.mrb[43].mxu0 }
 0x308   : > { %2138 = vst.msk [vmem:[%s6007_s28] sm:$0xf] %vm6290_vm12, %v4219_v29  ;;  %v4220_v32 = vpack.c.bf16 %v2129_v55, %v2129_v55  ;;  %vm6299_vm12 = vcmp.ne.s16.totalorder %v5683_v13, 0  ;;  %v4957_v13 = vld [vmem:[#allocation10 + $0x1b0] sm:$0xff]  }
 0x309   : > { %v2398_v34 = vpop.f32.mrb[40].mxu1 }
 0x30a   : > { %2139 = vst.msk [vmem:[%s6007_s28 + $0x4] sm:$0xf] %vm6291_vm11, %v4220_v32  ;;  %v2405_v35 = vadd.f32 %v2398_v34, %v2323_v10  ;;  %v4572_v5 = vpop.f32.mrb[41].mxu1  ;;  %vm6301_vm11 = vsmask.f32 5376 }
 0x30b   : > { %v2401_v37 = vpop.f32.mrb[42].mxu1  ;;  %v2642_v9 = vpop.f32.mrb[44].mxu0 }
 0x30c   : > { %v2406_v39 = vadd.f32 %v2401_v37, %v2326_v51  ;;  %v4573_v40 = vpop.f32.mrb[43].mxu1  ;;  %v4596_v21 = vpop.f32.mrb[45].mxu0  ;;  %v2484_v41 = vadd.f32 %v2477_v19, %v2405_v35 }
 0x30d   : > { %v2645_v44 = vpop.f32.mrb[46].mxu0 }
 0x30e   : > { %v4597_v45 = vpop.f32.mrb[47].mxu0  ;;  %v2485_v46 = vadd.f32 %v2480_v28, %v2406_v39 }
 0x311   : > { %v2564_v49 = vpop.f32.mrb[44].mxu1 }
 0x312   : > { %v2571_v12 = vadd.f32 %v2564_v49, %v2484_v41  ;;  %v4588_v50 = vpop.f32.mrb[45].mxu1 }
 0x313   : > { %v2567_v6 = vpop.f32.mrb[46].mxu1  ;;  %v2799_v42 = vpop.f32.mrb[48].mxu0 }
 0x314   : > { %v2572_v53 = vadd.f32 %v2567_v6, %v2485_v46  ;;  %v4589_v58 = vpop.f32.mrb[47].mxu1  ;;  %v4612_v59 = vpop.f32.mrb[49].mxu0  ;;  %v2649_v36 = vadd.f32 %v2642_v9, %v2571_v12 }
 0x315   : > { %v2802_v60 = vpop.f32.mrb[50].mxu0 }
 0x316   : > { %v4613_v62 = vpop.f32.mrb[51].mxu0  ;;  %v2650_v63 = vadd.f32 %v2645_v44, %v2572_v53 }
 0x319   : > { %v2713_v1 = vpop.f32.mrb[48].mxu1 }
 0x31a   : > { %v2720_v3 = vadd.f32 %v2713_v1, %v2649_v36  ;;  %v4604_v4 = vpop.f32.mrb[49].mxu1 }
 0x31b   : > { %v2716_v7 = vpop.f32.mrb[50].mxu1 }
 0x31c   : > { %v2721_v8 = vadd.f32 %v2716_v7, %v2650_v63  ;;  %v4605_v10 = vpop.f32.mrb[51].mxu1  ;;  %v2806_v11 = vadd.f32 %v2799_v42, %v2720_v3  ;;  %v2946_v7 = vld [vmem:[#allocation3 + $0x8] sm:$0x7] }
 0x31e   : > { %v2807_v33 = vadd.f32 %v2802_v60, %v2721_v8  ;;  %v2942_v60 = vld [vmem:[#allocation3] sm:$0xc] }
 0x321   : > { %v2877_v51 = vpop.f32.mrb[52].mxu1 }
 0x322   : > { %v2884_v57 = vadd.f32 %v2877_v51, %v2806_v11  ;;  %v4620_v15 = vpop.f32.mrb[53].mxu1 }
 0x323   : > { %v2880_v16 = vpop.f32.mrb[54].mxu1 }
 0x324   : > { %v2894_v17 = vadd.f32 %v4144_v31, %v2884_v57  ;;  %v2885_v18 = vadd.f32 %v2880_v16, %v2807_v33  ;;  %v4621_v19 = vpop.f32.mrb[55].mxu1 }
 0x326   : > { %v2898_v23 = vmul.f32 0.044715, %v2894_v17  ;;  %v2895_v24 = vadd.f32 %v4144_v31, %v2885_v18  ;;  %v2896_v37 = vmul.f32 0.5, %v2894_v17 }
 0x328   : > { %v2900_v26 = vmul.f32 %v2898_v23, %v2894_v17  ;;  %v2899_v27 = vmul.f32 0.044715, %v2895_v24  ;;  %v2897_v21 = vmul.f32 0.5, %v2895_v24 }
 0x32a   : > { %v2902_v28 = vmul.f32 %v2900_v26, %v2894_v17  ;;  %v2901_v29 = vmul.f32 %v2899_v27, %v2895_v24  ;;  %v4944_v27 = vld [vmem:[#allocation10 + $0x160] sm:$0xff]  }
 0x32c   : > { %v2904_v55 = vadd.f32 %v2902_v28, %v2894_v17  ;;  %v2903_v30 = vmul.f32 %v2901_v29, %v2895_v24 }
 0x32e   : > { %v2906_v32 = vmul.f32 0.7978846, %v2904_v55  ;;  %v2905_v34 = vadd.f32 %v2903_v30, %v2895_v24  ;;  %v4945_v55 = vld [vmem:[#allocation10 + $0x190] sm:$0xff]  }
 0x330   : > { %4978 = vtanh.f32 %v2906_v32  ;;  %v2907_v35 = vmul.f32 0.7978846, %v2905_v34  ;;  %v4946_v34 = vld [vmem:[#allocation10 + $0x168] sm:$0xff]  }
 0x332   : > { %4980 = vtanh.f32 %v2907_v35 }
 0x33a   : > { %v4979_v5 = vpop.eup %4978 }
 0x33b   : > { %v2910_v9 = vadd.f32 1.0, %v4979_v5  ;;  %v4947_v5 = vld [vmem:[#allocation10 + $0x198] sm:$0xff]  }
 0x33c   : > { %v4981_v39 = vpop.eup %4980 }
 0x33d   : > { %v2912_v40 = vmul.f32 %v2910_v9, %v2896_v37  ;;  %v2911_v41 = vadd.f32 1.0, %v4981_v39  ;;  %v4948_v9 = vld [vmem:[#allocation10 + $0x170] sm:$0xff]  }
 0x33f   : > { %v4221_v44 = vpack.c.bf16 %v2912_v40, %v2912_v40  ;;  %v2913_v45 = vmul.f32 %v2911_v41, %v2897_v21  ;;  %v4950_v41 = vld [vmem:[#allocation10 + $0x1c0] sm:$0xff]  }
 0x341   : > { %v2921_v46 = vshrl.u32 %v4221_v44, 16  ;;  %v2924_v49 = vshll.u32 %v4221_v44, 16  ;;  %v4222_v12 = vpack.c.bf16 %v2913_v45, %v2913_v45 }
 0x343   : > { %v2923_v50 = vrot.slane %v2921_v46, 5  ;;  %v2926_v6 = vrot.slane %v2924_v49, 6  ;;  %v2930_v42 = vshrl.u32 %v4222_v12, 16  ;;  %v2933_v53 = vshll.u32 %v4222_v12, 16  ;;  %v4951_v49 = vld [vmem:[#allocation10 + $0x178] sm:$0xff]  }
 0x345   : > { %v2927_v58 = vor.u32 %v2926_v6, %v2923_v50  ;;  %v2932_v59 = vrot.slane %v2930_v42, 5  ;;  %v2935_v36 = vrot.slane %v2933_v53, 6  ;;  %v4952_v50 = vld [vmem:[#allocation10 + $0x1c8] sm:$0xff]  }
 0x347   : > { %v2928_v62 = vrot.slane %v2927_v58, 4  ;;  %v2943_v63 = vsel %vm5752_vm7, %v2927_v58, %v2942_v60  ;;  %v2936_v1 = vor.u32 %v2935_v36, %v2932_v59  ;;  %vm6293_vm7 = vcmp.ne.s16.totalorder %v5615_v61, 0  ;;  %v4953_v58 = vld [vmem:[#allocation10 + $0x1a0] sm:$0xff]   ;;  %v4954_v60 = vld [vmem:[#allocation10 + $0x1d0] sm:$0xff]  }
 0x348   : > { %2944 = vst [vmem:[#allocation3] sm:$0xc] %v2943_v63 }
 0x349   : > { %v2937_v3 = vsel %vm5552_vm13, %v2928_v62, %v2936_v1  ;;  %v2938_v4 = vrot.slane %v2936_v1, 4  ;;  %vm6292_vm13 = vcmp.ne.s16.totalorder %v5606_v54, 0 }
 0x34a   : > { %2945 = vst.msk [vmem:[#allocation3 + $0x4] sm:$0xf] %vm1263_vm6, %v2937_v3  ;;  %vm6295_vm6 = vcmp.ne.s16.totalorder %v5593_v47, 0 }
 0x34b   : > { %v2947_v8 = vsel %vm5745_vm5, %v2938_v4, %v2946_v7  ;;  %vm6294_vm5 = vcmp.ne.s16.totalorder %v5595_v48, 0  ;;  %v4955_v4 = vld [vmem:[#allocation10 + $0x1a8] sm:$0xff]  }
 0x34c   : > { %2948 = vst [vmem:[#allocation3 + $0x8] sm:$0x7] %v2947_v8  ;;  %v4956_v8 = vld [vmem:[#allocation10 + $0x1d8] sm:$0xff]  }
 0x34f   : > { %v2949_v10 = vld [vmem:[#allocation3] sm:$0xf] }
 0x350   : > { %v2951_v22 = vsel %vm5572_vm10, %v2949_v10, 0  ;;  %v3227_v30 = vld [vmem:[#allocation3] sm:$0xc] }
 0x351   : > { %v6020_v11 = vld [vmem:[#allocation3 + $0x4] sm:$0xf]  ;;  %v3229_v54 = vsel %vm5610_vm2, %v3227_v30, 0  ;;  %v3133_v40 = vld [vmem:[#allocation3] sm:$0xe]  ;;  %vm6296_vm2 = vcmask 1045504  }
 0x352   : > { %v2952_v33 = vsel %vm5578_vm8, %v6020_v11, 0  ;;  %v4147_v51 = vcombine.low %v2949_v10, %v6020_v11  ;;  %v3230_v32 = vsel %vm6293_vm7, %v6020_v11, 0  ;;  %v3135_v21 = vsel %vm6295_vm6, %v6020_v11, 0  ;;  %v3425_v63 = vld [vmem:[#allocation3] sm:$0x8] }
 0x353   : > { %v4154_v31 = vcombine.low %v2951_v22, %v2952_v33  ;;  %v2962_v57 = vld [vmem:[#allocation3 + $0x8] sm:$0x1]  ;;  %v4167_v37 = vcombine.low %v3229_v54, %v3230_v32  ;;  %v3134_v45 = vsel %vm5600_vm14, %v3133_v40, 0  ;;  %v3427_v1 = vsel %vm6299_vm12, %v6020_v11, 0  ;;  %v4963_v54 = vld [vmem:[#allocation10 + $0x210] sm:$0xff]  }
 0x354   : > { %v4148_v15 = vcombine.low %v2962_v57, %v2962_v57  ;;  %v2983_v16 = vshll.u32 %v4147_v51, 16  ;;  %v2981_v17 = vshrl.u32 %v4147_v51, 16  ;;  %v3228_v23 = vld [vmem:[#allocation3 + $0x8] sm:$0x3]  ;;  %v3136_v61 = vsel %vm6294_vm5, %v2962_v57, 0  ;;  %v4966_v40 = vld [vmem:[#allocation10 + $0x1f0] sm:$0xff]  }
 0x355   : > { %4643 = vmatmul.mubr.msk.bf16.vlgmr.msra.gmra.mrb[56].mxu1 %vm1334_vm3, %v4154_v31  ;;  %v3231_v28 = vsel %vm6292_vm13, %v3228_v23, 0  ;;  %v3249_v56 = vrot.slane %v4167_v37, 2  ;;  %v4161_v44 = vcombine.low %v3136_v61, %v3136_v61  ;;  %v4160_v12 = vcombine.low %v3134_v45, %v3135_v21  ;;  %v3322_v42 = vld [vmem:[#allocation3 + $0x8] sm:$0x7]  ;;  %v4969_v45 = vld [vmem:[#allocation10 + $0x1f8] sm:$0xff]  }
 0x356   : > { %4659 = vmatpush3.bf16.msra.mxu1 %v4939_v25  ;;  %v2985_v18 = vrot.slane %v2983_v16, 1  ;;  %v2988_v19 = vshll.u32 %v4148_v15, 16  ;;  %4666 = vmatprep.mubr.msk.bf16.mxu1 %vm6245_vm1, %v5225_v0  ;;  %v4168_v35 = vcombine.low %v3231_v28, %v3231_v28  ;;  %v3428_v59 = vsel %vm6297_vm4, %v3322_v42, 0  ;;  %v6078_v57 = vld [vmem:[#allocation3 + $0x8] sm:$0xf] }
 0x357   : > { %4660 = vmatprep.subr.bf16.mxu1 %v5225_v0  ;;  %v3155_v6 = vrot.slane %v4161_v44, 1  ;;  %v3154_v53 = vrot.slane %v4160_v12, 1  ;;  %v4175_v62 = vcombine.low %v3322_v42, %v3322_v42  ;;  %v4174_v3 = vcombine.low %v3227_v30, %v6020_v11  ;;  %v4962_v30 = vld [vmem:[#allocation10 + $0x1e0] sm:$0xff]  }
 0x358   : > { %v2986_v24 = vor.u32 %v2985_v18, %v2981_v17  ;;  %v2990_v26 = vrot.slane %v2988_v19, 1  ;;  %v3250_v39 = vrot.slane %v4168_v35, 2  ;;  %v4182_v14 = vcombine.low %v3428_v59, %v3428_v59  ;;  %v3606_v17 = vld [vmem:[#allocation3 + $0x4] sm:$0xf]  ;;  %v4960_v19 = vld [vmem:[#allocation10 + $0x1b8] sm:$0xff]  }
 0x359   : > { %v3156_v36 = vsel %vm6298_vm15, %v3154_v53, %v3155_v6  ;;  %v3426_v7 = vsel %vm5671_vm0, %v3425_v63, 0  ;;  %v3347_v22 = vshrl.u32 %v4175_v62, 16  ;;  %v3350_v33 = vshll.u32 %v4175_v62, 16  ;;  %v4970_v12 = vld [vmem:[#allocation10 + $0x220] sm:$0xff]   ;;  %v4971_v6 = vld [vmem:[#allocation10 + $0x228] sm:$0xff]  }
 0x35a   : > { %4661 = vmatpush3.bf16.msra.mxu1 %v4941_v20  ;;  %v2991_v29 = vsel %vm474_vm9, %v2986_v24, %v2990_v26  ;;  %v3251_v46 = vsel %vm6296_vm2, %v3249_v56, %v3250_v39  ;;  %v4181_v10 = vcombine.low %v3426_v7, %v3427_v1  ;;  %v3447_v25 = vrot.slane %v4182_v14, 3  ;;  %v3708_v43 = vld [vmem:[#allocation3 + $0x4] sm:$0xe] }
 0x35b   : > { %4631 = vmatmul.mubr.msk.bf16.vlgmr.msra.gmra.mrb[52].mxu0 %vm1334_vm3, %v2991_v29  ;;  %4662 = vmatprep.subr.bf16.mxu1 %v5225_v0  ;;  %v3339_v51 = vshrl.u32 %v4174_v3, 16  ;;  %v3342_v31 = vshll.u32 %v4174_v3, 16  ;;  %v3349_v16 = vrot.slane %v3347_v22, 2  ;;  %v3352_v20 = vrot.slane %v3350_v33, 3  ;;  %v3608_v29 = vld [vmem:[#allocation3 + $0xc] sm:$0x1] }
 0x35c   : > { %4647 = vmatpush3.bf16.msra.mxu0 %v4944_v27  ;;  %4654 = vmatprep.mubr.msk.bf16.mxu0 %vm6245_vm1, %v5225_v0  ;;  %v3446_v15 = vrot.slane %v4181_v10, 3  ;;  %vm6300_vm0 = vcmask 1044480   ;;  %v4194_v26 = vcombine.low %v3606_v17, %v6078_v57  ;;  %v4961_v27 = vld [vmem:[#allocation10 + $0x208] sm:$0xff]   ;;  %v4195_v32 = vcombine.low %v3608_v29, %v3608_v29 }
 0x35d   : > { %4648 = vmatprep.subr.bf16.mxu0 %v5225_v0  ;;  %v3341_v23 = vrot.slane %v3339_v51, 2  ;;  %v3344_v24 = vrot.slane %v3342_v31, 3  ;;  %v3353_v28 = vor.u32 %v3352_v20, %v3349_v16  ;;  %v3709_v53 = vsel %vm5600_vm14, %v3708_v43, 0 }
 0x35e   : > { %4663 = vmatpush3.bf16.msra.mxu1 %v4945_v55  ;;  %v3448_v18 = vsel %vm6300_vm0, %v3446_v15, %v3447_v25  ;;  %v3634_v61 = vshll.u32 %v4195_v32, 16  ;;  %v3627_v39 = vshrl.u32 %v4194_v26, 16  ;;  %vm3824_vm14 = vcmask 519424  }
 0x35f   : > { %4664 = vmatprep.subr.bf16.mxu1 %v5225_v0  ;;  %v3345_v55 = vor.u32 %v3344_v24, %v3341_v23 }
 0x360   : > { %4649 = vmatpush3.bf16.msra.mxu0 %v4946_v34  ;;  %v3629_v34 = vshll.u32 %v4194_v26, 16  ;;  %v3636_v56 = vrot.slane %v3634_v61, 1 }
 0x361   : > { %4650 = vmatprep.subr.bf16.mxu0 %v5225_v0  ;;  %v3354_v35 = vsel %vm6301_vm11, %v3345_v55, %v3353_v28 }
 0x362   : > { %4665 = vmatpush3.bf16.msra.mxu1 %v4947_v5  ;;  %v4964_v5 = vld [vmem:[#allocation10 + $0x1e8] sm:$0xff]   ;;  %v3631_v37 = vrot.slane %v3629_v34, 1 }
 0x363   : > { %4682 = vmatprep.subr.bf16.mxu1 %v5225_v0 }
 0x364   : > { %4651 = vmatpush3.bf16.msra.mxu0 %v4948_v9  ;;  %v4965_v9 = vld [vmem:[#allocation10 + $0x218] sm:$0xff]   ;;  %v3632_v21 = vor.u32 %v3631_v37, %v3627_v39 }
 0x365   : > { %4667 = vmatmul.mubr.msk.bf16.vlgmr.msra.gmra.mrb[60].mxu1 %vm1334_vm3, %v3251_v46  ;;  %4652 = vmatprep.subr.bf16.mxu0 %v5225_v0 }
 0x366   : > { %4683 = vmatpush3.bf16.msra.mxu1 %v4950_v41  ;;  %4690 = vmatprep.mubr.msk.bf16.mxu1 %vm6245_vm1, %v5225_v0  ;;  %v3519_v41 = vld [vmem:[#allocation3 + $0x8] sm:$0xf]  ;;  %v3637_v44 = vsel %vm474_vm9, %v3632_v21, %v3636_v56 }
 0x367   : > { %4684 = vmatprep.subr.bf16.mxu1 %v5225_v0  ;;  %v3521_v46 = vsel %vm5578_vm8, %v3519_v41, 0  ;;  %vm6302_vm8 = vmmov %vm6295_vm6 }
 0x368   : > { %4653 = vmatpush3.bf16.msra.mxu0 %v4951_v49  ;;  %v3520_v49 = vsel %vm5572_vm10, %v6020_v11, 0  ;;  %v3710_v42 = vsel %vm6302_vm8, %v6078_v57, 0  ;;  %vm6303_vm10 = vmmov %vm6294_vm5  ;;  %v4972_v11 = vld [vmem:[#allocation10 + $0x230] sm:$0xff]  }
 0x369   : > { %4670 = vmatprep.subr.bf16.mxu0 %v5225_v0  ;;  %v3711_v38 = vsel %vm6303_vm10, %v3608_v29, 0 }
 0x36a   : > { %4685 = vmatpush3.bf16.msra.mxu1 %v4952_v50  ;;  %v4188_v50 = vcombine.low %v3520_v49, %v3521_v46  ;;  %v4202_v59 = vcombine.low %v3711_v38, %v3711_v38 }
 0x36b   : > { %4655 = vmatmul.mubr.msk.bf16.vlgmr.msra.gmra.mrb[56].mxu0 %vm1334_vm3, %v3156_v36  ;;  %4686 = vmatprep.subr.bf16.mxu1 %v5225_v0  ;;  %v4973_v36 = vld [vmem:[#allocation10 + $0x238] sm:$0xff]  }
 0x36c   : > { %4671 = vmatpush3.bf16.msra.mxu0 %v4953_v58  ;;  %4678 = vmatprep.mubr.msk.bf16.mxu0 %vm6245_vm1, %v5225_v0  ;;  %v4201_v58 = vcombine.low %v3709_v53, %v3710_v42  ;;  %v3730_v62 = vrot.slane %v4202_v59, 1 }
 0x36d   : > { %4672 = vmatprep.subr.bf16.mxu0 %v5225_v0 }
 0x36e   : > { %4687 = vmatpush3.bf16.msra.mxu1 %v4954_v60  ;;  %v3729_v60 = vrot.slane %v4201_v58, 1 }
 0x36f   : > { %4688 = vmatprep.subr.bf16.mxu1 %v5225_v0 }
 0x370   : > { %4673 = vmatpush3.bf16.msra.mxu0 %v4955_v4 }
 0x371   : > { %4674 = vmatprep.subr.bf16.mxu0 %v5225_v0 }
 0x372   : > { %4689 = vmatpush3.bf16.msra.mxu1 %v4956_v8 }
 0x373   : > { %4706 = vmatprep.subr.bf16.mxu1 %v5225_v0 }
 0x374   : > { %4675 = vmatpush3.bf16.msra.mxu0 %v4957_v13 }
 0x375   : > { %4691 = vmatmul.mubr.msk.bf16.vlgmr.msra.gmra.mrb[64].mxu1 %vm1334_vm3, %v3448_v18  ;;  %4676 = vmatprep.subr.bf16.mxu0 %v5225_v0 }
 0x376   : > { %4707 = vmatpush3.bf16.msra.mxu1 %v4959_v2  ;;  %4714 = vmatprep.mubr.msk.bf16.mxu1 %vm6245_vm1, %v5225_v0 }
 0x377   : > { %4708 = vmatprep.subr.bf16.mxu1 %v5225_v0 }
 0x378   : > { %4677 = vmatpush3.bf16.msra.mxu0 %v4960_v19 }
 0x379   : > { %4694 = vmatprep.subr.bf16.mxu0 %v5225_v0 }
 0x37a   : > { %4709 = vmatpush3.bf16.msra.mxu1 %v4961_v27 }
 0x37b   : > { %4679 = vmatmul.mubr.msk.bf16.vlgmr.msra.gmra.mrb[60].mxu0 %vm1334_vm3, %v3354_v35  ;;  %4710 = vmatprep.subr.bf16.mxu1 %v5225_v0 }
 0x37c   : > { %4695 = vmatpush3.bf16.msra.mxu0 %v4962_v30  ;;  %4702 = vmatprep.mubr.msk.bf16.mxu0 %vm6245_vm1, %v5225_v0 }
 0x37d   : > { %4696 = vmatprep.subr.bf16.mxu0 %v5225_v0 }
 0x37e   : > { %4711 = vmatpush3.bf16.msra.mxu1 %v4963_v54 }
 0x37f   : > { %4712 = vmatprep.subr.bf16.mxu1 %v5225_v0 }
 0x380   : > { %4697 = vmatpush3.bf16.msra.mxu0 %v4964_v5 }
 0x381   : > { %4698 = vmatprep.subr.bf16.mxu0 %v5225_v0 }
 0x382   : > { %4713 = vmatpush3.bf16.msra.mxu1 %v4965_v9 }
 0x384   : > { %4699 = vmatpush3.bf16.msra.mxu0 %v4966_v40 }
 0x385   : > { %4715 = vmatmul.mubr.msk.bf16.vlgmr.msra.gmra.mrb[68].mxu1 %vm1334_vm3, %v3637_v44  ;;  %4700 = vmatprep.subr.bf16.mxu0 %v5225_v0 }
 0x388   : > { %4701 = vmatpush3.bf16.msra.mxu0 %v4969_v45  ;;  %v4208_v45 = vld [vmem:[#allocation12 + $0x1] ss:$0 sm:$0xff] }
 0x389   : > { %4718 = vmatprep.subr.bf16.mxu0 %v5225_v0 }
 0x38b   : > { %4703 = vmatmul.mubr.msk.bf16.vlgmr.msra.gmra.mrb[64].mxu0 %vm1334_vm3, %v4188_v50 }
 0x38c   : > { %4719 = vmatpush3.bf16.msra.mxu0 %v4970_v12  ;;  %4726 = vmatprep.mubr.msk.bf16.mxu0 %vm6245_vm1, %v5225_v0  ;;  %vm6304_vm1 = vmmov %vm6298_vm15 }
 0x38d   : > { %4720 = vmatprep.subr.bf16.mxu0 %v5225_v0  ;;  %v3731_v47 = vsel %vm6304_vm1, %v3729_v60, %v3730_v62 }
 0x390   : > { %4721 = vmatpush3.bf16.msra.mxu0 %v4971_v6 }
 0x391   : > { %4722 = vmatprep.subr.bf16.mxu0 %v5225_v0 }
 0x394   : > { %4723 = vmatpush3.bf16.msra.mxu0 %v4972_v11 }
 0x395   : > { %4724 = vmatprep.subr.bf16.mxu0 %v5225_v0 }
 0x398   : > { %4725 = vmatpush3.bf16.msra.mxu0 %v4973_v36 }
 0x39b   : > { %4727 = vmatmul.mubr.msk.bf16.vlgmr.msra.gmra.mrb[68].mxu0 %vm1334_vm3, %v3731_v47 }
 0x428   : > { %v3126_v48 = vpop.f32.mrb[56].mxu1 }
 0x429   : > { %v4644_v63 = vpop.f32.mrb[57].mxu1 }
 0x42a   : > { %v3129_v1 = vpop.f32.mrb[58].mxu1 }
 0x42b   : > { %v4645_v3 = vpop.f32.mrb[59].mxu1 }
 0x42e   : > { %v3053_v4 = vpop.f32.mrb[52].mxu0 }
 0x42f   : > { %v3127_v52 = vadd.f32 %v3126_v48, %v3053_v4  ;;  %v4632_v14 = vpop.f32.mrb[53].mxu0 }
 0x430   : > { %v3056_v7 = vpop.f32.mrb[54].mxu0 }
 0x431   : > { %v3130_v8 = vadd.f32 %v3129_v1, %v3056_v7  ;;  %v4633_v10 = vpop.f32.mrb[55].mxu0 }
 0x438   : > { %v3313_v22 = vpop.f32.mrb[60].mxu1 }
 0x439   : > { %v4668_v33 = vpop.f32.mrb[61].mxu1 }
 0x43a   : > { %v3316_v0 = vpop.f32.mrb[62].mxu1 }
 0x43b   : > { %v4669_v13 = vpop.f32.mrb[63].mxu1 }
 0x43e   : > { %v3218_v25 = vpop.f32.mrb[56].mxu0 }
 0x43f   : > { %v3225_v51 = vadd.f32 %v3218_v25, %v3127_v52  ;;  %v4656_v31 = vpop.f32.mrb[57].mxu0 }
 0x440   : > { %v3221_v57 = vpop.f32.mrb[58].mxu0 }
 0x441   : > { %v3226_v15 = vadd.f32 %v3221_v57, %v3130_v8  ;;  %v4657_v2 = vpop.f32.mrb[59].mxu0  ;;  %v3320_v16 = vadd.f32 %v3313_v22, %v3225_v51 }
 0x443   : > { %v3321_v20 = vadd.f32 %v3316_v0, %v3226_v15 }
 0x448   : > { %v3510_v17 = vpop.f32.mrb[64].mxu1 }
 0x449   : > { %v4692_v18 = vpop.f32.mrb[65].mxu1 }
 0x44a   : > { %v3513_v19 = vpop.f32.mrb[66].mxu1 }
 0x44b   : > { %v4693_v23 = vpop.f32.mrb[67].mxu1 }
 0x44e   : > { %v3416_v24 = vpop.f32.mrb[60].mxu0 }
 0x44f   : > { %v3423_v26 = vadd.f32 %v3416_v24, %v3320_v16  ;;  %v4680_v27 = vpop.f32.mrb[61].mxu0 }
 0x450   : > { %v3419_v28 = vpop.f32.mrb[62].mxu0 }
 0x451   : > { %v3424_v29 = vadd.f32 %v3419_v28, %v3321_v20  ;;  %v4681_v55 = vpop.f32.mrb[63].mxu0  ;;  %v3517_v30 = vadd.f32 %v3510_v17, %v3423_v26 }
 0x453   : > { %v3518_v32 = vadd.f32 %v3513_v19, %v3424_v29 }
 0x458   : > { %v3699_v34 = vpop.f32.mrb[68].mxu1 }
 0x459   : > { %v4716_v35 = vpop.f32.mrb[69].mxu1 }
 0x45a   : > { %v3702_v54 = vpop.f32.mrb[70].mxu1 }
 0x45b   : > { %v4717_v5 = vpop.f32.mrb[71].mxu1 }
 0x45e   : > { %v3597_v37 = vpop.f32.mrb[64].mxu0 }
 0x45f   : > { %v3604_v61 = vadd.f32 %v3597_v37, %v3517_v30  ;;  %v4704_v9 = vpop.f32.mrb[65].mxu0 }
 0x460   : > { %v3600_v39 = vpop.f32.mrb[66].mxu0 }
 0x461   : > { %v3605_v40 = vadd.f32 %v3600_v39, %v3518_v32  ;;  %v4705_v21 = vpop.f32.mrb[67].mxu0  ;;  %v3706_v56 = vadd.f32 %v3699_v34, %v3604_v61 }
 0x463   : > { %v3707_v41 = vadd.f32 %v3702_v54, %v3605_v40 }
 0x46e   : > { %v3793_v44 = vpop.f32.mrb[68].mxu0 }
 0x46f   : > { %v3800_v46 = vadd.f32 %v3793_v44, %v3706_v56  ;;  %v4728_v49 = vpop.f32.mrb[69].mxu0 }
 0x470   : > { %v3796_v12 = vpop.f32.mrb[70].mxu0 }
 0x471   : > { %v3810_v50 = vadd.f32 %v4208_v45, %v3800_v46  ;;  %v3801_v6 = vadd.f32 %v3796_v12, %v3707_v41  ;;  %v4729_v43 = vpop.f32.mrb[71].mxu0 }
 0x473   : > { %v4223_v42 = vpack.c.bf16 %v3810_v50, %v3810_v50  ;;  %v3811_v38 = vadd.f32 %v4208_v45, %v3801_v6 }
 0x475   : > { %v4224_v11 = vpack.c.bf16 %v3811_v38, %v3811_v38  ;;  %3818 = vrot.lane.b32.xlu1 %v4223_v42, %s5229_s30 }
 0x477   : > { %3820 = vrot.lane.b32.xlu0 %v4224_v11, %s5229_s30 }
 0x4e7   : > { %v3819_v53 = vpop.permute.xlu1 %3818 }
 0x4e8   : > { %3825 = vst.msk [vmem:[%s6007_s28] sm:$0xf] %vm3824_vm14, %v3819_v53 }
 0x4e9   : > { %v3821_v58 = vpop.permute.xlu0 %3820 }
 0x4ea   : > { %3826 = vst.msk [vmem:[%s6007_s28 + $0x4] sm:$0xf] %vm3824_vm14, %v3821_v58 }
 0x4eb   : > { %5137 = shalt.err (!%p5134_p0)
}
 0x4ec   : > { %s5138_s14 = scalar_lea.hbm %s6126_s15, 128  ;;  %s5142_s7 = scalar_lea.hbm %s6184_s5, 256 }
 0x4ed   : > { %p5139_p4 = scmp.ne.s32.totalorder %s6126_s15, %s5138_s14  ;;  %p5143_p12 = scmp.lt.u32.totalorder %s6126_s15, %s6184_s5 }
 0x4ee   : > { %p5144_p1 = scmp.lt.u32.totalorder %s5142_s7, %s5138_s14  ;;  %p5146_p8 = scmp.lt.u32.totalorder %s5138_s14, %s6126_s15 }
 0x4ef   : > { %p5140_p13 = pnand %p5139_p4, %p5441_p5 }
 0x4f0   : > { %p5145_p11 = por %p5144_p1, %p5143_p12 }
 0x4f1   : > { %p5141_p2 = pneg %p5140_p13 }
 0x4f2   : > { %p5147_p6 = por %p5146_p8, %p5145_p11 }
 0x4f4   : > { %p5148_p10 = pnand %p5147_p6, %p5141_p2 }
 0x4f6   : > { %5151 = shalt.err (!%p5148_p10)
}
 0x4f7   : > { %s5231_s30 = smov 64   ;;  %s5232_s6 = smov 4  }
 0x4f8   : > { %4748 = dma.vmem_to_hbm [thread:$0]  (%p5441_p5), %s6128_s9, 128, %s6126_s15, %s3828_s17, %s5231_s30, %s5231_s30, %s5232_s6  }
 0x4f9 PF: > { %s6305_s12 = sld [smem:[#allocation18_spill]]  ;;  %s6306_s18 = sld [smem:[#allocation19_spill]] }
 0x4fa   : > { %p6308_p7 = scmp.ge.s32.totalorder %s5214_s23, 2 }
 0x4ff   : > { %s3857_s25 = sand.u32 1, %s6305_s12   ;;  %p6307_p3 = scmp.ne.s32.totalorder %s6306_s18, 0 }
 0x500   : > { %s3858_s21 = scalar_lea.sflag [#allocation6], %s3857_s25 }
 0x501   : > { %p4768_p9 = pnand %p6308_p7, %p6307_p3 }
 0x503   : > { %5189 = dma.done.wait (!%p4768_p9), %s3858_s21, 128  }
 0x504   : > { %5191 = vsyncadd (!%p4768_p9), %s3858_s21, 4294967168  ;;  %s23_s23 = sadd.s32 1, %s5214_s23   ;;  %s6309_s18 = smov %s5198_s19 }
 0x505   : > { %p20_p0 = scmp.ge.s32.totalorder %s23_s23, 4   ;;  %s6310_s19 = smov %s5202_s20 }
 0x506   : > { %s6311_s20 = smov %s5450_s16  ;;  %s6312_s21 = smov %s5210_s22 }
 0x507   : > { %s6313_s22 = smov %s6315_s24  ;;  %22 = sbr.rel (!%p20_p0) target bundleno = 8 (0x8), region = 141 }
 0x50e   :  { %3863 = vsyncpa [#allocation5], 1 }
 0x50f   :  { %3865 = vsyncpa [#allocation5 + $0x1], 1 }
 0x510   :  { %3866 = vsyncpa [#allocation8], 1 }
 0x511   :  { %3867 = vsyncpa [#allocation11], 1 }
 0x512   :  { %3868 = vsyncpa [#allocation6], 1 }
 0x513   :  { %3870 = vsyncpa [#allocation6 + $0x1], 1 }

</bundles_post_ra>
